<compile_context>
chip_gen: v6e
topology: v6e:2x2x1
jax: 0.10.0
libtpu: 0.0.40
codegen_flags: <defaults>
</compile_context>

<pallas_src>
import jax
import jax.numpy as jnp
import numpy as np
from jax.experimental import pallas as pl
from jax.experimental.pallas import tpu as pltpu

LANES = 128          # TPU lane width
SUBLANES = 8         # sublane granularity
MAX_TILE_ROWS = 512  # 512*128 = 65,536 batch elements / step, ~256 KiB per f32 block


def _softplus(v):
    # numerically stable log(1 + exp(v))
    return jnp.maximum(v, 0.0) + jnp.log1p(jnp.exp(-jnp.abs(v)))


_ACTS = {
    "relu": lambda v: jnp.maximum(v, 0.0),
    "tanh": jnp.tanh,
    "softplus": _softplus,
    "sigmoid": lambda v: 1.0 / (1.0 + jnp.exp(-v)),
}


def _make_kernel(layer_dims, layer_acts, preproc):
    """Build the fused kernel, specialized on static layer sizes / activations."""
    n_layers = len(layer_dims) - 1
    n_out = layer_dims[-1]
    acts = [_ACTS[name] for name in layer_acts]

    # Fuse layer 0 (1 -> h1) with layer 1 (h1 -> h2) when the input width is 1: each
    # layer-1 plane is produced on demand from x and consumed immediately into the
    # layer-2 accumulators (streaming), so all h1 planes are never live at once.
    fuse01 = (n_layers >= 2 and layer_dims[0] == 1)

    def kernel(*refs):
        params_ref = refs[0]                     # SMEM (3,)  [alpha, beta, gamma]
        wb_refs = refs[1:1 + 2 * n_layers]       # SMEM flat weights / biases
        x_ref = refs[1 + 2 * n_layers]           # VMEM (tile_rows, 128) lane-dense batch
        out_ref = refs[2 + 2 * n_layers]         # VMEM (n_out, tile_rows, 128)

        xb = x_ref[...].astype(jnp.float32)      # (tile_rows, 128)

        # ---- MLP on the VPU: hidden units as lane-dense (tile_rows, 128) planes, each
        #      layer a scalar-broadcast FMA chain (K=1 first layer, out_features=1 last,
        #      hidden widths << 128 -> MXU is not used; see header note).
        if fuse01:
            w0_ref, b0_ref = wb_refs[0], wb_refs[1]
            w1_ref, b1_ref = wb_refs[2], wb_refs[3]
            act0, act1 = acts[0], acts[1]
            d1, d2 = layer_dims[1], layer_dims[2]
            accs = [None] * d2
            for h in range(d1):
                # layer-1 unit h: computed from x on demand, consumed, then discarded
                p = act0(xb * w0_ref[h] + b0_ref[h])
                for k in range(d2):
                    t = p * w1_ref[h * d2 + k]
                    accs[k] = t if accs[k] is None else accs[k] + t
            planes = [act1(accs[k] + b1_ref[k]) for k in range(d2)]
            start_layer = 2
        else:
            planes = [xb]
            start_layer = 0

        for l in range(start_layer, n_layers):
            w_ref = wb_refs[2 * l]               # flat (din*dout,), index [h*dout + k]
            b_ref = wb_refs[2 * l + 1]           # (dout,)
            din, dout = layer_dims[l], layer_dims[l + 1]
            act = acts[l]
            nxt = []
            for k in range(dout):
                acc = planes[0] * w_ref[k]
                for h in range(1, din):
                    acc = acc + planes[h] * w_ref[h * dout + k]
                nxt.append(act(acc + b_ref[k]))
            planes = nxt                         # after last layer: n_out planes

        if preproc:
            alpha = params_ref[0]
            beta = params_ref[1]
            gamma = params_ref[2]
            relu_beta = jnp.maximum(beta, 0.0)   # scalars, computed once per step
            one_m_alpha = 1.0 - alpha
            eps = 1e-6
            xc = jnp.clip(xb, eps, 1.0 - eps)
            # gamma * (1-xc)**relu_beta * xc**(1-alpha) fused into a single exp
            # (3 EUP transcendentals instead of 2 pows = 4).  Both log args >= eps after
            # the clamp, so relu_beta == 0 gives exactly exp(0) = 1, no inf/NaN.
            # gamma is NOT folded into the exponent (would require gamma > 0).
            f_pre = gamma * jnp.exp(relu_beta * jnp.log(1.0 - xc)
                                    + one_m_alpha * jnp.log(xc))
            for o in range(n_out):
                out_ref[o] = (f_pre * planes[o]).astype(out_ref.dtype)
        else:
            for o in range(n_out):
                out_ref[o] = planes[o].astype(out_ref.dtype)

    return kernel


def _choose_tile_rows(rows_needed, max_tile_rows=MAX_TILE_ROWS):
    """Sublane-aligned row tile: as large as possible to amortize the ~0.35 us per-step
    overhead and hit good DMA efficiency, but never fewer than 2 grid steps (so v7x
    megacore can shard the batch) unless the whole batch fits in one minimal tile."""
    if rows_needed <= SUBLANES:
        return SUBLANES
    half = -(-rows_needed // 2)                          # cdiv -> at least 2 steps
    half = -(-half // SUBLANES) * SUBLANES               # round up to sublane multiple
    return int(min(max_tile_rows, half))


def preprocessed_mlp_forward(x, params, weights, biases, layer_dims, layer_acts,
                             *, preproc=True, tile_rows=None):
    """Fused PreprocessedMLP forward pass.

    x        : (N, 1) or (N,) float input.
    params   : (3,) [alpha, beta, gamma].
    weights  : list of (din, dout) matrices (transposed vs. torch's (out, in) layout).
    biases   : list of (dout,) vectors.
    Returns  : (N, n_out) float32.
    """
    layer_dims = tuple(int(d) for d in layer_dims)
    assert layer_dims[0] == 1, "kernel assumes num_input_layers == 1 (scalar feature)"
    n_layers = len(layer_dims) - 1
    n_out = layer_dims[-1]

    xf = jnp.asarray(x, jnp.float32).reshape(-1)
    n = xf.shape[0]
    rows_needed = -(-n // LANES)
    if tile_rows is None:
        tile_rows = _choose_tile_rows(rows_needed)
    grid_steps = max(1, -(-rows_needed // tile_rows))
    rows = grid_steps * tile_rows
    n_pad = rows * LANES
    if n_pad != n:
        # Pad with a "safe" value inside (0, 1); padded rows are dropped below.
        # TODO(synk): at very large N, mask the ragged tail in-kernel (scalar-prefetch
        # bound + pl.when) instead of this wrapper-side pad, to avoid an extra HBM pass.
        xf = jnp.pad(xf, (0, n_pad - n), constant_values=0.5)
    x2d = xf.reshape(rows, LANES)                        # lane-dense batch layout

    smem_spec = pl.BlockSpec(memory_space=pltpu.MemorySpace.SMEM)
    flat_wb = []
    for w, b in zip(weights, biases):
        flat_wb.append(jnp.asarray(w, jnp.float32).reshape(-1))   # [h*dout + k]
        flat_wb.append(jnp.asarray(b, jnp.float32).reshape(-1))

    kernel = _make_kernel(layer_dims, tuple(layer_acts), preproc)

    out3d = pl.pallas_call(
        kernel,
        out_shape=jax.ShapeDtypeStruct((n_out, rows, LANES), jnp.float32),
        grid=(grid_steps,),
        in_specs=[smem_spec] * (1 + 2 * n_layers)
        + [pl.BlockSpec((tile_rows, LANES), lambda i: (i, 0))],
        out_specs=pl.BlockSpec((n_out, tile_rows, LANES), lambda i: (0, i, 0)),
        compiler_params=pltpu.CompilerParams(
            dimension_semantics=("parallel",),          # megacore batch sharding on v7x
            vmem_limit_bytes=32 * 1024 * 1024,          # ample headroom on v5e/v6e/v7x
        ),
    )(jnp.asarray(params, jnp.float32), *flat_wb, x2d)

    if n_out == 1:
        # No transpose pass needed: (1, rows, 128) -> flat -> (N, 1).
        return out3d.reshape(n_pad)[:n].reshape(n, 1)
    # TODO(synk): for n_out > 1 emit a (rows, n_out*LANES) lane-dense output layout in
    # the kernel so this wrapper-side transpose (an extra HBM pass at large N) goes away.
    return out3d.reshape(n_out, n_pad)[:, :n].T          # (N, n_out)


def preprocessed_mlp_reference(x, params, weights, biases, layer_dims, layer_acts,
                               *, preproc=True):
    """Pure-JAX reference matching the PyTorch module semantics."""
    x = jnp.asarray(x, jnp.float32).reshape(-1, 1)
    h = x
    for l, (w, b) in enumerate(zip(weights, biases)):
        h = h @ jnp.asarray(w, jnp.float32) + jnp.asarray(b, jnp.float32)[None, :]
        h = _ACTS[layer_acts[l]](h)
    if not preproc:
        return h
    alpha, beta, gamma = params[0], params[1], params[2]
    xc = jnp.clip(x, 1e-6, 1.0 - 1e-6)
    f_pre = gamma * (1.0 - xc) ** jnp.maximum(beta, 0.0) * xc ** (1.0 - alpha)
    return f_pre * h


if __name__ == "__main__":
    key = jax.random.PRNGKey(0)

    # Module config: PreprocessedMLP(alpha, beta, gamma, ['tanh','tanh','softplus'],
    #                                hidden_layers=[32, 16], num_input_layers=1,
    #                                num_output_layers=1, preproc=True)
    alpha, beta, gamma = 1.5, 2.0, 0.8
    hidden_layers = [32, 16]
    act_functions = ["tanh", "tanh", "softplus"]
    num_input_layers, num_output_layers = 1, 1
    layer_dims = [num_input_layers] + hidden_layers + [num_output_layers]
    # Replicate SimplePerceptron's activation assignment quirk:
    #   Linear0 -> act[0]; Linear(i+1) -> act[i] for i in 0..len(hidden)-2; last -> act[-1]
    layer_acts = ([act_functions[0]]
                  + [act_functions[i] for i in range(len(hidden_layers) - 1)]
                  + [act_functions[-1]])

    # Deterministic torch-like init: U(-1/sqrt(fan_in), +1/sqrt(fan_in)).
    weights, biases = [], []
    for l in range(len(layer_dims) - 1):
        din, dout = layer_dims[l], layer_dims[l + 1]
        key, kw, kb = jax.random.split(key, 3)
        bound = 1.0 / (din ** 0.5)
        weights.append(jax.random.uniform(kw, (din, dout), jnp.float32, -bound, bound))
        biases.append(jax.random.uniform(kb, (dout,), jnp.float32, -bound, bound))

    key, kx = jax.random.split(key)
    batch = 2048          # -> rows_needed=16, tile_rows=8, grid=(2,): both v7x TCs get work
    x = jax.random.uniform(kx, (batch, 1), jnp.float32, minval=0.0, maxval=1.0)
    params = jnp.array([alpha, beta, gamma], jnp.float32)

    out = preprocessed_mlp_forward(x, params, weights, biases, layer_dims, layer_acts,
                                   preproc=True)
    out = jax.block_until_ready(out)

    ref = preprocessed_mlp_reference(x, params, weights, biases, layer_dims, layer_acts,
                                     preproc=True)
    np.testing.assert_allclose(np.asarray(out), np.asarray(ref), rtol=5e-4, atol=1e-6)
    print("KERNEL_OK")
</pallas_src>

<mosaic_0001>
module attributes {stable_mosaic.version = 11 : i64} {
  func.func @kernel(%arg0: i32, %arg1: memref<3xf32, #tpu.memory_space<smem>>, %arg2: memref<32xf32, #tpu.memory_space<smem>>, %arg3: memref<32xf32, #tpu.memory_space<smem>>, %arg4: memref<512xf32, #tpu.memory_space<smem>>, %arg5: memref<16xf32, #tpu.memory_space<smem>>, %arg6: memref<16xf32, #tpu.memory_space<smem>>, %arg7: memref<1xf32, #tpu.memory_space<smem>>, %arg8: memref<8x128xf32, #tpu.memory_space<vmem>>, %arg9: memref<1x8x128xf32, #tpu.memory_space<vmem>>) attributes {dimension_semantics = [#tpu.dimension_semantics<parallel>], iteration_bounds = array<i64: 2>, scalar_prefetch = 0 : i64, scratch_operands = 0 : i64, tpu.core_type = #tpu.core_type<tc>, window_params = [{transform_indices = @transform_0, window_bounds = array<i64: 3>}, {transform_indices = @transform_1, window_bounds = array<i64: 32>}, {transform_indices = @transform_2, window_bounds = array<i64: 32>}, {transform_indices = @transform_3, window_bounds = array<i64: 512>}, {transform_indices = @transform_4, window_bounds = array<i64: 16>}, {transform_indices = @transform_5, window_bounds = array<i64: 16>}, {transform_indices = @transform_6, window_bounds = array<i64: 1>}, {transform_indices = @transform_7, window_bounds = array<i64: 8, 128>}, {transform_indices = @transform_8, window_bounds = array<i64: 1, 8, 128>}]} {
    %c0 = arith.constant 0 : index
    %c0_0 = arith.constant 0 : index
    %0 = vector.load %arg8[%c0, %c0_0] : memref<8x128xf32, #tpu.memory_space<vmem>>, vector<8x128xf32>
    %c0_1 = arith.constant 0 : index
    %1 = memref.load %arg2[%c0_1] : memref<32xf32, #tpu.memory_space<smem>>
    %2 = vector.broadcast %1 : f32 to vector<8x128xf32>
    %3 = arith.mulf %0, %2 : vector<8x128xf32>
    %c0_2 = arith.constant 0 : index
    %4 = memref.load %arg3[%c0_2] : memref<32xf32, #tpu.memory_space<smem>>
    %5 = vector.broadcast %4 : f32 to vector<8x128xf32>
    %6 = arith.addf %3, %5 : vector<8x128xf32>
    %7 = math.tanh %6 : vector<8x128xf32>
    %c0_3 = arith.constant 0 : index
    %8 = memref.load %arg4[%c0_3] : memref<512xf32, #tpu.memory_space<smem>>
    %9 = vector.broadcast %8 : f32 to vector<8x128xf32>
    %10 = arith.mulf %7, %9 : vector<8x128xf32>
    %c1 = arith.constant 1 : index
    %11 = memref.load %arg4[%c1] : memref<512xf32, #tpu.memory_space<smem>>
    %12 = vector.broadcast %11 : f32 to vector<8x128xf32>
    %13 = arith.mulf %7, %12 : vector<8x128xf32>
    %c2 = arith.constant 2 : index
    %14 = memref.load %arg4[%c2] : memref<512xf32, #tpu.memory_space<smem>>
    %15 = vector.broadcast %14 : f32 to vector<8x128xf32>
    %16 = arith.mulf %7, %15 : vector<8x128xf32>
    %c3 = arith.constant 3 : index
    %17 = memref.load %arg4[%c3] : memref<512xf32, #tpu.memory_space<smem>>
    %18 = vector.broadcast %17 : f32 to vector<8x128xf32>
    %19 = arith.mulf %7, %18 : vector<8x128xf32>
    %c4 = arith.constant 4 : index
    %20 = memref.load %arg4[%c4] : memref<512xf32, #tpu.memory_space<smem>>
    %21 = vector.broadcast %20 : f32 to vector<8x128xf32>
    %22 = arith.mulf %7, %21 : vector<8x128xf32>
    %c5 = arith.constant 5 : index
    %23 = memref.load %arg4[%c5] : memref<512xf32, #tpu.memory_space<smem>>
    %24 = vector.broadcast %23 : f32 to vector<8x128xf32>
    %25 = arith.mulf %7, %24 : vector<8x128xf32>
    %c6 = arith.constant 6 : index
    %26 = memref.load %arg4[%c6] : memref<512xf32, #tpu.memory_space<smem>>
    %27 = vector.broadcast %26 : f32 to vector<8x128xf32>
    %28 = arith.mulf %7, %27 : vector<8x128xf32>
    %c7 = arith.constant 7 : index
    %29 = memref.load %arg4[%c7] : memref<512xf32, #tpu.memory_space<smem>>
    %30 = vector.broadcast %29 : f32 to vector<8x128xf32>
    %31 = arith.mulf %7, %30 : vector<8x128xf32>
    %c8 = arith.constant 8 : index
    %32 = memref.load %arg4[%c8] : memref<512xf32, #tpu.memory_space<smem>>
    %33 = vector.broadcast %32 : f32 to vector<8x128xf32>
    %34 = arith.mulf %7, %33 : vector<8x128xf32>
    %c9 = arith.constant 9 : index
    %35 = memref.load %arg4[%c9] : memref<512xf32, #tpu.memory_space<smem>>
    %36 = vector.broadcast %35 : f32 to vector<8x128xf32>
    %37 = arith.mulf %7, %36 : vector<8x128xf32>
    %c10 = arith.constant 10 : index
    %38 = memref.load %arg4[%c10] : memref<512xf32, #tpu.memory_space<smem>>
    %39 = vector.broadcast %38 : f32 to vector<8x128xf32>
    %40 = arith.mulf %7, %39 : vector<8x128xf32>
    %c11 = arith.constant 11 : index
    %41 = memref.load %arg4[%c11] : memref<512xf32, #tpu.memory_space<smem>>
    %42 = vector.broadcast %41 : f32 to vector<8x128xf32>
    %43 = arith.mulf %7, %42 : vector<8x128xf32>
    %c12 = arith.constant 12 : index
    %44 = memref.load %arg4[%c12] : memref<512xf32, #tpu.memory_space<smem>>
    %45 = vector.broadcast %44 : f32 to vector<8x128xf32>
    %46 = arith.mulf %7, %45 : vector<8x128xf32>
    %c13 = arith.constant 13 : index
    %47 = memref.load %arg4[%c13] : memref<512xf32, #tpu.memory_space<smem>>
    %48 = vector.broadcast %47 : f32 to vector<8x128xf32>
    %49 = arith.mulf %7, %48 : vector<8x128xf32>
    %c14 = arith.constant 14 : index
    %50 = memref.load %arg4[%c14] : memref<512xf32, #tpu.memory_space<smem>>
    %51 = vector.broadcast %50 : f32 to vector<8x128xf32>
    %52 = arith.mulf %7, %51 : vector<8x128xf32>
    %c15 = arith.constant 15 : index
    %53 = memref.load %arg4[%c15] : memref<512xf32, #tpu.memory_space<smem>>
    %54 = vector.broadcast %53 : f32 to vector<8x128xf32>
    %55 = arith.mulf %7, %54 : vector<8x128xf32>
    %c1_4 = arith.constant 1 : index
    %56 = memref.load %arg2[%c1_4] : memref<32xf32, #tpu.memory_space<smem>>
    %57 = vector.broadcast %56 : f32 to vector<8x128xf32>
    %58 = arith.mulf %0, %57 : vector<8x128xf32>
    %c1_5 = arith.constant 1 : index
    %59 = memref.load %arg3[%c1_5] : memref<32xf32, #tpu.memory_space<smem>>
    %60 = vector.broadcast %59 : f32 to vector<8x128xf32>
    %61 = arith.addf %58, %60 : vector<8x128xf32>
    %62 = math.tanh %61 : vector<8x128xf32>
    %c16 = arith.constant 16 : index
    %63 = memref.load %arg4[%c16] : memref<512xf32, #tpu.memory_space<smem>>
    %64 = vector.broadcast %63 : f32 to vector<8x128xf32>
    %65 = arith.mulf %62, %64 : vector<8x128xf32>
    %66 = arith.addf %10, %65 : vector<8x128xf32>
    %c17 = arith.constant 17 : index
    %67 = memref.load %arg4[%c17] : memref<512xf32, #tpu.memory_space<smem>>
    %68 = vector.broadcast %67 : f32 to vector<8x128xf32>
    %69 = arith.mulf %62, %68 : vector<8x128xf32>
    %70 = arith.addf %13, %69 : vector<8x128xf32>
    %c18 = arith.constant 18 : index
    %71 = memref.load %arg4[%c18] : memref<512xf32, #tpu.memory_space<smem>>
    %72 = vector.broadcast %71 : f32 to vector<8x128xf32>
    %73 = arith.mulf %62, %72 : vector<8x128xf32>
    %74 = arith.addf %16, %73 : vector<8x128xf32>
    %c19 = arith.constant 19 : index
    %75 = memref.load %arg4[%c19] : memref<512xf32, #tpu.memory_space<smem>>
    %76 = vector.broadcast %75 : f32 to vector<8x128xf32>
    %77 = arith.mulf %62, %76 : vector<8x128xf32>
    %78 = arith.addf %19, %77 : vector<8x128xf32>
    %c20 = arith.constant 20 : index
    %79 = memref.load %arg4[%c20] : memref<512xf32, #tpu.memory_space<smem>>
    %80 = vector.broadcast %79 : f32 to vector<8x128xf32>
    %81 = arith.mulf %62, %80 : vector<8x128xf32>
    %82 = arith.addf %22, %81 : vector<8x128xf32>
    %c21 = arith.constant 21 : index
    %83 = memref.load %arg4[%c21] : memref<512xf32, #tpu.memory_space<smem>>
    %84 = vector.broadcast %83 : f32 to vector<8x128xf32>
    %85 = arith.mulf %62, %84 : vector<8x128xf32>
    %86 = arith.addf %25, %85 : vector<8x128xf32>
    %c22 = arith.constant 22 : index
    %87 = memref.load %arg4[%c22] : memref<512xf32, #tpu.memory_space<smem>>
    %88 = vector.broadcast %87 : f32 to vector<8x128xf32>
    %89 = arith.mulf %62, %88 : vector<8x128xf32>
    %90 = arith.addf %28, %89 : vector<8x128xf32>
    %c23 = arith.constant 23 : index
    %91 = memref.load %arg4[%c23] : memref<512xf32, #tpu.memory_space<smem>>
    %92 = vector.broadcast %91 : f32 to vector<8x128xf32>
    %93 = arith.mulf %62, %92 : vector<8x128xf32>
    %94 = arith.addf %31, %93 : vector<8x128xf32>
    %c24 = arith.constant 24 : index
    %95 = memref.load %arg4[%c24] : memref<512xf32, #tpu.memory_space<smem>>
    %96 = vector.broadcast %95 : f32 to vector<8x128xf32>
    %97 = arith.mulf %62, %96 : vector<8x128xf32>
    %98 = arith.addf %34, %97 : vector<8x128xf32>
    %c25 = arith.constant 25 : index
    %99 = memref.load %arg4[%c25] : memref<512xf32, #tpu.memory_space<smem>>
    %100 = vector.broadcast %99 : f32 to vector<8x128xf32>
    %101 = arith.mulf %62, %100 : vector<8x128xf32>
    %102 = arith.addf %37, %101 : vector<8x128xf32>
    %c26 = arith.constant 26 : index
    %103 = memref.load %arg4[%c26] : memref<512xf32, #tpu.memory_space<smem>>
    %104 = vector.broadcast %103 : f32 to vector<8x128xf32>
    %105 = arith.mulf %62, %104 : vector<8x128xf32>
    %106 = arith.addf %40, %105 : vector<8x128xf32>
    %c27 = arith.constant 27 : index
    %107 = memref.load %arg4[%c27] : memref<512xf32, #tpu.memory_space<smem>>
    %108 = vector.broadcast %107 : f32 to vector<8x128xf32>
    %109 = arith.mulf %62, %108 : vector<8x128xf32>
    %110 = arith.addf %43, %109 : vector<8x128xf32>
    %c28 = arith.constant 28 : index
    %111 = memref.load %arg4[%c28] : memref<512xf32, #tpu.memory_space<smem>>
    %112 = vector.broadcast %111 : f32 to vector<8x128xf32>
    %113 = arith.mulf %62, %112 : vector<8x128xf32>
    %114 = arith.addf %46, %113 : vector<8x128xf32>
    %c29 = arith.constant 29 : index
    %115 = memref.load %arg4[%c29] : memref<512xf32, #tpu.memory_space<smem>>
    %116 = vector.broadcast %115 : f32 to vector<8x128xf32>
    %117 = arith.mulf %62, %116 : vector<8x128xf32>
    %118 = arith.addf %49, %117 : vector<8x128xf32>
    %c30 = arith.constant 30 : index
    %119 = memref.load %arg4[%c30] : memref<512xf32, #tpu.memory_space<smem>>
    %120 = vector.broadcast %119 : f32 to vector<8x128xf32>
    %121 = arith.mulf %62, %120 : vector<8x128xf32>
    %122 = arith.addf %52, %121 : vector<8x128xf32>
    %c31 = arith.constant 31 : index
    %123 = memref.load %arg4[%c31] : memref<512xf32, #tpu.memory_space<smem>>
    %124 = vector.broadcast %123 : f32 to vector<8x128xf32>
    %125 = arith.mulf %62, %124 : vector<8x128xf32>
    %126 = arith.addf %55, %125 : vector<8x128xf32>
    %c2_6 = arith.constant 2 : index
    %127 = memref.load %arg2[%c2_6] : memref<32xf32, #tpu.memory_space<smem>>
    %128 = vector.broadcast %127 : f32 to vector<8x128xf32>
    %129 = arith.mulf %0, %128 : vector<8x128xf32>
    %c2_7 = arith.constant 2 : index
    %130 = memref.load %arg3[%c2_7] : memref<32xf32, #tpu.memory_space<smem>>
    %131 = vector.broadcast %130 : f32 to vector<8x128xf32>
    %132 = arith.addf %129, %131 : vector<8x128xf32>
    %133 = math.tanh %132 : vector<8x128xf32>
    %c32 = arith.constant 32 : index
    %134 = memref.load %arg4[%c32] : memref<512xf32, #tpu.memory_space<smem>>
    %135 = vector.broadcast %134 : f32 to vector<8x128xf32>
    %136 = arith.mulf %133, %135 : vector<8x128xf32>
    %137 = arith.addf %66, %136 : vector<8x128xf32>
    %c33 = arith.constant 33 : index
    %138 = memref.load %arg4[%c33] : memref<512xf32, #tpu.memory_space<smem>>
    %139 = vector.broadcast %138 : f32 to vector<8x128xf32>
    %140 = arith.mulf %133, %139 : vector<8x128xf32>
    %141 = arith.addf %70, %140 : vector<8x128xf32>
    %c34 = arith.constant 34 : index
    %142 = memref.load %arg4[%c34] : memref<512xf32, #tpu.memory_space<smem>>
    %143 = vector.broadcast %142 : f32 to vector<8x128xf32>
    %144 = arith.mulf %133, %143 : vector<8x128xf32>
    %145 = arith.addf %74, %144 : vector<8x128xf32>
    %c35 = arith.constant 35 : index
    %146 = memref.load %arg4[%c35] : memref<512xf32, #tpu.memory_space<smem>>
    %147 = vector.broadcast %146 : f32 to vector<8x128xf32>
    %148 = arith.mulf %133, %147 : vector<8x128xf32>
    %149 = arith.addf %78, %148 : vector<8x128xf32>
    %c36 = arith.constant 36 : index
    %150 = memref.load %arg4[%c36] : memref<512xf32, #tpu.memory_space<smem>>
    %151 = vector.broadcast %150 : f32 to vector<8x128xf32>
    %152 = arith.mulf %133, %151 : vector<8x128xf32>
    %153 = arith.addf %82, %152 : vector<8x128xf32>
    %c37 = arith.constant 37 : index
    %154 = memref.load %arg4[%c37] : memref<512xf32, #tpu.memory_space<smem>>
    %155 = vector.broadcast %154 : f32 to vector<8x128xf32>
    %156 = arith.mulf %133, %155 : vector<8x128xf32>
    %157 = arith.addf %86, %156 : vector<8x128xf32>
    %c38 = arith.constant 38 : index
    %158 = memref.load %arg4[%c38] : memref<512xf32, #tpu.memory_space<smem>>
    %159 = vector.broadcast %158 : f32 to vector<8x128xf32>
    %160 = arith.mulf %133, %159 : vector<8x128xf32>
    %161 = arith.addf %90, %160 : vector<8x128xf32>
    %c39 = arith.constant 39 : index
    %162 = memref.load %arg4[%c39] : memref<512xf32, #tpu.memory_space<smem>>
    %163 = vector.broadcast %162 : f32 to vector<8x128xf32>
    %164 = arith.mulf %133, %163 : vector<8x128xf32>
    %165 = arith.addf %94, %164 : vector<8x128xf32>
    %c40 = arith.constant 40 : index
    %166 = memref.load %arg4[%c40] : memref<512xf32, #tpu.memory_space<smem>>
    %167 = vector.broadcast %166 : f32 to vector<8x128xf32>
    %168 = arith.mulf %133, %167 : vector<8x128xf32>
    %169 = arith.addf %98, %168 : vector<8x128xf32>
    %c41 = arith.constant 41 : index
    %170 = memref.load %arg4[%c41] : memref<512xf32, #tpu.memory_space<smem>>
    %171 = vector.broadcast %170 : f32 to vector<8x128xf32>
    %172 = arith.mulf %133, %171 : vector<8x128xf32>
    %173 = arith.addf %102, %172 : vector<8x128xf32>
    %c42 = arith.constant 42 : index
    %174 = memref.load %arg4[%c42] : memref<512xf32, #tpu.memory_space<smem>>
    %175 = vector.broadcast %174 : f32 to vector<8x128xf32>
    %176 = arith.mulf %133, %175 : vector<8x128xf32>
    %177 = arith.addf %106, %176 : vector<8x128xf32>
    %c43 = arith.constant 43 : index
    %178 = memref.load %arg4[%c43] : memref<512xf32, #tpu.memory_space<smem>>
    %179 = vector.broadcast %178 : f32 to vector<8x128xf32>
    %180 = arith.mulf %133, %179 : vector<8x128xf32>
    %181 = arith.addf %110, %180 : vector<8x128xf32>
    %c44 = arith.constant 44 : index
    %182 = memref.load %arg4[%c44] : memref<512xf32, #tpu.memory_space<smem>>
    %183 = vector.broadcast %182 : f32 to vector<8x128xf32>
    %184 = arith.mulf %133, %183 : vector<8x128xf32>
    %185 = arith.addf %114, %184 : vector<8x128xf32>
    %c45 = arith.constant 45 : index
    %186 = memref.load %arg4[%c45] : memref<512xf32, #tpu.memory_space<smem>>
    %187 = vector.broadcast %186 : f32 to vector<8x128xf32>
    %188 = arith.mulf %133, %187 : vector<8x128xf32>
    %189 = arith.addf %118, %188 : vector<8x128xf32>
    %c46 = arith.constant 46 : index
    %190 = memref.load %arg4[%c46] : memref<512xf32, #tpu.memory_space<smem>>
    %191 = vector.broadcast %190 : f32 to vector<8x128xf32>
    %192 = arith.mulf %133, %191 : vector<8x128xf32>
    %193 = arith.addf %122, %192 : vector<8x128xf32>
    %c47 = arith.constant 47 : index
    %194 = memref.load %arg4[%c47] : memref<512xf32, #tpu.memory_space<smem>>
    %195 = vector.broadcast %194 : f32 to vector<8x128xf32>
    %196 = arith.mulf %133, %195 : vector<8x128xf32>
    %197 = arith.addf %126, %196 : vector<8x128xf32>
    %c3_8 = arith.constant 3 : index
    %198 = memref.load %arg2[%c3_8] : memref<32xf32, #tpu.memory_space<smem>>
    %199 = vector.broadcast %198 : f32 to vector<8x128xf32>
    %200 = arith.mulf %0, %199 : vector<8x128xf32>
    %c3_9 = arith.constant 3 : index
    %201 = memref.load %arg3[%c3_9] : memref<32xf32, #tpu.memory_space<smem>>
    %202 = vector.broadcast %201 : f32 to vector<8x128xf32>
    %203 = arith.addf %200, %202 : vector<8x128xf32>
    %204 = math.tanh %203 : vector<8x128xf32>
    %c48 = arith.constant 48 : index
    %205 = memref.load %arg4[%c48] : memref<512xf32, #tpu.memory_space<smem>>
    %206 = vector.broadcast %205 : f32 to vector<8x128xf32>
    %207 = arith.mulf %204, %206 : vector<8x128xf32>
    %208 = arith.addf %137, %207 : vector<8x128xf32>
    %c49 = arith.constant 49 : index
    %209 = memref.load %arg4[%c49] : memref<512xf32, #tpu.memory_space<smem>>
    %210 = vector.broadcast %209 : f32 to vector<8x128xf32>
    %211 = arith.mulf %204, %210 : vector<8x128xf32>
    %212 = arith.addf %141, %211 : vector<8x128xf32>
    %c50 = arith.constant 50 : index
    %213 = memref.load %arg4[%c50] : memref<512xf32, #tpu.memory_space<smem>>
    %214 = vector.broadcast %213 : f32 to vector<8x128xf32>
    %215 = arith.mulf %204, %214 : vector<8x128xf32>
    %216 = arith.addf %145, %215 : vector<8x128xf32>
    %c51 = arith.constant 51 : index
    %217 = memref.load %arg4[%c51] : memref<512xf32, #tpu.memory_space<smem>>
    %218 = vector.broadcast %217 : f32 to vector<8x128xf32>
    %219 = arith.mulf %204, %218 : vector<8x128xf32>
    %220 = arith.addf %149, %219 : vector<8x128xf32>
    %c52 = arith.constant 52 : index
    %221 = memref.load %arg4[%c52] : memref<512xf32, #tpu.memory_space<smem>>
    %222 = vector.broadcast %221 : f32 to vector<8x128xf32>
    %223 = arith.mulf %204, %222 : vector<8x128xf32>
    %224 = arith.addf %153, %223 : vector<8x128xf32>
    %c53 = arith.constant 53 : index
    %225 = memref.load %arg4[%c53] : memref<512xf32, #tpu.memory_space<smem>>
    %226 = vector.broadcast %225 : f32 to vector<8x128xf32>
    %227 = arith.mulf %204, %226 : vector<8x128xf32>
    %228 = arith.addf %157, %227 : vector<8x128xf32>
    %c54 = arith.constant 54 : index
    %229 = memref.load %arg4[%c54] : memref<512xf32, #tpu.memory_space<smem>>
    %230 = vector.broadcast %229 : f32 to vector<8x128xf32>
    %231 = arith.mulf %204, %230 : vector<8x128xf32>
    %232 = arith.addf %161, %231 : vector<8x128xf32>
    %c55 = arith.constant 55 : index
    %233 = memref.load %arg4[%c55] : memref<512xf32, #tpu.memory_space<smem>>
    %234 = vector.broadcast %233 : f32 to vector<8x128xf32>
    %235 = arith.mulf %204, %234 : vector<8x128xf32>
    %236 = arith.addf %165, %235 : vector<8x128xf32>
    %c56 = arith.constant 56 : index
    %237 = memref.load %arg4[%c56] : memref<512xf32, #tpu.memory_space<smem>>
    %238 = vector.broadcast %237 : f32 to vector<8x128xf32>
    %239 = arith.mulf %204, %238 : vector<8x128xf32>
    %240 = arith.addf %169, %239 : vector<8x128xf32>
    %c57 = arith.constant 57 : index
    %241 = memref.load %arg4[%c57] : memref<512xf32, #tpu.memory_space<smem>>
    %242 = vector.broadcast %241 : f32 to vector<8x128xf32>
    %243 = arith.mulf %204, %242 : vector<8x128xf32>
    %244 = arith.addf %173, %243 : vector<8x128xf32>
    %c58 = arith.constant 58 : index
    %245 = memref.load %arg4[%c58] : memref<512xf32, #tpu.memory_space<smem>>
    %246 = vector.broadcast %245 : f32 to vector<8x128xf32>
    %247 = arith.mulf %204, %246 : vector<8x128xf32>
    %248 = arith.addf %177, %247 : vector<8x128xf32>
    %c59 = arith.constant 59 : index
    %249 = memref.load %arg4[%c59] : memref<512xf32, #tpu.memory_space<smem>>
    %250 = vector.broadcast %249 : f32 to vector<8x128xf32>
    %251 = arith.mulf %204, %250 : vector<8x128xf32>
    %252 = arith.addf %181, %251 : vector<8x128xf32>
    %c60 = arith.constant 60 : index
    %253 = memref.load %arg4[%c60] : memref<512xf32, #tpu.memory_space<smem>>
    %254 = vector.broadcast %253 : f32 to vector<8x128xf32>
    %255 = arith.mulf %204, %254 : vector<8x128xf32>
    %256 = arith.addf %185, %255 : vector<8x128xf32>
    %c61 = arith.constant 61 : index
    %257 = memref.load %arg4[%c61] : memref<512xf32, #tpu.memory_space<smem>>
    %258 = vector.broadcast %257 : f32 to vector<8x128xf32>
    %259 = arith.mulf %204, %258 : vector<8x128xf32>
    %260 = arith.addf %189, %259 : vector<8x128xf32>
    %c62 = arith.constant 62 : index
    %261 = memref.load %arg4[%c62] : memref<512xf32, #tpu.memory_space<smem>>
    %262 = vector.broadcast %261 : f32 to vector<8x128xf32>
    %263 = arith.mulf %204, %262 : vector<8x128xf32>
    %264 = arith.addf %193, %263 : vector<8x128xf32>
    %c63 = arith.constant 63 : index
    %265 = memref.load %arg4[%c63] : memref<512xf32, #tpu.memory_space<smem>>
    %266 = vector.broadcast %265 : f32 to vector<8x128xf32>
    %267 = arith.mulf %204, %266 : vector<8x128xf32>
    %268 = arith.addf %197, %267 : vector<8x128xf32>
    %c4_10 = arith.constant 4 : index
    %269 = memref.load %arg2[%c4_10] : memref<32xf32, #tpu.memory_space<smem>>
    %270 = vector.broadcast %269 : f32 to vector<8x128xf32>
    %271 = arith.mulf %0, %270 : vector<8x128xf32>
    %c4_11 = arith.constant 4 : index
    %272 = memref.load %arg3[%c4_11] : memref<32xf32, #tpu.memory_space<smem>>
    %273 = vector.broadcast %272 : f32 to vector<8x128xf32>
    %274 = arith.addf %271, %273 : vector<8x128xf32>
    %275 = math.tanh %274 : vector<8x128xf32>
    %c64 = arith.constant 64 : index
    %276 = memref.load %arg4[%c64] : memref<512xf32, #tpu.memory_space<smem>>
    %277 = vector.broadcast %276 : f32 to vector<8x128xf32>
    %278 = arith.mulf %275, %277 : vector<8x128xf32>
    %279 = arith.addf %208, %278 : vector<8x128xf32>
    %c65 = arith.constant 65 : index
    %280 = memref.load %arg4[%c65] : memref<512xf32, #tpu.memory_space<smem>>
    %281 = vector.broadcast %280 : f32 to vector<8x128xf32>
    %282 = arith.mulf %275, %281 : vector<8x128xf32>
    %283 = arith.addf %212, %282 : vector<8x128xf32>
    %c66 = arith.constant 66 : index
    %284 = memref.load %arg4[%c66] : memref<512xf32, #tpu.memory_space<smem>>
    %285 = vector.broadcast %284 : f32 to vector<8x128xf32>
    %286 = arith.mulf %275, %285 : vector<8x128xf32>
    %287 = arith.addf %216, %286 : vector<8x128xf32>
    %c67 = arith.constant 67 : index
    %288 = memref.load %arg4[%c67] : memref<512xf32, #tpu.memory_space<smem>>
    %289 = vector.broadcast %288 : f32 to vector<8x128xf32>
    %290 = arith.mulf %275, %289 : vector<8x128xf32>
    %291 = arith.addf %220, %290 : vector<8x128xf32>
    %c68 = arith.constant 68 : index
    %292 = memref.load %arg4[%c68] : memref<512xf32, #tpu.memory_space<smem>>
    %293 = vector.broadcast %292 : f32 to vector<8x128xf32>
    %294 = arith.mulf %275, %293 : vector<8x128xf32>
    %295 = arith.addf %224, %294 : vector<8x128xf32>
    %c69 = arith.constant 69 : index
    %296 = memref.load %arg4[%c69] : memref<512xf32, #tpu.memory_space<smem>>
    %297 = vector.broadcast %296 : f32 to vector<8x128xf32>
    %298 = arith.mulf %275, %297 : vector<8x128xf32>
    %299 = arith.addf %228, %298 : vector<8x128xf32>
    %c70 = arith.constant 70 : index
    %300 = memref.load %arg4[%c70] : memref<512xf32, #tpu.memory_space<smem>>
    %301 = vector.broadcast %300 : f32 to vector<8x128xf32>
    %302 = arith.mulf %275, %301 : vector<8x128xf32>
    %303 = arith.addf %232, %302 : vector<8x128xf32>
    %c71 = arith.constant 71 : index
    %304 = memref.load %arg4[%c71] : memref<512xf32, #tpu.memory_space<smem>>
    %305 = vector.broadcast %304 : f32 to vector<8x128xf32>
    %306 = arith.mulf %275, %305 : vector<8x128xf32>
    %307 = arith.addf %236, %306 : vector<8x128xf32>
    %c72 = arith.constant 72 : index
    %308 = memref.load %arg4[%c72] : memref<512xf32, #tpu.memory_space<smem>>
    %309 = vector.broadcast %308 : f32 to vector<8x128xf32>
    %310 = arith.mulf %275, %309 : vector<8x128xf32>
    %311 = arith.addf %240, %310 : vector<8x128xf32>
    %c73 = arith.constant 73 : index
    %312 = memref.load %arg4[%c73] : memref<512xf32, #tpu.memory_space<smem>>
    %313 = vector.broadcast %312 : f32 to vector<8x128xf32>
    %314 = arith.mulf %275, %313 : vector<8x128xf32>
    %315 = arith.addf %244, %314 : vector<8x128xf32>
    %c74 = arith.constant 74 : index
    %316 = memref.load %arg4[%c74] : memref<512xf32, #tpu.memory_space<smem>>
    %317 = vector.broadcast %316 : f32 to vector<8x128xf32>
    %318 = arith.mulf %275, %317 : vector<8x128xf32>
    %319 = arith.addf %248, %318 : vector<8x128xf32>
    %c75 = arith.constant 75 : index
    %320 = memref.load %arg4[%c75] : memref<512xf32, #tpu.memory_space<smem>>
    %321 = vector.broadcast %320 : f32 to vector<8x128xf32>
    %322 = arith.mulf %275, %321 : vector<8x128xf32>
    %323 = arith.addf %252, %322 : vector<8x128xf32>
    %c76 = arith.constant 76 : index
    %324 = memref.load %arg4[%c76] : memref<512xf32, #tpu.memory_space<smem>>
    %325 = vector.broadcast %324 : f32 to vector<8x128xf32>
    %326 = arith.mulf %275, %325 : vector<8x128xf32>
    %327 = arith.addf %256, %326 : vector<8x128xf32>
    %c77 = arith.constant 77 : index
    %328 = memref.load %arg4[%c77] : memref<512xf32, #tpu.memory_space<smem>>
    %329 = vector.broadcast %328 : f32 to vector<8x128xf32>
    %330 = arith.mulf %275, %329 : vector<8x128xf32>
    %331 = arith.addf %260, %330 : vector<8x128xf32>
    %c78 = arith.constant 78 : index
    %332 = memref.load %arg4[%c78] : memref<512xf32, #tpu.memory_space<smem>>
    %333 = vector.broadcast %332 : f32 to vector<8x128xf32>
    %334 = arith.mulf %275, %333 : vector<8x128xf32>
    %335 = arith.addf %264, %334 : vector<8x128xf32>
    %c79 = arith.constant 79 : index
    %336 = memref.load %arg4[%c79] : memref<512xf32, #tpu.memory_space<smem>>
    %337 = vector.broadcast %336 : f32 to vector<8x128xf32>
    %338 = arith.mulf %275, %337 : vector<8x128xf32>
    %339 = arith.addf %268, %338 : vector<8x128xf32>
    %c5_12 = arith.constant 5 : index
    %340 = memref.load %arg2[%c5_12] : memref<32xf32, #tpu.memory_space<smem>>
    %341 = vector.broadcast %340 : f32 to vector<8x128xf32>
    %342 = arith.mulf %0, %341 : vector<8x128xf32>
    %c5_13 = arith.constant 5 : index
    %343 = memref.load %arg3[%c5_13] : memref<32xf32, #tpu.memory_space<smem>>
    %344 = vector.broadcast %343 : f32 to vector<8x128xf32>
    %345 = arith.addf %342, %344 : vector<8x128xf32>
    %346 = math.tanh %345 : vector<8x128xf32>
    %c80 = arith.constant 80 : index
    %347 = memref.load %arg4[%c80] : memref<512xf32, #tpu.memory_space<smem>>
    %348 = vector.broadcast %347 : f32 to vector<8x128xf32>
    %349 = arith.mulf %346, %348 : vector<8x128xf32>
    %350 = arith.addf %279, %349 : vector<8x128xf32>
    %c81 = arith.constant 81 : index
    %351 = memref.load %arg4[%c81] : memref<512xf32, #tpu.memory_space<smem>>
    %352 = vector.broadcast %351 : f32 to vector<8x128xf32>
    %353 = arith.mulf %346, %352 : vector<8x128xf32>
    %354 = arith.addf %283, %353 : vector<8x128xf32>
    %c82 = arith.constant 82 : index
    %355 = memref.load %arg4[%c82] : memref<512xf32, #tpu.memory_space<smem>>
    %356 = vector.broadcast %355 : f32 to vector<8x128xf32>
    %357 = arith.mulf %346, %356 : vector<8x128xf32>
    %358 = arith.addf %287, %357 : vector<8x128xf32>
    %c83 = arith.constant 83 : index
    %359 = memref.load %arg4[%c83] : memref<512xf32, #tpu.memory_space<smem>>
    %360 = vector.broadcast %359 : f32 to vector<8x128xf32>
    %361 = arith.mulf %346, %360 : vector<8x128xf32>
    %362 = arith.addf %291, %361 : vector<8x128xf32>
    %c84 = arith.constant 84 : index
    %363 = memref.load %arg4[%c84] : memref<512xf32, #tpu.memory_space<smem>>
    %364 = vector.broadcast %363 : f32 to vector<8x128xf32>
    %365 = arith.mulf %346, %364 : vector<8x128xf32>
    %366 = arith.addf %295, %365 : vector<8x128xf32>
    %c85 = arith.constant 85 : index
    %367 = memref.load %arg4[%c85] : memref<512xf32, #tpu.memory_space<smem>>
    %368 = vector.broadcast %367 : f32 to vector<8x128xf32>
    %369 = arith.mulf %346, %368 : vector<8x128xf32>
    %370 = arith.addf %299, %369 : vector<8x128xf32>
    %c86 = arith.constant 86 : index
    %371 = memref.load %arg4[%c86] : memref<512xf32, #tpu.memory_space<smem>>
    %372 = vector.broadcast %371 : f32 to vector<8x128xf32>
    %373 = arith.mulf %346, %372 : vector<8x128xf32>
    %374 = arith.addf %303, %373 : vector<8x128xf32>
    %c87 = arith.constant 87 : index
    %375 = memref.load %arg4[%c87] : memref<512xf32, #tpu.memory_space<smem>>
    %376 = vector.broadcast %375 : f32 to vector<8x128xf32>
    %377 = arith.mulf %346, %376 : vector<8x128xf32>
    %378 = arith.addf %307, %377 : vector<8x128xf32>
    %c88 = arith.constant 88 : index
    %379 = memref.load %arg4[%c88] : memref<512xf32, #tpu.memory_space<smem>>
    %380 = vector.broadcast %379 : f32 to vector<8x128xf32>
    %381 = arith.mulf %346, %380 : vector<8x128xf32>
    %382 = arith.addf %311, %381 : vector<8x128xf32>
    %c89 = arith.constant 89 : index
    %383 = memref.load %arg4[%c89] : memref<512xf32, #tpu.memory_space<smem>>
    %384 = vector.broadcast %383 : f32 to vector<8x128xf32>
    %385 = arith.mulf %346, %384 : vector<8x128xf32>
    %386 = arith.addf %315, %385 : vector<8x128xf32>
    %c90 = arith.constant 90 : index
    %387 = memref.load %arg4[%c90] : memref<512xf32, #tpu.memory_space<smem>>
    %388 = vector.broadcast %387 : f32 to vector<8x128xf32>
    %389 = arith.mulf %346, %388 : vector<8x128xf32>
    %390 = arith.addf %319, %389 : vector<8x128xf32>
    %c91 = arith.constant 91 : index
    %391 = memref.load %arg4[%c91] : memref<512xf32, #tpu.memory_space<smem>>
    %392 = vector.broadcast %391 : f32 to vector<8x128xf32>
    %393 = arith.mulf %346, %392 : vector<8x128xf32>
    %394 = arith.addf %323, %393 : vector<8x128xf32>
    %c92 = arith.constant 92 : index
    %395 = memref.load %arg4[%c92] : memref<512xf32, #tpu.memory_space<smem>>
    %396 = vector.broadcast %395 : f32 to vector<8x128xf32>
    %397 = arith.mulf %346, %396 : vector<8x128xf32>
    %398 = arith.addf %327, %397 : vector<8x128xf32>
    %c93 = arith.constant 93 : index
    %399 = memref.load %arg4[%c93] : memref<512xf32, #tpu.memory_space<smem>>
    %400 = vector.broadcast %399 : f32 to vector<8x128xf32>
    %401 = arith.mulf %346, %400 : vector<8x128xf32>
    %402 = arith.addf %331, %401 : vector<8x128xf32>
    %c94 = arith.constant 94 : index
    %403 = memref.load %arg4[%c94] : memref<512xf32, #tpu.memory_space<smem>>
    %404 = vector.broadcast %403 : f32 to vector<8x128xf32>
    %405 = arith.mulf %346, %404 : vector<8x128xf32>
    %406 = arith.addf %335, %405 : vector<8x128xf32>
    %c95 = arith.constant 95 : index
    %407 = memref.load %arg4[%c95] : memref<512xf32, #tpu.memory_space<smem>>
    %408 = vector.broadcast %407 : f32 to vector<8x128xf32>
    %409 = arith.mulf %346, %408 : vector<8x128xf32>
    %410 = arith.addf %339, %409 : vector<8x128xf32>
    %c6_14 = arith.constant 6 : index
    %411 = memref.load %arg2[%c6_14] : memref<32xf32, #tpu.memory_space<smem>>
    %412 = vector.broadcast %411 : f32 to vector<8x128xf32>
    %413 = arith.mulf %0, %412 : vector<8x128xf32>
    %c6_15 = arith.constant 6 : index
    %414 = memref.load %arg3[%c6_15] : memref<32xf32, #tpu.memory_space<smem>>
    %415 = vector.broadcast %414 : f32 to vector<8x128xf32>
    %416 = arith.addf %413, %415 : vector<8x128xf32>
    %417 = math.tanh %416 : vector<8x128xf32>
    %c96 = arith.constant 96 : index
    %418 = memref.load %arg4[%c96] : memref<512xf32, #tpu.memory_space<smem>>
    %419 = vector.broadcast %418 : f32 to vector<8x128xf32>
    %420 = arith.mulf %417, %419 : vector<8x128xf32>
    %421 = arith.addf %350, %420 : vector<8x128xf32>
    %c97 = arith.constant 97 : index
    %422 = memref.load %arg4[%c97] : memref<512xf32, #tpu.memory_space<smem>>
    %423 = vector.broadcast %422 : f32 to vector<8x128xf32>
    %424 = arith.mulf %417, %423 : vector<8x128xf32>
    %425 = arith.addf %354, %424 : vector<8x128xf32>
    %c98 = arith.constant 98 : index
    %426 = memref.load %arg4[%c98] : memref<512xf32, #tpu.memory_space<smem>>
    %427 = vector.broadcast %426 : f32 to vector<8x128xf32>
    %428 = arith.mulf %417, %427 : vector<8x128xf32>
    %429 = arith.addf %358, %428 : vector<8x128xf32>
    %c99 = arith.constant 99 : index
    %430 = memref.load %arg4[%c99] : memref<512xf32, #tpu.memory_space<smem>>
    %431 = vector.broadcast %430 : f32 to vector<8x128xf32>
    %432 = arith.mulf %417, %431 : vector<8x128xf32>
    %433 = arith.addf %362, %432 : vector<8x128xf32>
    %c100 = arith.constant 100 : index
    %434 = memref.load %arg4[%c100] : memref<512xf32, #tpu.memory_space<smem>>
    %435 = vector.broadcast %434 : f32 to vector<8x128xf32>
    %436 = arith.mulf %417, %435 : vector<8x128xf32>
    %437 = arith.addf %366, %436 : vector<8x128xf32>
    %c101 = arith.constant 101 : index
    %438 = memref.load %arg4[%c101] : memref<512xf32, #tpu.memory_space<smem>>
    %439 = vector.broadcast %438 : f32 to vector<8x128xf32>
    %440 = arith.mulf %417, %439 : vector<8x128xf32>
    %441 = arith.addf %370, %440 : vector<8x128xf32>
    %c102 = arith.constant 102 : index
    %442 = memref.load %arg4[%c102] : memref<512xf32, #tpu.memory_space<smem>>
    %443 = vector.broadcast %442 : f32 to vector<8x128xf32>
    %444 = arith.mulf %417, %443 : vector<8x128xf32>
    %445 = arith.addf %374, %444 : vector<8x128xf32>
    %c103 = arith.constant 103 : index
    %446 = memref.load %arg4[%c103] : memref<512xf32, #tpu.memory_space<smem>>
    %447 = vector.broadcast %446 : f32 to vector<8x128xf32>
    %448 = arith.mulf %417, %447 : vector<8x128xf32>
    %449 = arith.addf %378, %448 : vector<8x128xf32>
    %c104 = arith.constant 104 : index
    %450 = memref.load %arg4[%c104] : memref<512xf32, #tpu.memory_space<smem>>
    %451 = vector.broadcast %450 : f32 to vector<8x128xf32>
    %452 = arith.mulf %417, %451 : vector<8x128xf32>
    %453 = arith.addf %382, %452 : vector<8x128xf32>
    %c105 = arith.constant 105 : index
    %454 = memref.load %arg4[%c105] : memref<512xf32, #tpu.memory_space<smem>>
    %455 = vector.broadcast %454 : f32 to vector<8x128xf32>
    %456 = arith.mulf %417, %455 : vector<8x128xf32>
    %457 = arith.addf %386, %456 : vector<8x128xf32>
    %c106 = arith.constant 106 : index
    %458 = memref.load %arg4[%c106] : memref<512xf32, #tpu.memory_space<smem>>
    %459 = vector.broadcast %458 : f32 to vector<8x128xf32>
    %460 = arith.mulf %417, %459 : vector<8x128xf32>
    %461 = arith.addf %390, %460 : vector<8x128xf32>
    %c107 = arith.constant 107 : index
    %462 = memref.load %arg4[%c107] : memref<512xf32, #tpu.memory_space<smem>>
    %463 = vector.broadcast %462 : f32 to vector<8x128xf32>
    %464 = arith.mulf %417, %463 : vector<8x128xf32>
    %465 = arith.addf %394, %464 : vector<8x128xf32>
    %c108 = arith.constant 108 : index
    %466 = memref.load %arg4[%c108] : memref<512xf32, #tpu.memory_space<smem>>
    %467 = vector.broadcast %466 : f32 to vector<8x128xf32>
    %468 = arith.mulf %417, %467 : vector<8x128xf32>
    %469 = arith.addf %398, %468 : vector<8x128xf32>
    %c109 = arith.constant 109 : index
    %470 = memref.load %arg4[%c109] : memref<512xf32, #tpu.memory_space<smem>>
    %471 = vector.broadcast %470 : f32 to vector<8x128xf32>
    %472 = arith.mulf %417, %471 : vector<8x128xf32>
    %473 = arith.addf %402, %472 : vector<8x128xf32>
    %c110 = arith.constant 110 : index
    %474 = memref.load %arg4[%c110] : memref<512xf32, #tpu.memory_space<smem>>
    %475 = vector.broadcast %474 : f32 to vector<8x128xf32>
    %476 = arith.mulf %417, %475 : vector<8x128xf32>
    %477 = arith.addf %406, %476 : vector<8x128xf32>
    %c111 = arith.constant 111 : index
    %478 = memref.load %arg4[%c111] : memref<512xf32, #tpu.memory_space<smem>>
    %479 = vector.broadcast %478 : f32 to vector<8x128xf32>
    %480 = arith.mulf %417, %479 : vector<8x128xf32>
    %481 = arith.addf %410, %480 : vector<8x128xf32>
    %c7_16 = arith.constant 7 : index
    %482 = memref.load %arg2[%c7_16] : memref<32xf32, #tpu.memory_space<smem>>
    %483 = vector.broadcast %482 : f32 to vector<8x128xf32>
    %484 = arith.mulf %0, %483 : vector<8x128xf32>
    %c7_17 = arith.constant 7 : index
    %485 = memref.load %arg3[%c7_17] : memref<32xf32, #tpu.memory_space<smem>>
    %486 = vector.broadcast %485 : f32 to vector<8x128xf32>
    %487 = arith.addf %484, %486 : vector<8x128xf32>
    %488 = math.tanh %487 : vector<8x128xf32>
    %c112 = arith.constant 112 : index
    %489 = memref.load %arg4[%c112] : memref<512xf32, #tpu.memory_space<smem>>
    %490 = vector.broadcast %489 : f32 to vector<8x128xf32>
    %491 = arith.mulf %488, %490 : vector<8x128xf32>
    %492 = arith.addf %421, %491 : vector<8x128xf32>
    %c113 = arith.constant 113 : index
    %493 = memref.load %arg4[%c113] : memref<512xf32, #tpu.memory_space<smem>>
    %494 = vector.broadcast %493 : f32 to vector<8x128xf32>
    %495 = arith.mulf %488, %494 : vector<8x128xf32>
    %496 = arith.addf %425, %495 : vector<8x128xf32>
    %c114 = arith.constant 114 : index
    %497 = memref.load %arg4[%c114] : memref<512xf32, #tpu.memory_space<smem>>
    %498 = vector.broadcast %497 : f32 to vector<8x128xf32>
    %499 = arith.mulf %488, %498 : vector<8x128xf32>
    %500 = arith.addf %429, %499 : vector<8x128xf32>
    %c115 = arith.constant 115 : index
    %501 = memref.load %arg4[%c115] : memref<512xf32, #tpu.memory_space<smem>>
    %502 = vector.broadcast %501 : f32 to vector<8x128xf32>
    %503 = arith.mulf %488, %502 : vector<8x128xf32>
    %504 = arith.addf %433, %503 : vector<8x128xf32>
    %c116 = arith.constant 116 : index
    %505 = memref.load %arg4[%c116] : memref<512xf32, #tpu.memory_space<smem>>
    %506 = vector.broadcast %505 : f32 to vector<8x128xf32>
    %507 = arith.mulf %488, %506 : vector<8x128xf32>
    %508 = arith.addf %437, %507 : vector<8x128xf32>
    %c117 = arith.constant 117 : index
    %509 = memref.load %arg4[%c117] : memref<512xf32, #tpu.memory_space<smem>>
    %510 = vector.broadcast %509 : f32 to vector<8x128xf32>
    %511 = arith.mulf %488, %510 : vector<8x128xf32>
    %512 = arith.addf %441, %511 : vector<8x128xf32>
    %c118 = arith.constant 118 : index
    %513 = memref.load %arg4[%c118] : memref<512xf32, #tpu.memory_space<smem>>
    %514 = vector.broadcast %513 : f32 to vector<8x128xf32>
    %515 = arith.mulf %488, %514 : vector<8x128xf32>
    %516 = arith.addf %445, %515 : vector<8x128xf32>
    %c119 = arith.constant 119 : index
    %517 = memref.load %arg4[%c119] : memref<512xf32, #tpu.memory_space<smem>>
    %518 = vector.broadcast %517 : f32 to vector<8x128xf32>
    %519 = arith.mulf %488, %518 : vector<8x128xf32>
    %520 = arith.addf %449, %519 : vector<8x128xf32>
    %c120 = arith.constant 120 : index
    %521 = memref.load %arg4[%c120] : memref<512xf32, #tpu.memory_space<smem>>
    %522 = vector.broadcast %521 : f32 to vector<8x128xf32>
    %523 = arith.mulf %488, %522 : vector<8x128xf32>
    %524 = arith.addf %453, %523 : vector<8x128xf32>
    %c121 = arith.constant 121 : index
    %525 = memref.load %arg4[%c121] : memref<512xf32, #tpu.memory_space<smem>>
    %526 = vector.broadcast %525 : f32 to vector<8x128xf32>
    %527 = arith.mulf %488, %526 : vector<8x128xf32>
    %528 = arith.addf %457, %527 : vector<8x128xf32>
    %c122 = arith.constant 122 : index
    %529 = memref.load %arg4[%c122] : memref<512xf32, #tpu.memory_space<smem>>
    %530 = vector.broadcast %529 : f32 to vector<8x128xf32>
    %531 = arith.mulf %488, %530 : vector<8x128xf32>
    %532 = arith.addf %461, %531 : vector<8x128xf32>
    %c123 = arith.constant 123 : index
    %533 = memref.load %arg4[%c123] : memref<512xf32, #tpu.memory_space<smem>>
    %534 = vector.broadcast %533 : f32 to vector<8x128xf32>
    %535 = arith.mulf %488, %534 : vector<8x128xf32>
    %536 = arith.addf %465, %535 : vector<8x128xf32>
    %c124 = arith.constant 124 : index
    %537 = memref.load %arg4[%c124] : memref<512xf32, #tpu.memory_space<smem>>
    %538 = vector.broadcast %537 : f32 to vector<8x128xf32>
    %539 = arith.mulf %488, %538 : vector<8x128xf32>
    %540 = arith.addf %469, %539 : vector<8x128xf32>
    %c125 = arith.constant 125 : index
    %541 = memref.load %arg4[%c125] : memref<512xf32, #tpu.memory_space<smem>>
    %542 = vector.broadcast %541 : f32 to vector<8x128xf32>
    %543 = arith.mulf %488, %542 : vector<8x128xf32>
    %544 = arith.addf %473, %543 : vector<8x128xf32>
    %c126 = arith.constant 126 : index
    %545 = memref.load %arg4[%c126] : memref<512xf32, #tpu.memory_space<smem>>
    %546 = vector.broadcast %545 : f32 to vector<8x128xf32>
    %547 = arith.mulf %488, %546 : vector<8x128xf32>
    %548 = arith.addf %477, %547 : vector<8x128xf32>
    %c127 = arith.constant 127 : index
    %549 = memref.load %arg4[%c127] : memref<512xf32, #tpu.memory_space<smem>>
    %550 = vector.broadcast %549 : f32 to vector<8x128xf32>
    %551 = arith.mulf %488, %550 : vector<8x128xf32>
    %552 = arith.addf %481, %551 : vector<8x128xf32>
    %c8_18 = arith.constant 8 : index
    %553 = memref.load %arg2[%c8_18] : memref<32xf32, #tpu.memory_space<smem>>
    %554 = vector.broadcast %553 : f32 to vector<8x128xf32>
    %555 = arith.mulf %0, %554 : vector<8x128xf32>
    %c8_19 = arith.constant 8 : index
    %556 = memref.load %arg3[%c8_19] : memref<32xf32, #tpu.memory_space<smem>>
    %557 = vector.broadcast %556 : f32 to vector<8x128xf32>
    %558 = arith.addf %555, %557 : vector<8x128xf32>
    %559 = math.tanh %558 : vector<8x128xf32>
    %c128 = arith.constant 128 : index
    %560 = memref.load %arg4[%c128] : memref<512xf32, #tpu.memory_space<smem>>
    %561 = vector.broadcast %560 : f32 to vector<8x128xf32>
    %562 = arith.mulf %559, %561 : vector<8x128xf32>
    %563 = arith.addf %492, %562 : vector<8x128xf32>
    %c129 = arith.constant 129 : index
    %564 = memref.load %arg4[%c129] : memref<512xf32, #tpu.memory_space<smem>>
    %565 = vector.broadcast %564 : f32 to vector<8x128xf32>
    %566 = arith.mulf %559, %565 : vector<8x128xf32>
    %567 = arith.addf %496, %566 : vector<8x128xf32>
    %c130 = arith.constant 130 : index
    %568 = memref.load %arg4[%c130] : memref<512xf32, #tpu.memory_space<smem>>
    %569 = vector.broadcast %568 : f32 to vector<8x128xf32>
    %570 = arith.mulf %559, %569 : vector<8x128xf32>
    %571 = arith.addf %500, %570 : vector<8x128xf32>
    %c131 = arith.constant 131 : index
    %572 = memref.load %arg4[%c131] : memref<512xf32, #tpu.memory_space<smem>>
    %573 = vector.broadcast %572 : f32 to vector<8x128xf32>
    %574 = arith.mulf %559, %573 : vector<8x128xf32>
    %575 = arith.addf %504, %574 : vector<8x128xf32>
    %c132 = arith.constant 132 : index
    %576 = memref.load %arg4[%c132] : memref<512xf32, #tpu.memory_space<smem>>
    %577 = vector.broadcast %576 : f32 to vector<8x128xf32>
    %578 = arith.mulf %559, %577 : vector<8x128xf32>
    %579 = arith.addf %508, %578 : vector<8x128xf32>
    %c133 = arith.constant 133 : index
    %580 = memref.load %arg4[%c133] : memref<512xf32, #tpu.memory_space<smem>>
    %581 = vector.broadcast %580 : f32 to vector<8x128xf32>
    %582 = arith.mulf %559, %581 : vector<8x128xf32>
    %583 = arith.addf %512, %582 : vector<8x128xf32>
    %c134 = arith.constant 134 : index
    %584 = memref.load %arg4[%c134] : memref<512xf32, #tpu.memory_space<smem>>
    %585 = vector.broadcast %584 : f32 to vector<8x128xf32>
    %586 = arith.mulf %559, %585 : vector<8x128xf32>
    %587 = arith.addf %516, %586 : vector<8x128xf32>
    %c135 = arith.constant 135 : index
    %588 = memref.load %arg4[%c135] : memref<512xf32, #tpu.memory_space<smem>>
    %589 = vector.broadcast %588 : f32 to vector<8x128xf32>
    %590 = arith.mulf %559, %589 : vector<8x128xf32>
    %591 = arith.addf %520, %590 : vector<8x128xf32>
    %c136 = arith.constant 136 : index
    %592 = memref.load %arg4[%c136] : memref<512xf32, #tpu.memory_space<smem>>
    %593 = vector.broadcast %592 : f32 to vector<8x128xf32>
    %594 = arith.mulf %559, %593 : vector<8x128xf32>
    %595 = arith.addf %524, %594 : vector<8x128xf32>
    %c137 = arith.constant 137 : index
    %596 = memref.load %arg4[%c137] : memref<512xf32, #tpu.memory_space<smem>>
    %597 = vector.broadcast %596 : f32 to vector<8x128xf32>
    %598 = arith.mulf %559, %597 : vector<8x128xf32>
    %599 = arith.addf %528, %598 : vector<8x128xf32>
    %c138 = arith.constant 138 : index
    %600 = memref.load %arg4[%c138] : memref<512xf32, #tpu.memory_space<smem>>
    %601 = vector.broadcast %600 : f32 to vector<8x128xf32>
    %602 = arith.mulf %559, %601 : vector<8x128xf32>
    %603 = arith.addf %532, %602 : vector<8x128xf32>
    %c139 = arith.constant 139 : index
    %604 = memref.load %arg4[%c139] : memref<512xf32, #tpu.memory_space<smem>>
    %605 = vector.broadcast %604 : f32 to vector<8x128xf32>
    %606 = arith.mulf %559, %605 : vector<8x128xf32>
    %607 = arith.addf %536, %606 : vector<8x128xf32>
    %c140 = arith.constant 140 : index
    %608 = memref.load %arg4[%c140] : memref<512xf32, #tpu.memory_space<smem>>
    %609 = vector.broadcast %608 : f32 to vector<8x128xf32>
    %610 = arith.mulf %559, %609 : vector<8x128xf32>
    %611 = arith.addf %540, %610 : vector<8x128xf32>
    %c141 = arith.constant 141 : index
    %612 = memref.load %arg4[%c141] : memref<512xf32, #tpu.memory_space<smem>>
    %613 = vector.broadcast %612 : f32 to vector<8x128xf32>
    %614 = arith.mulf %559, %613 : vector<8x128xf32>
    %615 = arith.addf %544, %614 : vector<8x128xf32>
    %c142 = arith.constant 142 : index
    %616 = memref.load %arg4[%c142] : memref<512xf32, #tpu.memory_space<smem>>
    %617 = vector.broadcast %616 : f32 to vector<8x128xf32>
    %618 = arith.mulf %559, %617 : vector<8x128xf32>
    %619 = arith.addf %548, %618 : vector<8x128xf32>
    %c143 = arith.constant 143 : index
    %620 = memref.load %arg4[%c143] : memref<512xf32, #tpu.memory_space<smem>>
    %621 = vector.broadcast %620 : f32 to vector<8x128xf32>
    %622 = arith.mulf %559, %621 : vector<8x128xf32>
    %623 = arith.addf %552, %622 : vector<8x128xf32>
    %c9_20 = arith.constant 9 : index
    %624 = memref.load %arg2[%c9_20] : memref<32xf32, #tpu.memory_space<smem>>
    %625 = vector.broadcast %624 : f32 to vector<8x128xf32>
    %626 = arith.mulf %0, %625 : vector<8x128xf32>
    %c9_21 = arith.constant 9 : index
    %627 = memref.load %arg3[%c9_21] : memref<32xf32, #tpu.memory_space<smem>>
    %628 = vector.broadcast %627 : f32 to vector<8x128xf32>
    %629 = arith.addf %626, %628 : vector<8x128xf32>
    %630 = math.tanh %629 : vector<8x128xf32>
    %c144 = arith.constant 144 : index
    %631 = memref.load %arg4[%c144] : memref<512xf32, #tpu.memory_space<smem>>
    %632 = vector.broadcast %631 : f32 to vector<8x128xf32>
    %633 = arith.mulf %630, %632 : vector<8x128xf32>
    %634 = arith.addf %563, %633 : vector<8x128xf32>
    %c145 = arith.constant 145 : index
    %635 = memref.load %arg4[%c145] : memref<512xf32, #tpu.memory_space<smem>>
    %636 = vector.broadcast %635 : f32 to vector<8x128xf32>
    %637 = arith.mulf %630, %636 : vector<8x128xf32>
    %638 = arith.addf %567, %637 : vector<8x128xf32>
    %c146 = arith.constant 146 : index
    %639 = memref.load %arg4[%c146] : memref<512xf32, #tpu.memory_space<smem>>
    %640 = vector.broadcast %639 : f32 to vector<8x128xf32>
    %641 = arith.mulf %630, %640 : vector<8x128xf32>
    %642 = arith.addf %571, %641 : vector<8x128xf32>
    %c147 = arith.constant 147 : index
    %643 = memref.load %arg4[%c147] : memref<512xf32, #tpu.memory_space<smem>>
    %644 = vector.broadcast %643 : f32 to vector<8x128xf32>
    %645 = arith.mulf %630, %644 : vector<8x128xf32>
    %646 = arith.addf %575, %645 : vector<8x128xf32>
    %c148 = arith.constant 148 : index
    %647 = memref.load %arg4[%c148] : memref<512xf32, #tpu.memory_space<smem>>
    %648 = vector.broadcast %647 : f32 to vector<8x128xf32>
    %649 = arith.mulf %630, %648 : vector<8x128xf32>
    %650 = arith.addf %579, %649 : vector<8x128xf32>
    %c149 = arith.constant 149 : index
    %651 = memref.load %arg4[%c149] : memref<512xf32, #tpu.memory_space<smem>>
    %652 = vector.broadcast %651 : f32 to vector<8x128xf32>
    %653 = arith.mulf %630, %652 : vector<8x128xf32>
    %654 = arith.addf %583, %653 : vector<8x128xf32>
    %c150 = arith.constant 150 : index
    %655 = memref.load %arg4[%c150] : memref<512xf32, #tpu.memory_space<smem>>
    %656 = vector.broadcast %655 : f32 to vector<8x128xf32>
    %657 = arith.mulf %630, %656 : vector<8x128xf32>
    %658 = arith.addf %587, %657 : vector<8x128xf32>
    %c151 = arith.constant 151 : index
    %659 = memref.load %arg4[%c151] : memref<512xf32, #tpu.memory_space<smem>>
    %660 = vector.broadcast %659 : f32 to vector<8x128xf32>
    %661 = arith.mulf %630, %660 : vector<8x128xf32>
    %662 = arith.addf %591, %661 : vector<8x128xf32>
    %c152 = arith.constant 152 : index
    %663 = memref.load %arg4[%c152] : memref<512xf32, #tpu.memory_space<smem>>
    %664 = vector.broadcast %663 : f32 to vector<8x128xf32>
    %665 = arith.mulf %630, %664 : vector<8x128xf32>
    %666 = arith.addf %595, %665 : vector<8x128xf32>
    %c153 = arith.constant 153 : index
    %667 = memref.load %arg4[%c153] : memref<512xf32, #tpu.memory_space<smem>>
    %668 = vector.broadcast %667 : f32 to vector<8x128xf32>
    %669 = arith.mulf %630, %668 : vector<8x128xf32>
    %670 = arith.addf %599, %669 : vector<8x128xf32>
    %c154 = arith.constant 154 : index
    %671 = memref.load %arg4[%c154] : memref<512xf32, #tpu.memory_space<smem>>
    %672 = vector.broadcast %671 : f32 to vector<8x128xf32>
    %673 = arith.mulf %630, %672 : vector<8x128xf32>
    %674 = arith.addf %603, %673 : vector<8x128xf32>
    %c155 = arith.constant 155 : index
    %675 = memref.load %arg4[%c155] : memref<512xf32, #tpu.memory_space<smem>>
    %676 = vector.broadcast %675 : f32 to vector<8x128xf32>
    %677 = arith.mulf %630, %676 : vector<8x128xf32>
    %678 = arith.addf %607, %677 : vector<8x128xf32>
    %c156 = arith.constant 156 : index
    %679 = memref.load %arg4[%c156] : memref<512xf32, #tpu.memory_space<smem>>
    %680 = vector.broadcast %679 : f32 to vector<8x128xf32>
    %681 = arith.mulf %630, %680 : vector<8x128xf32>
    %682 = arith.addf %611, %681 : vector<8x128xf32>
    %c157 = arith.constant 157 : index
    %683 = memref.load %arg4[%c157] : memref<512xf32, #tpu.memory_space<smem>>
    %684 = vector.broadcast %683 : f32 to vector<8x128xf32>
    %685 = arith.mulf %630, %684 : vector<8x128xf32>
    %686 = arith.addf %615, %685 : vector<8x128xf32>
    %c158 = arith.constant 158 : index
    %687 = memref.load %arg4[%c158] : memref<512xf32, #tpu.memory_space<smem>>
    %688 = vector.broadcast %687 : f32 to vector<8x128xf32>
    %689 = arith.mulf %630, %688 : vector<8x128xf32>
    %690 = arith.addf %619, %689 : vector<8x128xf32>
    %c159 = arith.constant 159 : index
    %691 = memref.load %arg4[%c159] : memref<512xf32, #tpu.memory_space<smem>>
    %692 = vector.broadcast %691 : f32 to vector<8x128xf32>
    %693 = arith.mulf %630, %692 : vector<8x128xf32>
    %694 = arith.addf %623, %693 : vector<8x128xf32>
    %c10_22 = arith.constant 10 : index
    %695 = memref.load %arg2[%c10_22] : memref<32xf32, #tpu.memory_space<smem>>
    %696 = vector.broadcast %695 : f32 to vector<8x128xf32>
    %697 = arith.mulf %0, %696 : vector<8x128xf32>
    %c10_23 = arith.constant 10 : index
    %698 = memref.load %arg3[%c10_23] : memref<32xf32, #tpu.memory_space<smem>>
    %699 = vector.broadcast %698 : f32 to vector<8x128xf32>
    %700 = arith.addf %697, %699 : vector<8x128xf32>
    %701 = math.tanh %700 : vector<8x128xf32>
    %c160 = arith.constant 160 : index
    %702 = memref.load %arg4[%c160] : memref<512xf32, #tpu.memory_space<smem>>
    %703 = vector.broadcast %702 : f32 to vector<8x128xf32>
    %704 = arith.mulf %701, %703 : vector<8x128xf32>
    %705 = arith.addf %634, %704 : vector<8x128xf32>
    %c161 = arith.constant 161 : index
    %706 = memref.load %arg4[%c161] : memref<512xf32, #tpu.memory_space<smem>>
    %707 = vector.broadcast %706 : f32 to vector<8x128xf32>
    %708 = arith.mulf %701, %707 : vector<8x128xf32>
    %709 = arith.addf %638, %708 : vector<8x128xf32>
    %c162 = arith.constant 162 : index
    %710 = memref.load %arg4[%c162] : memref<512xf32, #tpu.memory_space<smem>>
    %711 = vector.broadcast %710 : f32 to vector<8x128xf32>
    %712 = arith.mulf %701, %711 : vector<8x128xf32>
    %713 = arith.addf %642, %712 : vector<8x128xf32>
    %c163 = arith.constant 163 : index
    %714 = memref.load %arg4[%c163] : memref<512xf32, #tpu.memory_space<smem>>
    %715 = vector.broadcast %714 : f32 to vector<8x128xf32>
    %716 = arith.mulf %701, %715 : vector<8x128xf32>
    %717 = arith.addf %646, %716 : vector<8x128xf32>
    %c164 = arith.constant 164 : index
    %718 = memref.load %arg4[%c164] : memref<512xf32, #tpu.memory_space<smem>>
    %719 = vector.broadcast %718 : f32 to vector<8x128xf32>
    %720 = arith.mulf %701, %719 : vector<8x128xf32>
    %721 = arith.addf %650, %720 : vector<8x128xf32>
    %c165 = arith.constant 165 : index
    %722 = memref.load %arg4[%c165] : memref<512xf32, #tpu.memory_space<smem>>
    %723 = vector.broadcast %722 : f32 to vector<8x128xf32>
    %724 = arith.mulf %701, %723 : vector<8x128xf32>
    %725 = arith.addf %654, %724 : vector<8x128xf32>
    %c166 = arith.constant 166 : index
    %726 = memref.load %arg4[%c166] : memref<512xf32, #tpu.memory_space<smem>>
    %727 = vector.broadcast %726 : f32 to vector<8x128xf32>
    %728 = arith.mulf %701, %727 : vector<8x128xf32>
    %729 = arith.addf %658, %728 : vector<8x128xf32>
    %c167 = arith.constant 167 : index
    %730 = memref.load %arg4[%c167] : memref<512xf32, #tpu.memory_space<smem>>
    %731 = vector.broadcast %730 : f32 to vector<8x128xf32>
    %732 = arith.mulf %701, %731 : vector<8x128xf32>
    %733 = arith.addf %662, %732 : vector<8x128xf32>
    %c168 = arith.constant 168 : index
    %734 = memref.load %arg4[%c168] : memref<512xf32, #tpu.memory_space<smem>>
    %735 = vector.broadcast %734 : f32 to vector<8x128xf32>
    %736 = arith.mulf %701, %735 : vector<8x128xf32>
    %737 = arith.addf %666, %736 : vector<8x128xf32>
    %c169 = arith.constant 169 : index
    %738 = memref.load %arg4[%c169] : memref<512xf32, #tpu.memory_space<smem>>
    %739 = vector.broadcast %738 : f32 to vector<8x128xf32>
    %740 = arith.mulf %701, %739 : vector<8x128xf32>
    %741 = arith.addf %670, %740 : vector<8x128xf32>
    %c170 = arith.constant 170 : index
    %742 = memref.load %arg4[%c170] : memref<512xf32, #tpu.memory_space<smem>>
    %743 = vector.broadcast %742 : f32 to vector<8x128xf32>
    %744 = arith.mulf %701, %743 : vector<8x128xf32>
    %745 = arith.addf %674, %744 : vector<8x128xf32>
    %c171 = arith.constant 171 : index
    %746 = memref.load %arg4[%c171] : memref<512xf32, #tpu.memory_space<smem>>
    %747 = vector.broadcast %746 : f32 to vector<8x128xf32>
    %748 = arith.mulf %701, %747 : vector<8x128xf32>
    %749 = arith.addf %678, %748 : vector<8x128xf32>
    %c172 = arith.constant 172 : index
    %750 = memref.load %arg4[%c172] : memref<512xf32, #tpu.memory_space<smem>>
    %751 = vector.broadcast %750 : f32 to vector<8x128xf32>
    %752 = arith.mulf %701, %751 : vector<8x128xf32>
    %753 = arith.addf %682, %752 : vector<8x128xf32>
    %c173 = arith.constant 173 : index
    %754 = memref.load %arg4[%c173] : memref<512xf32, #tpu.memory_space<smem>>
    %755 = vector.broadcast %754 : f32 to vector<8x128xf32>
    %756 = arith.mulf %701, %755 : vector<8x128xf32>
    %757 = arith.addf %686, %756 : vector<8x128xf32>
    %c174 = arith.constant 174 : index
    %758 = memref.load %arg4[%c174] : memref<512xf32, #tpu.memory_space<smem>>
    %759 = vector.broadcast %758 : f32 to vector<8x128xf32>
    %760 = arith.mulf %701, %759 : vector<8x128xf32>
    %761 = arith.addf %690, %760 : vector<8x128xf32>
    %c175 = arith.constant 175 : index
    %762 = memref.load %arg4[%c175] : memref<512xf32, #tpu.memory_space<smem>>
    %763 = vector.broadcast %762 : f32 to vector<8x128xf32>
    %764 = arith.mulf %701, %763 : vector<8x128xf32>
    %765 = arith.addf %694, %764 : vector<8x128xf32>
    %c11_24 = arith.constant 11 : index
    %766 = memref.load %arg2[%c11_24] : memref<32xf32, #tpu.memory_space<smem>>
    %767 = vector.broadcast %766 : f32 to vector<8x128xf32>
    %768 = arith.mulf %0, %767 : vector<8x128xf32>
    %c11_25 = arith.constant 11 : index
    %769 = memref.load %arg3[%c11_25] : memref<32xf32, #tpu.memory_space<smem>>
    %770 = vector.broadcast %769 : f32 to vector<8x128xf32>
    %771 = arith.addf %768, %770 : vector<8x128xf32>
    %772 = math.tanh %771 : vector<8x128xf32>
    %c176 = arith.constant 176 : index
    %773 = memref.load %arg4[%c176] : memref<512xf32, #tpu.memory_space<smem>>
    %774 = vector.broadcast %773 : f32 to vector<8x128xf32>
    %775 = arith.mulf %772, %774 : vector<8x128xf32>
    %776 = arith.addf %705, %775 : vector<8x128xf32>
    %c177 = arith.constant 177 : index
    %777 = memref.load %arg4[%c177] : memref<512xf32, #tpu.memory_space<smem>>
    %778 = vector.broadcast %777 : f32 to vector<8x128xf32>
    %779 = arith.mulf %772, %778 : vector<8x128xf32>
    %780 = arith.addf %709, %779 : vector<8x128xf32>
    %c178 = arith.constant 178 : index
    %781 = memref.load %arg4[%c178] : memref<512xf32, #tpu.memory_space<smem>>
    %782 = vector.broadcast %781 : f32 to vector<8x128xf32>
    %783 = arith.mulf %772, %782 : vector<8x128xf32>
    %784 = arith.addf %713, %783 : vector<8x128xf32>
    %c179 = arith.constant 179 : index
    %785 = memref.load %arg4[%c179] : memref<512xf32, #tpu.memory_space<smem>>
    %786 = vector.broadcast %785 : f32 to vector<8x128xf32>
    %787 = arith.mulf %772, %786 : vector<8x128xf32>
    %788 = arith.addf %717, %787 : vector<8x128xf32>
    %c180 = arith.constant 180 : index
    %789 = memref.load %arg4[%c180] : memref<512xf32, #tpu.memory_space<smem>>
    %790 = vector.broadcast %789 : f32 to vector<8x128xf32>
    %791 = arith.mulf %772, %790 : vector<8x128xf32>
    %792 = arith.addf %721, %791 : vector<8x128xf32>
    %c181 = arith.constant 181 : index
    %793 = memref.load %arg4[%c181] : memref<512xf32, #tpu.memory_space<smem>>
    %794 = vector.broadcast %793 : f32 to vector<8x128xf32>
    %795 = arith.mulf %772, %794 : vector<8x128xf32>
    %796 = arith.addf %725, %795 : vector<8x128xf32>
    %c182 = arith.constant 182 : index
    %797 = memref.load %arg4[%c182] : memref<512xf32, #tpu.memory_space<smem>>
    %798 = vector.broadcast %797 : f32 to vector<8x128xf32>
    %799 = arith.mulf %772, %798 : vector<8x128xf32>
    %800 = arith.addf %729, %799 : vector<8x128xf32>
    %c183 = arith.constant 183 : index
    %801 = memref.load %arg4[%c183] : memref<512xf32, #tpu.memory_space<smem>>
    %802 = vector.broadcast %801 : f32 to vector<8x128xf32>
    %803 = arith.mulf %772, %802 : vector<8x128xf32>
    %804 = arith.addf %733, %803 : vector<8x128xf32>
    %c184 = arith.constant 184 : index
    %805 = memref.load %arg4[%c184] : memref<512xf32, #tpu.memory_space<smem>>
    %806 = vector.broadcast %805 : f32 to vector<8x128xf32>
    %807 = arith.mulf %772, %806 : vector<8x128xf32>
    %808 = arith.addf %737, %807 : vector<8x128xf32>
    %c185 = arith.constant 185 : index
    %809 = memref.load %arg4[%c185] : memref<512xf32, #tpu.memory_space<smem>>
    %810 = vector.broadcast %809 : f32 to vector<8x128xf32>
    %811 = arith.mulf %772, %810 : vector<8x128xf32>
    %812 = arith.addf %741, %811 : vector<8x128xf32>
    %c186 = arith.constant 186 : index
    %813 = memref.load %arg4[%c186] : memref<512xf32, #tpu.memory_space<smem>>
    %814 = vector.broadcast %813 : f32 to vector<8x128xf32>
    %815 = arith.mulf %772, %814 : vector<8x128xf32>
    %816 = arith.addf %745, %815 : vector<8x128xf32>
    %c187 = arith.constant 187 : index
    %817 = memref.load %arg4[%c187] : memref<512xf32, #tpu.memory_space<smem>>
    %818 = vector.broadcast %817 : f32 to vector<8x128xf32>
    %819 = arith.mulf %772, %818 : vector<8x128xf32>
    %820 = arith.addf %749, %819 : vector<8x128xf32>
    %c188 = arith.constant 188 : index
    %821 = memref.load %arg4[%c188] : memref<512xf32, #tpu.memory_space<smem>>
    %822 = vector.broadcast %821 : f32 to vector<8x128xf32>
    %823 = arith.mulf %772, %822 : vector<8x128xf32>
    %824 = arith.addf %753, %823 : vector<8x128xf32>
    %c189 = arith.constant 189 : index
    %825 = memref.load %arg4[%c189] : memref<512xf32, #tpu.memory_space<smem>>
    %826 = vector.broadcast %825 : f32 to vector<8x128xf32>
    %827 = arith.mulf %772, %826 : vector<8x128xf32>
    %828 = arith.addf %757, %827 : vector<8x128xf32>
    %c190 = arith.constant 190 : index
    %829 = memref.load %arg4[%c190] : memref<512xf32, #tpu.memory_space<smem>>
    %830 = vector.broadcast %829 : f32 to vector<8x128xf32>
    %831 = arith.mulf %772, %830 : vector<8x128xf32>
    %832 = arith.addf %761, %831 : vector<8x128xf32>
    %c191 = arith.constant 191 : index
    %833 = memref.load %arg4[%c191] : memref<512xf32, #tpu.memory_space<smem>>
    %834 = vector.broadcast %833 : f32 to vector<8x128xf32>
    %835 = arith.mulf %772, %834 : vector<8x128xf32>
    %836 = arith.addf %765, %835 : vector<8x128xf32>
    %c12_26 = arith.constant 12 : index
    %837 = memref.load %arg2[%c12_26] : memref<32xf32, #tpu.memory_space<smem>>
    %838 = vector.broadcast %837 : f32 to vector<8x128xf32>
    %839 = arith.mulf %0, %838 : vector<8x128xf32>
    %c12_27 = arith.constant 12 : index
    %840 = memref.load %arg3[%c12_27] : memref<32xf32, #tpu.memory_space<smem>>
    %841 = vector.broadcast %840 : f32 to vector<8x128xf32>
    %842 = arith.addf %839, %841 : vector<8x128xf32>
    %843 = math.tanh %842 : vector<8x128xf32>
    %c192 = arith.constant 192 : index
    %844 = memref.load %arg4[%c192] : memref<512xf32, #tpu.memory_space<smem>>
    %845 = vector.broadcast %844 : f32 to vector<8x128xf32>
    %846 = arith.mulf %843, %845 : vector<8x128xf32>
    %847 = arith.addf %776, %846 : vector<8x128xf32>
    %c193 = arith.constant 193 : index
    %848 = memref.load %arg4[%c193] : memref<512xf32, #tpu.memory_space<smem>>
    %849 = vector.broadcast %848 : f32 to vector<8x128xf32>
    %850 = arith.mulf %843, %849 : vector<8x128xf32>
    %851 = arith.addf %780, %850 : vector<8x128xf32>
    %c194 = arith.constant 194 : index
    %852 = memref.load %arg4[%c194] : memref<512xf32, #tpu.memory_space<smem>>
    %853 = vector.broadcast %852 : f32 to vector<8x128xf32>
    %854 = arith.mulf %843, %853 : vector<8x128xf32>
    %855 = arith.addf %784, %854 : vector<8x128xf32>
    %c195 = arith.constant 195 : index
    %856 = memref.load %arg4[%c195] : memref<512xf32, #tpu.memory_space<smem>>
    %857 = vector.broadcast %856 : f32 to vector<8x128xf32>
    %858 = arith.mulf %843, %857 : vector<8x128xf32>
    %859 = arith.addf %788, %858 : vector<8x128xf32>
    %c196 = arith.constant 196 : index
    %860 = memref.load %arg4[%c196] : memref<512xf32, #tpu.memory_space<smem>>
    %861 = vector.broadcast %860 : f32 to vector<8x128xf32>
    %862 = arith.mulf %843, %861 : vector<8x128xf32>
    %863 = arith.addf %792, %862 : vector<8x128xf32>
    %c197 = arith.constant 197 : index
    %864 = memref.load %arg4[%c197] : memref<512xf32, #tpu.memory_space<smem>>
    %865 = vector.broadcast %864 : f32 to vector<8x128xf32>
    %866 = arith.mulf %843, %865 : vector<8x128xf32>
    %867 = arith.addf %796, %866 : vector<8x128xf32>
    %c198 = arith.constant 198 : index
    %868 = memref.load %arg4[%c198] : memref<512xf32, #tpu.memory_space<smem>>
    %869 = vector.broadcast %868 : f32 to vector<8x128xf32>
    %870 = arith.mulf %843, %869 : vector<8x128xf32>
    %871 = arith.addf %800, %870 : vector<8x128xf32>
    %c199 = arith.constant 199 : index
    %872 = memref.load %arg4[%c199] : memref<512xf32, #tpu.memory_space<smem>>
    %873 = vector.broadcast %872 : f32 to vector<8x128xf32>
    %874 = arith.mulf %843, %873 : vector<8x128xf32>
    %875 = arith.addf %804, %874 : vector<8x128xf32>
    %c200 = arith.constant 200 : index
    %876 = memref.load %arg4[%c200] : memref<512xf32, #tpu.memory_space<smem>>
    %877 = vector.broadcast %876 : f32 to vector<8x128xf32>
    %878 = arith.mulf %843, %877 : vector<8x128xf32>
    %879 = arith.addf %808, %878 : vector<8x128xf32>
    %c201 = arith.constant 201 : index
    %880 = memref.load %arg4[%c201] : memref<512xf32, #tpu.memory_space<smem>>
    %881 = vector.broadcast %880 : f32 to vector<8x128xf32>
    %882 = arith.mulf %843, %881 : vector<8x128xf32>
    %883 = arith.addf %812, %882 : vector<8x128xf32>
    %c202 = arith.constant 202 : index
    %884 = memref.load %arg4[%c202] : memref<512xf32, #tpu.memory_space<smem>>
    %885 = vector.broadcast %884 : f32 to vector<8x128xf32>
    %886 = arith.mulf %843, %885 : vector<8x128xf32>
    %887 = arith.addf %816, %886 : vector<8x128xf32>
    %c203 = arith.constant 203 : index
    %888 = memref.load %arg4[%c203] : memref<512xf32, #tpu.memory_space<smem>>
    %889 = vector.broadcast %888 : f32 to vector<8x128xf32>
    %890 = arith.mulf %843, %889 : vector<8x128xf32>
    %891 = arith.addf %820, %890 : vector<8x128xf32>
    %c204 = arith.constant 204 : index
    %892 = memref.load %arg4[%c204] : memref<512xf32, #tpu.memory_space<smem>>
    %893 = vector.broadcast %892 : f32 to vector<8x128xf32>
    %894 = arith.mulf %843, %893 : vector<8x128xf32>
    %895 = arith.addf %824, %894 : vector<8x128xf32>
    %c205 = arith.constant 205 : index
    %896 = memref.load %arg4[%c205] : memref<512xf32, #tpu.memory_space<smem>>
    %897 = vector.broadcast %896 : f32 to vector<8x128xf32>
    %898 = arith.mulf %843, %897 : vector<8x128xf32>
    %899 = arith.addf %828, %898 : vector<8x128xf32>
    %c206 = arith.constant 206 : index
    %900 = memref.load %arg4[%c206] : memref<512xf32, #tpu.memory_space<smem>>
    %901 = vector.broadcast %900 : f32 to vector<8x128xf32>
    %902 = arith.mulf %843, %901 : vector<8x128xf32>
    %903 = arith.addf %832, %902 : vector<8x128xf32>
    %c207 = arith.constant 207 : index
    %904 = memref.load %arg4[%c207] : memref<512xf32, #tpu.memory_space<smem>>
    %905 = vector.broadcast %904 : f32 to vector<8x128xf32>
    %906 = arith.mulf %843, %905 : vector<8x128xf32>
    %907 = arith.addf %836, %906 : vector<8x128xf32>
    %c13_28 = arith.constant 13 : index
    %908 = memref.load %arg2[%c13_28] : memref<32xf32, #tpu.memory_space<smem>>
    %909 = vector.broadcast %908 : f32 to vector<8x128xf32>
    %910 = arith.mulf %0, %909 : vector<8x128xf32>
    %c13_29 = arith.constant 13 : index
    %911 = memref.load %arg3[%c13_29] : memref<32xf32, #tpu.memory_space<smem>>
    %912 = vector.broadcast %911 : f32 to vector<8x128xf32>
    %913 = arith.addf %910, %912 : vector<8x128xf32>
    %914 = math.tanh %913 : vector<8x128xf32>
    %c208 = arith.constant 208 : index
    %915 = memref.load %arg4[%c208] : memref<512xf32, #tpu.memory_space<smem>>
    %916 = vector.broadcast %915 : f32 to vector<8x128xf32>
    %917 = arith.mulf %914, %916 : vector<8x128xf32>
    %918 = arith.addf %847, %917 : vector<8x128xf32>
    %c209 = arith.constant 209 : index
    %919 = memref.load %arg4[%c209] : memref<512xf32, #tpu.memory_space<smem>>
    %920 = vector.broadcast %919 : f32 to vector<8x128xf32>
    %921 = arith.mulf %914, %920 : vector<8x128xf32>
    %922 = arith.addf %851, %921 : vector<8x128xf32>
    %c210 = arith.constant 210 : index
    %923 = memref.load %arg4[%c210] : memref<512xf32, #tpu.memory_space<smem>>
    %924 = vector.broadcast %923 : f32 to vector<8x128xf32>
    %925 = arith.mulf %914, %924 : vector<8x128xf32>
    %926 = arith.addf %855, %925 : vector<8x128xf32>
    %c211 = arith.constant 211 : index
    %927 = memref.load %arg4[%c211] : memref<512xf32, #tpu.memory_space<smem>>
    %928 = vector.broadcast %927 : f32 to vector<8x128xf32>
    %929 = arith.mulf %914, %928 : vector<8x128xf32>
    %930 = arith.addf %859, %929 : vector<8x128xf32>
    %c212 = arith.constant 212 : index
    %931 = memref.load %arg4[%c212] : memref<512xf32, #tpu.memory_space<smem>>
    %932 = vector.broadcast %931 : f32 to vector<8x128xf32>
    %933 = arith.mulf %914, %932 : vector<8x128xf32>
    %934 = arith.addf %863, %933 : vector<8x128xf32>
    %c213 = arith.constant 213 : index
    %935 = memref.load %arg4[%c213] : memref<512xf32, #tpu.memory_space<smem>>
    %936 = vector.broadcast %935 : f32 to vector<8x128xf32>
    %937 = arith.mulf %914, %936 : vector<8x128xf32>
    %938 = arith.addf %867, %937 : vector<8x128xf32>
    %c214 = arith.constant 214 : index
    %939 = memref.load %arg4[%c214] : memref<512xf32, #tpu.memory_space<smem>>
    %940 = vector.broadcast %939 : f32 to vector<8x128xf32>
    %941 = arith.mulf %914, %940 : vector<8x128xf32>
    %942 = arith.addf %871, %941 : vector<8x128xf32>
    %c215 = arith.constant 215 : index
    %943 = memref.load %arg4[%c215] : memref<512xf32, #tpu.memory_space<smem>>
    %944 = vector.broadcast %943 : f32 to vector<8x128xf32>
    %945 = arith.mulf %914, %944 : vector<8x128xf32>
    %946 = arith.addf %875, %945 : vector<8x128xf32>
    %c216 = arith.constant 216 : index
    %947 = memref.load %arg4[%c216] : memref<512xf32, #tpu.memory_space<smem>>
    %948 = vector.broadcast %947 : f32 to vector<8x128xf32>
    %949 = arith.mulf %914, %948 : vector<8x128xf32>
    %950 = arith.addf %879, %949 : vector<8x128xf32>
    %c217 = arith.constant 217 : index
    %951 = memref.load %arg4[%c217] : memref<512xf32, #tpu.memory_space<smem>>
    %952 = vector.broadcast %951 : f32 to vector<8x128xf32>
    %953 = arith.mulf %914, %952 : vector<8x128xf32>
    %954 = arith.addf %883, %953 : vector<8x128xf32>
    %c218 = arith.constant 218 : index
    %955 = memref.load %arg4[%c218] : memref<512xf32, #tpu.memory_space<smem>>
    %956 = vector.broadcast %955 : f32 to vector<8x128xf32>
    %957 = arith.mulf %914, %956 : vector<8x128xf32>
    %958 = arith.addf %887, %957 : vector<8x128xf32>
    %c219 = arith.constant 219 : index
    %959 = memref.load %arg4[%c219] : memref<512xf32, #tpu.memory_space<smem>>
    %960 = vector.broadcast %959 : f32 to vector<8x128xf32>
    %961 = arith.mulf %914, %960 : vector<8x128xf32>
    %962 = arith.addf %891, %961 : vector<8x128xf32>
    %c220 = arith.constant 220 : index
    %963 = memref.load %arg4[%c220] : memref<512xf32, #tpu.memory_space<smem>>
    %964 = vector.broadcast %963 : f32 to vector<8x128xf32>
    %965 = arith.mulf %914, %964 : vector<8x128xf32>
    %966 = arith.addf %895, %965 : vector<8x128xf32>
    %c221 = arith.constant 221 : index
    %967 = memref.load %arg4[%c221] : memref<512xf32, #tpu.memory_space<smem>>
    %968 = vector.broadcast %967 : f32 to vector<8x128xf32>
    %969 = arith.mulf %914, %968 : vector<8x128xf32>
    %970 = arith.addf %899, %969 : vector<8x128xf32>
    %c222 = arith.constant 222 : index
    %971 = memref.load %arg4[%c222] : memref<512xf32, #tpu.memory_space<smem>>
    %972 = vector.broadcast %971 : f32 to vector<8x128xf32>
    %973 = arith.mulf %914, %972 : vector<8x128xf32>
    %974 = arith.addf %903, %973 : vector<8x128xf32>
    %c223 = arith.constant 223 : index
    %975 = memref.load %arg4[%c223] : memref<512xf32, #tpu.memory_space<smem>>
    %976 = vector.broadcast %975 : f32 to vector<8x128xf32>
    %977 = arith.mulf %914, %976 : vector<8x128xf32>
    %978 = arith.addf %907, %977 : vector<8x128xf32>
    %c14_30 = arith.constant 14 : index
    %979 = memref.load %arg2[%c14_30] : memref<32xf32, #tpu.memory_space<smem>>
    %980 = vector.broadcast %979 : f32 to vector<8x128xf32>
    %981 = arith.mulf %0, %980 : vector<8x128xf32>
    %c14_31 = arith.constant 14 : index
    %982 = memref.load %arg3[%c14_31] : memref<32xf32, #tpu.memory_space<smem>>
    %983 = vector.broadcast %982 : f32 to vector<8x128xf32>
    %984 = arith.addf %981, %983 : vector<8x128xf32>
    %985 = math.tanh %984 : vector<8x128xf32>
    %c224 = arith.constant 224 : index
    %986 = memref.load %arg4[%c224] : memref<512xf32, #tpu.memory_space<smem>>
    %987 = vector.broadcast %986 : f32 to vector<8x128xf32>
    %988 = arith.mulf %985, %987 : vector<8x128xf32>
    %989 = arith.addf %918, %988 : vector<8x128xf32>
    %c225 = arith.constant 225 : index
    %990 = memref.load %arg4[%c225] : memref<512xf32, #tpu.memory_space<smem>>
    %991 = vector.broadcast %990 : f32 to vector<8x128xf32>
    %992 = arith.mulf %985, %991 : vector<8x128xf32>
    %993 = arith.addf %922, %992 : vector<8x128xf32>
    %c226 = arith.constant 226 : index
    %994 = memref.load %arg4[%c226] : memref<512xf32, #tpu.memory_space<smem>>
    %995 = vector.broadcast %994 : f32 to vector<8x128xf32>
    %996 = arith.mulf %985, %995 : vector<8x128xf32>
    %997 = arith.addf %926, %996 : vector<8x128xf32>
    %c227 = arith.constant 227 : index
    %998 = memref.load %arg4[%c227] : memref<512xf32, #tpu.memory_space<smem>>
    %999 = vector.broadcast %998 : f32 to vector<8x128xf32>
    %1000 = arith.mulf %985, %999 : vector<8x128xf32>
    %1001 = arith.addf %930, %1000 : vector<8x128xf32>
    %c228 = arith.constant 228 : index
    %1002 = memref.load %arg4[%c228] : memref<512xf32, #tpu.memory_space<smem>>
    %1003 = vector.broadcast %1002 : f32 to vector<8x128xf32>
    %1004 = arith.mulf %985, %1003 : vector<8x128xf32>
    %1005 = arith.addf %934, %1004 : vector<8x128xf32>
    %c229 = arith.constant 229 : index
    %1006 = memref.load %arg4[%c229] : memref<512xf32, #tpu.memory_space<smem>>
    %1007 = vector.broadcast %1006 : f32 to vector<8x128xf32>
    %1008 = arith.mulf %985, %1007 : vector<8x128xf32>
    %1009 = arith.addf %938, %1008 : vector<8x128xf32>
    %c230 = arith.constant 230 : index
    %1010 = memref.load %arg4[%c230] : memref<512xf32, #tpu.memory_space<smem>>
    %1011 = vector.broadcast %1010 : f32 to vector<8x128xf32>
    %1012 = arith.mulf %985, %1011 : vector<8x128xf32>
    %1013 = arith.addf %942, %1012 : vector<8x128xf32>
    %c231 = arith.constant 231 : index
    %1014 = memref.load %arg4[%c231] : memref<512xf32, #tpu.memory_space<smem>>
    %1015 = vector.broadcast %1014 : f32 to vector<8x128xf32>
    %1016 = arith.mulf %985, %1015 : vector<8x128xf32>
    %1017 = arith.addf %946, %1016 : vector<8x128xf32>
    %c232 = arith.constant 232 : index
    %1018 = memref.load %arg4[%c232] : memref<512xf32, #tpu.memory_space<smem>>
    %1019 = vector.broadcast %1018 : f32 to vector<8x128xf32>
    %1020 = arith.mulf %985, %1019 : vector<8x128xf32>
    %1021 = arith.addf %950, %1020 : vector<8x128xf32>
    %c233 = arith.constant 233 : index
    %1022 = memref.load %arg4[%c233] : memref<512xf32, #tpu.memory_space<smem>>
    %1023 = vector.broadcast %1022 : f32 to vector<8x128xf32>
    %1024 = arith.mulf %985, %1023 : vector<8x128xf32>
    %1025 = arith.addf %954, %1024 : vector<8x128xf32>
    %c234 = arith.constant 234 : index
    %1026 = memref.load %arg4[%c234] : memref<512xf32, #tpu.memory_space<smem>>
    %1027 = vector.broadcast %1026 : f32 to vector<8x128xf32>
    %1028 = arith.mulf %985, %1027 : vector<8x128xf32>
    %1029 = arith.addf %958, %1028 : vector<8x128xf32>
    %c235 = arith.constant 235 : index
    %1030 = memref.load %arg4[%c235] : memref<512xf32, #tpu.memory_space<smem>>
    %1031 = vector.broadcast %1030 : f32 to vector<8x128xf32>
    %1032 = arith.mulf %985, %1031 : vector<8x128xf32>
    %1033 = arith.addf %962, %1032 : vector<8x128xf32>
    %c236 = arith.constant 236 : index
    %1034 = memref.load %arg4[%c236] : memref<512xf32, #tpu.memory_space<smem>>
    %1035 = vector.broadcast %1034 : f32 to vector<8x128xf32>
    %1036 = arith.mulf %985, %1035 : vector<8x128xf32>
    %1037 = arith.addf %966, %1036 : vector<8x128xf32>
    %c237 = arith.constant 237 : index
    %1038 = memref.load %arg4[%c237] : memref<512xf32, #tpu.memory_space<smem>>
    %1039 = vector.broadcast %1038 : f32 to vector<8x128xf32>
    %1040 = arith.mulf %985, %1039 : vector<8x128xf32>
    %1041 = arith.addf %970, %1040 : vector<8x128xf32>
    %c238 = arith.constant 238 : index
    %1042 = memref.load %arg4[%c238] : memref<512xf32, #tpu.memory_space<smem>>
    %1043 = vector.broadcast %1042 : f32 to vector<8x128xf32>
    %1044 = arith.mulf %985, %1043 : vector<8x128xf32>
    %1045 = arith.addf %974, %1044 : vector<8x128xf32>
    %c239 = arith.constant 239 : index
    %1046 = memref.load %arg4[%c239] : memref<512xf32, #tpu.memory_space<smem>>
    %1047 = vector.broadcast %1046 : f32 to vector<8x128xf32>
    %1048 = arith.mulf %985, %1047 : vector<8x128xf32>
    %1049 = arith.addf %978, %1048 : vector<8x128xf32>
    %c15_32 = arith.constant 15 : index
    %1050 = memref.load %arg2[%c15_32] : memref<32xf32, #tpu.memory_space<smem>>
    %1051 = vector.broadcast %1050 : f32 to vector<8x128xf32>
    %1052 = arith.mulf %0, %1051 : vector<8x128xf32>
    %c15_33 = arith.constant 15 : index
    %1053 = memref.load %arg3[%c15_33] : memref<32xf32, #tpu.memory_space<smem>>
    %1054 = vector.broadcast %1053 : f32 to vector<8x128xf32>
    %1055 = arith.addf %1052, %1054 : vector<8x128xf32>
    %1056 = math.tanh %1055 : vector<8x128xf32>
    %c240 = arith.constant 240 : index
    %1057 = memref.load %arg4[%c240] : memref<512xf32, #tpu.memory_space<smem>>
    %1058 = vector.broadcast %1057 : f32 to vector<8x128xf32>
    %1059 = arith.mulf %1056, %1058 : vector<8x128xf32>
    %1060 = arith.addf %989, %1059 : vector<8x128xf32>
    %c241 = arith.constant 241 : index
    %1061 = memref.load %arg4[%c241] : memref<512xf32, #tpu.memory_space<smem>>
    %1062 = vector.broadcast %1061 : f32 to vector<8x128xf32>
    %1063 = arith.mulf %1056, %1062 : vector<8x128xf32>
    %1064 = arith.addf %993, %1063 : vector<8x128xf32>
    %c242 = arith.constant 242 : index
    %1065 = memref.load %arg4[%c242] : memref<512xf32, #tpu.memory_space<smem>>
    %1066 = vector.broadcast %1065 : f32 to vector<8x128xf32>
    %1067 = arith.mulf %1056, %1066 : vector<8x128xf32>
    %1068 = arith.addf %997, %1067 : vector<8x128xf32>
    %c243 = arith.constant 243 : index
    %1069 = memref.load %arg4[%c243] : memref<512xf32, #tpu.memory_space<smem>>
    %1070 = vector.broadcast %1069 : f32 to vector<8x128xf32>
    %1071 = arith.mulf %1056, %1070 : vector<8x128xf32>
    %1072 = arith.addf %1001, %1071 : vector<8x128xf32>
    %c244 = arith.constant 244 : index
    %1073 = memref.load %arg4[%c244] : memref<512xf32, #tpu.memory_space<smem>>
    %1074 = vector.broadcast %1073 : f32 to vector<8x128xf32>
    %1075 = arith.mulf %1056, %1074 : vector<8x128xf32>
    %1076 = arith.addf %1005, %1075 : vector<8x128xf32>
    %c245 = arith.constant 245 : index
    %1077 = memref.load %arg4[%c245] : memref<512xf32, #tpu.memory_space<smem>>
    %1078 = vector.broadcast %1077 : f32 to vector<8x128xf32>
    %1079 = arith.mulf %1056, %1078 : vector<8x128xf32>
    %1080 = arith.addf %1009, %1079 : vector<8x128xf32>
    %c246 = arith.constant 246 : index
    %1081 = memref.load %arg4[%c246] : memref<512xf32, #tpu.memory_space<smem>>
    %1082 = vector.broadcast %1081 : f32 to vector<8x128xf32>
    %1083 = arith.mulf %1056, %1082 : vector<8x128xf32>
    %1084 = arith.addf %1013, %1083 : vector<8x128xf32>
    %c247 = arith.constant 247 : index
    %1085 = memref.load %arg4[%c247] : memref<512xf32, #tpu.memory_space<smem>>
    %1086 = vector.broadcast %1085 : f32 to vector<8x128xf32>
    %1087 = arith.mulf %1056, %1086 : vector<8x128xf32>
    %1088 = arith.addf %1017, %1087 : vector<8x128xf32>
    %c248 = arith.constant 248 : index
    %1089 = memref.load %arg4[%c248] : memref<512xf32, #tpu.memory_space<smem>>
    %1090 = vector.broadcast %1089 : f32 to vector<8x128xf32>
    %1091 = arith.mulf %1056, %1090 : vector<8x128xf32>
    %1092 = arith.addf %1021, %1091 : vector<8x128xf32>
    %c249 = arith.constant 249 : index
    %1093 = memref.load %arg4[%c249] : memref<512xf32, #tpu.memory_space<smem>>
    %1094 = vector.broadcast %1093 : f32 to vector<8x128xf32>
    %1095 = arith.mulf %1056, %1094 : vector<8x128xf32>
    %1096 = arith.addf %1025, %1095 : vector<8x128xf32>
    %c250 = arith.constant 250 : index
    %1097 = memref.load %arg4[%c250] : memref<512xf32, #tpu.memory_space<smem>>
    %1098 = vector.broadcast %1097 : f32 to vector<8x128xf32>
    %1099 = arith.mulf %1056, %1098 : vector<8x128xf32>
    %1100 = arith.addf %1029, %1099 : vector<8x128xf32>
    %c251 = arith.constant 251 : index
    %1101 = memref.load %arg4[%c251] : memref<512xf32, #tpu.memory_space<smem>>
    %1102 = vector.broadcast %1101 : f32 to vector<8x128xf32>
    %1103 = arith.mulf %1056, %1102 : vector<8x128xf32>
    %1104 = arith.addf %1033, %1103 : vector<8x128xf32>
    %c252 = arith.constant 252 : index
    %1105 = memref.load %arg4[%c252] : memref<512xf32, #tpu.memory_space<smem>>
    %1106 = vector.broadcast %1105 : f32 to vector<8x128xf32>
    %1107 = arith.mulf %1056, %1106 : vector<8x128xf32>
    %1108 = arith.addf %1037, %1107 : vector<8x128xf32>
    %c253 = arith.constant 253 : index
    %1109 = memref.load %arg4[%c253] : memref<512xf32, #tpu.memory_space<smem>>
    %1110 = vector.broadcast %1109 : f32 to vector<8x128xf32>
    %1111 = arith.mulf %1056, %1110 : vector<8x128xf32>
    %1112 = arith.addf %1041, %1111 : vector<8x128xf32>
    %c254 = arith.constant 254 : index
    %1113 = memref.load %arg4[%c254] : memref<512xf32, #tpu.memory_space<smem>>
    %1114 = vector.broadcast %1113 : f32 to vector<8x128xf32>
    %1115 = arith.mulf %1056, %1114 : vector<8x128xf32>
    %1116 = arith.addf %1045, %1115 : vector<8x128xf32>
    %c255 = arith.constant 255 : index
    %1117 = memref.load %arg4[%c255] : memref<512xf32, #tpu.memory_space<smem>>
    %1118 = vector.broadcast %1117 : f32 to vector<8x128xf32>
    %1119 = arith.mulf %1056, %1118 : vector<8x128xf32>
    %1120 = arith.addf %1049, %1119 : vector<8x128xf32>
    %c16_34 = arith.constant 16 : index
    %1121 = memref.load %arg2[%c16_34] : memref<32xf32, #tpu.memory_space<smem>>
    %1122 = vector.broadcast %1121 : f32 to vector<8x128xf32>
    %1123 = arith.mulf %0, %1122 : vector<8x128xf32>
    %c16_35 = arith.constant 16 : index
    %1124 = memref.load %arg3[%c16_35] : memref<32xf32, #tpu.memory_space<smem>>
    %1125 = vector.broadcast %1124 : f32 to vector<8x128xf32>
    %1126 = arith.addf %1123, %1125 : vector<8x128xf32>
    %1127 = math.tanh %1126 : vector<8x128xf32>
    %c256 = arith.constant 256 : index
    %1128 = memref.load %arg4[%c256] : memref<512xf32, #tpu.memory_space<smem>>
    %1129 = vector.broadcast %1128 : f32 to vector<8x128xf32>
    %1130 = arith.mulf %1127, %1129 : vector<8x128xf32>
    %1131 = arith.addf %1060, %1130 : vector<8x128xf32>
    %c257 = arith.constant 257 : index
    %1132 = memref.load %arg4[%c257] : memref<512xf32, #tpu.memory_space<smem>>
    %1133 = vector.broadcast %1132 : f32 to vector<8x128xf32>
    %1134 = arith.mulf %1127, %1133 : vector<8x128xf32>
    %1135 = arith.addf %1064, %1134 : vector<8x128xf32>
    %c258 = arith.constant 258 : index
    %1136 = memref.load %arg4[%c258] : memref<512xf32, #tpu.memory_space<smem>>
    %1137 = vector.broadcast %1136 : f32 to vector<8x128xf32>
    %1138 = arith.mulf %1127, %1137 : vector<8x128xf32>
    %1139 = arith.addf %1068, %1138 : vector<8x128xf32>
    %c259 = arith.constant 259 : index
    %1140 = memref.load %arg4[%c259] : memref<512xf32, #tpu.memory_space<smem>>
    %1141 = vector.broadcast %1140 : f32 to vector<8x128xf32>
    %1142 = arith.mulf %1127, %1141 : vector<8x128xf32>
    %1143 = arith.addf %1072, %1142 : vector<8x128xf32>
    %c260 = arith.constant 260 : index
    %1144 = memref.load %arg4[%c260] : memref<512xf32, #tpu.memory_space<smem>>
    %1145 = vector.broadcast %1144 : f32 to vector<8x128xf32>
    %1146 = arith.mulf %1127, %1145 : vector<8x128xf32>
    %1147 = arith.addf %1076, %1146 : vector<8x128xf32>
    %c261 = arith.constant 261 : index
    %1148 = memref.load %arg4[%c261] : memref<512xf32, #tpu.memory_space<smem>>
    %1149 = vector.broadcast %1148 : f32 to vector<8x128xf32>
    %1150 = arith.mulf %1127, %1149 : vector<8x128xf32>
    %1151 = arith.addf %1080, %1150 : vector<8x128xf32>
    %c262 = arith.constant 262 : index
    %1152 = memref.load %arg4[%c262] : memref<512xf32, #tpu.memory_space<smem>>
    %1153 = vector.broadcast %1152 : f32 to vector<8x128xf32>
    %1154 = arith.mulf %1127, %1153 : vector<8x128xf32>
    %1155 = arith.addf %1084, %1154 : vector<8x128xf32>
    %c263 = arith.constant 263 : index
    %1156 = memref.load %arg4[%c263] : memref<512xf32, #tpu.memory_space<smem>>
    %1157 = vector.broadcast %1156 : f32 to vector<8x128xf32>
    %1158 = arith.mulf %1127, %1157 : vector<8x128xf32>
    %1159 = arith.addf %1088, %1158 : vector<8x128xf32>
    %c264 = arith.constant 264 : index
    %1160 = memref.load %arg4[%c264] : memref<512xf32, #tpu.memory_space<smem>>
    %1161 = vector.broadcast %1160 : f32 to vector<8x128xf32>
    %1162 = arith.mulf %1127, %1161 : vector<8x128xf32>
    %1163 = arith.addf %1092, %1162 : vector<8x128xf32>
    %c265 = arith.constant 265 : index
    %1164 = memref.load %arg4[%c265] : memref<512xf32, #tpu.memory_space<smem>>
    %1165 = vector.broadcast %1164 : f32 to vector<8x128xf32>
    %1166 = arith.mulf %1127, %1165 : vector<8x128xf32>
    %1167 = arith.addf %1096, %1166 : vector<8x128xf32>
    %c266 = arith.constant 266 : index
    %1168 = memref.load %arg4[%c266] : memref<512xf32, #tpu.memory_space<smem>>
    %1169 = vector.broadcast %1168 : f32 to vector<8x128xf32>
    %1170 = arith.mulf %1127, %1169 : vector<8x128xf32>
    %1171 = arith.addf %1100, %1170 : vector<8x128xf32>
    %c267 = arith.constant 267 : index
    %1172 = memref.load %arg4[%c267] : memref<512xf32, #tpu.memory_space<smem>>
    %1173 = vector.broadcast %1172 : f32 to vector<8x128xf32>
    %1174 = arith.mulf %1127, %1173 : vector<8x128xf32>
    %1175 = arith.addf %1104, %1174 : vector<8x128xf32>
    %c268 = arith.constant 268 : index
    %1176 = memref.load %arg4[%c268] : memref<512xf32, #tpu.memory_space<smem>>
    %1177 = vector.broadcast %1176 : f32 to vector<8x128xf32>
    %1178 = arith.mulf %1127, %1177 : vector<8x128xf32>
    %1179 = arith.addf %1108, %1178 : vector<8x128xf32>
    %c269 = arith.constant 269 : index
    %1180 = memref.load %arg4[%c269] : memref<512xf32, #tpu.memory_space<smem>>
    %1181 = vector.broadcast %1180 : f32 to vector<8x128xf32>
    %1182 = arith.mulf %1127, %1181 : vector<8x128xf32>
    %1183 = arith.addf %1112, %1182 : vector<8x128xf32>
    %c270 = arith.constant 270 : index
    %1184 = memref.load %arg4[%c270] : memref<512xf32, #tpu.memory_space<smem>>
    %1185 = vector.broadcast %1184 : f32 to vector<8x128xf32>
    %1186 = arith.mulf %1127, %1185 : vector<8x128xf32>
    %1187 = arith.addf %1116, %1186 : vector<8x128xf32>
    %c271 = arith.constant 271 : index
    %1188 = memref.load %arg4[%c271] : memref<512xf32, #tpu.memory_space<smem>>
    %1189 = vector.broadcast %1188 : f32 to vector<8x128xf32>
    %1190 = arith.mulf %1127, %1189 : vector<8x128xf32>
    %1191 = arith.addf %1120, %1190 : vector<8x128xf32>
    %c17_36 = arith.constant 17 : index
    %1192 = memref.load %arg2[%c17_36] : memref<32xf32, #tpu.memory_space<smem>>
    %1193 = vector.broadcast %1192 : f32 to vector<8x128xf32>
    %1194 = arith.mulf %0, %1193 : vector<8x128xf32>
    %c17_37 = arith.constant 17 : index
    %1195 = memref.load %arg3[%c17_37] : memref<32xf32, #tpu.memory_space<smem>>
    %1196 = vector.broadcast %1195 : f32 to vector<8x128xf32>
    %1197 = arith.addf %1194, %1196 : vector<8x128xf32>
    %1198 = math.tanh %1197 : vector<8x128xf32>
    %c272 = arith.constant 272 : index
    %1199 = memref.load %arg4[%c272] : memref<512xf32, #tpu.memory_space<smem>>
    %1200 = vector.broadcast %1199 : f32 to vector<8x128xf32>
    %1201 = arith.mulf %1198, %1200 : vector<8x128xf32>
    %1202 = arith.addf %1131, %1201 : vector<8x128xf32>
    %c273 = arith.constant 273 : index
    %1203 = memref.load %arg4[%c273] : memref<512xf32, #tpu.memory_space<smem>>
    %1204 = vector.broadcast %1203 : f32 to vector<8x128xf32>
    %1205 = arith.mulf %1198, %1204 : vector<8x128xf32>
    %1206 = arith.addf %1135, %1205 : vector<8x128xf32>
    %c274 = arith.constant 274 : index
    %1207 = memref.load %arg4[%c274] : memref<512xf32, #tpu.memory_space<smem>>
    %1208 = vector.broadcast %1207 : f32 to vector<8x128xf32>
    %1209 = arith.mulf %1198, %1208 : vector<8x128xf32>
    %1210 = arith.addf %1139, %1209 : vector<8x128xf32>
    %c275 = arith.constant 275 : index
    %1211 = memref.load %arg4[%c275] : memref<512xf32, #tpu.memory_space<smem>>
    %1212 = vector.broadcast %1211 : f32 to vector<8x128xf32>
    %1213 = arith.mulf %1198, %1212 : vector<8x128xf32>
    %1214 = arith.addf %1143, %1213 : vector<8x128xf32>
    %c276 = arith.constant 276 : index
    %1215 = memref.load %arg4[%c276] : memref<512xf32, #tpu.memory_space<smem>>
    %1216 = vector.broadcast %1215 : f32 to vector<8x128xf32>
    %1217 = arith.mulf %1198, %1216 : vector<8x128xf32>
    %1218 = arith.addf %1147, %1217 : vector<8x128xf32>
    %c277 = arith.constant 277 : index
    %1219 = memref.load %arg4[%c277] : memref<512xf32, #tpu.memory_space<smem>>
    %1220 = vector.broadcast %1219 : f32 to vector<8x128xf32>
    %1221 = arith.mulf %1198, %1220 : vector<8x128xf32>
    %1222 = arith.addf %1151, %1221 : vector<8x128xf32>
    %c278 = arith.constant 278 : index
    %1223 = memref.load %arg4[%c278] : memref<512xf32, #tpu.memory_space<smem>>
    %1224 = vector.broadcast %1223 : f32 to vector<8x128xf32>
    %1225 = arith.mulf %1198, %1224 : vector<8x128xf32>
    %1226 = arith.addf %1155, %1225 : vector<8x128xf32>
    %c279 = arith.constant 279 : index
    %1227 = memref.load %arg4[%c279] : memref<512xf32, #tpu.memory_space<smem>>
    %1228 = vector.broadcast %1227 : f32 to vector<8x128xf32>
    %1229 = arith.mulf %1198, %1228 : vector<8x128xf32>
    %1230 = arith.addf %1159, %1229 : vector<8x128xf32>
    %c280 = arith.constant 280 : index
    %1231 = memref.load %arg4[%c280] : memref<512xf32, #tpu.memory_space<smem>>
    %1232 = vector.broadcast %1231 : f32 to vector<8x128xf32>
    %1233 = arith.mulf %1198, %1232 : vector<8x128xf32>
    %1234 = arith.addf %1163, %1233 : vector<8x128xf32>
    %c281 = arith.constant 281 : index
    %1235 = memref.load %arg4[%c281] : memref<512xf32, #tpu.memory_space<smem>>
    %1236 = vector.broadcast %1235 : f32 to vector<8x128xf32>
    %1237 = arith.mulf %1198, %1236 : vector<8x128xf32>
    %1238 = arith.addf %1167, %1237 : vector<8x128xf32>
    %c282 = arith.constant 282 : index
    %1239 = memref.load %arg4[%c282] : memref<512xf32, #tpu.memory_space<smem>>
    %1240 = vector.broadcast %1239 : f32 to vector<8x128xf32>
    %1241 = arith.mulf %1198, %1240 : vector<8x128xf32>
    %1242 = arith.addf %1171, %1241 : vector<8x128xf32>
    %c283 = arith.constant 283 : index
    %1243 = memref.load %arg4[%c283] : memref<512xf32, #tpu.memory_space<smem>>
    %1244 = vector.broadcast %1243 : f32 to vector<8x128xf32>
    %1245 = arith.mulf %1198, %1244 : vector<8x128xf32>
    %1246 = arith.addf %1175, %1245 : vector<8x128xf32>
    %c284 = arith.constant 284 : index
    %1247 = memref.load %arg4[%c284] : memref<512xf32, #tpu.memory_space<smem>>
    %1248 = vector.broadcast %1247 : f32 to vector<8x128xf32>
    %1249 = arith.mulf %1198, %1248 : vector<8x128xf32>
    %1250 = arith.addf %1179, %1249 : vector<8x128xf32>
    %c285 = arith.constant 285 : index
    %1251 = memref.load %arg4[%c285] : memref<512xf32, #tpu.memory_space<smem>>
    %1252 = vector.broadcast %1251 : f32 to vector<8x128xf32>
    %1253 = arith.mulf %1198, %1252 : vector<8x128xf32>
    %1254 = arith.addf %1183, %1253 : vector<8x128xf32>
    %c286 = arith.constant 286 : index
    %1255 = memref.load %arg4[%c286] : memref<512xf32, #tpu.memory_space<smem>>
    %1256 = vector.broadcast %1255 : f32 to vector<8x128xf32>
    %1257 = arith.mulf %1198, %1256 : vector<8x128xf32>
    %1258 = arith.addf %1187, %1257 : vector<8x128xf32>
    %c287 = arith.constant 287 : index
    %1259 = memref.load %arg4[%c287] : memref<512xf32, #tpu.memory_space<smem>>
    %1260 = vector.broadcast %1259 : f32 to vector<8x128xf32>
    %1261 = arith.mulf %1198, %1260 : vector<8x128xf32>
    %1262 = arith.addf %1191, %1261 : vector<8x128xf32>
    %c18_38 = arith.constant 18 : index
    %1263 = memref.load %arg2[%c18_38] : memref<32xf32, #tpu.memory_space<smem>>
    %1264 = vector.broadcast %1263 : f32 to vector<8x128xf32>
    %1265 = arith.mulf %0, %1264 : vector<8x128xf32>
    %c18_39 = arith.constant 18 : index
    %1266 = memref.load %arg3[%c18_39] : memref<32xf32, #tpu.memory_space<smem>>
    %1267 = vector.broadcast %1266 : f32 to vector<8x128xf32>
    %1268 = arith.addf %1265, %1267 : vector<8x128xf32>
    %1269 = math.tanh %1268 : vector<8x128xf32>
    %c288 = arith.constant 288 : index
    %1270 = memref.load %arg4[%c288] : memref<512xf32, #tpu.memory_space<smem>>
    %1271 = vector.broadcast %1270 : f32 to vector<8x128xf32>
    %1272 = arith.mulf %1269, %1271 : vector<8x128xf32>
    %1273 = arith.addf %1202, %1272 : vector<8x128xf32>
    %c289 = arith.constant 289 : index
    %1274 = memref.load %arg4[%c289] : memref<512xf32, #tpu.memory_space<smem>>
    %1275 = vector.broadcast %1274 : f32 to vector<8x128xf32>
    %1276 = arith.mulf %1269, %1275 : vector<8x128xf32>
    %1277 = arith.addf %1206, %1276 : vector<8x128xf32>
    %c290 = arith.constant 290 : index
    %1278 = memref.load %arg4[%c290] : memref<512xf32, #tpu.memory_space<smem>>
    %1279 = vector.broadcast %1278 : f32 to vector<8x128xf32>
    %1280 = arith.mulf %1269, %1279 : vector<8x128xf32>
    %1281 = arith.addf %1210, %1280 : vector<8x128xf32>
    %c291 = arith.constant 291 : index
    %1282 = memref.load %arg4[%c291] : memref<512xf32, #tpu.memory_space<smem>>
    %1283 = vector.broadcast %1282 : f32 to vector<8x128xf32>
    %1284 = arith.mulf %1269, %1283 : vector<8x128xf32>
    %1285 = arith.addf %1214, %1284 : vector<8x128xf32>
    %c292 = arith.constant 292 : index
    %1286 = memref.load %arg4[%c292] : memref<512xf32, #tpu.memory_space<smem>>
    %1287 = vector.broadcast %1286 : f32 to vector<8x128xf32>
    %1288 = arith.mulf %1269, %1287 : vector<8x128xf32>
    %1289 = arith.addf %1218, %1288 : vector<8x128xf32>
    %c293 = arith.constant 293 : index
    %1290 = memref.load %arg4[%c293] : memref<512xf32, #tpu.memory_space<smem>>
    %1291 = vector.broadcast %1290 : f32 to vector<8x128xf32>
    %1292 = arith.mulf %1269, %1291 : vector<8x128xf32>
    %1293 = arith.addf %1222, %1292 : vector<8x128xf32>
    %c294 = arith.constant 294 : index
    %1294 = memref.load %arg4[%c294] : memref<512xf32, #tpu.memory_space<smem>>
    %1295 = vector.broadcast %1294 : f32 to vector<8x128xf32>
    %1296 = arith.mulf %1269, %1295 : vector<8x128xf32>
    %1297 = arith.addf %1226, %1296 : vector<8x128xf32>
    %c295 = arith.constant 295 : index
    %1298 = memref.load %arg4[%c295] : memref<512xf32, #tpu.memory_space<smem>>
    %1299 = vector.broadcast %1298 : f32 to vector<8x128xf32>
    %1300 = arith.mulf %1269, %1299 : vector<8x128xf32>
    %1301 = arith.addf %1230, %1300 : vector<8x128xf32>
    %c296 = arith.constant 296 : index
    %1302 = memref.load %arg4[%c296] : memref<512xf32, #tpu.memory_space<smem>>
    %1303 = vector.broadcast %1302 : f32 to vector<8x128xf32>
    %1304 = arith.mulf %1269, %1303 : vector<8x128xf32>
    %1305 = arith.addf %1234, %1304 : vector<8x128xf32>
    %c297 = arith.constant 297 : index
    %1306 = memref.load %arg4[%c297] : memref<512xf32, #tpu.memory_space<smem>>
    %1307 = vector.broadcast %1306 : f32 to vector<8x128xf32>
    %1308 = arith.mulf %1269, %1307 : vector<8x128xf32>
    %1309 = arith.addf %1238, %1308 : vector<8x128xf32>
    %c298 = arith.constant 298 : index
    %1310 = memref.load %arg4[%c298] : memref<512xf32, #tpu.memory_space<smem>>
    %1311 = vector.broadcast %1310 : f32 to vector<8x128xf32>
    %1312 = arith.mulf %1269, %1311 : vector<8x128xf32>
    %1313 = arith.addf %1242, %1312 : vector<8x128xf32>
    %c299 = arith.constant 299 : index
    %1314 = memref.load %arg4[%c299] : memref<512xf32, #tpu.memory_space<smem>>
    %1315 = vector.broadcast %1314 : f32 to vector<8x128xf32>
    %1316 = arith.mulf %1269, %1315 : vector<8x128xf32>
    %1317 = arith.addf %1246, %1316 : vector<8x128xf32>
    %c300 = arith.constant 300 : index
    %1318 = memref.load %arg4[%c300] : memref<512xf32, #tpu.memory_space<smem>>
    %1319 = vector.broadcast %1318 : f32 to vector<8x128xf32>
    %1320 = arith.mulf %1269, %1319 : vector<8x128xf32>
    %1321 = arith.addf %1250, %1320 : vector<8x128xf32>
    %c301 = arith.constant 301 : index
    %1322 = memref.load %arg4[%c301] : memref<512xf32, #tpu.memory_space<smem>>
    %1323 = vector.broadcast %1322 : f32 to vector<8x128xf32>
    %1324 = arith.mulf %1269, %1323 : vector<8x128xf32>
    %1325 = arith.addf %1254, %1324 : vector<8x128xf32>
    %c302 = arith.constant 302 : index
    %1326 = memref.load %arg4[%c302] : memref<512xf32, #tpu.memory_space<smem>>
    %1327 = vector.broadcast %1326 : f32 to vector<8x128xf32>
    %1328 = arith.mulf %1269, %1327 : vector<8x128xf32>
    %1329 = arith.addf %1258, %1328 : vector<8x128xf32>
    %c303 = arith.constant 303 : index
    %1330 = memref.load %arg4[%c303] : memref<512xf32, #tpu.memory_space<smem>>
    %1331 = vector.broadcast %1330 : f32 to vector<8x128xf32>
    %1332 = arith.mulf %1269, %1331 : vector<8x128xf32>
    %1333 = arith.addf %1262, %1332 : vector<8x128xf32>
    %c19_40 = arith.constant 19 : index
    %1334 = memref.load %arg2[%c19_40] : memref<32xf32, #tpu.memory_space<smem>>
    %1335 = vector.broadcast %1334 : f32 to vector<8x128xf32>
    %1336 = arith.mulf %0, %1335 : vector<8x128xf32>
    %c19_41 = arith.constant 19 : index
    %1337 = memref.load %arg3[%c19_41] : memref<32xf32, #tpu.memory_space<smem>>
    %1338 = vector.broadcast %1337 : f32 to vector<8x128xf32>
    %1339 = arith.addf %1336, %1338 : vector<8x128xf32>
    %1340 = math.tanh %1339 : vector<8x128xf32>
    %c304 = arith.constant 304 : index
    %1341 = memref.load %arg4[%c304] : memref<512xf32, #tpu.memory_space<smem>>
    %1342 = vector.broadcast %1341 : f32 to vector<8x128xf32>
    %1343 = arith.mulf %1340, %1342 : vector<8x128xf32>
    %1344 = arith.addf %1273, %1343 : vector<8x128xf32>
    %c305 = arith.constant 305 : index
    %1345 = memref.load %arg4[%c305] : memref<512xf32, #tpu.memory_space<smem>>
    %1346 = vector.broadcast %1345 : f32 to vector<8x128xf32>
    %1347 = arith.mulf %1340, %1346 : vector<8x128xf32>
    %1348 = arith.addf %1277, %1347 : vector<8x128xf32>
    %c306 = arith.constant 306 : index
    %1349 = memref.load %arg4[%c306] : memref<512xf32, #tpu.memory_space<smem>>
    %1350 = vector.broadcast %1349 : f32 to vector<8x128xf32>
    %1351 = arith.mulf %1340, %1350 : vector<8x128xf32>
    %1352 = arith.addf %1281, %1351 : vector<8x128xf32>
    %c307 = arith.constant 307 : index
    %1353 = memref.load %arg4[%c307] : memref<512xf32, #tpu.memory_space<smem>>
    %1354 = vector.broadcast %1353 : f32 to vector<8x128xf32>
    %1355 = arith.mulf %1340, %1354 : vector<8x128xf32>
    %1356 = arith.addf %1285, %1355 : vector<8x128xf32>
    %c308 = arith.constant 308 : index
    %1357 = memref.load %arg4[%c308] : memref<512xf32, #tpu.memory_space<smem>>
    %1358 = vector.broadcast %1357 : f32 to vector<8x128xf32>
    %1359 = arith.mulf %1340, %1358 : vector<8x128xf32>
    %1360 = arith.addf %1289, %1359 : vector<8x128xf32>
    %c309 = arith.constant 309 : index
    %1361 = memref.load %arg4[%c309] : memref<512xf32, #tpu.memory_space<smem>>
    %1362 = vector.broadcast %1361 : f32 to vector<8x128xf32>
    %1363 = arith.mulf %1340, %1362 : vector<8x128xf32>
    %1364 = arith.addf %1293, %1363 : vector<8x128xf32>
    %c310 = arith.constant 310 : index
    %1365 = memref.load %arg4[%c310] : memref<512xf32, #tpu.memory_space<smem>>
    %1366 = vector.broadcast %1365 : f32 to vector<8x128xf32>
    %1367 = arith.mulf %1340, %1366 : vector<8x128xf32>
    %1368 = arith.addf %1297, %1367 : vector<8x128xf32>
    %c311 = arith.constant 311 : index
    %1369 = memref.load %arg4[%c311] : memref<512xf32, #tpu.memory_space<smem>>
    %1370 = vector.broadcast %1369 : f32 to vector<8x128xf32>
    %1371 = arith.mulf %1340, %1370 : vector<8x128xf32>
    %1372 = arith.addf %1301, %1371 : vector<8x128xf32>
    %c312 = arith.constant 312 : index
    %1373 = memref.load %arg4[%c312] : memref<512xf32, #tpu.memory_space<smem>>
    %1374 = vector.broadcast %1373 : f32 to vector<8x128xf32>
    %1375 = arith.mulf %1340, %1374 : vector<8x128xf32>
    %1376 = arith.addf %1305, %1375 : vector<8x128xf32>
    %c313 = arith.constant 313 : index
    %1377 = memref.load %arg4[%c313] : memref<512xf32, #tpu.memory_space<smem>>
    %1378 = vector.broadcast %1377 : f32 to vector<8x128xf32>
    %1379 = arith.mulf %1340, %1378 : vector<8x128xf32>
    %1380 = arith.addf %1309, %1379 : vector<8x128xf32>
    %c314 = arith.constant 314 : index
    %1381 = memref.load %arg4[%c314] : memref<512xf32, #tpu.memory_space<smem>>
    %1382 = vector.broadcast %1381 : f32 to vector<8x128xf32>
    %1383 = arith.mulf %1340, %1382 : vector<8x128xf32>
    %1384 = arith.addf %1313, %1383 : vector<8x128xf32>
    %c315 = arith.constant 315 : index
    %1385 = memref.load %arg4[%c315] : memref<512xf32, #tpu.memory_space<smem>>
    %1386 = vector.broadcast %1385 : f32 to vector<8x128xf32>
    %1387 = arith.mulf %1340, %1386 : vector<8x128xf32>
    %1388 = arith.addf %1317, %1387 : vector<8x128xf32>
    %c316 = arith.constant 316 : index
    %1389 = memref.load %arg4[%c316] : memref<512xf32, #tpu.memory_space<smem>>
    %1390 = vector.broadcast %1389 : f32 to vector<8x128xf32>
    %1391 = arith.mulf %1340, %1390 : vector<8x128xf32>
    %1392 = arith.addf %1321, %1391 : vector<8x128xf32>
    %c317 = arith.constant 317 : index
    %1393 = memref.load %arg4[%c317] : memref<512xf32, #tpu.memory_space<smem>>
    %1394 = vector.broadcast %1393 : f32 to vector<8x128xf32>
    %1395 = arith.mulf %1340, %1394 : vector<8x128xf32>
    %1396 = arith.addf %1325, %1395 : vector<8x128xf32>
    %c318 = arith.constant 318 : index
    %1397 = memref.load %arg4[%c318] : memref<512xf32, #tpu.memory_space<smem>>
    %1398 = vector.broadcast %1397 : f32 to vector<8x128xf32>
    %1399 = arith.mulf %1340, %1398 : vector<8x128xf32>
    %1400 = arith.addf %1329, %1399 : vector<8x128xf32>
    %c319 = arith.constant 319 : index
    %1401 = memref.load %arg4[%c319] : memref<512xf32, #tpu.memory_space<smem>>
    %1402 = vector.broadcast %1401 : f32 to vector<8x128xf32>
    %1403 = arith.mulf %1340, %1402 : vector<8x128xf32>
    %1404 = arith.addf %1333, %1403 : vector<8x128xf32>
    %c20_42 = arith.constant 20 : index
    %1405 = memref.load %arg2[%c20_42] : memref<32xf32, #tpu.memory_space<smem>>
    %1406 = vector.broadcast %1405 : f32 to vector<8x128xf32>
    %1407 = arith.mulf %0, %1406 : vector<8x128xf32>
    %c20_43 = arith.constant 20 : index
    %1408 = memref.load %arg3[%c20_43] : memref<32xf32, #tpu.memory_space<smem>>
    %1409 = vector.broadcast %1408 : f32 to vector<8x128xf32>
    %1410 = arith.addf %1407, %1409 : vector<8x128xf32>
    %1411 = math.tanh %1410 : vector<8x128xf32>
    %c320 = arith.constant 320 : index
    %1412 = memref.load %arg4[%c320] : memref<512xf32, #tpu.memory_space<smem>>
    %1413 = vector.broadcast %1412 : f32 to vector<8x128xf32>
    %1414 = arith.mulf %1411, %1413 : vector<8x128xf32>
    %1415 = arith.addf %1344, %1414 : vector<8x128xf32>
    %c321 = arith.constant 321 : index
    %1416 = memref.load %arg4[%c321] : memref<512xf32, #tpu.memory_space<smem>>
    %1417 = vector.broadcast %1416 : f32 to vector<8x128xf32>
    %1418 = arith.mulf %1411, %1417 : vector<8x128xf32>
    %1419 = arith.addf %1348, %1418 : vector<8x128xf32>
    %c322 = arith.constant 322 : index
    %1420 = memref.load %arg4[%c322] : memref<512xf32, #tpu.memory_space<smem>>
    %1421 = vector.broadcast %1420 : f32 to vector<8x128xf32>
    %1422 = arith.mulf %1411, %1421 : vector<8x128xf32>
    %1423 = arith.addf %1352, %1422 : vector<8x128xf32>
    %c323 = arith.constant 323 : index
    %1424 = memref.load %arg4[%c323] : memref<512xf32, #tpu.memory_space<smem>>
    %1425 = vector.broadcast %1424 : f32 to vector<8x128xf32>
    %1426 = arith.mulf %1411, %1425 : vector<8x128xf32>
    %1427 = arith.addf %1356, %1426 : vector<8x128xf32>
    %c324 = arith.constant 324 : index
    %1428 = memref.load %arg4[%c324] : memref<512xf32, #tpu.memory_space<smem>>
    %1429 = vector.broadcast %1428 : f32 to vector<8x128xf32>
    %1430 = arith.mulf %1411, %1429 : vector<8x128xf32>
    %1431 = arith.addf %1360, %1430 : vector<8x128xf32>
    %c325 = arith.constant 325 : index
    %1432 = memref.load %arg4[%c325] : memref<512xf32, #tpu.memory_space<smem>>
    %1433 = vector.broadcast %1432 : f32 to vector<8x128xf32>
    %1434 = arith.mulf %1411, %1433 : vector<8x128xf32>
    %1435 = arith.addf %1364, %1434 : vector<8x128xf32>
    %c326 = arith.constant 326 : index
    %1436 = memref.load %arg4[%c326] : memref<512xf32, #tpu.memory_space<smem>>
    %1437 = vector.broadcast %1436 : f32 to vector<8x128xf32>
    %1438 = arith.mulf %1411, %1437 : vector<8x128xf32>
    %1439 = arith.addf %1368, %1438 : vector<8x128xf32>
    %c327 = arith.constant 327 : index
    %1440 = memref.load %arg4[%c327] : memref<512xf32, #tpu.memory_space<smem>>
    %1441 = vector.broadcast %1440 : f32 to vector<8x128xf32>
    %1442 = arith.mulf %1411, %1441 : vector<8x128xf32>
    %1443 = arith.addf %1372, %1442 : vector<8x128xf32>
    %c328 = arith.constant 328 : index
    %1444 = memref.load %arg4[%c328] : memref<512xf32, #tpu.memory_space<smem>>
    %1445 = vector.broadcast %1444 : f32 to vector<8x128xf32>
    %1446 = arith.mulf %1411, %1445 : vector<8x128xf32>
    %1447 = arith.addf %1376, %1446 : vector<8x128xf32>
    %c329 = arith.constant 329 : index
    %1448 = memref.load %arg4[%c329] : memref<512xf32, #tpu.memory_space<smem>>
    %1449 = vector.broadcast %1448 : f32 to vector<8x128xf32>
    %1450 = arith.mulf %1411, %1449 : vector<8x128xf32>
    %1451 = arith.addf %1380, %1450 : vector<8x128xf32>
    %c330 = arith.constant 330 : index
    %1452 = memref.load %arg4[%c330] : memref<512xf32, #tpu.memory_space<smem>>
    %1453 = vector.broadcast %1452 : f32 to vector<8x128xf32>
    %1454 = arith.mulf %1411, %1453 : vector<8x128xf32>
    %1455 = arith.addf %1384, %1454 : vector<8x128xf32>
    %c331 = arith.constant 331 : index
    %1456 = memref.load %arg4[%c331] : memref<512xf32, #tpu.memory_space<smem>>
    %1457 = vector.broadcast %1456 : f32 to vector<8x128xf32>
    %1458 = arith.mulf %1411, %1457 : vector<8x128xf32>
    %1459 = arith.addf %1388, %1458 : vector<8x128xf32>
    %c332 = arith.constant 332 : index
    %1460 = memref.load %arg4[%c332] : memref<512xf32, #tpu.memory_space<smem>>
    %1461 = vector.broadcast %1460 : f32 to vector<8x128xf32>
    %1462 = arith.mulf %1411, %1461 : vector<8x128xf32>
    %1463 = arith.addf %1392, %1462 : vector<8x128xf32>
    %c333 = arith.constant 333 : index
    %1464 = memref.load %arg4[%c333] : memref<512xf32, #tpu.memory_space<smem>>
    %1465 = vector.broadcast %1464 : f32 to vector<8x128xf32>
    %1466 = arith.mulf %1411, %1465 : vector<8x128xf32>
    %1467 = arith.addf %1396, %1466 : vector<8x128xf32>
    %c334 = arith.constant 334 : index
    %1468 = memref.load %arg4[%c334] : memref<512xf32, #tpu.memory_space<smem>>
    %1469 = vector.broadcast %1468 : f32 to vector<8x128xf32>
    %1470 = arith.mulf %1411, %1469 : vector<8x128xf32>
    %1471 = arith.addf %1400, %1470 : vector<8x128xf32>
    %c335 = arith.constant 335 : index
    %1472 = memref.load %arg4[%c335] : memref<512xf32, #tpu.memory_space<smem>>
    %1473 = vector.broadcast %1472 : f32 to vector<8x128xf32>
    %1474 = arith.mulf %1411, %1473 : vector<8x128xf32>
    %1475 = arith.addf %1404, %1474 : vector<8x128xf32>
    %c21_44 = arith.constant 21 : index
    %1476 = memref.load %arg2[%c21_44] : memref<32xf32, #tpu.memory_space<smem>>
    %1477 = vector.broadcast %1476 : f32 to vector<8x128xf32>
    %1478 = arith.mulf %0, %1477 : vector<8x128xf32>
    %c21_45 = arith.constant 21 : index
    %1479 = memref.load %arg3[%c21_45] : memref<32xf32, #tpu.memory_space<smem>>
    %1480 = vector.broadcast %1479 : f32 to vector<8x128xf32>
    %1481 = arith.addf %1478, %1480 : vector<8x128xf32>
    %1482 = math.tanh %1481 : vector<8x128xf32>
    %c336 = arith.constant 336 : index
    %1483 = memref.load %arg4[%c336] : memref<512xf32, #tpu.memory_space<smem>>
    %1484 = vector.broadcast %1483 : f32 to vector<8x128xf32>
    %1485 = arith.mulf %1482, %1484 : vector<8x128xf32>
    %1486 = arith.addf %1415, %1485 : vector<8x128xf32>
    %c337 = arith.constant 337 : index
    %1487 = memref.load %arg4[%c337] : memref<512xf32, #tpu.memory_space<smem>>
    %1488 = vector.broadcast %1487 : f32 to vector<8x128xf32>
    %1489 = arith.mulf %1482, %1488 : vector<8x128xf32>
    %1490 = arith.addf %1419, %1489 : vector<8x128xf32>
    %c338 = arith.constant 338 : index
    %1491 = memref.load %arg4[%c338] : memref<512xf32, #tpu.memory_space<smem>>
    %1492 = vector.broadcast %1491 : f32 to vector<8x128xf32>
    %1493 = arith.mulf %1482, %1492 : vector<8x128xf32>
    %1494 = arith.addf %1423, %1493 : vector<8x128xf32>
    %c339 = arith.constant 339 : index
    %1495 = memref.load %arg4[%c339] : memref<512xf32, #tpu.memory_space<smem>>
    %1496 = vector.broadcast %1495 : f32 to vector<8x128xf32>
    %1497 = arith.mulf %1482, %1496 : vector<8x128xf32>
    %1498 = arith.addf %1427, %1497 : vector<8x128xf32>
    %c340 = arith.constant 340 : index
    %1499 = memref.load %arg4[%c340] : memref<512xf32, #tpu.memory_space<smem>>
    %1500 = vector.broadcast %1499 : f32 to vector<8x128xf32>
    %1501 = arith.mulf %1482, %1500 : vector<8x128xf32>
    %1502 = arith.addf %1431, %1501 : vector<8x128xf32>
    %c341 = arith.constant 341 : index
    %1503 = memref.load %arg4[%c341] : memref<512xf32, #tpu.memory_space<smem>>
    %1504 = vector.broadcast %1503 : f32 to vector<8x128xf32>
    %1505 = arith.mulf %1482, %1504 : vector<8x128xf32>
    %1506 = arith.addf %1435, %1505 : vector<8x128xf32>
    %c342 = arith.constant 342 : index
    %1507 = memref.load %arg4[%c342] : memref<512xf32, #tpu.memory_space<smem>>
    %1508 = vector.broadcast %1507 : f32 to vector<8x128xf32>
    %1509 = arith.mulf %1482, %1508 : vector<8x128xf32>
    %1510 = arith.addf %1439, %1509 : vector<8x128xf32>
    %c343 = arith.constant 343 : index
    %1511 = memref.load %arg4[%c343] : memref<512xf32, #tpu.memory_space<smem>>
    %1512 = vector.broadcast %1511 : f32 to vector<8x128xf32>
    %1513 = arith.mulf %1482, %1512 : vector<8x128xf32>
    %1514 = arith.addf %1443, %1513 : vector<8x128xf32>
    %c344 = arith.constant 344 : index
    %1515 = memref.load %arg4[%c344] : memref<512xf32, #tpu.memory_space<smem>>
    %1516 = vector.broadcast %1515 : f32 to vector<8x128xf32>
    %1517 = arith.mulf %1482, %1516 : vector<8x128xf32>
    %1518 = arith.addf %1447, %1517 : vector<8x128xf32>
    %c345 = arith.constant 345 : index
    %1519 = memref.load %arg4[%c345] : memref<512xf32, #tpu.memory_space<smem>>
    %1520 = vector.broadcast %1519 : f32 to vector<8x128xf32>
    %1521 = arith.mulf %1482, %1520 : vector<8x128xf32>
    %1522 = arith.addf %1451, %1521 : vector<8x128xf32>
    %c346 = arith.constant 346 : index
    %1523 = memref.load %arg4[%c346] : memref<512xf32, #tpu.memory_space<smem>>
    %1524 = vector.broadcast %1523 : f32 to vector<8x128xf32>
    %1525 = arith.mulf %1482, %1524 : vector<8x128xf32>
    %1526 = arith.addf %1455, %1525 : vector<8x128xf32>
    %c347 = arith.constant 347 : index
    %1527 = memref.load %arg4[%c347] : memref<512xf32, #tpu.memory_space<smem>>
    %1528 = vector.broadcast %1527 : f32 to vector<8x128xf32>
    %1529 = arith.mulf %1482, %1528 : vector<8x128xf32>
    %1530 = arith.addf %1459, %1529 : vector<8x128xf32>
    %c348 = arith.constant 348 : index
    %1531 = memref.load %arg4[%c348] : memref<512xf32, #tpu.memory_space<smem>>
    %1532 = vector.broadcast %1531 : f32 to vector<8x128xf32>
    %1533 = arith.mulf %1482, %1532 : vector<8x128xf32>
    %1534 = arith.addf %1463, %1533 : vector<8x128xf32>
    %c349 = arith.constant 349 : index
    %1535 = memref.load %arg4[%c349] : memref<512xf32, #tpu.memory_space<smem>>
    %1536 = vector.broadcast %1535 : f32 to vector<8x128xf32>
    %1537 = arith.mulf %1482, %1536 : vector<8x128xf32>
    %1538 = arith.addf %1467, %1537 : vector<8x128xf32>
    %c350 = arith.constant 350 : index
    %1539 = memref.load %arg4[%c350] : memref<512xf32, #tpu.memory_space<smem>>
    %1540 = vector.broadcast %1539 : f32 to vector<8x128xf32>
    %1541 = arith.mulf %1482, %1540 : vector<8x128xf32>
    %1542 = arith.addf %1471, %1541 : vector<8x128xf32>
    %c351 = arith.constant 351 : index
    %1543 = memref.load %arg4[%c351] : memref<512xf32, #tpu.memory_space<smem>>
    %1544 = vector.broadcast %1543 : f32 to vector<8x128xf32>
    %1545 = arith.mulf %1482, %1544 : vector<8x128xf32>
    %1546 = arith.addf %1475, %1545 : vector<8x128xf32>
    %c22_46 = arith.constant 22 : index
    %1547 = memref.load %arg2[%c22_46] : memref<32xf32, #tpu.memory_space<smem>>
    %1548 = vector.broadcast %1547 : f32 to vector<8x128xf32>
    %1549 = arith.mulf %0, %1548 : vector<8x128xf32>
    %c22_47 = arith.constant 22 : index
    %1550 = memref.load %arg3[%c22_47] : memref<32xf32, #tpu.memory_space<smem>>
    %1551 = vector.broadcast %1550 : f32 to vector<8x128xf32>
    %1552 = arith.addf %1549, %1551 : vector<8x128xf32>
    %1553 = math.tanh %1552 : vector<8x128xf32>
    %c352 = arith.constant 352 : index
    %1554 = memref.load %arg4[%c352] : memref<512xf32, #tpu.memory_space<smem>>
    %1555 = vector.broadcast %1554 : f32 to vector<8x128xf32>
    %1556 = arith.mulf %1553, %1555 : vector<8x128xf32>
    %1557 = arith.addf %1486, %1556 : vector<8x128xf32>
    %c353 = arith.constant 353 : index
    %1558 = memref.load %arg4[%c353] : memref<512xf32, #tpu.memory_space<smem>>
    %1559 = vector.broadcast %1558 : f32 to vector<8x128xf32>
    %1560 = arith.mulf %1553, %1559 : vector<8x128xf32>
    %1561 = arith.addf %1490, %1560 : vector<8x128xf32>
    %c354 = arith.constant 354 : index
    %1562 = memref.load %arg4[%c354] : memref<512xf32, #tpu.memory_space<smem>>
    %1563 = vector.broadcast %1562 : f32 to vector<8x128xf32>
    %1564 = arith.mulf %1553, %1563 : vector<8x128xf32>
    %1565 = arith.addf %1494, %1564 : vector<8x128xf32>
    %c355 = arith.constant 355 : index
    %1566 = memref.load %arg4[%c355] : memref<512xf32, #tpu.memory_space<smem>>
    %1567 = vector.broadcast %1566 : f32 to vector<8x128xf32>
    %1568 = arith.mulf %1553, %1567 : vector<8x128xf32>
    %1569 = arith.addf %1498, %1568 : vector<8x128xf32>
    %c356 = arith.constant 356 : index
    %1570 = memref.load %arg4[%c356] : memref<512xf32, #tpu.memory_space<smem>>
    %1571 = vector.broadcast %1570 : f32 to vector<8x128xf32>
    %1572 = arith.mulf %1553, %1571 : vector<8x128xf32>
    %1573 = arith.addf %1502, %1572 : vector<8x128xf32>
    %c357 = arith.constant 357 : index
    %1574 = memref.load %arg4[%c357] : memref<512xf32, #tpu.memory_space<smem>>
    %1575 = vector.broadcast %1574 : f32 to vector<8x128xf32>
    %1576 = arith.mulf %1553, %1575 : vector<8x128xf32>
    %1577 = arith.addf %1506, %1576 : vector<8x128xf32>
    %c358 = arith.constant 358 : index
    %1578 = memref.load %arg4[%c358] : memref<512xf32, #tpu.memory_space<smem>>
    %1579 = vector.broadcast %1578 : f32 to vector<8x128xf32>
    %1580 = arith.mulf %1553, %1579 : vector<8x128xf32>
    %1581 = arith.addf %1510, %1580 : vector<8x128xf32>
    %c359 = arith.constant 359 : index
    %1582 = memref.load %arg4[%c359] : memref<512xf32, #tpu.memory_space<smem>>
    %1583 = vector.broadcast %1582 : f32 to vector<8x128xf32>
    %1584 = arith.mulf %1553, %1583 : vector<8x128xf32>
    %1585 = arith.addf %1514, %1584 : vector<8x128xf32>
    %c360 = arith.constant 360 : index
    %1586 = memref.load %arg4[%c360] : memref<512xf32, #tpu.memory_space<smem>>
    %1587 = vector.broadcast %1586 : f32 to vector<8x128xf32>
    %1588 = arith.mulf %1553, %1587 : vector<8x128xf32>
    %1589 = arith.addf %1518, %1588 : vector<8x128xf32>
    %c361 = arith.constant 361 : index
    %1590 = memref.load %arg4[%c361] : memref<512xf32, #tpu.memory_space<smem>>
    %1591 = vector.broadcast %1590 : f32 to vector<8x128xf32>
    %1592 = arith.mulf %1553, %1591 : vector<8x128xf32>
    %1593 = arith.addf %1522, %1592 : vector<8x128xf32>
    %c362 = arith.constant 362 : index
    %1594 = memref.load %arg4[%c362] : memref<512xf32, #tpu.memory_space<smem>>
    %1595 = vector.broadcast %1594 : f32 to vector<8x128xf32>
    %1596 = arith.mulf %1553, %1595 : vector<8x128xf32>
    %1597 = arith.addf %1526, %1596 : vector<8x128xf32>
    %c363 = arith.constant 363 : index
    %1598 = memref.load %arg4[%c363] : memref<512xf32, #tpu.memory_space<smem>>
    %1599 = vector.broadcast %1598 : f32 to vector<8x128xf32>
    %1600 = arith.mulf %1553, %1599 : vector<8x128xf32>
    %1601 = arith.addf %1530, %1600 : vector<8x128xf32>
    %c364 = arith.constant 364 : index
    %1602 = memref.load %arg4[%c364] : memref<512xf32, #tpu.memory_space<smem>>
    %1603 = vector.broadcast %1602 : f32 to vector<8x128xf32>
    %1604 = arith.mulf %1553, %1603 : vector<8x128xf32>
    %1605 = arith.addf %1534, %1604 : vector<8x128xf32>
    %c365 = arith.constant 365 : index
    %1606 = memref.load %arg4[%c365] : memref<512xf32, #tpu.memory_space<smem>>
    %1607 = vector.broadcast %1606 : f32 to vector<8x128xf32>
    %1608 = arith.mulf %1553, %1607 : vector<8x128xf32>
    %1609 = arith.addf %1538, %1608 : vector<8x128xf32>
    %c366 = arith.constant 366 : index
    %1610 = memref.load %arg4[%c366] : memref<512xf32, #tpu.memory_space<smem>>
    %1611 = vector.broadcast %1610 : f32 to vector<8x128xf32>
    %1612 = arith.mulf %1553, %1611 : vector<8x128xf32>
    %1613 = arith.addf %1542, %1612 : vector<8x128xf32>
    %c367 = arith.constant 367 : index
    %1614 = memref.load %arg4[%c367] : memref<512xf32, #tpu.memory_space<smem>>
    %1615 = vector.broadcast %1614 : f32 to vector<8x128xf32>
    %1616 = arith.mulf %1553, %1615 : vector<8x128xf32>
    %1617 = arith.addf %1546, %1616 : vector<8x128xf32>
    %c23_48 = arith.constant 23 : index
    %1618 = memref.load %arg2[%c23_48] : memref<32xf32, #tpu.memory_space<smem>>
    %1619 = vector.broadcast %1618 : f32 to vector<8x128xf32>
    %1620 = arith.mulf %0, %1619 : vector<8x128xf32>
    %c23_49 = arith.constant 23 : index
    %1621 = memref.load %arg3[%c23_49] : memref<32xf32, #tpu.memory_space<smem>>
    %1622 = vector.broadcast %1621 : f32 to vector<8x128xf32>
    %1623 = arith.addf %1620, %1622 : vector<8x128xf32>
    %1624 = math.tanh %1623 : vector<8x128xf32>
    %c368 = arith.constant 368 : index
    %1625 = memref.load %arg4[%c368] : memref<512xf32, #tpu.memory_space<smem>>
    %1626 = vector.broadcast %1625 : f32 to vector<8x128xf32>
    %1627 = arith.mulf %1624, %1626 : vector<8x128xf32>
    %1628 = arith.addf %1557, %1627 : vector<8x128xf32>
    %c369 = arith.constant 369 : index
    %1629 = memref.load %arg4[%c369] : memref<512xf32, #tpu.memory_space<smem>>
    %1630 = vector.broadcast %1629 : f32 to vector<8x128xf32>
    %1631 = arith.mulf %1624, %1630 : vector<8x128xf32>
    %1632 = arith.addf %1561, %1631 : vector<8x128xf32>
    %c370 = arith.constant 370 : index
    %1633 = memref.load %arg4[%c370] : memref<512xf32, #tpu.memory_space<smem>>
    %1634 = vector.broadcast %1633 : f32 to vector<8x128xf32>
    %1635 = arith.mulf %1624, %1634 : vector<8x128xf32>
    %1636 = arith.addf %1565, %1635 : vector<8x128xf32>
    %c371 = arith.constant 371 : index
    %1637 = memref.load %arg4[%c371] : memref<512xf32, #tpu.memory_space<smem>>
    %1638 = vector.broadcast %1637 : f32 to vector<8x128xf32>
    %1639 = arith.mulf %1624, %1638 : vector<8x128xf32>
    %1640 = arith.addf %1569, %1639 : vector<8x128xf32>
    %c372 = arith.constant 372 : index
    %1641 = memref.load %arg4[%c372] : memref<512xf32, #tpu.memory_space<smem>>
    %1642 = vector.broadcast %1641 : f32 to vector<8x128xf32>
    %1643 = arith.mulf %1624, %1642 : vector<8x128xf32>
    %1644 = arith.addf %1573, %1643 : vector<8x128xf32>
    %c373 = arith.constant 373 : index
    %1645 = memref.load %arg4[%c373] : memref<512xf32, #tpu.memory_space<smem>>
    %1646 = vector.broadcast %1645 : f32 to vector<8x128xf32>
    %1647 = arith.mulf %1624, %1646 : vector<8x128xf32>
    %1648 = arith.addf %1577, %1647 : vector<8x128xf32>
    %c374 = arith.constant 374 : index
    %1649 = memref.load %arg4[%c374] : memref<512xf32, #tpu.memory_space<smem>>
    %1650 = vector.broadcast %1649 : f32 to vector<8x128xf32>
    %1651 = arith.mulf %1624, %1650 : vector<8x128xf32>
    %1652 = arith.addf %1581, %1651 : vector<8x128xf32>
    %c375 = arith.constant 375 : index
    %1653 = memref.load %arg4[%c375] : memref<512xf32, #tpu.memory_space<smem>>
    %1654 = vector.broadcast %1653 : f32 to vector<8x128xf32>
    %1655 = arith.mulf %1624, %1654 : vector<8x128xf32>
    %1656 = arith.addf %1585, %1655 : vector<8x128xf32>
    %c376 = arith.constant 376 : index
    %1657 = memref.load %arg4[%c376] : memref<512xf32, #tpu.memory_space<smem>>
    %1658 = vector.broadcast %1657 : f32 to vector<8x128xf32>
    %1659 = arith.mulf %1624, %1658 : vector<8x128xf32>
    %1660 = arith.addf %1589, %1659 : vector<8x128xf32>
    %c377 = arith.constant 377 : index
    %1661 = memref.load %arg4[%c377] : memref<512xf32, #tpu.memory_space<smem>>
    %1662 = vector.broadcast %1661 : f32 to vector<8x128xf32>
    %1663 = arith.mulf %1624, %1662 : vector<8x128xf32>
    %1664 = arith.addf %1593, %1663 : vector<8x128xf32>
    %c378 = arith.constant 378 : index
    %1665 = memref.load %arg4[%c378] : memref<512xf32, #tpu.memory_space<smem>>
    %1666 = vector.broadcast %1665 : f32 to vector<8x128xf32>
    %1667 = arith.mulf %1624, %1666 : vector<8x128xf32>
    %1668 = arith.addf %1597, %1667 : vector<8x128xf32>
    %c379 = arith.constant 379 : index
    %1669 = memref.load %arg4[%c379] : memref<512xf32, #tpu.memory_space<smem>>
    %1670 = vector.broadcast %1669 : f32 to vector<8x128xf32>
    %1671 = arith.mulf %1624, %1670 : vector<8x128xf32>
    %1672 = arith.addf %1601, %1671 : vector<8x128xf32>
    %c380 = arith.constant 380 : index
    %1673 = memref.load %arg4[%c380] : memref<512xf32, #tpu.memory_space<smem>>
    %1674 = vector.broadcast %1673 : f32 to vector<8x128xf32>
    %1675 = arith.mulf %1624, %1674 : vector<8x128xf32>
    %1676 = arith.addf %1605, %1675 : vector<8x128xf32>
    %c381 = arith.constant 381 : index
    %1677 = memref.load %arg4[%c381] : memref<512xf32, #tpu.memory_space<smem>>
    %1678 = vector.broadcast %1677 : f32 to vector<8x128xf32>
    %1679 = arith.mulf %1624, %1678 : vector<8x128xf32>
    %1680 = arith.addf %1609, %1679 : vector<8x128xf32>
    %c382 = arith.constant 382 : index
    %1681 = memref.load %arg4[%c382] : memref<512xf32, #tpu.memory_space<smem>>
    %1682 = vector.broadcast %1681 : f32 to vector<8x128xf32>
    %1683 = arith.mulf %1624, %1682 : vector<8x128xf32>
    %1684 = arith.addf %1613, %1683 : vector<8x128xf32>
    %c383 = arith.constant 383 : index
    %1685 = memref.load %arg4[%c383] : memref<512xf32, #tpu.memory_space<smem>>
    %1686 = vector.broadcast %1685 : f32 to vector<8x128xf32>
    %1687 = arith.mulf %1624, %1686 : vector<8x128xf32>
    %1688 = arith.addf %1617, %1687 : vector<8x128xf32>
    %c24_50 = arith.constant 24 : index
    %1689 = memref.load %arg2[%c24_50] : memref<32xf32, #tpu.memory_space<smem>>
    %1690 = vector.broadcast %1689 : f32 to vector<8x128xf32>
    %1691 = arith.mulf %0, %1690 : vector<8x128xf32>
    %c24_51 = arith.constant 24 : index
    %1692 = memref.load %arg3[%c24_51] : memref<32xf32, #tpu.memory_space<smem>>
    %1693 = vector.broadcast %1692 : f32 to vector<8x128xf32>
    %1694 = arith.addf %1691, %1693 : vector<8x128xf32>
    %1695 = math.tanh %1694 : vector<8x128xf32>
    %c384 = arith.constant 384 : index
    %1696 = memref.load %arg4[%c384] : memref<512xf32, #tpu.memory_space<smem>>
    %1697 = vector.broadcast %1696 : f32 to vector<8x128xf32>
    %1698 = arith.mulf %1695, %1697 : vector<8x128xf32>
    %1699 = arith.addf %1628, %1698 : vector<8x128xf32>
    %c385 = arith.constant 385 : index
    %1700 = memref.load %arg4[%c385] : memref<512xf32, #tpu.memory_space<smem>>
    %1701 = vector.broadcast %1700 : f32 to vector<8x128xf32>
    %1702 = arith.mulf %1695, %1701 : vector<8x128xf32>
    %1703 = arith.addf %1632, %1702 : vector<8x128xf32>
    %c386 = arith.constant 386 : index
    %1704 = memref.load %arg4[%c386] : memref<512xf32, #tpu.memory_space<smem>>
    %1705 = vector.broadcast %1704 : f32 to vector<8x128xf32>
    %1706 = arith.mulf %1695, %1705 : vector<8x128xf32>
    %1707 = arith.addf %1636, %1706 : vector<8x128xf32>
    %c387 = arith.constant 387 : index
    %1708 = memref.load %arg4[%c387] : memref<512xf32, #tpu.memory_space<smem>>
    %1709 = vector.broadcast %1708 : f32 to vector<8x128xf32>
    %1710 = arith.mulf %1695, %1709 : vector<8x128xf32>
    %1711 = arith.addf %1640, %1710 : vector<8x128xf32>
    %c388 = arith.constant 388 : index
    %1712 = memref.load %arg4[%c388] : memref<512xf32, #tpu.memory_space<smem>>
    %1713 = vector.broadcast %1712 : f32 to vector<8x128xf32>
    %1714 = arith.mulf %1695, %1713 : vector<8x128xf32>
    %1715 = arith.addf %1644, %1714 : vector<8x128xf32>
    %c389 = arith.constant 389 : index
    %1716 = memref.load %arg4[%c389] : memref<512xf32, #tpu.memory_space<smem>>
    %1717 = vector.broadcast %1716 : f32 to vector<8x128xf32>
    %1718 = arith.mulf %1695, %1717 : vector<8x128xf32>
    %1719 = arith.addf %1648, %1718 : vector<8x128xf32>
    %c390 = arith.constant 390 : index
    %1720 = memref.load %arg4[%c390] : memref<512xf32, #tpu.memory_space<smem>>
    %1721 = vector.broadcast %1720 : f32 to vector<8x128xf32>
    %1722 = arith.mulf %1695, %1721 : vector<8x128xf32>
    %1723 = arith.addf %1652, %1722 : vector<8x128xf32>
    %c391 = arith.constant 391 : index
    %1724 = memref.load %arg4[%c391] : memref<512xf32, #tpu.memory_space<smem>>
    %1725 = vector.broadcast %1724 : f32 to vector<8x128xf32>
    %1726 = arith.mulf %1695, %1725 : vector<8x128xf32>
    %1727 = arith.addf %1656, %1726 : vector<8x128xf32>
    %c392 = arith.constant 392 : index
    %1728 = memref.load %arg4[%c392] : memref<512xf32, #tpu.memory_space<smem>>
    %1729 = vector.broadcast %1728 : f32 to vector<8x128xf32>
    %1730 = arith.mulf %1695, %1729 : vector<8x128xf32>
    %1731 = arith.addf %1660, %1730 : vector<8x128xf32>
    %c393 = arith.constant 393 : index
    %1732 = memref.load %arg4[%c393] : memref<512xf32, #tpu.memory_space<smem>>
    %1733 = vector.broadcast %1732 : f32 to vector<8x128xf32>
    %1734 = arith.mulf %1695, %1733 : vector<8x128xf32>
    %1735 = arith.addf %1664, %1734 : vector<8x128xf32>
    %c394 = arith.constant 394 : index
    %1736 = memref.load %arg4[%c394] : memref<512xf32, #tpu.memory_space<smem>>
    %1737 = vector.broadcast %1736 : f32 to vector<8x128xf32>
    %1738 = arith.mulf %1695, %1737 : vector<8x128xf32>
    %1739 = arith.addf %1668, %1738 : vector<8x128xf32>
    %c395 = arith.constant 395 : index
    %1740 = memref.load %arg4[%c395] : memref<512xf32, #tpu.memory_space<smem>>
    %1741 = vector.broadcast %1740 : f32 to vector<8x128xf32>
    %1742 = arith.mulf %1695, %1741 : vector<8x128xf32>
    %1743 = arith.addf %1672, %1742 : vector<8x128xf32>
    %c396 = arith.constant 396 : index
    %1744 = memref.load %arg4[%c396] : memref<512xf32, #tpu.memory_space<smem>>
    %1745 = vector.broadcast %1744 : f32 to vector<8x128xf32>
    %1746 = arith.mulf %1695, %1745 : vector<8x128xf32>
    %1747 = arith.addf %1676, %1746 : vector<8x128xf32>
    %c397 = arith.constant 397 : index
    %1748 = memref.load %arg4[%c397] : memref<512xf32, #tpu.memory_space<smem>>
    %1749 = vector.broadcast %1748 : f32 to vector<8x128xf32>
    %1750 = arith.mulf %1695, %1749 : vector<8x128xf32>
    %1751 = arith.addf %1680, %1750 : vector<8x128xf32>
    %c398 = arith.constant 398 : index
    %1752 = memref.load %arg4[%c398] : memref<512xf32, #tpu.memory_space<smem>>
    %1753 = vector.broadcast %1752 : f32 to vector<8x128xf32>
    %1754 = arith.mulf %1695, %1753 : vector<8x128xf32>
    %1755 = arith.addf %1684, %1754 : vector<8x128xf32>
    %c399 = arith.constant 399 : index
    %1756 = memref.load %arg4[%c399] : memref<512xf32, #tpu.memory_space<smem>>
    %1757 = vector.broadcast %1756 : f32 to vector<8x128xf32>
    %1758 = arith.mulf %1695, %1757 : vector<8x128xf32>
    %1759 = arith.addf %1688, %1758 : vector<8x128xf32>
    %c25_52 = arith.constant 25 : index
    %1760 = memref.load %arg2[%c25_52] : memref<32xf32, #tpu.memory_space<smem>>
    %1761 = vector.broadcast %1760 : f32 to vector<8x128xf32>
    %1762 = arith.mulf %0, %1761 : vector<8x128xf32>
    %c25_53 = arith.constant 25 : index
    %1763 = memref.load %arg3[%c25_53] : memref<32xf32, #tpu.memory_space<smem>>
    %1764 = vector.broadcast %1763 : f32 to vector<8x128xf32>
    %1765 = arith.addf %1762, %1764 : vector<8x128xf32>
    %1766 = math.tanh %1765 : vector<8x128xf32>
    %c400 = arith.constant 400 : index
    %1767 = memref.load %arg4[%c400] : memref<512xf32, #tpu.memory_space<smem>>
    %1768 = vector.broadcast %1767 : f32 to vector<8x128xf32>
    %1769 = arith.mulf %1766, %1768 : vector<8x128xf32>
    %1770 = arith.addf %1699, %1769 : vector<8x128xf32>
    %c401 = arith.constant 401 : index
    %1771 = memref.load %arg4[%c401] : memref<512xf32, #tpu.memory_space<smem>>
    %1772 = vector.broadcast %1771 : f32 to vector<8x128xf32>
    %1773 = arith.mulf %1766, %1772 : vector<8x128xf32>
    %1774 = arith.addf %1703, %1773 : vector<8x128xf32>
    %c402 = arith.constant 402 : index
    %1775 = memref.load %arg4[%c402] : memref<512xf32, #tpu.memory_space<smem>>
    %1776 = vector.broadcast %1775 : f32 to vector<8x128xf32>
    %1777 = arith.mulf %1766, %1776 : vector<8x128xf32>
    %1778 = arith.addf %1707, %1777 : vector<8x128xf32>
    %c403 = arith.constant 403 : index
    %1779 = memref.load %arg4[%c403] : memref<512xf32, #tpu.memory_space<smem>>
    %1780 = vector.broadcast %1779 : f32 to vector<8x128xf32>
    %1781 = arith.mulf %1766, %1780 : vector<8x128xf32>
    %1782 = arith.addf %1711, %1781 : vector<8x128xf32>
    %c404 = arith.constant 404 : index
    %1783 = memref.load %arg4[%c404] : memref<512xf32, #tpu.memory_space<smem>>
    %1784 = vector.broadcast %1783 : f32 to vector<8x128xf32>
    %1785 = arith.mulf %1766, %1784 : vector<8x128xf32>
    %1786 = arith.addf %1715, %1785 : vector<8x128xf32>
    %c405 = arith.constant 405 : index
    %1787 = memref.load %arg4[%c405] : memref<512xf32, #tpu.memory_space<smem>>
    %1788 = vector.broadcast %1787 : f32 to vector<8x128xf32>
    %1789 = arith.mulf %1766, %1788 : vector<8x128xf32>
    %1790 = arith.addf %1719, %1789 : vector<8x128xf32>
    %c406 = arith.constant 406 : index
    %1791 = memref.load %arg4[%c406] : memref<512xf32, #tpu.memory_space<smem>>
    %1792 = vector.broadcast %1791 : f32 to vector<8x128xf32>
    %1793 = arith.mulf %1766, %1792 : vector<8x128xf32>
    %1794 = arith.addf %1723, %1793 : vector<8x128xf32>
    %c407 = arith.constant 407 : index
    %1795 = memref.load %arg4[%c407] : memref<512xf32, #tpu.memory_space<smem>>
    %1796 = vector.broadcast %1795 : f32 to vector<8x128xf32>
    %1797 = arith.mulf %1766, %1796 : vector<8x128xf32>
    %1798 = arith.addf %1727, %1797 : vector<8x128xf32>
    %c408 = arith.constant 408 : index
    %1799 = memref.load %arg4[%c408] : memref<512xf32, #tpu.memory_space<smem>>
    %1800 = vector.broadcast %1799 : f32 to vector<8x128xf32>
    %1801 = arith.mulf %1766, %1800 : vector<8x128xf32>
    %1802 = arith.addf %1731, %1801 : vector<8x128xf32>
    %c409 = arith.constant 409 : index
    %1803 = memref.load %arg4[%c409] : memref<512xf32, #tpu.memory_space<smem>>
    %1804 = vector.broadcast %1803 : f32 to vector<8x128xf32>
    %1805 = arith.mulf %1766, %1804 : vector<8x128xf32>
    %1806 = arith.addf %1735, %1805 : vector<8x128xf32>
    %c410 = arith.constant 410 : index
    %1807 = memref.load %arg4[%c410] : memref<512xf32, #tpu.memory_space<smem>>
    %1808 = vector.broadcast %1807 : f32 to vector<8x128xf32>
    %1809 = arith.mulf %1766, %1808 : vector<8x128xf32>
    %1810 = arith.addf %1739, %1809 : vector<8x128xf32>
    %c411 = arith.constant 411 : index
    %1811 = memref.load %arg4[%c411] : memref<512xf32, #tpu.memory_space<smem>>
    %1812 = vector.broadcast %1811 : f32 to vector<8x128xf32>
    %1813 = arith.mulf %1766, %1812 : vector<8x128xf32>
    %1814 = arith.addf %1743, %1813 : vector<8x128xf32>
    %c412 = arith.constant 412 : index
    %1815 = memref.load %arg4[%c412] : memref<512xf32, #tpu.memory_space<smem>>
    %1816 = vector.broadcast %1815 : f32 to vector<8x128xf32>
    %1817 = arith.mulf %1766, %1816 : vector<8x128xf32>
    %1818 = arith.addf %1747, %1817 : vector<8x128xf32>
    %c413 = arith.constant 413 : index
    %1819 = memref.load %arg4[%c413] : memref<512xf32, #tpu.memory_space<smem>>
    %1820 = vector.broadcast %1819 : f32 to vector<8x128xf32>
    %1821 = arith.mulf %1766, %1820 : vector<8x128xf32>
    %1822 = arith.addf %1751, %1821 : vector<8x128xf32>
    %c414 = arith.constant 414 : index
    %1823 = memref.load %arg4[%c414] : memref<512xf32, #tpu.memory_space<smem>>
    %1824 = vector.broadcast %1823 : f32 to vector<8x128xf32>
    %1825 = arith.mulf %1766, %1824 : vector<8x128xf32>
    %1826 = arith.addf %1755, %1825 : vector<8x128xf32>
    %c415 = arith.constant 415 : index
    %1827 = memref.load %arg4[%c415] : memref<512xf32, #tpu.memory_space<smem>>
    %1828 = vector.broadcast %1827 : f32 to vector<8x128xf32>
    %1829 = arith.mulf %1766, %1828 : vector<8x128xf32>
    %1830 = arith.addf %1759, %1829 : vector<8x128xf32>
    %c26_54 = arith.constant 26 : index
    %1831 = memref.load %arg2[%c26_54] : memref<32xf32, #tpu.memory_space<smem>>
    %1832 = vector.broadcast %1831 : f32 to vector<8x128xf32>
    %1833 = arith.mulf %0, %1832 : vector<8x128xf32>
    %c26_55 = arith.constant 26 : index
    %1834 = memref.load %arg3[%c26_55] : memref<32xf32, #tpu.memory_space<smem>>
    %1835 = vector.broadcast %1834 : f32 to vector<8x128xf32>
    %1836 = arith.addf %1833, %1835 : vector<8x128xf32>
    %1837 = math.tanh %1836 : vector<8x128xf32>
    %c416 = arith.constant 416 : index
    %1838 = memref.load %arg4[%c416] : memref<512xf32, #tpu.memory_space<smem>>
    %1839 = vector.broadcast %1838 : f32 to vector<8x128xf32>
    %1840 = arith.mulf %1837, %1839 : vector<8x128xf32>
    %1841 = arith.addf %1770, %1840 : vector<8x128xf32>
    %c417 = arith.constant 417 : index
    %1842 = memref.load %arg4[%c417] : memref<512xf32, #tpu.memory_space<smem>>
    %1843 = vector.broadcast %1842 : f32 to vector<8x128xf32>
    %1844 = arith.mulf %1837, %1843 : vector<8x128xf32>
    %1845 = arith.addf %1774, %1844 : vector<8x128xf32>
    %c418 = arith.constant 418 : index
    %1846 = memref.load %arg4[%c418] : memref<512xf32, #tpu.memory_space<smem>>
    %1847 = vector.broadcast %1846 : f32 to vector<8x128xf32>
    %1848 = arith.mulf %1837, %1847 : vector<8x128xf32>
    %1849 = arith.addf %1778, %1848 : vector<8x128xf32>
    %c419 = arith.constant 419 : index
    %1850 = memref.load %arg4[%c419] : memref<512xf32, #tpu.memory_space<smem>>
    %1851 = vector.broadcast %1850 : f32 to vector<8x128xf32>
    %1852 = arith.mulf %1837, %1851 : vector<8x128xf32>
    %1853 = arith.addf %1782, %1852 : vector<8x128xf32>
    %c420 = arith.constant 420 : index
    %1854 = memref.load %arg4[%c420] : memref<512xf32, #tpu.memory_space<smem>>
    %1855 = vector.broadcast %1854 : f32 to vector<8x128xf32>
    %1856 = arith.mulf %1837, %1855 : vector<8x128xf32>
    %1857 = arith.addf %1786, %1856 : vector<8x128xf32>
    %c421 = arith.constant 421 : index
    %1858 = memref.load %arg4[%c421] : memref<512xf32, #tpu.memory_space<smem>>
    %1859 = vector.broadcast %1858 : f32 to vector<8x128xf32>
    %1860 = arith.mulf %1837, %1859 : vector<8x128xf32>
    %1861 = arith.addf %1790, %1860 : vector<8x128xf32>
    %c422 = arith.constant 422 : index
    %1862 = memref.load %arg4[%c422] : memref<512xf32, #tpu.memory_space<smem>>
    %1863 = vector.broadcast %1862 : f32 to vector<8x128xf32>
    %1864 = arith.mulf %1837, %1863 : vector<8x128xf32>
    %1865 = arith.addf %1794, %1864 : vector<8x128xf32>
    %c423 = arith.constant 423 : index
    %1866 = memref.load %arg4[%c423] : memref<512xf32, #tpu.memory_space<smem>>
    %1867 = vector.broadcast %1866 : f32 to vector<8x128xf32>
    %1868 = arith.mulf %1837, %1867 : vector<8x128xf32>
    %1869 = arith.addf %1798, %1868 : vector<8x128xf32>
    %c424 = arith.constant 424 : index
    %1870 = memref.load %arg4[%c424] : memref<512xf32, #tpu.memory_space<smem>>
    %1871 = vector.broadcast %1870 : f32 to vector<8x128xf32>
    %1872 = arith.mulf %1837, %1871 : vector<8x128xf32>
    %1873 = arith.addf %1802, %1872 : vector<8x128xf32>
    %c425 = arith.constant 425 : index
    %1874 = memref.load %arg4[%c425] : memref<512xf32, #tpu.memory_space<smem>>
    %1875 = vector.broadcast %1874 : f32 to vector<8x128xf32>
    %1876 = arith.mulf %1837, %1875 : vector<8x128xf32>
    %1877 = arith.addf %1806, %1876 : vector<8x128xf32>
    %c426 = arith.constant 426 : index
    %1878 = memref.load %arg4[%c426] : memref<512xf32, #tpu.memory_space<smem>>
    %1879 = vector.broadcast %1878 : f32 to vector<8x128xf32>
    %1880 = arith.mulf %1837, %1879 : vector<8x128xf32>
    %1881 = arith.addf %1810, %1880 : vector<8x128xf32>
    %c427 = arith.constant 427 : index
    %1882 = memref.load %arg4[%c427] : memref<512xf32, #tpu.memory_space<smem>>
    %1883 = vector.broadcast %1882 : f32 to vector<8x128xf32>
    %1884 = arith.mulf %1837, %1883 : vector<8x128xf32>
    %1885 = arith.addf %1814, %1884 : vector<8x128xf32>
    %c428 = arith.constant 428 : index
    %1886 = memref.load %arg4[%c428] : memref<512xf32, #tpu.memory_space<smem>>
    %1887 = vector.broadcast %1886 : f32 to vector<8x128xf32>
    %1888 = arith.mulf %1837, %1887 : vector<8x128xf32>
    %1889 = arith.addf %1818, %1888 : vector<8x128xf32>
    %c429 = arith.constant 429 : index
    %1890 = memref.load %arg4[%c429] : memref<512xf32, #tpu.memory_space<smem>>
    %1891 = vector.broadcast %1890 : f32 to vector<8x128xf32>
    %1892 = arith.mulf %1837, %1891 : vector<8x128xf32>
    %1893 = arith.addf %1822, %1892 : vector<8x128xf32>
    %c430 = arith.constant 430 : index
    %1894 = memref.load %arg4[%c430] : memref<512xf32, #tpu.memory_space<smem>>
    %1895 = vector.broadcast %1894 : f32 to vector<8x128xf32>
    %1896 = arith.mulf %1837, %1895 : vector<8x128xf32>
    %1897 = arith.addf %1826, %1896 : vector<8x128xf32>
    %c431 = arith.constant 431 : index
    %1898 = memref.load %arg4[%c431] : memref<512xf32, #tpu.memory_space<smem>>
    %1899 = vector.broadcast %1898 : f32 to vector<8x128xf32>
    %1900 = arith.mulf %1837, %1899 : vector<8x128xf32>
    %1901 = arith.addf %1830, %1900 : vector<8x128xf32>
    %c27_56 = arith.constant 27 : index
    %1902 = memref.load %arg2[%c27_56] : memref<32xf32, #tpu.memory_space<smem>>
    %1903 = vector.broadcast %1902 : f32 to vector<8x128xf32>
    %1904 = arith.mulf %0, %1903 : vector<8x128xf32>
    %c27_57 = arith.constant 27 : index
    %1905 = memref.load %arg3[%c27_57] : memref<32xf32, #tpu.memory_space<smem>>
    %1906 = vector.broadcast %1905 : f32 to vector<8x128xf32>
    %1907 = arith.addf %1904, %1906 : vector<8x128xf32>
    %1908 = math.tanh %1907 : vector<8x128xf32>
    %c432 = arith.constant 432 : index
    %1909 = memref.load %arg4[%c432] : memref<512xf32, #tpu.memory_space<smem>>
    %1910 = vector.broadcast %1909 : f32 to vector<8x128xf32>
    %1911 = arith.mulf %1908, %1910 : vector<8x128xf32>
    %1912 = arith.addf %1841, %1911 : vector<8x128xf32>
    %c433 = arith.constant 433 : index
    %1913 = memref.load %arg4[%c433] : memref<512xf32, #tpu.memory_space<smem>>
    %1914 = vector.broadcast %1913 : f32 to vector<8x128xf32>
    %1915 = arith.mulf %1908, %1914 : vector<8x128xf32>
    %1916 = arith.addf %1845, %1915 : vector<8x128xf32>
    %c434 = arith.constant 434 : index
    %1917 = memref.load %arg4[%c434] : memref<512xf32, #tpu.memory_space<smem>>
    %1918 = vector.broadcast %1917 : f32 to vector<8x128xf32>
    %1919 = arith.mulf %1908, %1918 : vector<8x128xf32>
    %1920 = arith.addf %1849, %1919 : vector<8x128xf32>
    %c435 = arith.constant 435 : index
    %1921 = memref.load %arg4[%c435] : memref<512xf32, #tpu.memory_space<smem>>
    %1922 = vector.broadcast %1921 : f32 to vector<8x128xf32>
    %1923 = arith.mulf %1908, %1922 : vector<8x128xf32>
    %1924 = arith.addf %1853, %1923 : vector<8x128xf32>
    %c436 = arith.constant 436 : index
    %1925 = memref.load %arg4[%c436] : memref<512xf32, #tpu.memory_space<smem>>
    %1926 = vector.broadcast %1925 : f32 to vector<8x128xf32>
    %1927 = arith.mulf %1908, %1926 : vector<8x128xf32>
    %1928 = arith.addf %1857, %1927 : vector<8x128xf32>
    %c437 = arith.constant 437 : index
    %1929 = memref.load %arg4[%c437] : memref<512xf32, #tpu.memory_space<smem>>
    %1930 = vector.broadcast %1929 : f32 to vector<8x128xf32>
    %1931 = arith.mulf %1908, %1930 : vector<8x128xf32>
    %1932 = arith.addf %1861, %1931 : vector<8x128xf32>
    %c438 = arith.constant 438 : index
    %1933 = memref.load %arg4[%c438] : memref<512xf32, #tpu.memory_space<smem>>
    %1934 = vector.broadcast %1933 : f32 to vector<8x128xf32>
    %1935 = arith.mulf %1908, %1934 : vector<8x128xf32>
    %1936 = arith.addf %1865, %1935 : vector<8x128xf32>
    %c439 = arith.constant 439 : index
    %1937 = memref.load %arg4[%c439] : memref<512xf32, #tpu.memory_space<smem>>
    %1938 = vector.broadcast %1937 : f32 to vector<8x128xf32>
    %1939 = arith.mulf %1908, %1938 : vector<8x128xf32>
    %1940 = arith.addf %1869, %1939 : vector<8x128xf32>
    %c440 = arith.constant 440 : index
    %1941 = memref.load %arg4[%c440] : memref<512xf32, #tpu.memory_space<smem>>
    %1942 = vector.broadcast %1941 : f32 to vector<8x128xf32>
    %1943 = arith.mulf %1908, %1942 : vector<8x128xf32>
    %1944 = arith.addf %1873, %1943 : vector<8x128xf32>
    %c441 = arith.constant 441 : index
    %1945 = memref.load %arg4[%c441] : memref<512xf32, #tpu.memory_space<smem>>
    %1946 = vector.broadcast %1945 : f32 to vector<8x128xf32>
    %1947 = arith.mulf %1908, %1946 : vector<8x128xf32>
    %1948 = arith.addf %1877, %1947 : vector<8x128xf32>
    %c442 = arith.constant 442 : index
    %1949 = memref.load %arg4[%c442] : memref<512xf32, #tpu.memory_space<smem>>
    %1950 = vector.broadcast %1949 : f32 to vector<8x128xf32>
    %1951 = arith.mulf %1908, %1950 : vector<8x128xf32>
    %1952 = arith.addf %1881, %1951 : vector<8x128xf32>
    %c443 = arith.constant 443 : index
    %1953 = memref.load %arg4[%c443] : memref<512xf32, #tpu.memory_space<smem>>
    %1954 = vector.broadcast %1953 : f32 to vector<8x128xf32>
    %1955 = arith.mulf %1908, %1954 : vector<8x128xf32>
    %1956 = arith.addf %1885, %1955 : vector<8x128xf32>
    %c444 = arith.constant 444 : index
    %1957 = memref.load %arg4[%c444] : memref<512xf32, #tpu.memory_space<smem>>
    %1958 = vector.broadcast %1957 : f32 to vector<8x128xf32>
    %1959 = arith.mulf %1908, %1958 : vector<8x128xf32>
    %1960 = arith.addf %1889, %1959 : vector<8x128xf32>
    %c445 = arith.constant 445 : index
    %1961 = memref.load %arg4[%c445] : memref<512xf32, #tpu.memory_space<smem>>
    %1962 = vector.broadcast %1961 : f32 to vector<8x128xf32>
    %1963 = arith.mulf %1908, %1962 : vector<8x128xf32>
    %1964 = arith.addf %1893, %1963 : vector<8x128xf32>
    %c446 = arith.constant 446 : index
    %1965 = memref.load %arg4[%c446] : memref<512xf32, #tpu.memory_space<smem>>
    %1966 = vector.broadcast %1965 : f32 to vector<8x128xf32>
    %1967 = arith.mulf %1908, %1966 : vector<8x128xf32>
    %1968 = arith.addf %1897, %1967 : vector<8x128xf32>
    %c447 = arith.constant 447 : index
    %1969 = memref.load %arg4[%c447] : memref<512xf32, #tpu.memory_space<smem>>
    %1970 = vector.broadcast %1969 : f32 to vector<8x128xf32>
    %1971 = arith.mulf %1908, %1970 : vector<8x128xf32>
    %1972 = arith.addf %1901, %1971 : vector<8x128xf32>
    %c28_58 = arith.constant 28 : index
    %1973 = memref.load %arg2[%c28_58] : memref<32xf32, #tpu.memory_space<smem>>
    %1974 = vector.broadcast %1973 : f32 to vector<8x128xf32>
    %1975 = arith.mulf %0, %1974 : vector<8x128xf32>
    %c28_59 = arith.constant 28 : index
    %1976 = memref.load %arg3[%c28_59] : memref<32xf32, #tpu.memory_space<smem>>
    %1977 = vector.broadcast %1976 : f32 to vector<8x128xf32>
    %1978 = arith.addf %1975, %1977 : vector<8x128xf32>
    %1979 = math.tanh %1978 : vector<8x128xf32>
    %c448 = arith.constant 448 : index
    %1980 = memref.load %arg4[%c448] : memref<512xf32, #tpu.memory_space<smem>>
    %1981 = vector.broadcast %1980 : f32 to vector<8x128xf32>
    %1982 = arith.mulf %1979, %1981 : vector<8x128xf32>
    %1983 = arith.addf %1912, %1982 : vector<8x128xf32>
    %c449 = arith.constant 449 : index
    %1984 = memref.load %arg4[%c449] : memref<512xf32, #tpu.memory_space<smem>>
    %1985 = vector.broadcast %1984 : f32 to vector<8x128xf32>
    %1986 = arith.mulf %1979, %1985 : vector<8x128xf32>
    %1987 = arith.addf %1916, %1986 : vector<8x128xf32>
    %c450 = arith.constant 450 : index
    %1988 = memref.load %arg4[%c450] : memref<512xf32, #tpu.memory_space<smem>>
    %1989 = vector.broadcast %1988 : f32 to vector<8x128xf32>
    %1990 = arith.mulf %1979, %1989 : vector<8x128xf32>
    %1991 = arith.addf %1920, %1990 : vector<8x128xf32>
    %c451 = arith.constant 451 : index
    %1992 = memref.load %arg4[%c451] : memref<512xf32, #tpu.memory_space<smem>>
    %1993 = vector.broadcast %1992 : f32 to vector<8x128xf32>
    %1994 = arith.mulf %1979, %1993 : vector<8x128xf32>
    %1995 = arith.addf %1924, %1994 : vector<8x128xf32>
    %c452 = arith.constant 452 : index
    %1996 = memref.load %arg4[%c452] : memref<512xf32, #tpu.memory_space<smem>>
    %1997 = vector.broadcast %1996 : f32 to vector<8x128xf32>
    %1998 = arith.mulf %1979, %1997 : vector<8x128xf32>
    %1999 = arith.addf %1928, %1998 : vector<8x128xf32>
    %c453 = arith.constant 453 : index
    %2000 = memref.load %arg4[%c453] : memref<512xf32, #tpu.memory_space<smem>>
    %2001 = vector.broadcast %2000 : f32 to vector<8x128xf32>
    %2002 = arith.mulf %1979, %2001 : vector<8x128xf32>
    %2003 = arith.addf %1932, %2002 : vector<8x128xf32>
    %c454 = arith.constant 454 : index
    %2004 = memref.load %arg4[%c454] : memref<512xf32, #tpu.memory_space<smem>>
    %2005 = vector.broadcast %2004 : f32 to vector<8x128xf32>
    %2006 = arith.mulf %1979, %2005 : vector<8x128xf32>
    %2007 = arith.addf %1936, %2006 : vector<8x128xf32>
    %c455 = arith.constant 455 : index
    %2008 = memref.load %arg4[%c455] : memref<512xf32, #tpu.memory_space<smem>>
    %2009 = vector.broadcast %2008 : f32 to vector<8x128xf32>
    %2010 = arith.mulf %1979, %2009 : vector<8x128xf32>
    %2011 = arith.addf %1940, %2010 : vector<8x128xf32>
    %c456 = arith.constant 456 : index
    %2012 = memref.load %arg4[%c456] : memref<512xf32, #tpu.memory_space<smem>>
    %2013 = vector.broadcast %2012 : f32 to vector<8x128xf32>
    %2014 = arith.mulf %1979, %2013 : vector<8x128xf32>
    %2015 = arith.addf %1944, %2014 : vector<8x128xf32>
    %c457 = arith.constant 457 : index
    %2016 = memref.load %arg4[%c457] : memref<512xf32, #tpu.memory_space<smem>>
    %2017 = vector.broadcast %2016 : f32 to vector<8x128xf32>
    %2018 = arith.mulf %1979, %2017 : vector<8x128xf32>
    %2019 = arith.addf %1948, %2018 : vector<8x128xf32>
    %c458 = arith.constant 458 : index
    %2020 = memref.load %arg4[%c458] : memref<512xf32, #tpu.memory_space<smem>>
    %2021 = vector.broadcast %2020 : f32 to vector<8x128xf32>
    %2022 = arith.mulf %1979, %2021 : vector<8x128xf32>
    %2023 = arith.addf %1952, %2022 : vector<8x128xf32>
    %c459 = arith.constant 459 : index
    %2024 = memref.load %arg4[%c459] : memref<512xf32, #tpu.memory_space<smem>>
    %2025 = vector.broadcast %2024 : f32 to vector<8x128xf32>
    %2026 = arith.mulf %1979, %2025 : vector<8x128xf32>
    %2027 = arith.addf %1956, %2026 : vector<8x128xf32>
    %c460 = arith.constant 460 : index
    %2028 = memref.load %arg4[%c460] : memref<512xf32, #tpu.memory_space<smem>>
    %2029 = vector.broadcast %2028 : f32 to vector<8x128xf32>
    %2030 = arith.mulf %1979, %2029 : vector<8x128xf32>
    %2031 = arith.addf %1960, %2030 : vector<8x128xf32>
    %c461 = arith.constant 461 : index
    %2032 = memref.load %arg4[%c461] : memref<512xf32, #tpu.memory_space<smem>>
    %2033 = vector.broadcast %2032 : f32 to vector<8x128xf32>
    %2034 = arith.mulf %1979, %2033 : vector<8x128xf32>
    %2035 = arith.addf %1964, %2034 : vector<8x128xf32>
    %c462 = arith.constant 462 : index
    %2036 = memref.load %arg4[%c462] : memref<512xf32, #tpu.memory_space<smem>>
    %2037 = vector.broadcast %2036 : f32 to vector<8x128xf32>
    %2038 = arith.mulf %1979, %2037 : vector<8x128xf32>
    %2039 = arith.addf %1968, %2038 : vector<8x128xf32>
    %c463 = arith.constant 463 : index
    %2040 = memref.load %arg4[%c463] : memref<512xf32, #tpu.memory_space<smem>>
    %2041 = vector.broadcast %2040 : f32 to vector<8x128xf32>
    %2042 = arith.mulf %1979, %2041 : vector<8x128xf32>
    %2043 = arith.addf %1972, %2042 : vector<8x128xf32>
    %c29_60 = arith.constant 29 : index
    %2044 = memref.load %arg2[%c29_60] : memref<32xf32, #tpu.memory_space<smem>>
    %2045 = vector.broadcast %2044 : f32 to vector<8x128xf32>
    %2046 = arith.mulf %0, %2045 : vector<8x128xf32>
    %c29_61 = arith.constant 29 : index
    %2047 = memref.load %arg3[%c29_61] : memref<32xf32, #tpu.memory_space<smem>>
    %2048 = vector.broadcast %2047 : f32 to vector<8x128xf32>
    %2049 = arith.addf %2046, %2048 : vector<8x128xf32>
    %2050 = math.tanh %2049 : vector<8x128xf32>
    %c464 = arith.constant 464 : index
    %2051 = memref.load %arg4[%c464] : memref<512xf32, #tpu.memory_space<smem>>
    %2052 = vector.broadcast %2051 : f32 to vector<8x128xf32>
    %2053 = arith.mulf %2050, %2052 : vector<8x128xf32>
    %2054 = arith.addf %1983, %2053 : vector<8x128xf32>
    %c465 = arith.constant 465 : index
    %2055 = memref.load %arg4[%c465] : memref<512xf32, #tpu.memory_space<smem>>
    %2056 = vector.broadcast %2055 : f32 to vector<8x128xf32>
    %2057 = arith.mulf %2050, %2056 : vector<8x128xf32>
    %2058 = arith.addf %1987, %2057 : vector<8x128xf32>
    %c466 = arith.constant 466 : index
    %2059 = memref.load %arg4[%c466] : memref<512xf32, #tpu.memory_space<smem>>
    %2060 = vector.broadcast %2059 : f32 to vector<8x128xf32>
    %2061 = arith.mulf %2050, %2060 : vector<8x128xf32>
    %2062 = arith.addf %1991, %2061 : vector<8x128xf32>
    %c467 = arith.constant 467 : index
    %2063 = memref.load %arg4[%c467] : memref<512xf32, #tpu.memory_space<smem>>
    %2064 = vector.broadcast %2063 : f32 to vector<8x128xf32>
    %2065 = arith.mulf %2050, %2064 : vector<8x128xf32>
    %2066 = arith.addf %1995, %2065 : vector<8x128xf32>
    %c468 = arith.constant 468 : index
    %2067 = memref.load %arg4[%c468] : memref<512xf32, #tpu.memory_space<smem>>
    %2068 = vector.broadcast %2067 : f32 to vector<8x128xf32>
    %2069 = arith.mulf %2050, %2068 : vector<8x128xf32>
    %2070 = arith.addf %1999, %2069 : vector<8x128xf32>
    %c469 = arith.constant 469 : index
    %2071 = memref.load %arg4[%c469] : memref<512xf32, #tpu.memory_space<smem>>
    %2072 = vector.broadcast %2071 : f32 to vector<8x128xf32>
    %2073 = arith.mulf %2050, %2072 : vector<8x128xf32>
    %2074 = arith.addf %2003, %2073 : vector<8x128xf32>
    %c470 = arith.constant 470 : index
    %2075 = memref.load %arg4[%c470] : memref<512xf32, #tpu.memory_space<smem>>
    %2076 = vector.broadcast %2075 : f32 to vector<8x128xf32>
    %2077 = arith.mulf %2050, %2076 : vector<8x128xf32>
    %2078 = arith.addf %2007, %2077 : vector<8x128xf32>
    %c471 = arith.constant 471 : index
    %2079 = memref.load %arg4[%c471] : memref<512xf32, #tpu.memory_space<smem>>
    %2080 = vector.broadcast %2079 : f32 to vector<8x128xf32>
    %2081 = arith.mulf %2050, %2080 : vector<8x128xf32>
    %2082 = arith.addf %2011, %2081 : vector<8x128xf32>
    %c472 = arith.constant 472 : index
    %2083 = memref.load %arg4[%c472] : memref<512xf32, #tpu.memory_space<smem>>
    %2084 = vector.broadcast %2083 : f32 to vector<8x128xf32>
    %2085 = arith.mulf %2050, %2084 : vector<8x128xf32>
    %2086 = arith.addf %2015, %2085 : vector<8x128xf32>
    %c473 = arith.constant 473 : index
    %2087 = memref.load %arg4[%c473] : memref<512xf32, #tpu.memory_space<smem>>
    %2088 = vector.broadcast %2087 : f32 to vector<8x128xf32>
    %2089 = arith.mulf %2050, %2088 : vector<8x128xf32>
    %2090 = arith.addf %2019, %2089 : vector<8x128xf32>
    %c474 = arith.constant 474 : index
    %2091 = memref.load %arg4[%c474] : memref<512xf32, #tpu.memory_space<smem>>
    %2092 = vector.broadcast %2091 : f32 to vector<8x128xf32>
    %2093 = arith.mulf %2050, %2092 : vector<8x128xf32>
    %2094 = arith.addf %2023, %2093 : vector<8x128xf32>
    %c475 = arith.constant 475 : index
    %2095 = memref.load %arg4[%c475] : memref<512xf32, #tpu.memory_space<smem>>
    %2096 = vector.broadcast %2095 : f32 to vector<8x128xf32>
    %2097 = arith.mulf %2050, %2096 : vector<8x128xf32>
    %2098 = arith.addf %2027, %2097 : vector<8x128xf32>
    %c476 = arith.constant 476 : index
    %2099 = memref.load %arg4[%c476] : memref<512xf32, #tpu.memory_space<smem>>
    %2100 = vector.broadcast %2099 : f32 to vector<8x128xf32>
    %2101 = arith.mulf %2050, %2100 : vector<8x128xf32>
    %2102 = arith.addf %2031, %2101 : vector<8x128xf32>
    %c477 = arith.constant 477 : index
    %2103 = memref.load %arg4[%c477] : memref<512xf32, #tpu.memory_space<smem>>
    %2104 = vector.broadcast %2103 : f32 to vector<8x128xf32>
    %2105 = arith.mulf %2050, %2104 : vector<8x128xf32>
    %2106 = arith.addf %2035, %2105 : vector<8x128xf32>
    %c478 = arith.constant 478 : index
    %2107 = memref.load %arg4[%c478] : memref<512xf32, #tpu.memory_space<smem>>
    %2108 = vector.broadcast %2107 : f32 to vector<8x128xf32>
    %2109 = arith.mulf %2050, %2108 : vector<8x128xf32>
    %2110 = arith.addf %2039, %2109 : vector<8x128xf32>
    %c479 = arith.constant 479 : index
    %2111 = memref.load %arg4[%c479] : memref<512xf32, #tpu.memory_space<smem>>
    %2112 = vector.broadcast %2111 : f32 to vector<8x128xf32>
    %2113 = arith.mulf %2050, %2112 : vector<8x128xf32>
    %2114 = arith.addf %2043, %2113 : vector<8x128xf32>
    %c30_62 = arith.constant 30 : index
    %2115 = memref.load %arg2[%c30_62] : memref<32xf32, #tpu.memory_space<smem>>
    %2116 = vector.broadcast %2115 : f32 to vector<8x128xf32>
    %2117 = arith.mulf %0, %2116 : vector<8x128xf32>
    %c30_63 = arith.constant 30 : index
    %2118 = memref.load %arg3[%c30_63] : memref<32xf32, #tpu.memory_space<smem>>
    %2119 = vector.broadcast %2118 : f32 to vector<8x128xf32>
    %2120 = arith.addf %2117, %2119 : vector<8x128xf32>
    %2121 = math.tanh %2120 : vector<8x128xf32>
    %c480 = arith.constant 480 : index
    %2122 = memref.load %arg4[%c480] : memref<512xf32, #tpu.memory_space<smem>>
    %2123 = vector.broadcast %2122 : f32 to vector<8x128xf32>
    %2124 = arith.mulf %2121, %2123 : vector<8x128xf32>
    %2125 = arith.addf %2054, %2124 : vector<8x128xf32>
    %c481 = arith.constant 481 : index
    %2126 = memref.load %arg4[%c481] : memref<512xf32, #tpu.memory_space<smem>>
    %2127 = vector.broadcast %2126 : f32 to vector<8x128xf32>
    %2128 = arith.mulf %2121, %2127 : vector<8x128xf32>
    %2129 = arith.addf %2058, %2128 : vector<8x128xf32>
    %c482 = arith.constant 482 : index
    %2130 = memref.load %arg4[%c482] : memref<512xf32, #tpu.memory_space<smem>>
    %2131 = vector.broadcast %2130 : f32 to vector<8x128xf32>
    %2132 = arith.mulf %2121, %2131 : vector<8x128xf32>
    %2133 = arith.addf %2062, %2132 : vector<8x128xf32>
    %c483 = arith.constant 483 : index
    %2134 = memref.load %arg4[%c483] : memref<512xf32, #tpu.memory_space<smem>>
    %2135 = vector.broadcast %2134 : f32 to vector<8x128xf32>
    %2136 = arith.mulf %2121, %2135 : vector<8x128xf32>
    %2137 = arith.addf %2066, %2136 : vector<8x128xf32>
    %c484 = arith.constant 484 : index
    %2138 = memref.load %arg4[%c484] : memref<512xf32, #tpu.memory_space<smem>>
    %2139 = vector.broadcast %2138 : f32 to vector<8x128xf32>
    %2140 = arith.mulf %2121, %2139 : vector<8x128xf32>
    %2141 = arith.addf %2070, %2140 : vector<8x128xf32>
    %c485 = arith.constant 485 : index
    %2142 = memref.load %arg4[%c485] : memref<512xf32, #tpu.memory_space<smem>>
    %2143 = vector.broadcast %2142 : f32 to vector<8x128xf32>
    %2144 = arith.mulf %2121, %2143 : vector<8x128xf32>
    %2145 = arith.addf %2074, %2144 : vector<8x128xf32>
    %c486 = arith.constant 486 : index
    %2146 = memref.load %arg4[%c486] : memref<512xf32, #tpu.memory_space<smem>>
    %2147 = vector.broadcast %2146 : f32 to vector<8x128xf32>
    %2148 = arith.mulf %2121, %2147 : vector<8x128xf32>
    %2149 = arith.addf %2078, %2148 : vector<8x128xf32>
    %c487 = arith.constant 487 : index
    %2150 = memref.load %arg4[%c487] : memref<512xf32, #tpu.memory_space<smem>>
    %2151 = vector.broadcast %2150 : f32 to vector<8x128xf32>
    %2152 = arith.mulf %2121, %2151 : vector<8x128xf32>
    %2153 = arith.addf %2082, %2152 : vector<8x128xf32>
    %c488 = arith.constant 488 : index
    %2154 = memref.load %arg4[%c488] : memref<512xf32, #tpu.memory_space<smem>>
    %2155 = vector.broadcast %2154 : f32 to vector<8x128xf32>
    %2156 = arith.mulf %2121, %2155 : vector<8x128xf32>
    %2157 = arith.addf %2086, %2156 : vector<8x128xf32>
    %c489 = arith.constant 489 : index
    %2158 = memref.load %arg4[%c489] : memref<512xf32, #tpu.memory_space<smem>>
    %2159 = vector.broadcast %2158 : f32 to vector<8x128xf32>
    %2160 = arith.mulf %2121, %2159 : vector<8x128xf32>
    %2161 = arith.addf %2090, %2160 : vector<8x128xf32>
    %c490 = arith.constant 490 : index
    %2162 = memref.load %arg4[%c490] : memref<512xf32, #tpu.memory_space<smem>>
    %2163 = vector.broadcast %2162 : f32 to vector<8x128xf32>
    %2164 = arith.mulf %2121, %2163 : vector<8x128xf32>
    %2165 = arith.addf %2094, %2164 : vector<8x128xf32>
    %c491 = arith.constant 491 : index
    %2166 = memref.load %arg4[%c491] : memref<512xf32, #tpu.memory_space<smem>>
    %2167 = vector.broadcast %2166 : f32 to vector<8x128xf32>
    %2168 = arith.mulf %2121, %2167 : vector<8x128xf32>
    %2169 = arith.addf %2098, %2168 : vector<8x128xf32>
    %c492 = arith.constant 492 : index
    %2170 = memref.load %arg4[%c492] : memref<512xf32, #tpu.memory_space<smem>>
    %2171 = vector.broadcast %2170 : f32 to vector<8x128xf32>
    %2172 = arith.mulf %2121, %2171 : vector<8x128xf32>
    %2173 = arith.addf %2102, %2172 : vector<8x128xf32>
    %c493 = arith.constant 493 : index
    %2174 = memref.load %arg4[%c493] : memref<512xf32, #tpu.memory_space<smem>>
    %2175 = vector.broadcast %2174 : f32 to vector<8x128xf32>
    %2176 = arith.mulf %2121, %2175 : vector<8x128xf32>
    %2177 = arith.addf %2106, %2176 : vector<8x128xf32>
    %c494 = arith.constant 494 : index
    %2178 = memref.load %arg4[%c494] : memref<512xf32, #tpu.memory_space<smem>>
    %2179 = vector.broadcast %2178 : f32 to vector<8x128xf32>
    %2180 = arith.mulf %2121, %2179 : vector<8x128xf32>
    %2181 = arith.addf %2110, %2180 : vector<8x128xf32>
    %c495 = arith.constant 495 : index
    %2182 = memref.load %arg4[%c495] : memref<512xf32, #tpu.memory_space<smem>>
    %2183 = vector.broadcast %2182 : f32 to vector<8x128xf32>
    %2184 = arith.mulf %2121, %2183 : vector<8x128xf32>
    %2185 = arith.addf %2114, %2184 : vector<8x128xf32>
    %c31_64 = arith.constant 31 : index
    %2186 = memref.load %arg2[%c31_64] : memref<32xf32, #tpu.memory_space<smem>>
    %2187 = vector.broadcast %2186 : f32 to vector<8x128xf32>
    %2188 = arith.mulf %0, %2187 : vector<8x128xf32>
    %c31_65 = arith.constant 31 : index
    %2189 = memref.load %arg3[%c31_65] : memref<32xf32, #tpu.memory_space<smem>>
    %2190 = vector.broadcast %2189 : f32 to vector<8x128xf32>
    %2191 = arith.addf %2188, %2190 : vector<8x128xf32>
    %2192 = math.tanh %2191 : vector<8x128xf32>
    %c496 = arith.constant 496 : index
    %2193 = memref.load %arg4[%c496] : memref<512xf32, #tpu.memory_space<smem>>
    %2194 = vector.broadcast %2193 : f32 to vector<8x128xf32>
    %2195 = arith.mulf %2192, %2194 : vector<8x128xf32>
    %2196 = arith.addf %2125, %2195 : vector<8x128xf32>
    %c497 = arith.constant 497 : index
    %2197 = memref.load %arg4[%c497] : memref<512xf32, #tpu.memory_space<smem>>
    %2198 = vector.broadcast %2197 : f32 to vector<8x128xf32>
    %2199 = arith.mulf %2192, %2198 : vector<8x128xf32>
    %2200 = arith.addf %2129, %2199 : vector<8x128xf32>
    %c498 = arith.constant 498 : index
    %2201 = memref.load %arg4[%c498] : memref<512xf32, #tpu.memory_space<smem>>
    %2202 = vector.broadcast %2201 : f32 to vector<8x128xf32>
    %2203 = arith.mulf %2192, %2202 : vector<8x128xf32>
    %2204 = arith.addf %2133, %2203 : vector<8x128xf32>
    %c499 = arith.constant 499 : index
    %2205 = memref.load %arg4[%c499] : memref<512xf32, #tpu.memory_space<smem>>
    %2206 = vector.broadcast %2205 : f32 to vector<8x128xf32>
    %2207 = arith.mulf %2192, %2206 : vector<8x128xf32>
    %2208 = arith.addf %2137, %2207 : vector<8x128xf32>
    %c500 = arith.constant 500 : index
    %2209 = memref.load %arg4[%c500] : memref<512xf32, #tpu.memory_space<smem>>
    %2210 = vector.broadcast %2209 : f32 to vector<8x128xf32>
    %2211 = arith.mulf %2192, %2210 : vector<8x128xf32>
    %2212 = arith.addf %2141, %2211 : vector<8x128xf32>
    %c501 = arith.constant 501 : index
    %2213 = memref.load %arg4[%c501] : memref<512xf32, #tpu.memory_space<smem>>
    %2214 = vector.broadcast %2213 : f32 to vector<8x128xf32>
    %2215 = arith.mulf %2192, %2214 : vector<8x128xf32>
    %2216 = arith.addf %2145, %2215 : vector<8x128xf32>
    %c502 = arith.constant 502 : index
    %2217 = memref.load %arg4[%c502] : memref<512xf32, #tpu.memory_space<smem>>
    %2218 = vector.broadcast %2217 : f32 to vector<8x128xf32>
    %2219 = arith.mulf %2192, %2218 : vector<8x128xf32>
    %2220 = arith.addf %2149, %2219 : vector<8x128xf32>
    %c503 = arith.constant 503 : index
    %2221 = memref.load %arg4[%c503] : memref<512xf32, #tpu.memory_space<smem>>
    %2222 = vector.broadcast %2221 : f32 to vector<8x128xf32>
    %2223 = arith.mulf %2192, %2222 : vector<8x128xf32>
    %2224 = arith.addf %2153, %2223 : vector<8x128xf32>
    %c504 = arith.constant 504 : index
    %2225 = memref.load %arg4[%c504] : memref<512xf32, #tpu.memory_space<smem>>
    %2226 = vector.broadcast %2225 : f32 to vector<8x128xf32>
    %2227 = arith.mulf %2192, %2226 : vector<8x128xf32>
    %2228 = arith.addf %2157, %2227 : vector<8x128xf32>
    %c505 = arith.constant 505 : index
    %2229 = memref.load %arg4[%c505] : memref<512xf32, #tpu.memory_space<smem>>
    %2230 = vector.broadcast %2229 : f32 to vector<8x128xf32>
    %2231 = arith.mulf %2192, %2230 : vector<8x128xf32>
    %2232 = arith.addf %2161, %2231 : vector<8x128xf32>
    %c506 = arith.constant 506 : index
    %2233 = memref.load %arg4[%c506] : memref<512xf32, #tpu.memory_space<smem>>
    %2234 = vector.broadcast %2233 : f32 to vector<8x128xf32>
    %2235 = arith.mulf %2192, %2234 : vector<8x128xf32>
    %2236 = arith.addf %2165, %2235 : vector<8x128xf32>
    %c507 = arith.constant 507 : index
    %2237 = memref.load %arg4[%c507] : memref<512xf32, #tpu.memory_space<smem>>
    %2238 = vector.broadcast %2237 : f32 to vector<8x128xf32>
    %2239 = arith.mulf %2192, %2238 : vector<8x128xf32>
    %2240 = arith.addf %2169, %2239 : vector<8x128xf32>
    %c508 = arith.constant 508 : index
    %2241 = memref.load %arg4[%c508] : memref<512xf32, #tpu.memory_space<smem>>
    %2242 = vector.broadcast %2241 : f32 to vector<8x128xf32>
    %2243 = arith.mulf %2192, %2242 : vector<8x128xf32>
    %2244 = arith.addf %2173, %2243 : vector<8x128xf32>
    %c509 = arith.constant 509 : index
    %2245 = memref.load %arg4[%c509] : memref<512xf32, #tpu.memory_space<smem>>
    %2246 = vector.broadcast %2245 : f32 to vector<8x128xf32>
    %2247 = arith.mulf %2192, %2246 : vector<8x128xf32>
    %2248 = arith.addf %2177, %2247 : vector<8x128xf32>
    %c510 = arith.constant 510 : index
    %2249 = memref.load %arg4[%c510] : memref<512xf32, #tpu.memory_space<smem>>
    %2250 = vector.broadcast %2249 : f32 to vector<8x128xf32>
    %2251 = arith.mulf %2192, %2250 : vector<8x128xf32>
    %2252 = arith.addf %2181, %2251 : vector<8x128xf32>
    %c511 = arith.constant 511 : index
    %2253 = memref.load %arg4[%c511] : memref<512xf32, #tpu.memory_space<smem>>
    %2254 = vector.broadcast %2253 : f32 to vector<8x128xf32>
    %2255 = arith.mulf %2192, %2254 : vector<8x128xf32>
    %2256 = arith.addf %2185, %2255 : vector<8x128xf32>
    %c0_66 = arith.constant 0 : index
    %2257 = memref.load %arg5[%c0_66] : memref<16xf32, #tpu.memory_space<smem>>
    %2258 = vector.broadcast %2257 : f32 to vector<8x128xf32>
    %2259 = arith.addf %2196, %2258 : vector<8x128xf32>
    %2260 = math.tanh %2259 : vector<8x128xf32>
    %c1_67 = arith.constant 1 : index
    %2261 = memref.load %arg5[%c1_67] : memref<16xf32, #tpu.memory_space<smem>>
    %2262 = vector.broadcast %2261 : f32 to vector<8x128xf32>
    %2263 = arith.addf %2200, %2262 : vector<8x128xf32>
    %2264 = math.tanh %2263 : vector<8x128xf32>
    %c2_68 = arith.constant 2 : index
    %2265 = memref.load %arg5[%c2_68] : memref<16xf32, #tpu.memory_space<smem>>
    %2266 = vector.broadcast %2265 : f32 to vector<8x128xf32>
    %2267 = arith.addf %2204, %2266 : vector<8x128xf32>
    %2268 = math.tanh %2267 : vector<8x128xf32>
    %c3_69 = arith.constant 3 : index
    %2269 = memref.load %arg5[%c3_69] : memref<16xf32, #tpu.memory_space<smem>>
    %2270 = vector.broadcast %2269 : f32 to vector<8x128xf32>
    %2271 = arith.addf %2208, %2270 : vector<8x128xf32>
    %2272 = math.tanh %2271 : vector<8x128xf32>
    %c4_70 = arith.constant 4 : index
    %2273 = memref.load %arg5[%c4_70] : memref<16xf32, #tpu.memory_space<smem>>
    %2274 = vector.broadcast %2273 : f32 to vector<8x128xf32>
    %2275 = arith.addf %2212, %2274 : vector<8x128xf32>
    %2276 = math.tanh %2275 : vector<8x128xf32>
    %c5_71 = arith.constant 5 : index
    %2277 = memref.load %arg5[%c5_71] : memref<16xf32, #tpu.memory_space<smem>>
    %2278 = vector.broadcast %2277 : f32 to vector<8x128xf32>
    %2279 = arith.addf %2216, %2278 : vector<8x128xf32>
    %2280 = math.tanh %2279 : vector<8x128xf32>
    %c6_72 = arith.constant 6 : index
    %2281 = memref.load %arg5[%c6_72] : memref<16xf32, #tpu.memory_space<smem>>
    %2282 = vector.broadcast %2281 : f32 to vector<8x128xf32>
    %2283 = arith.addf %2220, %2282 : vector<8x128xf32>
    %2284 = math.tanh %2283 : vector<8x128xf32>
    %c7_73 = arith.constant 7 : index
    %2285 = memref.load %arg5[%c7_73] : memref<16xf32, #tpu.memory_space<smem>>
    %2286 = vector.broadcast %2285 : f32 to vector<8x128xf32>
    %2287 = arith.addf %2224, %2286 : vector<8x128xf32>
    %2288 = math.tanh %2287 : vector<8x128xf32>
    %c8_74 = arith.constant 8 : index
    %2289 = memref.load %arg5[%c8_74] : memref<16xf32, #tpu.memory_space<smem>>
    %2290 = vector.broadcast %2289 : f32 to vector<8x128xf32>
    %2291 = arith.addf %2228, %2290 : vector<8x128xf32>
    %2292 = math.tanh %2291 : vector<8x128xf32>
    %c9_75 = arith.constant 9 : index
    %2293 = memref.load %arg5[%c9_75] : memref<16xf32, #tpu.memory_space<smem>>
    %2294 = vector.broadcast %2293 : f32 to vector<8x128xf32>
    %2295 = arith.addf %2232, %2294 : vector<8x128xf32>
    %2296 = math.tanh %2295 : vector<8x128xf32>
    %c10_76 = arith.constant 10 : index
    %2297 = memref.load %arg5[%c10_76] : memref<16xf32, #tpu.memory_space<smem>>
    %2298 = vector.broadcast %2297 : f32 to vector<8x128xf32>
    %2299 = arith.addf %2236, %2298 : vector<8x128xf32>
    %2300 = math.tanh %2299 : vector<8x128xf32>
    %c11_77 = arith.constant 11 : index
    %2301 = memref.load %arg5[%c11_77] : memref<16xf32, #tpu.memory_space<smem>>
    %2302 = vector.broadcast %2301 : f32 to vector<8x128xf32>
    %2303 = arith.addf %2240, %2302 : vector<8x128xf32>
    %2304 = math.tanh %2303 : vector<8x128xf32>
    %c12_78 = arith.constant 12 : index
    %2305 = memref.load %arg5[%c12_78] : memref<16xf32, #tpu.memory_space<smem>>
    %2306 = vector.broadcast %2305 : f32 to vector<8x128xf32>
    %2307 = arith.addf %2244, %2306 : vector<8x128xf32>
    %2308 = math.tanh %2307 : vector<8x128xf32>
    %c13_79 = arith.constant 13 : index
    %2309 = memref.load %arg5[%c13_79] : memref<16xf32, #tpu.memory_space<smem>>
    %2310 = vector.broadcast %2309 : f32 to vector<8x128xf32>
    %2311 = arith.addf %2248, %2310 : vector<8x128xf32>
    %2312 = math.tanh %2311 : vector<8x128xf32>
    %c14_80 = arith.constant 14 : index
    %2313 = memref.load %arg5[%c14_80] : memref<16xf32, #tpu.memory_space<smem>>
    %2314 = vector.broadcast %2313 : f32 to vector<8x128xf32>
    %2315 = arith.addf %2252, %2314 : vector<8x128xf32>
    %2316 = math.tanh %2315 : vector<8x128xf32>
    %c15_81 = arith.constant 15 : index
    %2317 = memref.load %arg5[%c15_81] : memref<16xf32, #tpu.memory_space<smem>>
    %2318 = vector.broadcast %2317 : f32 to vector<8x128xf32>
    %2319 = arith.addf %2256, %2318 : vector<8x128xf32>
    %2320 = math.tanh %2319 : vector<8x128xf32>
    %c0_82 = arith.constant 0 : index
    %2321 = memref.load %arg6[%c0_82] : memref<16xf32, #tpu.memory_space<smem>>
    %2322 = vector.broadcast %2321 : f32 to vector<8x128xf32>
    %2323 = arith.mulf %2260, %2322 : vector<8x128xf32>
    %c1_83 = arith.constant 1 : index
    %2324 = memref.load %arg6[%c1_83] : memref<16xf32, #tpu.memory_space<smem>>
    %2325 = vector.broadcast %2324 : f32 to vector<8x128xf32>
    %2326 = arith.mulf %2264, %2325 : vector<8x128xf32>
    %2327 = arith.addf %2323, %2326 : vector<8x128xf32>
    %c2_84 = arith.constant 2 : index
    %2328 = memref.load %arg6[%c2_84] : memref<16xf32, #tpu.memory_space<smem>>
    %2329 = vector.broadcast %2328 : f32 to vector<8x128xf32>
    %2330 = arith.mulf %2268, %2329 : vector<8x128xf32>
    %2331 = arith.addf %2327, %2330 : vector<8x128xf32>
    %c3_85 = arith.constant 3 : index
    %2332 = memref.load %arg6[%c3_85] : memref<16xf32, #tpu.memory_space<smem>>
    %2333 = vector.broadcast %2332 : f32 to vector<8x128xf32>
    %2334 = arith.mulf %2272, %2333 : vector<8x128xf32>
    %2335 = arith.addf %2331, %2334 : vector<8x128xf32>
    %c4_86 = arith.constant 4 : index
    %2336 = memref.load %arg6[%c4_86] : memref<16xf32, #tpu.memory_space<smem>>
    %2337 = vector.broadcast %2336 : f32 to vector<8x128xf32>
    %2338 = arith.mulf %2276, %2337 : vector<8x128xf32>
    %2339 = arith.addf %2335, %2338 : vector<8x128xf32>
    %c5_87 = arith.constant 5 : index
    %2340 = memref.load %arg6[%c5_87] : memref<16xf32, #tpu.memory_space<smem>>
    %2341 = vector.broadcast %2340 : f32 to vector<8x128xf32>
    %2342 = arith.mulf %2280, %2341 : vector<8x128xf32>
    %2343 = arith.addf %2339, %2342 : vector<8x128xf32>
    %c6_88 = arith.constant 6 : index
    %2344 = memref.load %arg6[%c6_88] : memref<16xf32, #tpu.memory_space<smem>>
    %2345 = vector.broadcast %2344 : f32 to vector<8x128xf32>
    %2346 = arith.mulf %2284, %2345 : vector<8x128xf32>
    %2347 = arith.addf %2343, %2346 : vector<8x128xf32>
    %c7_89 = arith.constant 7 : index
    %2348 = memref.load %arg6[%c7_89] : memref<16xf32, #tpu.memory_space<smem>>
    %2349 = vector.broadcast %2348 : f32 to vector<8x128xf32>
    %2350 = arith.mulf %2288, %2349 : vector<8x128xf32>
    %2351 = arith.addf %2347, %2350 : vector<8x128xf32>
    %c8_90 = arith.constant 8 : index
    %2352 = memref.load %arg6[%c8_90] : memref<16xf32, #tpu.memory_space<smem>>
    %2353 = vector.broadcast %2352 : f32 to vector<8x128xf32>
    %2354 = arith.mulf %2292, %2353 : vector<8x128xf32>
    %2355 = arith.addf %2351, %2354 : vector<8x128xf32>
    %c9_91 = arith.constant 9 : index
    %2356 = memref.load %arg6[%c9_91] : memref<16xf32, #tpu.memory_space<smem>>
    %2357 = vector.broadcast %2356 : f32 to vector<8x128xf32>
    %2358 = arith.mulf %2296, %2357 : vector<8x128xf32>
    %2359 = arith.addf %2355, %2358 : vector<8x128xf32>
    %c10_92 = arith.constant 10 : index
    %2360 = memref.load %arg6[%c10_92] : memref<16xf32, #tpu.memory_space<smem>>
    %2361 = vector.broadcast %2360 : f32 to vector<8x128xf32>
    %2362 = arith.mulf %2300, %2361 : vector<8x128xf32>
    %2363 = arith.addf %2359, %2362 : vector<8x128xf32>
    %c11_93 = arith.constant 11 : index
    %2364 = memref.load %arg6[%c11_93] : memref<16xf32, #tpu.memory_space<smem>>
    %2365 = vector.broadcast %2364 : f32 to vector<8x128xf32>
    %2366 = arith.mulf %2304, %2365 : vector<8x128xf32>
    %2367 = arith.addf %2363, %2366 : vector<8x128xf32>
    %c12_94 = arith.constant 12 : index
    %2368 = memref.load %arg6[%c12_94] : memref<16xf32, #tpu.memory_space<smem>>
    %2369 = vector.broadcast %2368 : f32 to vector<8x128xf32>
    %2370 = arith.mulf %2308, %2369 : vector<8x128xf32>
    %2371 = arith.addf %2367, %2370 : vector<8x128xf32>
    %c13_95 = arith.constant 13 : index
    %2372 = memref.load %arg6[%c13_95] : memref<16xf32, #tpu.memory_space<smem>>
    %2373 = vector.broadcast %2372 : f32 to vector<8x128xf32>
    %2374 = arith.mulf %2312, %2373 : vector<8x128xf32>
    %2375 = arith.addf %2371, %2374 : vector<8x128xf32>
    %c14_96 = arith.constant 14 : index
    %2376 = memref.load %arg6[%c14_96] : memref<16xf32, #tpu.memory_space<smem>>
    %2377 = vector.broadcast %2376 : f32 to vector<8x128xf32>
    %2378 = arith.mulf %2316, %2377 : vector<8x128xf32>
    %2379 = arith.addf %2375, %2378 : vector<8x128xf32>
    %c15_97 = arith.constant 15 : index
    %2380 = memref.load %arg6[%c15_97] : memref<16xf32, #tpu.memory_space<smem>>
    %2381 = vector.broadcast %2380 : f32 to vector<8x128xf32>
    %2382 = arith.mulf %2320, %2381 : vector<8x128xf32>
    %2383 = arith.addf %2379, %2382 : vector<8x128xf32>
    %c0_98 = arith.constant 0 : index
    %2384 = memref.load %arg7[%c0_98] : memref<1xf32, #tpu.memory_space<smem>>
    %2385 = vector.broadcast %2384 : f32 to vector<8x128xf32>
    %2386 = arith.addf %2383, %2385 : vector<8x128xf32>
    %cst = arith.constant 0.000000e+00 : f32
    %2387 = vector.broadcast %cst : f32 to vector<8x128xf32>
    %2388 = arith.maximumf %2386, %2387 : vector<8x128xf32>
    %2389 = math.absf %2386 : vector<8x128xf32>
    %cst_99 = arith.constant 0.000000e+00 : f32
    %2390 = vector.broadcast %cst_99 : f32 to vector<8x128xf32>
    %2391 = arith.subf %2390, %2389 : vector<8x128xf32>
    %2392 = math.exp %2391 : vector<8x128xf32>
    %2393 = math.log1p %2392 : vector<8x128xf32>
    %2394 = arith.addf %2388, %2393 : vector<8x128xf32>
    %c0_100 = arith.constant 0 : index
    %2395 = memref.load %arg1[%c0_100] : memref<3xf32, #tpu.memory_space<smem>>
    %c1_101 = arith.constant 1 : index
    %2396 = memref.load %arg1[%c1_101] : memref<3xf32, #tpu.memory_space<smem>>
    %c2_102 = arith.constant 2 : index
    %2397 = memref.load %arg1[%c2_102] : memref<3xf32, #tpu.memory_space<smem>>
    %cst_103 = arith.constant 0.000000e+00 : f32
    %2398 = arith.maximumf %2396, %cst_103 : f32
    %cst_104 = arith.constant 1.000000e+00 : f32
    %2399 = arith.subf %cst_104, %2395 : f32
    %cst_105 = arith.constant 9.99999997E-7 : f32
    %cst_106 = arith.constant 0.999998986 : f32
    %2400 = vector.broadcast %cst_105 : f32 to vector<8x128xf32>
    %2401 = arith.maximumf %2400, %0 : vector<8x128xf32>
    %2402 = vector.broadcast %cst_106 : f32 to vector<8x128xf32>
    %2403 = arith.minimumf %2402, %2401 : vector<8x128xf32>
    %cst_107 = arith.constant 1.000000e+00 : f32
    %2404 = vector.broadcast %cst_107 : f32 to vector<8x128xf32>
    %2405 = arith.subf %2404, %2403 : vector<8x128xf32>
    %2406 = math.log %2405 : vector<8x128xf32>
    %2407 = vector.broadcast %2398 : f32 to vector<8x128xf32>
    %2408 = arith.mulf %2407, %2406 : vector<8x128xf32>
    %2409 = math.log %2403 : vector<8x128xf32>
    %2410 = vector.broadcast %2399 : f32 to vector<8x128xf32>
    %2411 = arith.mulf %2410, %2409 : vector<8x128xf32>
    %2412 = arith.addf %2408, %2411 : vector<8x128xf32>
    %2413 = math.exp %2412 : vector<8x128xf32>
    %2414 = vector.broadcast %2397 : f32 to vector<8x128xf32>
    %2415 = arith.mulf %2414, %2413 : vector<8x128xf32>
    %2416 = arith.mulf %2415, %2394 : vector<8x128xf32>
    %c0_108 = arith.constant 0 : index
    %c0_109 = arith.constant 0 : index
    %c0_110 = arith.constant 0 : index
    %2417 = vector.load %arg9[%c0_108, %c0_109, %c0_110] : memref<1x8x128xf32, #tpu.memory_space<vmem>>, vector<1x8x128xf32>
    %2418 = vector.shape_cast %2417 : vector<1x8x128xf32> to vector<8x128xf32>
    %2419 = vector.shape_cast %2416 : vector<8x128xf32> to vector<1x8x128xf32>
    tpu.vector_store %arg9[%c0_108, %c0_109, %c0_110], %2419 {strides = array<i32>} : memref<1x8x128xf32, #tpu.memory_space<vmem>>, vector<1x8x128xf32>,
    return
  }
  func.func @transform_0(%arg0: i32) -> i32 {
    %c0_i32 = arith.constant 0 : i32
    %c0_i32_0 = arith.constant 0 : i32
    return %c0_i32 : i32
  }
  func.func @transform_1(%arg0: i32) -> i32 {
    %c0_i32 = arith.constant 0 : i32
    %c0_i32_0 = arith.constant 0 : i32
    return %c0_i32 : i32
  }
  func.func @transform_2(%arg0: i32) -> i32 {
    %c0_i32 = arith.constant 0 : i32
    %c0_i32_0 = arith.constant 0 : i32
    return %c0_i32 : i32
  }
  func.func @transform_3(%arg0: i32) -> i32 {
    %c0_i32 = arith.constant 0 : i32
    %c0_i32_0 = arith.constant 0 : i32
    return %c0_i32 : i32
  }
  func.func @transform_4(%arg0: i32) -> i32 {
    %c0_i32 = arith.constant 0 : i32
    %c0_i32_0 = arith.constant 0 : i32
    return %c0_i32 : i32
  }
  func.func @transform_5(%arg0: i32) -> i32 {
    %c0_i32 = arith.constant 0 : i32
    %c0_i32_0 = arith.constant 0 : i32
    return %c0_i32 : i32
  }
  func.func @transform_6(%arg0: i32) -> i32 {
    %c0_i32 = arith.constant 0 : i32
    %c0_i32_0 = arith.constant 0 : i32
    return %c0_i32 : i32
  }
  func.func @transform_7(%arg0: i32) -> (i32, i32) {
    %c0_i32 = arith.constant 0 : i32
    %c0_i32_0 = arith.constant 0 : i32
    return %arg0, %c0_i32 : i32, i32
  }
  func.func @transform_8(%arg0: i32) -> (i32, i32, i32) {
    %c0_i32 = arith.constant 0 : i32
    %c0_i32_0 = arith.constant 0 : i32
    %c0_i32_1 = arith.constant 0 : i32
    return %c0_i32, %arg0, %c0_i32_0 : i32, i32, i32
  }
}

</mosaic_0001>

<bundles_post_ra>
// kernel: tpu_custom_call.1
= control target key start
LH: loop header
LB: loop body
LE: loop exit
PB: predicated region body
PF: predicated region fallthrough
CT: control target
= control target key end

     0   :  { %s7029_s0 = inlined_call_operand.vmem [shape: f32[3], index: 0, kind: input, shape index: {}]   ;;  %s7030_s1 = inlined_call_operand.vmem [shape: f32[32], index: 1, kind: input, shape index: {}]   ;;  %s7031_s2 = inlined_call_operand.vmem [shape: f32[32], index: 2, kind: input, shape index: {}]   ;;  %s7032_s3 = inlined_call_operand.vmem [shape: f32[512], index: 3, kind: input, shape index: {}]   ;;  %s7033_s4 = inlined_call_operand.vmem [shape: f32[16], index: 4, kind: input, shape index: {}]   ;;  %s7034_s5 = inlined_call_operand.vmem [shape: f32[16], index: 5, kind: input, shape index: {}]   ;;  %s7035_s6 = inlined_call_operand.<no memory space> [shape: f32[1], index: 6, kind: input, shape index: {}]   ;;  %s7036_s7 = inlined_call_operand.hbm [shape: f32[16,128], index: 7, kind: input, shape index: {}]   ;;  %s7037_s8 = inlined_call_operand.hbm [shape: f32[1,16,128], index: 8, kind: output, shape index: {}]  }
   0x1   :  { %7083 = sst [smem:[#allocation187_spill]] %s7029_s0 }
   0x2   :  { %7084 = sst [smem:[#allocation188_spill]] %s7030_s1 }
   0x3   :  { %7085 = sst [smem:[#allocation189_spill]] %s7031_s2 }
   0x4   :  { %7086 = sst [smem:[#allocation190_spill]] %s7032_s3 }
   0x5   :  { %7087 = sst [smem:[#allocation191_spill]] %s7033_s4 }
   0x6   :  { %7088 = sst [smem:[#allocation192_spill]] %s7034_s5 }
   0x7   :  { %7089 = sst [smem:[#allocation193_spill]] %s7036_s7 }
   0x8   :  { %7090 = sst [smem:[#allocation194_spill]] %s7037_s8 }
   0x9   :  { %13 = sst [smem:[#allocation2]] %s7035_s6 }
   0xa   :  { %14 = vsyncpa [#allocation6], 0 }
   0xb   :  { %15 = vsyncpa [#allocation8], 0 }
   0xc   :  { %16 = vsyncpa [#allocation11], 0 }
   0xd   :  { %17 = vsyncpa [#allocation14], 0 }
   0xe   :  { %18 = vsyncpa [#allocation4], 0 }
   0xf   :  { %20 = vsyncpa [#allocation4 + $0x1], 0 }
  0x10   :  { %21 = vsyncpa [#allocation5], 0 }
  0x11   :  { %23 = vsyncpa [#allocation5 + $0x1], 0  ;;  %s4072_s29 = smov 0   ;;  %s4074_s30 = smov 0  }
  0x12   :  { %s4076_s9 = smov 0   ;;  %s4078_s10 = smov 0  }
  0x13 LB: > { %7091 = sst [smem:[#allocation23_spill]] %s4001_s29  ;;  %s4096_s13 = sadd.s32 4294967295, %s4013_s10   ;;  %s4013_s10 = sphi %s4078_s10, %s7996_s10   ;;  %s4009_s9 = sphi %s4076_s9, %s7999_s9   ;;  %s4005_s30 = sphi %s4074_s30, %s7998_s30   ;;  %s4001_s29 = sphi %s4072_s29, %s7997_s29  }
  0x14   : > { %7092 = sst [smem:[#allocation24_spill]] %s4005_s30  ;;  %p2969_p0 = scmp.ge.s32.totalorder %s4013_s10, 1 }
  0x15   : > { %7093 = sst [smem:[#allocation25_spill]] %s4009_s9  ;;  %p7038_p1 = scmp.eq.s32.totalorder %s4096_s13, 0 }
  0x16   : > { %7094 = sst [smem:[#allocation26_spill]] %s4013_s10  ;;  %p233_p2 = scmp.lt.s32.totalorder %s4013_s10, 3 }
  0x17   : > { %s7095_s1 = sld [smem:[#allocation188_spill]] }
  0x18   : > { %7096 = sst [smem:[#allocation27_spill]] %s4096_s13  ;;  %p4101_p3 = pnand %p2969_p0, %p233_p2 }
  0x19   : > { %s7098_s3 = sld [smem:[#allocation190_spill]] }
  0x1a   : > { %s7097_s14 = scalar_select %p4101_p3, 1, 0 }
  0x1b   : > { %p3625_p5 = pneg %p4101_p3  ;;  %s7099_s0 = sld [smem:[#allocation187_spill]] }
  0x1c   : > { %s7101_s2 = sld [smem:[#allocation189_spill]] }
  0x1d   : > { %s257_s12 = sshll.u32 %s7095_s1, 4  ;;  %p4116_p6 = pnand %p3625_p5, %p7038_p1  ;;  %s258_s12 = int_to_ptr.vmem [resolvable:$true] %s257_s12 }
  0x1e   : > { %s3815_s25 = scalar_lea.vmem %s258_s12, 16  ;;  %p3823_p11 = scmp.lt.s32.totalorder %s258_s12, %s258_s12 }
  0x1f   : > { %s279_s17 = sshll.u32 %s7098_s3, 4  ;;  %p3816_p7 = scmp.ne.s32.totalorder %s258_s12, %s3815_s25  ;;  %s280_s17 = int_to_ptr.vmem [resolvable:$true] %s279_s17 }
  0x20   : > { %p4129_p8 = pneg %p4116_p6  ;;  %p3824_p12 = scmp.lt.s32.totalorder %s3815_s25, %s3815_s25 }
  0x21   : > { %s246_s20 = sshll.u32 %s7099_s0, 4  ;;  %s4120_s20 = int_to_ptr.vmem [resolvable:$true] %s246_s20 }
  0x22   : > { %s268_s24 = sshll.u32 %s7101_s2, 4  ;;  %p3818_p9 = pnand %p4129_p8, %p3816_p7  ;;  %s4125_s24 = int_to_ptr.vmem [resolvable:$true] %s268_s24 }
  0x23   : > { %p3825_p13 = por %p3824_p12, %p3823_p11 }
  0x24   : > { %p3819_p10 = pneg %p3818_p9 }
  0x26   : > { %p3826_p0 = pnand %p3825_p13, %p3819_p10 }
  0x28   : > { %3829 = shalt.err (!%p3826_p0)
}
  0x29   : > { %s4015_s27 = smov [#allocation7]   ;;  %s3830_s28 = scalar_lea.vmem %s280_s17, 64 }
  0x2a   : > { %3631 = dma.vmem_to_smem (!%p4116_p6), %s258_s12, 16, %s4015_s27, [#allocation8]  }
  0x2b   : > { %p3831_p2 = scmp.ne.s32.totalorder %s280_s17, %s3830_s28  ;;  %p3838_p1 = scmp.lt.s32.totalorder %s280_s17, %s280_s17 }
  0x2c   : > { %p3839_p3 = scmp.lt.s32.totalorder %s3830_s28, %s3830_s28 }
  0x2d   : > { %p3833_p5 = pnand %p3831_p2, %p4129_p8 }
  0x2e   : > { %p3840_p7 = por %p3839_p3, %p3838_p1 }
  0x2f   : > { %p3834_p4 = pneg %p3833_p5 }
  0x31   : > { %p3841_p9 = pnand %p3840_p7, %p3834_p4 }
  0x33   : > { %3844 = shalt.err (!%p3841_p9)
}
  0x34   : > { %s4016_s6 = smov [#allocation10]   ;;  %s3845_s11 = scalar_lea.vmem %s4120_s20, 16 }
  0x35   : > { %3637 = dma.vmem_to_smem (!%p4116_p6), %s280_s17, 64, %s4016_s6, [#allocation11]  }
  0x36   : > { %p3846_p10 = scmp.ne.s32.totalorder %s4120_s20, %s3845_s11  ;;  %p3853_p13 = scmp.lt.s32.totalorder %s4120_s20, %s4120_s20 }
  0x37   : > { %p3854_p0 = scmp.lt.s32.totalorder %s3845_s11, %s3845_s11 }
  0x38   : > { %p3848_p11 = pnand %p3846_p10, %p4129_p8 }
  0x39   : > { %p3855_p2 = por %p3854_p0, %p3853_p13 }
  0x3a   : > { %p3849_p12 = pneg %p3848_p11 }
  0x3c   : > { %p3856_p1 = pnand %p3855_p2, %p3849_p12 }
  0x3e   : > { %3859 = shalt.err (!%p3856_p1)
}
  0x3f   : > { %s4017_s12 = smov [#allocation3]   ;;  %s3860_s15 = scalar_lea.vmem %s4125_s24, 16 }
  0x40   : > { %3628 = dma.vmem_to_smem (!%p4116_p6), %s4120_s20, 16, %s4017_s12, [#allocation6]  }
  0x41   : > { %p3861_p3 = scmp.ne.s32.totalorder %s4125_s24, %s3860_s15  ;;  %p3868_p7 = scmp.lt.s32.totalorder %s4125_s24, %s4125_s24 }
  0x42   : > { %p3869_p9 = scmp.lt.s32.totalorder %s3860_s15, %s3860_s15 }
  0x43   : > { %p3863_p4 = pnand %p3861_p3, %p4129_p8 }
  0x44   : > { %p3870_p10 = por %p3869_p9, %p3868_p7 }
  0x45   : > { %p3864_p5 = pneg %p3863_p4 }
  0x47   : > { %p3871_p11 = pnand %p3870_p10, %p3864_p5 }
  0x49   : > { %3874 = shalt.err (!%p3871_p11)
}
  0x4a   : > { %s4018_s16 = smov [#allocation9]   ;;  %s7103_s4 = sld [smem:[#allocation191_spill]] }
  0x4b   : > { %3634 = dma.vmem_to_smem (!%p4116_p6), %s4125_s24, 16, %s4018_s16, [#allocation8]  }
  0x4c   : > { %s7104_s5 = sld [smem:[#allocation192_spill]] }
  0x50   : > { %s290_s19 = sshll.u32 %s7103_s4, 4  ;;  %s291_s19 = int_to_ptr.vmem [resolvable:$true] %s290_s19 }
  0x51   : > { %s3875_s25 = scalar_lea.vmem %s291_s19, 16  ;;  %p3883_p2 = scmp.lt.s32.totalorder %s291_s19, %s291_s19 }
  0x52   : > { %s301_s23 = sshll.u32 %s7104_s5, 4  ;;  %p3876_p12 = scmp.ne.s32.totalorder %s291_s19, %s3875_s25  ;;  %s302_s23 = int_to_ptr.vmem [resolvable:$true] %s301_s23 }
  0x53   : > { %p3884_p1 = scmp.lt.s32.totalorder %s3875_s25, %s3875_s25 }
  0x54   : > { %p3878_p13 = pnand %p3876_p12, %p4129_p8 }
  0x55   : > { %p3885_p3 = por %p3884_p1, %p3883_p2 }
  0x56   : > { %p3879_p0 = pneg %p3878_p13 }
  0x58   : > { %p3886_p4 = pnand %p3885_p3, %p3879_p0 }
  0x5a   : > { %3889 = shalt.err (!%p3886_p4)
}
  0x5b   : > { %s4019_s24 = smov [#allocation12]   ;;  %s3890_s27 = scalar_lea.vmem %s302_s23, 16 }
  0x5c   : > { %3640 = dma.vmem_to_smem (!%p4116_p6), %s291_s19, 16, %s4019_s24, [#allocation11]  }
  0x5d   : > { %p3891_p5 = scmp.ne.s32.totalorder %s302_s23, %s3890_s27  ;;  %p3898_p10 = scmp.lt.s32.totalorder %s302_s23, %s302_s23 }
  0x5e   : > { %p3899_p11 = scmp.lt.s32.totalorder %s3890_s27, %s3890_s27 }
  0x5f   : > { %p3893_p7 = pnand %p3891_p5, %p4129_p8 }
  0x60   : > { %p3900_p12 = por %p3899_p11, %p3898_p10 }
  0x61   : > { %p3894_p9 = pneg %p3893_p7 }
  0x63   : > { %p3901_p13 = pnand %p3900_p12, %p3894_p9 }
  0x65   : > { %3904 = shalt.err (!%p3901_p13)
}
  0x66   : > { %s4020_s28 = smov [#allocation13]   ;;  %s2968_s26 = sadd.s32 4294967294, %s4013_s10  }
  0x67   : > { %3643 = dma.vmem_to_smem (!%p4116_p6), %s302_s23, 16, %s4020_s28, [#allocation14]  }
  0x68   : > { %s4175_s6 = sadd.s32 1, %s4013_s10   ;;  %s183_s11 = sadd.s32 1, %s4009_s9 }
  0x69   : > { %7105 = sst [smem:[#allocation28_spill]] %s4175_s6  ;;  %s180_s21 = ssub.s32 %s4013_s10, %s4175_s6 }
  0x6a   : > { %p181_p8 = scmp.eq.s32.totalorder %s180_s21, 0  ;;  %p190_p0 = scmp.ne.s32.totalorder %s4009_s9, %s4005_s30 }
  0x6b   : > { %p191_p2 = scmp.eq.s32.totalorder %s4013_s10, 0  ;;  %p196_p1 = scmp.ne.s32.totalorder %s4005_s30, %s4001_s29 }
  0x6c   : > { %s4186_s12 = scalar_select %p181_p8, %s4009_s9, %s183_s11  }
  0x6d   : > { %p4188_p3 = por %p191_p2, %p190_p0  ;;  %p7108_p4 = scmp.eq.s32.totalorder %s4096_s13, 0 }
  0x6e   : > { %7106 = sst [smem:[#allocation29_spill]] %s4186_s12  ;;  %p220_p5 = scmp.eq.s32.totalorder %s4096_s13, 1 }
  0x6f   : > { %p4194_p6 = por %p7108_p4, %p196_p1  ;;  %p226_p7 = scmp.eq.s32.totalorder %s2968_s26, 1 }
  0x70   : > { %p3658_p9 = scmp.lt.s32.totalorder %s4013_s10, 2  ;;  %s315_s17 = sand.u32 1, %s4009_s9  }
  0x71   : > { %s7109_s16 = scalar_select %p4194_p6, 1, 0 }
  0x72   : > { %p4201_p10 = por %p220_p5, %p190_p0  ;;  %p4205_p11 = por %p226_p7, %p196_p1 }
  0x73   : > { %s2977_s20 = sshll.u32 %s315_s17, 3  ;;  %s2978_s22 = sshll.u32 %s4013_s10, 7 }
  0x74   : > { %s7110_s18 = scalar_select %p4201_p10, 1, 0 }
  0x75   : > { %s7112_s19 = scalar_select %p4205_p11, 1, 0 }
  0x76   : > { %7111 = sst [smem:[#allocation30_spill]] %s7110_s18  ;;  %s319_s27 = scalar_lea.vmem [#allocation15], %s2977_s20 }
  0x77   : > { %7113 = sst [smem:[#allocation31_spill]] %s7112_s19  ;;  %s326_s28 = sshll.u32 %s319_s27, 4  ;;  %s327_s28 = int_to_ptr.vmem [resolvable:$true] %s326_s28 }
  0x78   : > { %s7114_s7 = sld [smem:[#allocation193_spill]]  ;;  %p4217_p12 = pnand %p3658_p9, %p4188_p3 }
  0x79   : > { %s316_s21 = scalar_lea.sflag [#allocation4], %s315_s17 }
  0x7a   : > { %p3907_p8 = pneg %p4217_p12 }
  0x7e   : > { %s4213_s24 = scalar_lea.hbm %s7114_s7, %s2978_s22  ;;  %s3910_s25 = scalar_lea.hbm %s7114_s7, 256 }
  0x7f   : > { %s3905_s11 = scalar_lea.hbm %s4213_s24, 128  ;;  %p3911_p1 = scmp.lt.s32.totalorder %s4213_s24, %s7114_s7 }
  0x80   : > { %p3906_p13 = scmp.ne.s32.totalorder %s4213_s24, %s3905_s11  ;;  %p3912_p3 = scmp.lt.s32.totalorder %s3910_s25, %s3905_s11 }
  0x82   : > { %p3908_p0 = pnand %p3907_p8, %p3906_p13  ;;  %p3913_p4 = por %p3912_p3, %p3911_p1 }
  0x84   : > { %p3909_p2 = pneg %p3908_p0 }
  0x86   : > { %p3914_p5 = pnand %p3913_p4, %p3909_p2 }
  0x88   : > { %3917 = shalt.err (!%p3914_p5)
}
  0x89   : > { %s3918_s15 = scalar_lea.vmem %s327_s28, 128  ;;  %s4021_s17 = smov [#allocation15]  }
  0x8a   : > { %p3919_p7 = scmp.ne.s32.totalorder %s327_s28, %s3918_s15  ;;  %s3923_s0 = sshll.u32 %s4021_s17, 4  ;;  %s3924_s0 = int_to_ptr.vmem [resolvable:$false] %s3923_s0 }
  0x8b   : > { %s3925_s1 = scalar_lea.vmem %s3924_s0, 256  ;;  %p3926_p13 = scmp.lt.s32.totalorder %s327_s28, %s3924_s0 }
  0x8c   : > { %p3921_p9 = pnand %p3919_p7, %p3907_p8  ;;  %p3927_p0 = scmp.lt.s32.totalorder %s3925_s1, %s3918_s15 }
  0x8e   : > { %p3922_p11 = pneg %p3921_p9  ;;  %p3928_p10 = por %p3927_p0, %p3926_p13 }
  0x90   : > { %p3929_p6 = pnand %p3928_p10, %p3922_p11 }
  0x92   : > { %3932 = shalt.err (!%p3929_p6)
}
  0x93   : > { %3647 = dma.hbm_to_vmem [thread:$0]  (!%p4217_p12), %s4213_s24, 128, %s327_s28, %s316_s21  }
  0x94   : > { %p7116_p2 = scmp.ne.s32.totalorder %s7097_s14, 0 }
  0x96   : > { %335 = sbr.rel (%p7116_p2) target bundleno = 1718 (0x6b6), region = 52 }
  0x9b   : > { %p7117_p1 = scmp.eq.s32.totalorder %s4096_s13, 0 }
  0x9d   : > { %3976 = dma.done.wait (%p7117_p1), [#allocation6], 16   ;;  %p7118_p8 = pmov %p7117_p1 }
  0x9e   : > { %p7119_p3 = pmov %p7117_p1 }
  0x9f   : > { %3978 = vsyncadd (%p7118_p8), [#allocation6], 4294967280 }
  0xa0   : > { %3980 = dma.done.wait (%p7119_p3), [#allocation8], 32   ;;  %p7120_p4 = pmov %p7117_p1 }
  0xa1   : > { %p7121_p6 = pmov %p7117_p1 }
  0xa2   : > { %3982 = vsyncadd (%p7120_p4), [#allocation8], 4294967264 }
  0xa3   : > { %3984 = dma.done.wait (%p7121_p6), [#allocation11], 80   ;;  %p7122_p10 = pmov %p7117_p1 }
  0xa4   : > { %p7123_p11 = pmov %p7117_p1 }
  0xa5   : > { %3986 = vsyncadd (%p7122_p10), [#allocation11], 4294967216 }
  0xa6   : > { %3988 = dma.done.wait (%p7123_p11), [#allocation14], 16   ;;  %p7124_p12 = pmov %p7117_p1 }
  0xa7   : > { %s4254_s0 = sand.u32 1, %s4005_s30   ;;  %p7127_p5 = scmp.ne.s32.totalorder %s7109_s16, 0 }
  0xa8   : > { %3990 = vsyncadd (%p7124_p12), [#allocation14], 4294967280  ;;  %7125 = sst [smem:[#allocation32_spill]] %s4254_s0  ;;  %s7042_s1 = sshll.u32 %s4254_s0, 3 }
  0xa9   : > { %s362_s14 = scalar_lea.sflag [#allocation4], %s4254_s0  ;;  %s4260_s24 = scalar_lea.vmem [#allocation15], %s7042_s1 }
  0xaa   : > { %7126 = sst [smem:[#allocation33_spill]] %s4260_s24 }
  0xab   : > { %3992 = dma.done.wait (%p7127_p5), %s362_s14, 128  }
  0xac   : > { %3994 = vsyncadd (%p7127_p5), %s362_s14, 4294967168 }
  0xad   : > { %370 = sfence }
  0xae   : > { %s4266_s28 = sld [smem:[#allocation7]]  ;;  %v4573_v0 = vld [vmem:[%s4260_s24] sm:$0xff] }
  0xaf   : > { %s4268_s26 = sld [smem:[#allocation9]] }
  0xb0   : > { %s4270_s21 = sld [smem:[#allocation10]] }
  0xb1   : > { %s4272_s11 = sld [smem:[#allocation10 + $0x1]] }
  0xb2   : > { %s4274_s22 = sld [smem:[#allocation10 + $0x2]] }
  0xb3   : > { %s4276_s23 = sld [smem:[#allocation10 + $0x3]] }
  0xb4   : > { %s4278_s25 = sld [smem:[#allocation10 + $0x4]]  ;;  %v401_v1 = vstv %s4266_s28 }
  0xb5   : > { %s4280_s20 = sld [smem:[#allocation10 + $0x5]]  ;;  %v402_v2 = vmul.f32 %v401_v1, %v4573_v0  ;;  %v404_v3 = vstv %s4268_s26 }
  0xb6   : > { %s4282_s27 = sld [smem:[#allocation10 + $0x6]]  ;;  %v408_v9 = vstv %s4270_s21 }
  0xb7   : > { %s4284_s16 = sld [smem:[#allocation10 + $0x7]]  ;;  %v405_v4 = vadd.f32 %v404_v3, %v402_v2  ;;  %v411_v10 = vstv %s4272_s11 }
  0xb8   : > { %s4286_s15 = sld [smem:[#allocation10 + $0x8]]  ;;  %v414_v12 = vstv %s4274_s22 }
  0xb9   : > { %s4288_s17 = sld [smem:[#allocation10 + $0x9]]  ;;  %3705 = vtanh.f32 %v405_v4  ;;  %v417_v13 = vstv %s4276_s23 }
  0xba   : > { %s4290_s14 = sld [smem:[#allocation10 + $0xa]]  ;;  %v420_v14 = vstv %s4278_s25 }
  0xbb   : > { %s4292_s1 = sld [smem:[#allocation10 + $0xb]]  ;;  %v423_v15 = vstv %s4280_s20 }
  0xbc   : > { %s4294_s2 = sld [smem:[#allocation10 + $0xc]]  ;;  %v426_v17 = vstv %s4282_s27 }
  0xbd   : > { %s4296_s3 = sld [smem:[#allocation10 + $0xd]]  ;;  %v429_v18 = vstv %s4284_s16 }
  0xbe   : > { %s4298_s4 = sld [smem:[#allocation10 + $0xe]]  ;;  %v432_v19 = vstv %s4286_s15 }
  0xbf   : > { %s4300_s5 = sld [smem:[#allocation10 + $0xf]]  ;;  %v435_v20 = vstv %s4288_s17 }
  0xc0   : > { %s4302_s7 = sld [smem:[#allocation7 + $0x1]]  ;;  %v438_v21 = vstv %s4290_s14 }
  0xc1   : > { %s4304_s12 = sld [smem:[#allocation9 + $0x1]]  ;;  %v441_v22 = vstv %s4292_s1 }
  0xc2   : > { %s4306_s9 = sld [smem:[#allocation10 + $0x10]]  ;;  %v444_v23 = vstv %s4294_s2 }
  0xc3   : > { %s4308_s30 = sld [smem:[#allocation10 + $0x11]]  ;;  %v447_v25 = vstv %s4296_s3 }
  0xc4   : > { %7128 = sst [smem:[#allocation34_spill]] %s4298_s4 }
  0xc5   : > { %7129 = sst [smem:[#allocation35_spill]] %s4300_s5 }
  0xc6   : > { %s4310_s6 = sld [smem:[#allocation10 + $0x12]]  ;;  %v456_v5 = vstv %s4302_s7  ;;  %v3706_v16 = vpop.eup %3705 }
  0xc7   : > { %s4312_s10 = sld [smem:[#allocation10 + $0x13]]  ;;  %v457_v6 = vmul.f32 %v456_v5, %v4573_v0  ;;  %v459_v7 = vstv %s4304_s12  ;;  %v409_v29 = vmul.f32 %v3706_v16, %v408_v9  ;;  %v4654_v30 = vmul.f32 %v3706_v16, %v411_v10 }
  0xc8   : > { %7130 = sst [smem:[#allocation36_spill]] %s4306_s9  ;;  %v4656_v31 = vmul.f32 %v3706_v16, %v414_v12  ;;  %v4658_v32 = vmul.f32 %v3706_v16, %v417_v13  ;;  %v4662_v33 = vmul.f32 %v3706_v16, %v420_v14  ;;  %v4664_v34 = vmul.f32 %v3706_v16, %v423_v15 }
  0xc9   : > { %7131 = sst [smem:[#allocation37_spill]] %s4308_s30  ;;  %v460_v8 = vadd.f32 %v459_v7, %v457_v6  ;;  %v4666_v35 = vmul.f32 %v3706_v16, %v426_v17  ;;  %v4668_v36 = vmul.f32 %v3706_v16, %v429_v18  ;;  %v4672_v37 = vmul.f32 %v3706_v16, %v432_v19 }
  0xca   : > { %s4314_s19 = sld [smem:[#allocation10 + $0x14]]  ;;  %v4674_v38 = vmul.f32 %v3706_v16, %v435_v20  ;;  %v4676_v39 = vmul.f32 %v3706_v16, %v438_v21  ;;  %v4680_v41 = vmul.f32 %v3706_v16, %v441_v22  ;;  %v4682_v42 = vmul.f32 %v3706_v16, %v444_v23 }
  0xcb   : > { %s4316_s29 = sld [smem:[#allocation10 + $0x15]]  ;;  %3707 = vtanh.f32 %v460_v8  ;;  %v4684_v43 = vmul.f32 %v3706_v16, %v447_v25 }
  0xcc   : > { %7132 = sst [smem:[#allocation38_spill]] %s4310_s6 }
  0xcd   : > { %7133 = sst [smem:[#allocation39_spill]] %s4312_s10 }
  0xce   : > { %s4318_s8 = sld [smem:[#allocation10 + $0x16]] }
  0xcf   : > { %s4320_s18 = sld [smem:[#allocation10 + $0x17]] }
  0xd0   : > { %7134 = sst [smem:[#allocation40_spill]] %s4314_s19 }
  0xd1   : > { %7135 = sst [smem:[#allocation41_spill]] %s4316_s29 }
  0xd2   : > { %s4322_s0 = sld [smem:[#allocation10 + $0x18]] }
  0xd3   : > { %s4324_s13 = sld [smem:[#allocation10 + $0x19]] }
  0xd4   : > { %7136 = sst [smem:[#allocation42_spill]] %s4318_s8 }
  0xd5   : > { %7137 = sst [smem:[#allocation43_spill]] %s4320_s18 }
  0xd6   : > { %s4326_s5 = sld [smem:[#allocation10 + $0x1a]] }
  0xd7   : > { %s4328_s9 = sld [smem:[#allocation10 + $0x1b]] }
  0xd8   : > { %7138 = sst [smem:[#allocation44_spill]] %s4322_s0  ;;  %v3708_v49 = vpop.eup %3707 }
  0xd9   : > { %7139 = sst [smem:[#allocation45_spill]] %s4324_s13 }
  0xda   : > { %s4330_s30 = sld [smem:[#allocation10 + $0x1c]] }
  0xdb   : > { %s4332_s6 = sld [smem:[#allocation10 + $0x1d]] }
  0xdc   : > { %7140 = sst [smem:[#allocation46_spill]] %s4326_s5 }
  0xdd   : > { %7141 = sst [smem:[#allocation47_spill]] %s4328_s9 }
  0xde   : > { %s4334_s10 = sld [smem:[#allocation10 + $0x1e]] }
  0xdf   : > { %s4336_s19 = sld [smem:[#allocation10 + $0x1f]] }
  0xe0   : > { %7142 = sst [smem:[#allocation48_spill]] %s4330_s30 }
  0xe1   : > { %7143 = sst [smem:[#allocation49_spill]] %s4332_s6 }
  0xe2   : > { %s4338_s29 = sld [smem:[#allocation7 + $0x2]] }
  0xe3   : > { %s4340_s8 = sld [smem:[#allocation9 + $0x2]] }
  0xe4   : > { %7144 = sst [smem:[#allocation50_spill]] %s4334_s10 }
  0xe5   : > { %7145 = sst [smem:[#allocation51_spill]] %s4336_s19 }
  0xe6   : > { %s4342_s18 = sld [smem:[#allocation10 + $0x20]] }
  0xe7   : > { %s4344_s0 = sld [smem:[#allocation10 + $0x21]] }
  0xe8   : > { %s4346_s13 = sld [smem:[#allocation10 + $0x22]]  ;;  %v527_v11 = vstv %s4338_s29 }
  0xe9   : > { %7146 = sst [smem:[#allocation52_spill]] %s4340_s8  ;;  %v528_v24 = vmul.f32 %v527_v11, %v4573_v0 }
  0xea   : > { %s4348_s5 = sld [smem:[#allocation10 + $0x23]] }
  0xeb   : > { %s4350_s9 = sld [smem:[#allocation10 + $0x24]] }
  0xec   : > { %7147 = sst [smem:[#allocation53_spill]] %s4342_s18 }
  0xed   : > { %7148 = sst [smem:[#allocation54_spill]] %s4344_s0 }
  0xee   : > { %7149 = sst [smem:[#allocation55_spill]] %s4346_s13 }
  0xef   : > { %s4352_s30 = sld [smem:[#allocation10 + $0x25]] }
  0xf0   : > { %7150 = sst [smem:[#allocation56_spill]] %s4348_s5 }
  0xf1   : > { %7151 = sst [smem:[#allocation57_spill]] %s4350_s9 }
  0xf2   : > { %s4354_s6 = sld [smem:[#allocation10 + $0x26]] }
  0xf3   : > { %s4356_s10 = sld [smem:[#allocation10 + $0x27]] }
  0xf4   : > { %s4358_s19 = sld [smem:[#allocation10 + $0x28]] }
  0xf5   : > { %7152 = sst [smem:[#allocation58_spill]] %s4352_s30 }
  0xf6   : > { %s4360_s4 = sld [smem:[#allocation10 + $0x29]] }
  0xf7   : > { %s4362_s8 = sld [smem:[#allocation10 + $0x2a]] }
  0xf8   : > { %7153 = sst [smem:[#allocation59_spill]] %s4354_s6 }
  0xf9   : > { %7154 = sst [smem:[#allocation60_spill]] %s4356_s10 }
  0xfa   : > { %7155 = sst [smem:[#allocation61_spill]] %s4358_s19 }
  0xfb   : > { %s4364_s18 = sld [smem:[#allocation10 + $0x2b]] }
  0xfc   : > { %7156 = sst [smem:[#allocation62_spill]] %s4360_s4 }
  0xfd   : > { %7157 = sst [smem:[#allocation63_spill]] %s4362_s8 }
  0xfe   : > { %s4366_s0 = sld [smem:[#allocation10 + $0x2c]] }
  0xff   : > { %s4368_s13 = sld [smem:[#allocation10 + $0x2d]] }
 0x100   : > { %s4370_s5 = sld [smem:[#allocation10 + $0x2e]] }
 0x101   : > { %7158 = sst [smem:[#allocation64_spill]] %s4364_s18 }
 0x102   : > { %s4372_s9 = sld [smem:[#allocation10 + $0x2f]] }
 0x103   : > { %s4374_s30 = sld [smem:[#allocation7 + $0x3]] }
 0x104   : > { %7159 = sst [smem:[#allocation65_spill]] %s4366_s0 }
 0x105   : > { %7160 = sst [smem:[#allocation66_spill]] %s4368_s13 }
 0x106   : > { %7161 = sst [smem:[#allocation67_spill]] %s4370_s5 }
 0x107   : > { %s4376_s6 = sld [smem:[#allocation9 + $0x3]] }
 0x108   : > { %7162 = sst [smem:[#allocation68_spill]] %s4372_s9 }
 0x109   : > { %7163 = sst [smem:[#allocation69_spill]] %s4374_s30 }
 0x10a   : > { %s4378_s10 = sld [smem:[#allocation10 + $0x30]] }
 0x10b   : > { %s4380_s19 = sld [smem:[#allocation10 + $0x31]] }
 0x10c   : > { %s4382_s4 = sld [smem:[#allocation10 + $0x32]] }
 0x10d   : > { %7164 = sst [smem:[#allocation70_spill]] %s4376_s6 }
 0x10e   : > { %s4384_s8 = sld [smem:[#allocation10 + $0x33]] }
 0x10f   : > { %s4386_s18 = sld [smem:[#allocation10 + $0x34]] }
 0x110   : > { %7165 = sst [smem:[#allocation71_spill]] %s4378_s10 }
 0x111   : > { %7166 = sst [smem:[#allocation72_spill]] %s4380_s19 }
 0x112   : > { %7167 = sst [smem:[#allocation73_spill]] %s4382_s4 }
 0x113   : > { %s4388_s0 = sld [smem:[#allocation10 + $0x35]] }
 0x114   : > { %7168 = sst [smem:[#allocation74_spill]] %s4384_s8 }
 0x115   : > { %7169 = sst [smem:[#allocation75_spill]] %s4386_s18 }
 0x116   : > { %s4390_s13 = sld [smem:[#allocation10 + $0x36]] }
 0x117   : > { %s4392_s5 = sld [smem:[#allocation10 + $0x37]] }
 0x118   : > { %s4394_s9 = sld [smem:[#allocation10 + $0x38]] }
 0x119   : > { %7170 = sst [smem:[#allocation76_spill]] %s4388_s0 }
 0x11a   : > { %s4396_s30 = sld [smem:[#allocation10 + $0x39]] }
 0x11b   : > { %s4398_s6 = sld [smem:[#allocation10 + $0x3a]] }
 0x11c   : > { %7171 = sst [smem:[#allocation77_spill]] %s4390_s13 }
 0x11d   : > { %7172 = sst [smem:[#allocation78_spill]] %s4392_s5 }
 0x11e   : > { %7173 = sst [smem:[#allocation79_spill]] %s4394_s9 }
 0x11f   : > { %s4400_s10 = sld [smem:[#allocation10 + $0x3b]] }
 0x120   : > { %7174 = sst [smem:[#allocation80_spill]] %s4396_s30 }
 0x121   : > { %7175 = sst [smem:[#allocation81_spill]] %s4398_s6 }
 0x122   : > { %s4402_s19 = sld [smem:[#allocation10 + $0x3c]] }
 0x123   : > { %s4404_s4 = sld [smem:[#allocation10 + $0x3d]] }
 0x124   : > { %s4406_s8 = sld [smem:[#allocation10 + $0x3e]] }
 0x125   : > { %7176 = sst [smem:[#allocation82_spill]] %s4400_s10 }
 0x126   : > { %s4408_s18 = sld [smem:[#allocation10 + $0x3f]] }
 0x127   : > { %s4410_s0 = sld [smem:[#allocation7 + $0x4]] }
 0x128   : > { %7177 = sst [smem:[#allocation83_spill]] %s4402_s19 }
 0x129   : > { %7178 = sst [smem:[#allocation84_spill]] %s4404_s4 }
 0x12a   : > { %7179 = sst [smem:[#allocation85_spill]] %s4406_s8 }
 0x12b   : > { %s4412_s13 = sld [smem:[#allocation9 + $0x4]] }
 0x12c   : > { %7180 = sst [smem:[#allocation86_spill]] %s4408_s18 }
 0x12d   : > { %7181 = sst [smem:[#allocation87_spill]] %s4410_s0 }
 0x12e   : > { %s4414_s5 = sld [smem:[#allocation10 + $0x40]] }
 0x12f   : > { %s4416_s9 = sld [smem:[#allocation10 + $0x41]] }
 0x130   : > { %s4418_s30 = sld [smem:[#allocation10 + $0x42]] }
 0x131   : > { %7182 = sst [smem:[#allocation88_spill]] %s4412_s13 }
 0x132   : > { %s4420_s6 = sld [smem:[#allocation10 + $0x43]] }
 0x133   : > { %s4422_s10 = sld [smem:[#allocation10 + $0x44]] }
 0x134   : > { %7183 = sst [smem:[#allocation89_spill]] %s4414_s5 }
 0x135   : > { %7184 = sst [smem:[#allocation90_spill]] %s4416_s9 }
 0x136   : > { %7185 = sst [smem:[#allocation91_spill]] %s4418_s30 }
 0x137   : > { %s4424_s19 = sld [smem:[#allocation10 + $0x45]] }
 0x138   : > { %7186 = sst [smem:[#allocation92_spill]] %s4420_s6 }
 0x139   : > { %7187 = sst [smem:[#allocation93_spill]] %s4422_s10 }
 0x13a   : > { %s4426_s4 = sld [smem:[#allocation10 + $0x46]] }
 0x13b   : > { %s4428_s8 = sld [smem:[#allocation10 + $0x47]] }
 0x13c   : > { %s4430_s18 = sld [smem:[#allocation10 + $0x48]] }
 0x13d   : > { %7188 = sst [smem:[#allocation94_spill]] %s4424_s19 }
 0x13e   : > { %s4432_s0 = sld [smem:[#allocation10 + $0x49]] }
 0x13f   : > { %s4434_s13 = sld [smem:[#allocation10 + $0x4a]] }
 0x140   : > { %7189 = sst [smem:[#allocation95_spill]] %s4426_s4 }
 0x141   : > { %7190 = sst [smem:[#allocation96_spill]] %s4428_s8 }
 0x142   : > { %7191 = sst [smem:[#allocation97_spill]] %s4430_s18 }
 0x143   : > { %s4436_s5 = sld [smem:[#allocation10 + $0x4b]] }
 0x144   : > { %7192 = sst [smem:[#allocation98_spill]] %s4432_s0 }
 0x145   : > { %7193 = sst [smem:[#allocation99_spill]] %s4434_s13 }
 0x146   : > { %s4438_s9 = sld [smem:[#allocation10 + $0x4c]] }
 0x147   : > { %s4440_s30 = sld [smem:[#allocation10 + $0x4d]] }
 0x148   : > { %s4442_s6 = sld [smem:[#allocation10 + $0x4e]] }
 0x149   : > { %7194 = sst [smem:[#allocation100_spill]] %s4436_s5 }
 0x14a   : > { %s4444_s10 = sld [smem:[#allocation10 + $0x4f]] }
 0x14b   : > { %s4446_s19 = sld [smem:[#allocation7 + $0x5]] }
 0x14c   : > { %7195 = sst [smem:[#allocation101_spill]] %s4438_s9 }
 0x14d   : > { %7196 = sst [smem:[#allocation102_spill]] %s4440_s30 }
 0x14e   : > { %7197 = sst [smem:[#allocation103_spill]] %s4442_s6 }
 0x14f   : > { %s4448_s4 = sld [smem:[#allocation9 + $0x5]] }
 0x150   : > { %7198 = sst [smem:[#allocation104_spill]] %s4444_s10 }
 0x151   : > { %7199 = sst [smem:[#allocation105_spill]] %s4446_s19 }
 0x152   : > { %s4450_s8 = sld [smem:[#allocation10 + $0x50]] }
 0x153   : > { %s4452_s18 = sld [smem:[#allocation10 + $0x51]] }
 0x154   : > { %s4454_s0 = sld [smem:[#allocation10 + $0x52]] }
 0x155   : > { %7200 = sst [smem:[#allocation106_spill]] %s4448_s4 }
 0x156   : > { %s4456_s13 = sld [smem:[#allocation10 + $0x53]] }
 0x157   : > { %s4458_s5 = sld [smem:[#allocation10 + $0x54]] }
 0x158   : > { %7201 = sst [smem:[#allocation107_spill]] %s4450_s8 }
 0x159   : > { %7202 = sst [smem:[#allocation108_spill]] %s4452_s18 }
 0x15a   : > { %7203 = sst [smem:[#allocation109_spill]] %s4454_s0 }
 0x15b   : > { %s4460_s9 = sld [smem:[#allocation10 + $0x55]] }
 0x15c   : > { %7204 = sst [smem:[#allocation110_spill]] %s4456_s13 }
 0x15d   : > { %7205 = sst [smem:[#allocation111_spill]] %s4458_s5 }
 0x15e   : > { %s4462_s30 = sld [smem:[#allocation10 + $0x56]] }
 0x15f   : > { %s4464_s6 = sld [smem:[#allocation10 + $0x57]] }
 0x160   : > { %s4466_s10 = sld [smem:[#allocation10 + $0x58]] }
 0x161   : > { %7206 = sst [smem:[#allocation112_spill]] %s4460_s9 }
 0x162   : > { %s4468_s19 = sld [smem:[#allocation10 + $0x59]] }
 0x163   : > { %s4470_s4 = sld [smem:[#allocation10 + $0x5a]] }
 0x164   : > { %7207 = sst [smem:[#allocation113_spill]] %s4462_s30 }
 0x165   : > { %7208 = sst [smem:[#allocation114_spill]] %s4464_s6 }
 0x166   : > { %7209 = sst [smem:[#allocation115_spill]] %s4466_s10 }
 0x167   : > { %s4472_s8 = sld [smem:[#allocation10 + $0x5b]] }
 0x168   : > { %7210 = sst [smem:[#allocation116_spill]] %s4468_s19 }
 0x169   : > { %7211 = sst [smem:[#allocation117_spill]] %s4470_s4 }
 0x16a   : > { %s4474_s18 = sld [smem:[#allocation10 + $0x5c]] }
 0x16b   : > { %s4476_s0 = sld [smem:[#allocation10 + $0x5d]] }
 0x16c   : > { %s4478_s13 = sld [smem:[#allocation10 + $0x5e]] }
 0x16d   : > { %7212 = sst [smem:[#allocation118_spill]] %s4472_s8 }
 0x16e   : > { %s4480_s5 = sld [smem:[#allocation10 + $0x5f]] }
 0x16f   : > { %s4482_s9 = sld [smem:[#allocation7 + $0x6]] }
 0x170   : > { %7213 = sst [smem:[#allocation119_spill]] %s4474_s18 }
 0x171   : > { %7214 = sst [smem:[#allocation120_spill]] %s4476_s0 }
 0x172   : > { %7215 = sst [smem:[#allocation121_spill]] %s4478_s13 }
 0x173   : > { %s4484_s30 = sld [smem:[#allocation9 + $0x6]] }
 0x174   : > { %7216 = sst [smem:[#allocation122_spill]] %s4480_s5 }
 0x175   : > { %7217 = sst [smem:[#allocation123_spill]] %s4482_s9 }
 0x176   : > { %s4486_s6 = sld [smem:[#allocation10 + $0x60]] }
 0x177   : > { %s4488_s10 = sld [smem:[#allocation10 + $0x61]] }
 0x178   : > { %s4490_s19 = sld [smem:[#allocation10 + $0x62]] }
 0x179   : > { %7218 = sst [smem:[#allocation124_spill]] %s4484_s30 }
 0x17a   : > { %s4492_s4 = sld [smem:[#allocation10 + $0x63]] }
 0x17b   : > { %s4494_s8 = sld [smem:[#allocation10 + $0x64]] }
 0x17c   : > { %7219 = sst [smem:[#allocation125_spill]] %s4486_s6 }
 0x17d   : > { %7220 = sst [smem:[#allocation126_spill]] %s4488_s10 }
 0x17e   : > { %7221 = sst [smem:[#allocation127_spill]] %s4490_s19 }
 0x17f   : > { %s4496_s18 = sld [smem:[#allocation10 + $0x65]] }
 0x180   : > { %7222 = sst [smem:[#allocation128_spill]] %s4492_s4 }
 0x181   : > { %7223 = sst [smem:[#allocation129_spill]] %s4494_s8 }
 0x182   : > { %s4498_s0 = sld [smem:[#allocation10 + $0x66]] }
 0x183   : > { %s4500_s13 = sld [smem:[#allocation10 + $0x67]] }
 0x184   : > { %s4502_s5 = sld [smem:[#allocation10 + $0x68]] }
 0x185   : > { %7224 = sst [smem:[#allocation130_spill]] %s4496_s18 }
 0x186   : > { %s4504_s9 = sld [smem:[#allocation10 + $0x69]] }
 0x187   : > { %s4506_s30 = sld [smem:[#allocation10 + $0x6a]] }
 0x188   : > { %7225 = sst [smem:[#allocation131_spill]] %s4498_s0 }
 0x189   : > { %7226 = sst [smem:[#allocation132_spill]] %s4500_s13 }
 0x18a   : > { %7227 = sst [smem:[#allocation133_spill]] %s4502_s5 }
 0x18b   : > { %s4508_s6 = sld [smem:[#allocation10 + $0x6b]] }
 0x18c   : > { %7228 = sst [smem:[#allocation134_spill]] %s4504_s9 }
 0x18d   : > { %7229 = sst [smem:[#allocation135_spill]] %s4506_s30 }
 0x18e   : > { %s4510_s10 = sld [smem:[#allocation10 + $0x6c]] }
 0x18f   : > { %s4512_s19 = sld [smem:[#allocation10 + $0x6d]] }
 0x190   : > { %s4514_s4 = sld [smem:[#allocation10 + $0x6e]] }
 0x191   : > { %7230 = sst [smem:[#allocation136_spill]] %s4508_s6 }
 0x192   : > { %s4516_s8 = sld [smem:[#allocation10 + $0x6f]] }
 0x193   : > { %s4518_s18 = sld [smem:[#allocation7 + $0x7]] }
 0x194   : > { %7231 = sst [smem:[#allocation137_spill]] %s4510_s10 }
 0x195   : > { %7232 = sst [smem:[#allocation138_spill]] %s4512_s19 }
 0x196   : > { %7233 = sst [smem:[#allocation139_spill]] %s4514_s4 }
 0x197   : > { %s4520_s0 = sld [smem:[#allocation9 + $0x7]] }
 0x198   : > { %7234 = sst [smem:[#allocation140_spill]] %s4516_s8 }
 0x199   : > { %7235 = sst [smem:[#allocation141_spill]] %s4518_s18 }
 0x19a   : > { %s4522_s13 = sld [smem:[#allocation10 + $0x70]] }
 0x19b   : > { %s4524_s5 = sld [smem:[#allocation10 + $0x71]] }
 0x19c   : > { %s4526_s9 = sld [smem:[#allocation10 + $0x72]] }
 0x19d   : > { %s4528_s30 = sld [smem:[#allocation10 + $0x73]] }
 0x19e   : > { %s4530_s6 = sld [smem:[#allocation10 + $0x74]] }
 0x19f   : > { %s4532_s10 = sld [smem:[#allocation10 + $0x75]] }
 0x1a0   : > { %7236 = sst [smem:[#allocation142_spill]] %s4522_s13 }
 0x1a1   : > { %7237 = sst [smem:[#allocation143_spill]] %s4524_s5 }
 0x1a2   : > { %7238 = sst [smem:[#allocation144_spill]] %s4526_s9 }
 0x1a3   : > { %7239 = sst [smem:[#allocation145_spill]] %s4528_s30 }
 0x1a4   : > { %7240 = sst [smem:[#allocation146_spill]] %s4530_s6 }
 0x1a5   : > { %7241 = sst [smem:[#allocation147_spill]] %s4532_s10 }
 0x1a6   : > { %s4534_s19 = sld [smem:[#allocation10 + $0x76]] }
 0x1a7   : > { %s4536_s4 = sld [smem:[#allocation10 + $0x77]] }
 0x1a8   : > { %s4538_s8 = sld [smem:[#allocation10 + $0x78]] }
 0x1a9   : > { %s4540_s18 = sld [smem:[#allocation10 + $0x79]] }
 0x1aa   : > { %s4542_s13 = sld [smem:[#allocation10 + $0x7a]] }
 0x1ab   : > { %s4544_s5 = sld [smem:[#allocation10 + $0x7b]] }
 0x1ac   : > { %7242 = sst [smem:[#allocation148_spill]] %s4534_s19 }
 0x1ad   : > { %7243 = sst [smem:[#allocation149_spill]] %s4536_s4 }
 0x1ae   : > { %7244 = sst [smem:[#allocation150_spill]] %s4538_s8 }
 0x1af   : > { %7245 = sst [smem:[#allocation151_spill]] %s4540_s18 }
 0x1b0   : > { %7246 = sst [smem:[#allocation152_spill]] %s4542_s13 }
 0x1b1   : > { %7247 = sst [smem:[#allocation153_spill]] %s4544_s5 }
 0x1b2   : > { %s4546_s9 = sld [smem:[#allocation10 + $0x7c]] }
 0x1b3   : > { %s4548_s30 = sld [smem:[#allocation10 + $0x7d]] }
 0x1b4   : > { %s4550_s6 = sld [smem:[#allocation10 + $0x7e]] }
 0x1b5   : > { %s4552_s10 = sld [smem:[#allocation10 + $0x7f]] }
 0x1b6   : > { %s4554_s19 = sld [smem:[#allocation7 + $0x8]] }
 0x1b7   : > { %s4556_s8 = sld [smem:[#allocation9 + $0x8]] }
 0x1b8   : > { %7248 = sst [smem:[#allocation154_spill]] %s4546_s9 }
 0x1b9   : > { %7249 = sst [smem:[#allocation155_spill]] %s4548_s30 }
 0x1ba   : > { %7250 = sst [smem:[#allocation156_spill]] %s4550_s6 }
 0x1bb   : > { %7251 = sst [smem:[#allocation157_spill]] %s4552_s10 }
 0x1bc   : > { %s4558_s18 = sld [smem:[#allocation10 + $0x80]] }
 0x1bd   : > { %7252 = sst [smem:[#allocation158_spill]] %s4556_s8 }
 0x1be   : > { %s4560_s4 = sld [smem:[#allocation10 + $0x81]] }
 0x1bf   : > { %s4562_s13 = sld [smem:[#allocation10 + $0x82]] }
 0x1c0   : > { %s4564_s5 = sld [smem:[#allocation10 + $0x83]] }
 0x1c1   : > { %s4566_s9 = sld [smem:[#allocation10 + $0x84]] }
 0x1c2   : > { %7253 = sst [smem:[#allocation159_spill]] %s4558_s18 }
 0x1c3   : > { %s4568_s30 = sld [smem:[#allocation10 + $0x85]] }
 0x1c4   : > { %s4570_s6 = sld [smem:[#allocation10 + $0x86]] }
 0x1c5   : > { %s4576_s10 = sld [smem:[#allocation10 + $0x87]] }
 0x1c6   : > { %7254 = sst [smem:[#allocation160_spill]] %s4564_s5 }
 0x1c7   : > { %7255 = sst [smem:[#allocation161_spill]] %s4566_s9 }
 0x1c8   : > { %s4578_s8 = sld [smem:[#allocation10 + $0x88]] }
 0x1c9   : > { %7256 = sst [smem:[#allocation162_spill]] %s4568_s30 }
 0x1ca   : > { %7257 = sst [smem:[#allocation163_spill]] %s4570_s6 }
 0x1cb   : > { %7258 = sst [smem:[#allocation164_spill]] %s4576_s10 }
 0x1cc   : > { %s4580_s18 = sld [smem:[#allocation10 + $0x89]] }
 0x1cd   : > { %s4583_s5 = sld [smem:[#allocation10 + $0x8a]] }
 0x1ce   : > { %7259 = sst [smem:[#allocation165_spill]] %s4578_s8 }
 0x1cf   : > { %s4586_s9 = sld [smem:[#allocation10 + $0x8b]] }
 0x1d0   : > { %s4588_s30 = sld [smem:[#allocation10 + $0x8c]] }
 0x1d1   : > { %s4590_s6 = sld [smem:[#allocation10 + $0x8d]] }
 0x1d2   : > { %7260 = sst [smem:[#allocation166_spill]] %s4580_s18 }
 0x1d3   : > { %7261 = sst [smem:[#allocation167_spill]] %s4583_s5 }
 0x1d4   : > { %s4592_s28 = sld [smem:[#allocation10 + $0x8e]] }
 0x1d5   : > { %7262 = sst [smem:[#allocation168_spill]] %s4586_s9 }
 0x1d6   : > { %7263 = sst [smem:[#allocation169_spill]] %s4588_s30 }
 0x1d7   : > { %7264 = sst [smem:[#allocation170_spill]] %s4590_s6 }
 0x1d8   : > { %s4595_s10 = sld [smem:[#allocation10 + $0x8f]] }
 0x1d9   : > { %s4597_s8 = sld [smem:[#allocation7 + $0x9]] }
 0x1da   : > { %7265 = sst [smem:[#allocation171_spill]] %s4592_s28 }
 0x1db   : > { %s4599_s18 = sld [smem:[#allocation9 + $0x9]] }
 0x1dc   : > { %s4602_s26 = sld [smem:[#allocation10 + $0x90]] }
 0x1dd   : > { %s4605_s6 = sld [smem:[#allocation10 + $0x91]] }
 0x1de   : > { %7266 = sst [smem:[#allocation172_spill]] %s4595_s10 }
 0x1df   : > { %s4607_s28 = sld [smem:[#allocation10 + $0x92]] }
 0x1e0   : > { %s4609_s7 = sld [smem:[#allocation10 + $0x93]] }
 0x1e1   : > { %s4611_s10 = sld [smem:[#allocation10 + $0x94]] }
 0x1e2   : > { %7267 = sst [smem:[#allocation173_spill]] %s4602_s26 }
 0x1e3   : > { %7268 = sst [smem:[#allocation174_spill]] %s4605_s6 }
 0x1e4   : > { %s4613_s30 = sld [smem:[#allocation10 + $0x95]] }
 0x1e5   : > { %7269 = sst [smem:[#allocation175_spill]] %s4607_s28 }
 0x1e6   : > { %7270 = sst [smem:[#allocation176_spill]] %s4609_s7 }
 0x1e7   : > { %7271 = sst [smem:[#allocation177_spill]] %s4611_s10 }
 0x1e8   : > { %s4615_s9 = sld [smem:[#allocation10 + $0x96]] }
 0x1e9   : > { %s4617_s26 = sld [smem:[#allocation10 + $0x97]] }
 0x1ea   : > { %7272 = sst [smem:[#allocation178_spill]] %s4613_s30 }
 0x1eb   : > { %s4619_s12 = sld [smem:[#allocation10 + $0x98]] }
 0x1ec   : > { %s4621_s28 = sld [smem:[#allocation10 + $0x99]] }
 0x1ed   : > { %s4623_s7 = sld [smem:[#allocation10 + $0x9a]] }
 0x1ee   : > { %7273 = sst [smem:[#allocation179_spill]] %s4615_s9 }
 0x1ef   : > { %7274 = sst [smem:[#allocation180_spill]] %s4617_s26 }
 0x1f0   : > { %s4628_s9 = sld [smem:[#allocation10 + $0x9b]] }
 0x1f1   : > { %7275 = sst [smem:[#allocation181_spill]] %s4619_s12 }
 0x1f2   : > { %7276 = sst [smem:[#allocation182_spill]] %s4621_s28 }
 0x1f3   : > { %7277 = sst [smem:[#allocation183_spill]] %s4623_s7 }
 0x1f4   : > { %s7279_s26 = sld [smem:[#allocation34_spill]] }
 0x1f5   : > { %s7280_s30 = sld [smem:[#allocation35_spill]] }
 0x1f6   : > { %7278 = sst [smem:[#allocation184_spill]] %s4628_s9 }
 0x1f7   : > { %s7281_s12 = sld [smem:[#allocation52_spill]] }
 0x1f8   : > { %s4634_s10 = sld [smem:[#allocation10 + $0x9c]] }
 0x1f9   : > { %s4640_s21 = sld [smem:[#allocation10 + $0x9d]] }
 0x1fa   : > { %s4646_s29 = sld [smem:[#allocation10 + $0x9e]]  ;;  %v450_v26 = vstv %s7279_s26 }
 0x1fb   : > { %v453_v27 = vstv %s7280_s30  ;;  %s4652_s11 = sld [smem:[#allocation10 + $0x9f]]  ;;  %v4686_v44 = vmul.f32 %v3706_v16, %v450_v26 }
 0x1fc   : > { %s4660_s22 = sld [smem:[#allocation7 + $0xa]]  ;;  %v4690_v45 = vmul.f32 %v3706_v16, %v453_v27 }
 0x1fd   : > { %v530_v28 = vstv %s7281_s12  ;;  %s7287_s2 = sld [smem:[#allocation36_spill]] }
 0x1fe   : > { %7282 = sst [smem:[#allocation34_spill]] %s4634_s10  ;;  %v531_v40 = vadd.f32 %v530_v28, %v528_v24 }
 0x1ff   : > { %7283 = sst [smem:[#allocation35_spill]] %s4640_s21 }
 0x200   : > { %7284 = sst [smem:[#allocation52_spill]] %s4646_s29  ;;  %3709 = vtanh.f32 %v531_v40 }
 0x201   : > { %7285 = sst [smem:[#allocation185_spill]] %s4652_s11 }
 0x202   : > { %7286 = sst [smem:[#allocation186_spill]] %s4660_s22 }
 0x203   : > { %s7288_s3 = sld [smem:[#allocation37_spill]]  ;;  %v463_v46 = vstv %s7287_s2 }
 0x204   : > { %s7289_s30 = sld [smem:[#allocation38_spill]]  ;;  %v464_v61 = vmul.f32 %v3708_v49, %v463_v46 }
 0x205   : > { %s4670_s1 = sld [smem:[#allocation9 + $0xa]] }
 0x206   : > { %s7291_s23 = sld [smem:[#allocation39_spill]]  ;;  %v4730_v14 = vadd.f32 %v464_v61, %v409_v29 }
 0x207   : > { %s7292_s25 = sld [smem:[#allocation40_spill]] }
 0x208   : > { %s7293_s20 = sld [smem:[#allocation41_spill]] }
 0x209   : > { %s7294_s27 = sld [smem:[#allocation42_spill]]  ;;  %v467_v47 = vstv %s7288_s3 }
 0x20a   : > { %s4678_s16 = sld [smem:[#allocation10 + $0xa0]]  ;;  %v471_v48 = vstv %s7289_s30  ;;  %v468_v6 = vmul.f32 %v3708_v49, %v467_v47 }
 0x20b   : > { %7290 = sst [smem:[#allocation36_spill]] %s4670_s1  ;;  %v472_v7 = vmul.f32 %v3708_v49, %v471_v48 }
 0x20c   : > { %s7296_s15 = sld [smem:[#allocation43_spill]]  ;;  %v475_v50 = vstv %s7291_s23  ;;  %v4737_v22 = vadd.f32 %v468_v6, %v4654_v30 }
 0x20d   : > { %s7297_s17 = sld [smem:[#allocation44_spill]]  ;;  %v479_v51 = vstv %s7292_s25  ;;  %v476_v8 = vmul.f32 %v3708_v49, %v475_v50  ;;  %v4740_v23 = vadd.f32 %v472_v7, %v4656_v31 }
 0x20e   : > { %s7298_s14 = sld [smem:[#allocation69_spill]]  ;;  %v483_v52 = vstv %s7293_s20  ;;  %v480_v10 = vmul.f32 %v3708_v49, %v479_v51 }
 0x20f   : > { %s4688_s26 = sld [smem:[#allocation10 + $0xa1]]  ;;  %v487_v53 = vstv %s7294_s27  ;;  %v484_v11 = vmul.f32 %v3708_v49, %v483_v52  ;;  %v4745_v26 = vadd.f32 %v476_v8, %v4658_v32 }
 0x210   : > { %7295 = sst [smem:[#allocation37_spill]] %s4678_s16  ;;  %v488_v12 = vmul.f32 %v3708_v49, %v487_v53  ;;  %v4748_v27 = vadd.f32 %v480_v10, %v4662_v33 }
 0x211   : > { %s7300_s12 = sld [smem:[#allocation45_spill]]  ;;  %v4751_v28 = vadd.f32 %v484_v11, %v4664_v34 }
 0x212   : > { %s7301_s11 = sld [smem:[#allocation46_spill]]  ;;  %v491_v54 = vstv %s7296_s15  ;;  %v4754_v29 = vadd.f32 %v488_v12, %v4666_v35 }
 0x213   : > { %s7302_s16 = sld [smem:[#allocation47_spill]]  ;;  %v495_v55 = vstv %s7297_s17  ;;  %v492_v13 = vmul.f32 %v3708_v49, %v491_v54 }
 0x214   : > { %s7303_s29 = sld [smem:[#allocation48_spill]]  ;;  %v598_v56 = vstv %s7298_s14  ;;  %v496_v15 = vmul.f32 %v3708_v49, %v495_v55 }
 0x215   : > { %7299 = sst [smem:[#allocation38_spill]] %s4688_s26  ;;  %v599_v5 = vmul.f32 %v598_v56, %v4573_v0  ;;  %v4759_v30 = vadd.f32 %v492_v13, %v4668_v36 }
 0x216   : > { %s4695_s21 = sld [smem:[#allocation10 + $0xa2]]  ;;  %v4762_v31 = vadd.f32 %v496_v15, %v4672_v37 }
 0x217   : > { %s7305_s10 = sld [smem:[#allocation49_spill]]  ;;  %v499_v57 = vstv %s7300_s12 }
 0x218   : > { %s7306_s9 = sld [smem:[#allocation50_spill]]  ;;  %v503_v58 = vstv %s7301_s11  ;;  %v500_v16 = vmul.f32 %v3708_v49, %v499_v57 }
 0x219   : > { %s7307_s7 = sld [smem:[#allocation51_spill]]  ;;  %v507_v59 = vstv %s7302_s16  ;;  %v504_v17 = vmul.f32 %v3708_v49, %v503_v58 }
 0x21a   : > { %s4701_s26 = sld [smem:[#allocation10 + $0xa3]]  ;;  %v511_v60 = vstv %s7303_s29  ;;  %v508_v18 = vmul.f32 %v3708_v49, %v507_v59  ;;  %v4765_v32 = vadd.f32 %v500_v16, %v4674_v38 }
 0x21b   : > { %s7309_s28 = sld [smem:[#allocation53_spill]]  ;;  %v512_v19 = vmul.f32 %v3708_v49, %v511_v60  ;;  %v4768_v33 = vadd.f32 %v504_v17, %v4676_v39 }
 0x21c   : > { %7304 = sst [smem:[#allocation39_spill]] %s4695_s21  ;;  %v4773_v34 = vadd.f32 %v508_v18, %v4680_v41  ;;  %v3710_v41 = vpop.eup %3709 }
 0x21d   : > { %s7310_s2 = sld [smem:[#allocation54_spill]]  ;;  %v515_v62 = vstv %s7305_s10  ;;  %v4776_v35 = vadd.f32 %v512_v19, %v4682_v42 }
 0x21e   : > { %s7311_s3 = sld [smem:[#allocation55_spill]]  ;;  %v519_v63 = vstv %s7306_s9  ;;  %v516_v20 = vmul.f32 %v3708_v49, %v515_v62 }
 0x21f   : > { %s4706_s30 = sld [smem:[#allocation10 + $0xa4]]  ;;  %v523_v1 = vstv %s7307_s7  ;;  %v520_v24 = vmul.f32 %v3708_v49, %v519_v63 }
 0x220   : > { %7308 = sst [smem:[#allocation40_spill]] %s4701_s26  ;;  %v524_v25 = vmul.f32 %v3708_v49, %v523_v1  ;;  %v4779_v36 = vadd.f32 %v516_v20, %v4684_v43 }
 0x221   : > { %s7313_s23 = sld [smem:[#allocation70_spill]]  ;;  %v534_v2 = vstv %s7309_s28  ;;  %v4784_v37 = vadd.f32 %v520_v24, %v4686_v44 }
 0x222   : > { %s4712_s25 = sld [smem:[#allocation10 + $0xa5]]  ;;  %v4787_v38 = vadd.f32 %v524_v25, %v4690_v45  ;;  %v535_v54 = vmul.f32 %v3710_v41, %v534_v2 }
 0x223   : > { %s4717_s20 = sld [smem:[#allocation10 + $0xa6]]  ;;  %v538_v3 = vstv %s7310_s2 }
 0x224   : > { %v542_v4 = vstv %s7311_s3  ;;  %s4723_s27 = sld [smem:[#allocation10 + $0xa7]]  ;;  %v539_v62 = vmul.f32 %v3710_v41, %v538_v3 }
 0x225   : > { %7312 = sst [smem:[#allocation41_spill]] %s4706_s30  ;;  %v543_v63 = vmul.f32 %v3710_v41, %v542_v4 }
 0x226   : > { %s4726_s29 = sld [smem:[#allocation10 + $0xa8]]  ;;  %v540_v16 = vadd.f32 %v539_v62, %v4737_v22 }
 0x227   : > { %v601_v9 = vstv %s7313_s23  ;;  %s4728_s9 = sld [smem:[#allocation10 + $0xa9]]  ;;  %v544_v17 = vadd.f32 %v543_v63, %v4740_v23 }
 0x228   : > { %7314 = sst [smem:[#allocation42_spill]] %s4712_s25  ;;  %v602_v21 = vadd.f32 %v601_v9, %v599_v5  ;;  %v536_v9 = vadd.f32 %v535_v54, %v4730_v14 }
 0x229   : > { %7315 = sst [smem:[#allocation43_spill]] %s4717_s20 }
 0x22a   : > { %7316 = sst [smem:[#allocation44_spill]] %s4723_s27  ;;  %3711 = vtanh.f32 %v602_v21 }
 0x22b   : > { %s4732_s10 = sld [smem:[#allocation10 + $0xaa]] }
 0x22c   : > { %7317 = sst [smem:[#allocation69_spill]] %s4726_s29 }
 0x22d   : > { %7318 = sst [smem:[#allocation45_spill]] %s4728_s9 }
 0x22e   : > { %s4734_s7 = sld [smem:[#allocation10 + $0xab]] }
 0x22f   : > { %s4742_s11 = sld [smem:[#allocation10 + $0xac]] }
 0x230   : > { %s7322_s16 = sld [smem:[#allocation56_spill]] }
 0x231   : > { %7319 = sst [smem:[#allocation46_spill]] %s4732_s10 }
 0x232   : > { %s7323_s15 = sld [smem:[#allocation57_spill]] }
 0x233   : > { %s4756_s17 = sld [smem:[#allocation10 + $0xad]] }
 0x234   : > { %7320 = sst [smem:[#allocation47_spill]] %s4734_s7 }
 0x235   : > { %7321 = sst [smem:[#allocation48_spill]] %s4742_s11 }
 0x236   : > { %s7325_s14 = sld [smem:[#allocation58_spill]]  ;;  %v546_v39 = vstv %s7322_s16 }
 0x237   : > { %s7326_s12 = sld [smem:[#allocation59_spill]]  ;;  %v547_v1 = vmul.f32 %v3710_v41, %v546_v39  ;;  %v3712_v25 = vpop.eup %3711 }
 0x238   : > { %s7327_s23 = sld [smem:[#allocation60_spill]]  ;;  %v550_v40 = vstv %s7323_s15 }
 0x239   : > { %7324 = sst [smem:[#allocation49_spill]] %s4756_s17  ;;  %v551_v5 = vmul.f32 %v3710_v41, %v550_v40  ;;  %v548_v14 = vadd.f32 %v547_v1, %v4745_v26 }
 0x23a   : > { %s7328_s11 = sld [smem:[#allocation61_spill]] }
 0x23b   : > { %s4770_s7 = sld [smem:[#allocation10 + $0xae]]  ;;  %v552_v20 = vadd.f32 %v551_v5, %v4748_v27 }
 0x23c   : > { %s7330_s17 = sld [smem:[#allocation62_spill]]  ;;  %v554_v42 = vstv %s7325_s14 }
 0x23d   : > { %s7331_s10 = sld [smem:[#allocation63_spill]]  ;;  %v558_v43 = vstv %s7326_s12  ;;  %v555_v2 = vmul.f32 %v3710_v41, %v554_v42 }
 0x23e   : > { %s7332_s9 = sld [smem:[#allocation64_spill]]  ;;  %v562_v46 = vstv %s7327_s23  ;;  %v559_v6 = vmul.f32 %v3710_v41, %v558_v43 }
 0x23f   : > { %s7333_s29 = sld [smem:[#allocation65_spill]]  ;;  %v563_v7 = vmul.f32 %v3710_v41, %v562_v46  ;;  %v556_v21 = vadd.f32 %v555_v2, %v4751_v28 }
 0x240   : > { %s4781_s27 = sld [smem:[#allocation10 + $0xaf]]  ;;  %v566_v44 = vstv %s7328_s11  ;;  %v560_v22 = vadd.f32 %v559_v6, %v4754_v29 }
 0x241   : > { %7329 = sst [smem:[#allocation50_spill]] %s4770_s7  ;;  %v567_v10 = vmul.f32 %v3710_v41, %v566_v44  ;;  %v564_v23 = vadd.f32 %v563_v7, %v4759_v30 }
 0x242   : > { %s7335_s7 = sld [smem:[#allocation66_spill]]  ;;  %v570_v45 = vstv %s7330_s17 }
 0x243   : > { %s7336_s20 = sld [smem:[#allocation67_spill]]  ;;  %v574_v47 = vstv %s7331_s10  ;;  %v571_v11 = vmul.f32 %v3710_v41, %v570_v45  ;;  %v568_v39 = vadd.f32 %v567_v10, %v4762_v31 }
 0x244   : > { %s7337_s25 = sld [smem:[#allocation68_spill]]  ;;  %v578_v48 = vstv %s7332_s9  ;;  %v575_v3 = vmul.f32 %v3710_v41, %v574_v47 }
 0x245   : > { %s7338_s30 = sld [smem:[#allocation71_spill]]  ;;  %v582_v49 = vstv %s7333_s29  ;;  %v579_v4 = vmul.f32 %v3710_v41, %v578_v48  ;;  %v572_v26 = vadd.f32 %v571_v11, %v4765_v32 }
 0x246   : > { %7334 = sst [smem:[#allocation51_spill]] %s4781_s27  ;;  %v583_v13 = vmul.f32 %v3710_v41, %v582_v49  ;;  %v576_v27 = vadd.f32 %v575_v3, %v4768_v33 }
 0x247   : > { %s4791_s26 = sld [smem:[#allocation7 + $0xb]]  ;;  %v580_v28 = vadd.f32 %v579_v4, %v4773_v34 }
 0x248   : > { %s7340_s21 = sld [smem:[#allocation72_spill]]  ;;  %v586_v50 = vstv %s7335_s7  ;;  %v584_v40 = vadd.f32 %v583_v13, %v4776_v35 }
 0x249   : > { %s7341_s27 = sld [smem:[#allocation73_spill]]  ;;  %v590_v51 = vstv %s7336_s20  ;;  %v587_v15 = vmul.f32 %v3710_v41, %v586_v50 }
 0x24a   : > { %s7342_s1 = sld [smem:[#allocation87_spill]]  ;;  %v594_v52 = vstv %s7337_s25  ;;  %v591_v18 = vmul.f32 %v3710_v41, %v590_v51 }
 0x24b   : > { %s4797_s22 = sld [smem:[#allocation9 + $0xb]]  ;;  %v605_v53 = vstv %s7338_s30  ;;  %v595_v19 = vmul.f32 %v3710_v41, %v594_v52  ;;  %v588_v29 = vadd.f32 %v587_v15, %v4779_v36 }
 0x24c   : > { %s7343_s6 = sld [smem:[#allocation74_spill]]  ;;  %v592_v30 = vadd.f32 %v591_v18, %v4784_v37  ;;  %v606_v34 = vmul.f32 %v3712_v25, %v605_v53 }
 0x24d   : > { %7339 = sst [smem:[#allocation53_spill]] %s4791_s26  ;;  %v596_v31 = vadd.f32 %v595_v19, %v4787_v38 }
 0x24e   : > { %s7344_s5 = sld [smem:[#allocation75_spill]]  ;;  %v609_v55 = vstv %s7340_s21  ;;  %v4894_v51 = vadd.f32 %v606_v34, %v536_v9 }
 0x24f   : > { %s7345_s16 = sld [smem:[#allocation76_spill]]  ;;  %v613_v56 = vstv %s7341_s27  ;;  %v610_v43 = vmul.f32 %v3712_v25, %v609_v55 }
 0x250   : > { %s7346_s15 = sld [smem:[#allocation77_spill]]  ;;  %v669_v57 = vstv %s7342_s1  ;;  %v614_v46 = vmul.f32 %v3712_v25, %v613_v56 }
 0x251   : > { %s4803_s26 = sld [smem:[#allocation10 + $0xb0]]  ;;  %v670_v8 = vmul.f32 %v669_v57, %v4573_v0 }
 0x252   : > { %s4809_s14 = sld [smem:[#allocation10 + $0xb1]]  ;;  %v617_v58 = vstv %s7343_s6  ;;  %v4906_v63 = vadd.f32 %v614_v46, %v544_v17 }
 0x253   : > { %s4816_s10 = sld [smem:[#allocation10 + $0xb2]]  ;;  %v618_v44 = vmul.f32 %v3712_v25, %v617_v58 }
 0x254   : > { %v621_v59 = vstv %s7344_s5  ;;  %s7349_s29 = sld [smem:[#allocation88_spill]] }
 0x255   : > { %v625_v60 = vstv %s7345_s16  ;;  %s4822_s9 = sld [smem:[#allocation10 + $0xb3]]  ;;  %v622_v47 = vmul.f32 %v3712_v25, %v621_v59  ;;  %v4902_v59 = vadd.f32 %v610_v43, %v540_v16  ;;  %v4908_v1 = vadd.f32 %v618_v44, %v548_v14 }
 0x256   : > { %v629_v61 = vstv %s7346_s15  ;;  %s4828_s28 = sld [smem:[#allocation10 + $0xb4]]  ;;  %v626_v48 = vmul.f32 %v3712_v25, %v625_v60 }
 0x257   : > { %s4831_s1 = sld [smem:[#allocation10 + $0xb5]]  ;;  %v630_v49 = vmul.f32 %v3712_v25, %v629_v61  ;;  %v4912_v6 = vadd.f32 %v622_v47, %v552_v20 }
 0x258   : > { %7347 = sst [smem:[#allocation54_spill]] %s4809_s14  ;;  %v4914_v7 = vadd.f32 %v626_v48, %v556_v21 }
 0x259   : > { %7348 = sst [smem:[#allocation55_spill]] %s4816_s10 }
 0x25a   : > { %v672_v12 = vstv %s7349_s29  ;;  %s4835_s2 = sld [smem:[#allocation10 + $0xb6]] }
 0x25b   : > { %7350 = sst [smem:[#allocation70_spill]] %s4822_s9  ;;  %v673_v24 = vadd.f32 %v672_v12, %v670_v8  ;;  %v4916_v8 = vadd.f32 %v630_v49, %v560_v22 }
 0x25c   : > { %7351 = sst [smem:[#allocation56_spill]] %s4828_s28 }
 0x25d   : > { %7352 = sst [smem:[#allocation57_spill]] %s4831_s1  ;;  %3713 = vtanh.f32 %v673_v24 }
 0x25e   : > { %s4837_s3 = sld [smem:[#allocation10 + $0xb7]] }
 0x25f   : > { %s4841_s30 = sld [smem:[#allocation10 + $0xb8]] }
 0x260   : > { %7353 = sst [smem:[#allocation58_spill]] %s4835_s2 }
 0x261   : > { %s7356_s25 = sld [smem:[#allocation78_spill]] }
 0x262   : > { %s7357_s20 = sld [smem:[#allocation79_spill]] }
 0x263   : > { %s4846_s7 = sld [smem:[#allocation10 + $0xb9]] }
 0x264   : > { %7354 = sst [smem:[#allocation59_spill]] %s4837_s3 }
 0x265   : > { %7355 = sst [smem:[#allocation60_spill]] %s4841_s30 }
 0x266   : > { %s7359_s11 = sld [smem:[#allocation80_spill]] }
 0x267   : > { %s7360_s17 = sld [smem:[#allocation105_spill]]  ;;  %v633_v32 = vstv %s7356_s25 }
 0x268   : > { %s4852_s12 = sld [smem:[#allocation10 + $0xba]]  ;;  %v637_v33 = vstv %s7357_s20  ;;  %v634_v52 = vmul.f32 %v3712_v25, %v633_v32 }
 0x269   : > { %7358 = sst [smem:[#allocation61_spill]] %s4846_s7  ;;  %v638_v55 = vmul.f32 %v3712_v25, %v637_v33 }
 0x26a   : > { %s7362_s23 = sld [smem:[#allocation81_spill]]  ;;  %v4918_v9 = vadd.f32 %v634_v52, %v564_v23 }
 0x26b   : > { %s7363_s29 = sld [smem:[#allocation82_spill]]  ;;  %v4922_v10 = vadd.f32 %v638_v55, %v568_v39 }
 0x26c   : > { %s7364_s7 = sld [smem:[#allocation83_spill]]  ;;  %v641_v35 = vstv %s7359_s11 }
 0x26d   : > { %s7365_s30 = sld [smem:[#allocation84_spill]]  ;;  %v740_v36 = vstv %s7360_s17  ;;  %v642_v56 = vmul.f32 %v3712_v25, %v641_v35 }
 0x26e   : > { %7361 = sst [smem:[#allocation62_spill]] %s4852_s12  ;;  %v741_v50 = vmul.f32 %v740_v36, %v4573_v0 }
 0x26f   : > { %s4858_s3 = sld [smem:[#allocation10 + $0xbb]]  ;;  %v4924_v11 = vadd.f32 %v642_v56, %v572_v26 }
 0x270   : > { %s7367_s12 = sld [smem:[#allocation85_spill]]  ;;  %v645_v41 = vstv %s7362_s23 }
 0x271   : > { %s4864_s2 = sld [smem:[#allocation10 + $0xbc]]  ;;  %v649_v37 = vstv %s7363_s29  ;;  %v646_v57 = vmul.f32 %v3712_v25, %v645_v41 }
 0x272   : > { %s7370_s1 = sld [smem:[#allocation86_spill]]  ;;  %v653_v42 = vstv %s7364_s7  ;;  %v650_v58 = vmul.f32 %v3712_v25, %v649_v37 }
 0x273   : > { %s7371_s28 = sld [smem:[#allocation106_spill]]  ;;  %v657_v38 = vstv %s7365_s30  ;;  %v654_v60 = vmul.f32 %v3712_v25, %v653_v42  ;;  %v4926_v12 = vadd.f32 %v646_v57, %v576_v27 }
 0x274   : > { %s4874_s25 = sld [smem:[#allocation10 + $0xbe]]  ;;  %v658_v61 = vmul.f32 %v3712_v25, %v657_v38  ;;  %v4928_v3 = vadd.f32 %v650_v58, %v580_v28 }
 0x275   : > { %7366 = sst [smem:[#allocation63_spill]] %s4858_s3  ;;  %v4932_v4 = vadd.f32 %v654_v60, %v584_v40 }
 0x276   : > { %s4868_s3 = sld [smem:[#allocation10 + $0xbd]]  ;;  %v661_v45 = vstv %s7367_s12  ;;  %v4934_v13 = vadd.f32 %v658_v61, %v588_v29 }
 0x277   : > { %7368 = sst [smem:[#allocation64_spill]] %s4864_s2  ;;  %v662_v62 = vmul.f32 %v3712_v25, %v661_v45 }
 0x278   : > { %s4883_s20 = sld [smem:[#allocation10 + $0xbf]]  ;;  %v665_v53 = vstv %s7370_s1 }
 0x279   : > { %s4892_s30 = sld [smem:[#allocation7 + $0xc]]  ;;  %v743_v54 = vstv %s7371_s28  ;;  %v666_v5 = vmul.f32 %v3712_v25, %v665_v53  ;;  %v4936_v15 = vadd.f32 %v662_v62, %v592_v30  ;;  %v3714_v25 = vpop.eup %3713 }
 0x27a   : > { %7372 = sst [smem:[#allocation66_spill]] %s4874_s25  ;;  %v744_v2 = vadd.f32 %v743_v54, %v741_v50 }
 0x27b   : > { %s4898_s6 = sld [smem:[#allocation9 + $0xc]]  ;;  %v4941_v17 = vadd.f32 %v666_v5, %v596_v31 }
 0x27c   : > { %7369 = sst [smem:[#allocation65_spill]] %s4868_s3  ;;  %3715 = vtanh.f32 %v744_v2 }
 0x27d   : > { %s4900_s5 = sld [smem:[#allocation10 + $0xc0]] }
 0x27e   : > { %7373 = sst [smem:[#allocation67_spill]] %s4883_s20 }
 0x27f   : > { %7374 = sst [smem:[#allocation68_spill]] %s4892_s30 }
 0x280   : > { %s4904_s21 = sld [smem:[#allocation10 + $0xc1]] }
 0x281   : > { %7375 = sst [smem:[#allocation71_spill]] %s4898_s6 }
 0x282   : > { %s7378_s27 = sld [smem:[#allocation89_spill]] }
 0x283   : > { %7376 = sst [smem:[#allocation72_spill]] %s4900_s5 }
 0x284   : > { %s4910_s16 = sld [smem:[#allocation10 + $0xc2]] }
 0x285   : > { %s7380_s15 = sld [smem:[#allocation90_spill]] }
 0x286   : > { %7377 = sst [smem:[#allocation73_spill]] %s4904_s21 }
 0x287   : > { %s7381_s28 = sld [smem:[#allocation91_spill]] }
 0x288   : > { %s4920_s1 = sld [smem:[#allocation10 + $0xc3]]  ;;  %v676_v16 = vstv %s7378_s27 }
 0x289   : > { %s7383_s7 = sld [smem:[#allocation92_spill]]  ;;  %v677_v34 = vmul.f32 %v3714_v25, %v676_v16 }
 0x28a   : > { %7379 = sst [smem:[#allocation87_spill]] %s4910_s16 }
 0x28b   : > { %s7384_s11 = sld [smem:[#allocation93_spill]]  ;;  %v680_v18 = vstv %s7380_s15  ;;  %v678_v53 = vadd.f32 %v677_v34, %v4894_v51 }
 0x28c   : > { %s7385_s17 = sld [smem:[#allocation94_spill]]  ;;  %v681_v37 = vmul.f32 %v3714_v25, %v680_v18 }
 0x28d   : > { %s7386_s12 = sld [smem:[#allocation95_spill]]  ;;  %v684_v19 = vstv %s7381_s28 }
 0x28e   : > { %7382 = sst [smem:[#allocation74_spill]] %s4920_s1  ;;  %v685_v46 = vmul.f32 %v3714_v25, %v684_v19  ;;  %v682_v62 = vadd.f32 %v681_v37, %v4902_v59 }
 0x28f   : > { %s4930_s23 = sld [smem:[#allocation10 + $0xc4]]  ;;  %v688_v14 = vstv %s7383_s7 }
 0x290   : > { %s7388_s29 = sld [smem:[#allocation96_spill]]  ;;  %v689_v44 = vmul.f32 %v3714_v25, %v688_v14  ;;  %v686_v5 = vadd.f32 %v685_v46, %v4906_v63 }
 0x291   : > { %s7389_s1 = sld [smem:[#allocation97_spill]]  ;;  %v692_v20 = vstv %s7384_s11 }
 0x292   : > { %s7390_s16 = sld [smem:[#allocation98_spill]]  ;;  %v696_v21 = vstv %s7385_s17  ;;  %v693_v45 = vmul.f32 %v3714_v25, %v692_v20  ;;  %v690_v51 = vadd.f32 %v689_v44, %v4908_v1  ;;  %v3716_v20 = vpop.eup %3715 }
 0x293   : > { %s7391_s21 = sld [smem:[#allocation99_spill]]  ;;  %v700_v24 = vstv %s7386_s12  ;;  %v697_v48 = vmul.f32 %v3714_v25, %v696_v21 }
 0x294   : > { %s4939_s5 = sld [smem:[#allocation10 + $0xc5]]  ;;  %v701_v49 = vmul.f32 %v3714_v25, %v700_v24  ;;  %v694_v18 = vadd.f32 %v693_v45, %v4912_v6 }
 0x295   : > { %7387 = sst [smem:[#allocation75_spill]] %s4930_s23  ;;  %v698_v19 = vadd.f32 %v697_v48, %v4914_v7 }
 0x296   : > { %s7393_s20 = sld [smem:[#allocation100_spill]]  ;;  %v704_v22 = vstv %s7388_s29  ;;  %v702_v14 = vadd.f32 %v701_v49, %v4916_v8 }
 0x297   : > { %s7394_s25 = sld [smem:[#allocation101_spill]]  ;;  %v708_v23 = vstv %s7389_s1  ;;  %v705_v50 = vmul.f32 %v3714_v25, %v704_v22 }
 0x298   : > { %s7395_s23 = sld [smem:[#allocation102_spill]]  ;;  %v712_v39 = vstv %s7390_s16  ;;  %v709_v54 = vmul.f32 %v3714_v25, %v708_v23 }
 0x299   : > { %s7396_s3 = sld [smem:[#allocation103_spill]]  ;;  %v716_v26 = vstv %s7391_s21  ;;  %v713_v55 = vmul.f32 %v3714_v25, %v712_v39  ;;  %v706_v59 = vadd.f32 %v705_v50, %v4918_v9 }
 0x29a   : > { %7392 = sst [smem:[#allocation76_spill]] %s4939_s5  ;;  %v717_v56 = vmul.f32 %v3714_v25, %v716_v26  ;;  %v710_v63 = vadd.f32 %v709_v54, %v4922_v10 }
 0x29b   : > { %s4945_s2 = sld [smem:[#allocation10 + $0xc6]]  ;;  %v714_v21 = vadd.f32 %v713_v55, %v4924_v11 }
 0x29c   : > { %s7398_s6 = sld [smem:[#allocation104_spill]]  ;;  %v720_v27 = vstv %s7393_s20  ;;  %v718_v1 = vadd.f32 %v717_v56, %v4926_v12 }
 0x29d   : > { %s7399_s9 = sld [smem:[#allocation107_spill]]  ;;  %v724_v28 = vstv %s7394_s25  ;;  %v721_v57 = vmul.f32 %v3714_v25, %v720_v27 }
 0x29e   : > { %s7400_s27 = sld [smem:[#allocation108_spill]]  ;;  %v728_v40 = vstv %s7395_s23  ;;  %v725_v58 = vmul.f32 %v3714_v25, %v724_v28 }
 0x29f   : > { %s7401_s30 = sld [smem:[#allocation123_spill]]  ;;  %v732_v29 = vstv %s7396_s3  ;;  %v729_v60 = vmul.f32 %v3714_v25, %v728_v40  ;;  %v722_v6 = vadd.f32 %v721_v57, %v4928_v3 }
 0x2a0   : > { %s4951_s5 = sld [smem:[#allocation10 + $0xc7]]  ;;  %v733_v61 = vmul.f32 %v3714_v25, %v732_v29  ;;  %v726_v7 = vadd.f32 %v725_v58, %v4932_v4 }
 0x2a1   : > { %7397 = sst [smem:[#allocation77_spill]] %s4945_s2  ;;  %v730_v8 = vadd.f32 %v729_v60, %v4934_v13 }
 0x2a2   : > { %s7403_s15 = sld [smem:[#allocation109_spill]]  ;;  %v736_v30 = vstv %s7398_s6  ;;  %v734_v9 = vadd.f32 %v733_v61, %v4936_v15 }
 0x2a3   : > { %s7404_s28 = sld [smem:[#allocation110_spill]]  ;;  %v747_v31 = vstv %s7399_s9  ;;  %v737_v2 = vmul.f32 %v3714_v25, %v736_v30  ;;  %v885_v30 = vstv %s4520_s0 }
 0x2a4   : > { %s7405_s10 = sld [smem:[#allocation111_spill]]  ;;  %v751_v32 = vstv %s7400_s27  ;;  %v748_v12 = vmul.f32 %v3716_v20, %v747_v31 }
 0x2a5   : > { %s4957_s14 = sld [smem:[#allocation10 + $0xc8]]  ;;  %v811_v33 = vstv %s7401_s30  ;;  %v738_v10 = vadd.f32 %v737_v2, %v4941_v17  ;;  %v752_v13 = vmul.f32 %v3716_v20, %v751_v32 }
 0x2a6   : > { %7402 = sst [smem:[#allocation88_spill]] %s4951_s5  ;;  %v812_v47 = vmul.f32 %v811_v33, %v4573_v0  ;;  %v5037_v31 = vadd.f32 %v748_v12, %v678_v53  ;;  %v953_v12 = vstv %s4554_s19 }
 0x2a7   : > { %s7407_s7 = sld [smem:[#allocation112_spill]] }
 0x2a8   : > { %s7408_s11 = sld [smem:[#allocation113_spill]]  ;;  %v755_v35 = vstv %s7403_s15 }
 0x2a9   : > { %s7409_s17 = sld [smem:[#allocation114_spill]]  ;;  %v759_v36 = vstv %s7404_s28  ;;  %v756_v15 = vmul.f32 %v3716_v20, %v755_v35  ;;  %v5042_v35 = vadd.f32 %v752_v13, %v682_v62 }
 0x2aa   : > { %s4963_s12 = sld [smem:[#allocation10 + $0xc9]]  ;;  %v763_v41 = vstv %s7405_s10  ;;  %v760_v22 = vmul.f32 %v3716_v20, %v759_v36 }
 0x2ab   : > { %7406 = sst [smem:[#allocation78_spill]] %s4957_s14  ;;  %v764_v17 = vmul.f32 %v3716_v20, %v763_v41  ;;  %v5044_v36 = vadd.f32 %v756_v15, %v686_v5 }
 0x2ac   : > { %s4969_s1 = sld [smem:[#allocation10 + $0xca]]  ;;  %v5050_v44 = vadd.f32 %v760_v22, %v690_v51 }
 0x2ad   : > { %s7412_s21 = sld [smem:[#allocation124_spill]]  ;;  %v767_v42 = vstv %s7407_s7  ;;  %v5052_v45 = vadd.f32 %v764_v17, %v694_v18 }
 0x2ae   : > { %s4974_s20 = sld [smem:[#allocation10 + $0xcb]]  ;;  %v771_v38 = vstv %s7408_s11  ;;  %v768_v23 = vmul.f32 %v3716_v20, %v767_v42 }
 0x2af   : > { %v775_v43 = vstv %s7409_s17  ;;  %s4979_s3 = sld [smem:[#allocation10 + $0xcc]]  ;;  %v772_v39 = vmul.f32 %v3716_v20, %v771_v38 }
 0x2b0   : > { %7410 = sst [smem:[#allocation79_spill]] %s4963_s12  ;;  %v776_v26 = vmul.f32 %v3716_v20, %v775_v43 }
 0x2b1   : > { %s4982_s9 = sld [smem:[#allocation10 + $0xcd]]  ;;  %v5058_v49 = vadd.f32 %v772_v39, %v702_v14 }
 0x2b2   : > { %7411 = sst [smem:[#allocation80_spill]] %s4969_s1  ;;  %v5060_v50 = vadd.f32 %v776_v26, %v706_v59 }
 0x2b3   : > { %v814_v52 = vstv %s7412_s21  ;;  %s4985_s10 = sld [smem:[#allocation10 + $0xce]] }
 0x2b4   : > { %7413 = sst [smem:[#allocation105_spill]] %s4974_s20  ;;  %v815_v16 = vadd.f32 %v814_v52, %v812_v47  ;;  %v5054_v47 = vadd.f32 %v768_v23, %v698_v19 }
 0x2b5   : > { %7414 = sst [smem:[#allocation81_spill]] %s4979_s3 }
 0x2b6   : > { %s4988_s25 = sld [smem:[#allocation10 + $0xcf]]  ;;  %3717 = vtanh.f32 %v815_v16 }
 0x2b7   : > { %7415 = sst [smem:[#allocation82_spill]] %s4982_s9 }
 0x2b8   : > { %s4990_s30 = sld [smem:[#allocation7 + $0xd]] }
 0x2b9   : > { %7416 = sst [smem:[#allocation83_spill]] %s4985_s10 }
 0x2ba   : > { %s4994_s6 = sld [smem:[#allocation9 + $0xd]] }
 0x2bb   : > { %s7418_s16 = sld [smem:[#allocation115_spill]] }
 0x2bc   : > { %7417 = sst [smem:[#allocation84_spill]] %s4988_s25 }
 0x2bd   : > { %s7419_s23 = sld [smem:[#allocation141_spill]] }
 0x2be   : > { %s5000_s29 = sld [smem:[#allocation10 + $0xd0]] }
 0x2bf   : > { %s7421_s15 = sld [smem:[#allocation116_spill]] }
 0x2c0   : > { %s7422_s28 = sld [smem:[#allocation117_spill]] }
 0x2c1   : > { %s7423_s7 = sld [smem:[#allocation118_spill]]  ;;  %v779_v24 = vstv %s7418_s16 }
 0x2c2   : > { %s5006_s11 = sld [smem:[#allocation10 + $0xd1]]  ;;  %v780_v32 = vmul.f32 %v3716_v20, %v779_v24 }
 0x2c3   : > { %s5012_s17 = sld [smem:[#allocation10 + $0xd2]]  ;;  %v882_v11 = vstv %s7419_s23  ;;  %v3718_v51 = vpop.eup %3717 }
 0x2c4   : > { %7420 = sst [smem:[#allocation85_spill]] %s5000_s29  ;;  %v883_v27 = vmul.f32 %v882_v11, %v4573_v0  ;;  %v5062_v52 = vadd.f32 %v780_v32, %v710_v63 }
 0x2c5   : > { %s5017_s21 = sld [smem:[#allocation10 + $0xd3]]  ;;  %v783_v25 = vstv %s7421_s15 }
 0x2c6   : > { %s7427_s29 = sld [smem:[#allocation119_spill]]  ;;  %v787_v3 = vstv %s7422_s28  ;;  %v784_v33 = vmul.f32 %v3716_v20, %v783_v25  ;;  %v886_v46 = vadd.f32 %v885_v30, %v883_v27 }
 0x2c7   : > { %s7429_s25 = sld [smem:[#allocation121_spill]]  ;;  %v791_v4 = vstv %s7423_s7  ;;  %v788_v41 = vmul.f32 %v3716_v20, %v787_v3 }
 0x2c8   : > { %7424 = sst [smem:[#allocation86_spill]] %s5006_s11  ;;  %v792_v37 = vmul.f32 %v3716_v20, %v791_v4  ;;  %v5064_v53 = vadd.f32 %v784_v33, %v714_v21  ;;  %3719 = vtanh.f32 %v886_v46 }
 0x2c9   : > { %7425 = sst [smem:[#allocation106_spill]] %s5012_s17  ;;  %v5068_v54 = vadd.f32 %v788_v41, %v718_v1 }
 0x2ca   : > { %s7428_s11 = sld [smem:[#allocation120_spill]]  ;;  %v5070_v55 = vadd.f32 %v792_v37, %v722_v6 }
 0x2cb   : > { %7426 = sst [smem:[#allocation89_spill]] %s5017_s21 }
 0x2cc   : > { %s5022_s10 = sld [smem:[#allocation10 + $0xd4]]  ;;  %v795_v28 = vstv %s7427_s29 }
 0x2cd   : > { %s7431_s17 = sld [smem:[#allocation122_spill]]  ;;  %v803_v29 = vstv %s7429_s25  ;;  %v796_v42 = vmul.f32 %v3716_v20, %v795_v28  ;;  %v954_v28 = vmul.f32 %v953_v12, %v4573_v0 }
 0x2ce   : > { %s5026_s16 = sld [smem:[#allocation10 + $0xd5]]  ;;  %v804_v43 = vmul.f32 %v3716_v20, %v803_v29 }
 0x2cf   : > { %s5029_s23 = sld [smem:[#allocation10 + $0xd6]]  ;;  %v5076_v58 = vadd.f32 %v796_v42, %v726_v7 }
 0x2d0   : > { %v799_v40 = vstv %s7428_s11  ;;  %s5035_s15 = sld [smem:[#allocation10 + $0xd7]]  ;;  %v5080_v61 = vadd.f32 %v804_v43, %v734_v9 }
 0x2d1   : > { %s5040_s27 = sld [smem:[#allocation10 + $0xd8]]  ;;  %v800_v38 = vmul.f32 %v3716_v20, %v799_v40 }
 0x2d2   : > { %7430 = sst [smem:[#allocation90_spill]] %s5022_s10 }
 0x2d3   : > { %v807_v34 = vstv %s7431_s17  ;;  %s5046_s28 = sld [smem:[#allocation10 + $0xd9]]  ;;  %v5078_v60 = vadd.f32 %v800_v38, %v730_v8 }
 0x2d4   : > { %7432 = sst [smem:[#allocation91_spill]] %s5026_s16  ;;  %v808_v48 = vmul.f32 %v3716_v20, %v807_v34 }
 0x2d5   : > { %7433 = sst [smem:[#allocation92_spill]] %s5029_s23 }
 0x2d6   : > { %7434 = sst [smem:[#allocation93_spill]] %s5035_s15  ;;  %v5084_v62 = vadd.f32 %v808_v48, %v738_v10 }
 0x2d7   : > { %7435 = sst [smem:[#allocation94_spill]] %s5040_s27 }
 0x2d8   : > { %s7437_s0 = sld [smem:[#allocation125_spill]] }
 0x2d9   : > { %7436 = sst [smem:[#allocation95_spill]] %s5046_s28 }
 0x2da   : > { %s7438_s25 = sld [smem:[#allocation126_spill]] }
 0x2db   : > { %s5048_s29 = sld [smem:[#allocation10 + $0xda]] }
 0x2dc   : > { %s5056_s7 = sld [smem:[#allocation10 + $0xdb]] }
 0x2dd   : > { %s7441_s11 = sld [smem:[#allocation127_spill]] }
 0x2de   : > { %s7442_s17 = sld [smem:[#allocation128_spill]]  ;;  %v818_v56 = vstv %s7437_s0 }
 0x2df   : > { %s7443_s28 = sld [smem:[#allocation129_spill]]  ;;  %v819_v10 = vmul.f32 %v3718_v51, %v818_v56 }
 0x2e0   : > { %s7445_s27 = sld [smem:[#allocation130_spill]]  ;;  %v822_v57 = vstv %s7438_s25 }
 0x2e1   : > { %7439 = sst [smem:[#allocation96_spill]] %s5048_s29  ;;  %v823_v15 = vmul.f32 %v3718_v51, %v822_v57  ;;  %v820_v40 = vadd.f32 %v819_v10, %v5037_v31  ;;  %v3720_v57 = vpop.eup %3719  ;;  %v1027_v10 = vstv %s4599_s18 }
 0x2e2   : > { %7440 = sst [smem:[#allocation97_spill]] %s5056_s7 }
 0x2e3   : > { %s5066_s29 = sld [smem:[#allocation10 + $0xdc]]  ;;  %v826_v5 = vstv %s7441_s11  ;;  %v824_v0 = vadd.f32 %v823_v15, %v5042_v35 }
 0x2e4   : > { %s7446_s15 = sld [smem:[#allocation131_spill]]  ;;  %v830_v2 = vstv %s7442_s17  ;;  %v827_v22 = vmul.f32 %v3718_v51, %v826_v5 }
 0x2e5   : > { %s7447_s7 = sld [smem:[#allocation132_spill]]  ;;  %v834_v16 = vstv %s7443_s28  ;;  %v831_v39 = vmul.f32 %v3718_v51, %v830_v2 }
 0x2e6   : > { %s7448_s23 = sld [smem:[#allocation133_spill]]  ;;  %v838_v18 = vstv %s7445_s27  ;;  %v835_v26 = vmul.f32 %v3718_v51, %v834_v16  ;;  %v828_v31 = vadd.f32 %v827_v22, %v5044_v36 }
 0x2e7   : > { %s5074_s16 = sld [smem:[#allocation10 + $0xdd]]  ;;  %v839_v27 = vmul.f32 %v3718_v51, %v838_v18  ;;  %v832_v48 = vadd.f32 %v831_v39, %v5050_v44 }
 0x2e8   : > { %s7450_s10 = sld [smem:[#allocation134_spill]]  ;;  %v836_v5 = vadd.f32 %v835_v26, %v5052_v45 }
 0x2e9   : > { %7444 = sst [smem:[#allocation98_spill]] %s5066_s29  ;;  %v840_v2 = vadd.f32 %v839_v27, %v5054_v47 }
 0x2ea   : > { %s7451_s21 = sld [smem:[#allocation135_spill]]  ;;  %v842_v19 = vstv %s7446_s15 }
 0x2eb   : > { %s7452_s29 = sld [smem:[#allocation136_spill]]  ;;  %v846_v14 = vstv %s7447_s7  ;;  %v843_v29 = vmul.f32 %v3718_v51, %v842_v19 }
 0x2ec   : > { %s7453_s9 = sld [smem:[#allocation137_spill]]  ;;  %v850_v20 = vstv %s7448_s23  ;;  %v847_v30 = vmul.f32 %v3718_v51, %v846_v14 }
 0x2ed   : > { %7449 = sst [smem:[#allocation99_spill]] %s5074_s16  ;;  %v851_v33 = vmul.f32 %v3718_v51, %v850_v20  ;;  %v844_v16 = vadd.f32 %v843_v29, %v5058_v49 }
 0x2ee   : > { %s5082_s3 = sld [smem:[#allocation10 + $0xde]]  ;;  %v854_v59 = vstv %s7450_s10 }
 0x2ef   : > { %s7455_s0 = sld [smem:[#allocation138_spill]]  ;;  %v855_v34 = vmul.f32 %v3718_v51, %v854_v59  ;;  %v852_v35 = vadd.f32 %v851_v33, %v5062_v52 }
 0x2f0   : > { %s7456_s25 = sld [smem:[#allocation139_spill]]  ;;  %v858_v63 = vstv %s7451_s21 }
 0x2f1   : > { %s7457_s16 = sld [smem:[#allocation140_spill]]  ;;  %v862_v21 = vstv %s7452_s29  ;;  %v859_v41 = vmul.f32 %v3718_v51, %v858_v63  ;;  %v856_v36 = vadd.f32 %v855_v34, %v5064_v53 }
 0x2f2   : > { %s7458_s20 = sld [smem:[#allocation142_spill]]  ;;  %v866_v1 = vstv %s7453_s9  ;;  %v863_v37 = vmul.f32 %v3718_v51, %v862_v21 }
 0x2f3   : > { %s5089_s1 = sld [smem:[#allocation10 + $0xdf]]  ;;  %v867_v42 = vmul.f32 %v3718_v51, %v866_v1  ;;  %v860_v44 = vadd.f32 %v859_v41, %v5068_v54  ;;  %v1024_v54 = vstv %s4597_s8  ;;  %v5172_v1 = vld [vmem:[%s4260_s24] sm:$0xff] }
 0x2f4   : > { %7454 = sst [smem:[#allocation100_spill]] %s5082_s3  ;;  %v864_v18 = vadd.f32 %v863_v37, %v5070_v55 }
 0x2f5   : > { %s7459_s12 = sld [smem:[#allocation143_spill]]  ;;  %v870_v6 = vstv %s7455_s0  ;;  %v868_v45 = vadd.f32 %v867_v42, %v5076_v58 }
 0x2f6   : > { %s7460_s14 = sld [smem:[#allocation144_spill]]  ;;  %v874_v7 = vstv %s7456_s25  ;;  %v871_v38 = vmul.f32 %v3718_v51, %v870_v6  ;;  %v1025_v6 = vmul.f32 %v5172_v1, %v1024_v54 }
 0x2f7   : > { %s5095_s3 = sld [smem:[#allocation7 + $0xe]]  ;;  %v878_v8 = vstv %s7457_s16  ;;  %v875_v43 = vmul.f32 %v3718_v51, %v874_v7 }
 0x2f8   : > { %s7461_s5 = sld [smem:[#allocation145_spill]]  ;;  %v889_v9 = vstv %s7458_s20  ;;  %v879_v46 = vmul.f32 %v3718_v51, %v878_v8  ;;  %v848_v51 = vadd.f32 %v847_v30, %v5060_v50  ;;  %v872_v47 = vadd.f32 %v871_v38, %v5078_v60 }
 0x2f9   : > { %s7462_s11 = sld [smem:[#allocation146_spill]]  ;;  %v876_v49 = vadd.f32 %v875_v43, %v5080_v61  ;;  %v890_v52 = vmul.f32 %v3720_v57, %v889_v9  ;;  %v1028_v26 = vadd.f32 %v1027_v10, %v1025_v6  ;;  %v964_v43 = vstv %s4560_s4 }
 0x2fa   : > { %s7463_s17 = sld [smem:[#allocation147_spill]]  ;;  %v880_v50 = vadd.f32 %v879_v46, %v5084_v62  ;;  %v968_v46 = vstv %s4562_s13 }
 0x2fb   : > { %s7464_s28 = sld [smem:[#allocation148_spill]]  ;;  %v893_v24 = vstv %s7459_s12  ;;  %v5177_v7 = vadd.f32 %v890_v52, %v820_v40 }
 0x2fc   : > { %s5101_s2 = sld [smem:[#allocation9 + $0xe]]  ;;  %v897_v11 = vstv %s7460_s14  ;;  %v894_v53 = vmul.f32 %v3720_v57, %v893_v24 }
 0x2fd   : > { %s7465_s27 = sld [smem:[#allocation149_spill]]  ;;  %v898_v55 = vmul.f32 %v3720_v57, %v897_v11 }
 0x2fe   : > { %s7466_s15 = sld [smem:[#allocation150_spill]]  ;;  %v901_v25 = vstv %s7461_s5 }
 0x2ff   : > { %s5107_s7 = sld [smem:[#allocation10 + $0xe0]]  ;;  %v905_v3 = vstv %s7462_s11  ;;  %v902_v58 = vmul.f32 %v3720_v57, %v901_v25  ;;  %v5193_v22 = vadd.f32 %v898_v55, %v828_v31 }
 0x300   : > { %s5112_s10 = sld [smem:[#allocation10 + $0xe1]]  ;;  %v909_v4 = vstv %s7463_s17  ;;  %v906_v60 = vmul.f32 %v3720_v57, %v905_v3  ;;  %v5189_v3 = vadd.f32 %v894_v53, %v824_v0 }
 0x301   : > { %s7469_s9 = sld [smem:[#allocation158_spill]]  ;;  %v913_v13 = vstv %s7464_s28  ;;  %v910_v61 = vmul.f32 %v3720_v57, %v909_v4 }
 0x302   : > { %s5118_s21 = sld [smem:[#allocation10 + $0xe2]]  ;;  %v914_v62 = vmul.f32 %v3720_v57, %v913_v13 }
 0x303   : > { %v917_v17 = vstv %s7465_s27  ;;  %s5122_s20 = sld [smem:[#allocation10 + $0xe3]]  ;;  %v5201_v27 = vadd.f32 %v910_v61, %v840_v2 }
 0x304   : > { %v921_v23 = vstv %s7466_s15  ;;  %s5125_s19 = sld [smem:[#allocation10 + $0xe4]]  ;;  %v918_v8 = vmul.f32 %v3720_v57, %v917_v17  ;;  %v5195_v17 = vadd.f32 %v902_v58, %v832_v48 }
 0x305   : > { %7467 = sst [smem:[#allocation101_spill]] %s5107_s7  ;;  %v922_v24 = vmul.f32 %v3720_v57, %v921_v23  ;;  %v5199_v23 = vadd.f32 %v906_v60, %v836_v5 }
 0x306   : > { %7468 = sst [smem:[#allocation102_spill]] %s5112_s10  ;;  %v5205_v40 = vadd.f32 %v918_v8, %v848_v51 }
 0x307   : > { %v956_v32 = vstv %s7469_s9  ;;  %s5129_s14 = sld [smem:[#allocation10 + $0xe5]]  ;;  %v5209_v29 = vadd.f32 %v922_v24, %v852_v35 }
 0x308   : > { %7470 = sst [smem:[#allocation103_spill]] %s5118_s21  ;;  %v957_v56 = vadd.f32 %v956_v32, %v954_v28  ;;  %v5203_v28 = vadd.f32 %v914_v62, %v844_v16 }
 0x309   : > { %7471 = sst [smem:[#allocation104_spill]] %s5122_s20 }
 0x30a   : > { %7472 = sst [smem:[#allocation107_spill]] %s5125_s19  ;;  %3721 = vtanh.f32 %v957_v56 }
 0x30b   : > { %s5131_s5 = sld [smem:[#allocation10 + $0xe6]]  ;;  %3723 = vtanh.f32 %v1028_v26 }
 0x30c   : > { %s5133_s12 = sld [smem:[#allocation10 + $0xe7]] }
 0x30d   : > { %7473 = sst [smem:[#allocation108_spill]] %s5129_s14 }
 0x30e   : > { %s5138_s16 = sld [smem:[#allocation10 + $0xe8]] }
 0x30f   : > { %s5144_s23 = sld [smem:[#allocation10 + $0xe9]] }
 0x310   : > { %s5150_s29 = sld [smem:[#allocation10 + $0xea]] }
 0x311   : > { %7474 = sst [smem:[#allocation123_spill]] %s5131_s5 }
 0x312   : > { %7475 = sst [smem:[#allocation109_spill]] %s5133_s12 }
 0x313   : > { %s7479_s0 = sld [smem:[#allocation151_spill]] }
 0x314   : > { %7476 = sst [smem:[#allocation110_spill]] %s5138_s16 }
 0x315   : > { %7477 = sst [smem:[#allocation111_spill]] %s5144_s23 }
 0x316   : > { %7478 = sst [smem:[#allocation112_spill]] %s5150_s29 }
 0x317   : > { %s7480_s25 = sld [smem:[#allocation152_spill]] }
 0x318   : > { %s7481_s11 = sld [smem:[#allocation153_spill]] }
 0x319   : > { %s5156_s17 = sld [smem:[#allocation10 + $0xeb]]  ;;  %v925_v19 = vstv %s7479_s0 }
 0x31a   : > { %s7483_s28 = sld [smem:[#allocation154_spill]]  ;;  %v926_v11 = vmul.f32 %v3720_v57, %v925_v19 }
 0x31b   : > { %s7484_s9 = sld [smem:[#allocation155_spill]] }
 0x31c   : > { %s7485_s23 = sld [smem:[#allocation156_spill]]  ;;  %v5211_v30 = vadd.f32 %v926_v11, %v856_v36 }
 0x31d   : > { %s5159_s29 = sld [smem:[#allocation10 + $0xec]]  ;;  %v929_v14 = vstv %s7480_s25 }
 0x31e   : > { %s7487_s16 = sld [smem:[#allocation157_spill]]  ;;  %v933_v20 = vstv %s7481_s11  ;;  %v930_v12 = vmul.f32 %v3720_v57, %v929_v14 }
 0x31f   : > { %7482 = sst [smem:[#allocation113_spill]] %s5156_s17  ;;  %v934_v25 = vmul.f32 %v3720_v57, %v933_v20 }
 0x320   : > { %s5161_s12 = sld [smem:[#allocation10 + $0xed]]  ;;  %v937_v59 = vstv %s7483_s28  ;;  %v5213_v32 = vadd.f32 %v930_v12, %v860_v44 }
 0x321   : > { %s5166_s17 = sld [smem:[#allocation10 + $0xee]]  ;;  %v941_v63 = vstv %s7484_s9  ;;  %v938_v4 = vmul.f32 %v3720_v57, %v937_v59  ;;  %v5215_v33 = vadd.f32 %v934_v25, %v864_v18 }
 0x322   : > { %v945_v21 = vstv %s7485_s23  ;;  %s5175_s8 = sld [smem:[#allocation10 + $0xef]]  ;;  %v942_v13 = vmul.f32 %v3720_v57, %v941_v63 }
 0x323   : > { %7486 = sst [smem:[#allocation114_spill]] %s5159_s29  ;;  %v946_v15 = vmul.f32 %v3720_v57, %v945_v21  ;;  %v5219_v34 = vadd.f32 %v938_v4, %v868_v45 }
 0x324   : > { %v949_v9 = vstv %s7487_s16  ;;  %s5183_s0 = sld [smem:[#allocation7 + $0xf]]  ;;  %v5221_v41 = vadd.f32 %v942_v13, %v872_v47 }
 0x325   : > { %s5187_s23 = sld [smem:[#allocation9 + $0xf]]  ;;  %v950_v39 = vmul.f32 %v3720_v57, %v949_v9  ;;  %v5223_v37 = vadd.f32 %v946_v15, %v876_v49  ;;  %v3722_v57 = vpop.eup %3721 }
 0x326   : > { %7488 = sst [smem:[#allocation124_spill]] %s5161_s12  ;;  %v965_v58 = vmul.f32 %v3722_v57, %v964_v43  ;;  %v969_v19 = vmul.f32 %v3722_v57, %v968_v46 }
 0x327   : > { %7489 = sst [smem:[#allocation115_spill]] %s5166_s17  ;;  %v5228_v38 = vadd.f32 %v950_v39, %v880_v50 }
 0x328   : > { %7490 = sst [smem:[#allocation141_spill]] %s5175_s8  ;;  %v966_v15 = vadd.f32 %v965_v58, %v5189_v3  ;;  %v970_v39 = vadd.f32 %v969_v19, %v5193_v22 }
 0x329   : > { %s5191_s25 = sld [smem:[#allocation10 + $0xf0]] }
 0x32a   : > { %s7492_s18 = sld [smem:[#allocation159_spill]] }
 0x32b   : > { %s5197_s27 = sld [smem:[#allocation10 + $0xf1]] }
 0x32c   : > { %s5207_s15 = sld [smem:[#allocation10 + $0xf2]] }
 0x32d   : > { %s7495_s16 = sld [smem:[#allocation160_spill]] }
 0x32e   : > { %s7496_s11 = sld [smem:[#allocation161_spill]] }
 0x32f   : > { %7491 = sst [smem:[#allocation116_spill]] %s5191_s25 }
 0x330   : > { %s7497_s28 = sld [smem:[#allocation162_spill]]  ;;  %v960_v42 = vstv %s7492_s18 }
 0x331   : > { %7493 = sst [smem:[#allocation117_spill]] %s5197_s27  ;;  %v961_v52 = vmul.f32 %v3722_v57, %v960_v42 }
 0x332   : > { %7494 = sst [smem:[#allocation118_spill]] %s5207_s15 }
 0x333   : > { %s7498_s9 = sld [smem:[#allocation163_spill]]  ;;  %v972_v0 = vstv %s7495_s16  ;;  %v962_v9 = vadd.f32 %v961_v52, %v5177_v7 }
 0x334   : > { %s5217_s24 = sld [smem:[#allocation10 + $0xf3]]  ;;  %v976_v31 = vstv %s7496_s11  ;;  %v973_v14 = vmul.f32 %v3722_v57, %v972_v0 }
 0x335   : > { %s7500_s27 = sld [smem:[#allocation164_spill]]  ;;  %v977_v20 = vmul.f32 %v3722_v57, %v976_v31  ;;  %v3724_v31 = vpop.eup %3723 }
 0x336   : > { %s7501_s15 = sld [smem:[#allocation165_spill]]  ;;  %v980_v48 = vstv %s7497_s28  ;;  %v974_v7 = vadd.f32 %v973_v14, %v5195_v17 }
 0x337   : > { %s7502_s25 = sld [smem:[#allocation166_spill]]  ;;  %v981_v63 = vmul.f32 %v3722_v57, %v980_v48  ;;  %v978_v43 = vadd.f32 %v977_v20, %v5199_v23 }
 0x338   : > { %s7503_s8 = sld [smem:[#allocation167_spill]] }
 0x339   : > { %s5226_s17 = sld [smem:[#allocation10 + $0xf4]]  ;;  %v984_v56 = vstv %s7498_s9  ;;  %v982_v46 = vadd.f32 %v981_v63, %v5201_v27 }
 0x33a   : > { %7499 = sst [smem:[#allocation119_spill]] %s5217_s24  ;;  %v985_v21 = vmul.f32 %v3722_v57, %v984_v56 }
 0x33b   : > { %s7505_s12 = sld [smem:[#allocation168_spill]]  ;;  %v988_v5 = vstv %s7500_s27 }
 0x33c   : > { %s7506_s29 = sld [smem:[#allocation169_spill]]  ;;  %v992_v2 = vstv %s7501_s15  ;;  %v989_v6 = vmul.f32 %v3722_v57, %v988_v5  ;;  %v986_v0 = vadd.f32 %v985_v21, %v5203_v28 }
 0x33d   : > { %s7507_s24 = sld [smem:[#allocation170_spill]]  ;;  %v996_v16 = vstv %s7502_s25  ;;  %v993_v10 = vmul.f32 %v3722_v57, %v992_v2 }
 0x33e   : > { %s7508_s5 = sld [smem:[#allocation171_spill]]  ;;  %v1000_v51 = vstv %s7503_s8  ;;  %v997_v24 = vmul.f32 %v3722_v57, %v996_v16  ;;  %v990_v3 = vadd.f32 %v989_v6, %v5205_v40 }
 0x33f   : > { %7504 = sst [smem:[#allocation120_spill]] %s5226_s17  ;;  %v1001_v11 = vmul.f32 %v3722_v57, %v1000_v51  ;;  %v994_v22 = vadd.f32 %v993_v10, %v5209_v29 }
 0x340   : > { %s5232_s14 = sld [smem:[#allocation10 + $0xf5]]  ;;  %v998_v48 = vadd.f32 %v997_v24, %v5211_v30 }
 0x341   : > { %s7509_s19 = sld [smem:[#allocation172_spill]]  ;;  %v1004_v35 = vstv %s7505_s12  ;;  %v1002_v17 = vadd.f32 %v1001_v11, %v5213_v32 }
 0x342   : > { %s7510_s20 = sld [smem:[#allocation173_spill]]  ;;  %v1008_v36 = vstv %s7506_s29  ;;  %v1005_v12 = vmul.f32 %v3722_v57, %v1004_v35 }
 0x343   : > { %s7511_s18 = sld [smem:[#allocation174_spill]]  ;;  %v1012_v44 = vstv %s7507_s24  ;;  %v1009_v25 = vmul.f32 %v3722_v57, %v1008_v36 }
 0x344   : > { %s7512_s21 = sld [smem:[#allocation186_spill]]  ;;  %v1016_v18 = vstv %s7508_s5  ;;  %v1013_v4 = vmul.f32 %v3722_v57, %v1012_v44  ;;  %v1006_v23 = vadd.f32 %v1005_v12, %v5215_v33 }
 0x345   : > { %s5238_s17 = sld [smem:[#allocation10 + $0xf6]]  ;;  %v1017_v13 = vmul.f32 %v3722_v57, %v1016_v18  ;;  %v1010_v27 = vadd.f32 %v1009_v25, %v5219_v34 }
 0x346   : > { %s7514_s4 = sld [smem:[#allocation175_spill]]  ;;  %v1014_v28 = vadd.f32 %v1013_v4, %v5221_v41 }
 0x347   : > { %s7515_s13 = sld [smem:[#allocation176_spill]]  ;;  %v1020_v45 = vstv %s7509_s19  ;;  %v1018_v40 = vadd.f32 %v1017_v13, %v5223_v37 }
 0x348   : > { %s7516_s10 = sld [smem:[#allocation177_spill]]  ;;  %v1031_v47 = vstv %s7510_s20  ;;  %v1021_v26 = vmul.f32 %v3722_v57, %v1020_v45  ;;  %v1169_v45 = vstv %s4797_s22 }
 0x349   : > { %s5244_s7 = sld [smem:[#allocation10 + $0xf7]]  ;;  %v1035_v49 = vstv %s7511_s18  ;;  %v1032_v32 = vmul.f32 %v3724_v31, %v1031_v47 }
 0x34a   : > { %s7518_s16 = sld [smem:[#allocation178_spill]]  ;;  %v1095_v50 = vstv %s7512_s21  ;;  %v1022_v29 = vadd.f32 %v1021_v26, %v5228_v38  ;;  %v1036_v41 = vmul.f32 %v3724_v31, %v1035_v49 }
 0x34b   : > { %7513 = sst [smem:[#allocation121_spill]] %s5238_s17  ;;  %v1096_v59 = vmul.f32 %v5172_v1, %v1095_v50  ;;  %v5324_v47 = vadd.f32 %v1032_v32, %v962_v9 }
 0x34c   : > { %s7519_s11 = sld [smem:[#allocation179_spill]]  ;;  %v1039_v53 = vstv %s7514_s4 }
 0x34d   : > { %s7520_s28 = sld [smem:[#allocation180_spill]]  ;;  %v1043_v54 = vstv %s7515_s13  ;;  %v1040_v37 = vmul.f32 %v3724_v31, %v1039_v53  ;;  %v5329_v53 = vadd.f32 %v1036_v41, %v966_v15 }
 0x34e   : > { %s5250_s9 = sld [smem:[#allocation10 + $0xf8]]  ;;  %v1047_v55 = vstv %s7516_s10  ;;  %v1044_v5 = vmul.f32 %v3724_v31, %v1043_v54 }
 0x34f   : > { %7517 = sst [smem:[#allocation122_spill]] %s5244_s7  ;;  %v1048_v38 = vmul.f32 %v3724_v31, %v1047_v55  ;;  %v5331_v54 = vadd.f32 %v1040_v37, %v970_v39 }
 0x350   : > { %s5256_s27 = sld [smem:[#allocation10 + $0xf9]]  ;;  %v1051_v60 = vstv %s7518_s16  ;;  %v5337_v14 = vadd.f32 %v1044_v5, %v974_v7 }
 0x351   : > { %s7523_s8 = sld [smem:[#allocation36_spill]]  ;;  %v1052_v2 = vmul.f32 %v3724_v31, %v1051_v60  ;;  %v5339_v20 = vadd.f32 %v1048_v38, %v978_v43 }
 0x352   : > { %s5261_s12 = sld [smem:[#allocation10 + $0xfa]]  ;;  %v1055_v61 = vstv %s7519_s11 }
 0x353   : > { %v1059_v62 = vstv %s7520_s28  ;;  %s5266_s24 = sld [smem:[#allocation10 + $0xfb]]  ;;  %v1056_v16 = vmul.f32 %v3724_v31, %v1055_v61 }
 0x354   : > { %7521 = sst [smem:[#allocation125_spill]] %s5250_s9  ;;  %v1060_v51 = vmul.f32 %v3724_v31, %v1059_v62 }
 0x355   : > { %s5269_s21 = sld [smem:[#allocation10 + $0xfc]]  ;;  %v5345_v21 = vadd.f32 %v1056_v16, %v986_v0 }
 0x356   : > { %7522 = sst [smem:[#allocation126_spill]] %s5256_s27  ;;  %v5347_v6 = vadd.f32 %v1060_v51, %v990_v3 }
 0x357   : > { %v1098_v8 = vstv %s7523_s8  ;;  %s5272_s10 = sld [smem:[#allocation10 + $0xfd]] }
 0x358   : > { %7524 = sst [smem:[#allocation127_spill]] %s5261_s12  ;;  %v1099_v42 = vadd.f32 %v1098_v8, %v1096_v59  ;;  %v5341_v59 = vadd.f32 %v1052_v2, %v982_v46 }
 0x359   : > { %7525 = sst [smem:[#allocation128_spill]] %s5266_s24 }
 0x35a   : > { %s5275_s20 = sld [smem:[#allocation10 + $0xfe]]  ;;  %3725 = vtanh.f32 %v1099_v42 }
 0x35b   : > { %7526 = sst [smem:[#allocation129_spill]] %s5269_s21 }
 0x35c   : > { %s5277_s19 = sld [smem:[#allocation10 + $0xff]] }
 0x35d   : > { %7527 = sst [smem:[#allocation130_spill]] %s5272_s10 }
 0x35e   : > { %s5281_s5 = sld [smem:[#allocation7 + $0x10]] }
 0x35f   : > { %s7530_s29 = sld [smem:[#allocation181_spill]] }
 0x360   : > { %7528 = sst [smem:[#allocation131_spill]] %s5275_s20 }
 0x361   : > { %s7531_s25 = sld [smem:[#allocation53_spill]] }
 0x362   : > { %7529 = sst [smem:[#allocation132_spill]] %s5277_s19 }
 0x363   : > { %s5287_s15 = sld [smem:[#allocation9 + $0x10]] }
 0x364   : > { %s7533_s4 = sld [smem:[#allocation182_spill]] }
 0x365   : > { %s7534_s13 = sld [smem:[#allocation183_spill]]  ;;  %v1063_v56 = vstv %s7530_s29 }
 0x366   : > { %s7535_s16 = sld [smem:[#allocation184_spill]]  ;;  %v1064_v49 = vmul.f32 %v3724_v31, %v1063_v56 }
 0x367   : > { %s5293_s11 = sld [smem:[#allocation10 + $0x100]]  ;;  %v1166_v30 = vstv %s7531_s25  ;;  %v3726_v7 = vpop.eup %3725 }
 0x368   : > { %s5299_s28 = sld [smem:[#allocation10 + $0x101]]  ;;  %v1167_v35 = vmul.f32 %v5172_v1, %v1166_v30  ;;  %v5349_v8 = vadd.f32 %v1064_v49, %v994_v22 }
 0x369   : > { %7532 = sst [smem:[#allocation133_spill]] %s5287_s15 }
 0x36a   : > { %s5304_s8 = sld [smem:[#allocation10 + $0x102]]  ;;  %v1067_v57 = vstv %s7533_s4  ;;  %v1170_v19 = vadd.f32 %v1169_v45, %v1167_v35 }
 0x36b   : > { %s7539_s19 = sld [smem:[#allocation34_spill]]  ;;  %v1071_v33 = vstv %s7534_s13  ;;  %v1068_v50 = vmul.f32 %v3724_v31, %v1067_v57 }
 0x36c   : > { %s7541_s20 = sld [smem:[#allocation52_spill]]  ;;  %v1075_v34 = vstv %s7535_s16  ;;  %v1072_v55 = vmul.f32 %v3724_v31, %v1071_v33  ;;  %3727 = vtanh.f32 %v1170_v19 }
 0x36d   : > { %7536 = sst [smem:[#allocation134_spill]] %s5293_s11  ;;  %v1076_v58 = vmul.f32 %v3724_v31, %v1075_v34  ;;  %v5351_v9 = vadd.f32 %v1068_v50, %v998_v48 }
 0x36e   : > { %7537 = sst [smem:[#allocation135_spill]] %s5299_s28  ;;  %v5355_v10 = vadd.f32 %v1072_v55, %v1002_v17 }
 0x36f   : > { %s7540_s11 = sld [smem:[#allocation35_spill]]  ;;  %v5357_v24 = vadd.f32 %v1076_v58, %v1006_v23 }
 0x370   : > { %7538 = sst [smem:[#allocation136_spill]] %s5304_s8 }
 0x371   : > { %s5309_s10 = sld [smem:[#allocation10 + $0x103]]  ;;  %v1079_v36 = vstv %s7539_s19 }
 0x372   : > { %s7543_s28 = sld [smem:[#allocation185_spill]]  ;;  %v1087_v18 = vstv %s7541_s20  ;;  %v1080_v60 = vmul.f32 %v3724_v31, %v1079_v36 }
 0x373   : > { %s5313_s29 = sld [smem:[#allocation10 + $0x104]]  ;;  %v1088_v62 = vmul.f32 %v3724_v31, %v1087_v18 }
 0x374   : > { %s5316_s25 = sld [smem:[#allocation10 + $0x105]]  ;;  %v5363_v25 = vadd.f32 %v1080_v60, %v1010_v27 }
 0x375   : > { %v1083_v44 = vstv %s7540_s11  ;;  %s5322_s4 = sld [smem:[#allocation10 + $0x106]]  ;;  %v5367_v13 = vadd.f32 %v1088_v62, %v1018_v40  ;;  %v1173_v40 = vstv %s4803_s26 }
 0x376   : > { %s5327_s18 = sld [smem:[#allocation10 + $0x107]]  ;;  %v1084_v61 = vmul.f32 %v3724_v31, %v1083_v44 }
 0x377   : > { %7542 = sst [smem:[#allocation137_spill]] %s5309_s10 }
 0x378   : > { %v1091_v52 = vstv %s7543_s28  ;;  %s5333_s13 = sld [smem:[#allocation10 + $0x108]]  ;;  %v5365_v4 = vadd.f32 %v1084_v61, %v1014_v28 }
 0x379   : > { %7544 = sst [smem:[#allocation138_spill]] %s5313_s29  ;;  %v1092_v63 = vmul.f32 %v3724_v31, %v1091_v52 }
 0x37a   : > { %7545 = sst [smem:[#allocation139_spill]] %s5316_s25 }
 0x37b   : > { %7546 = sst [smem:[#allocation140_spill]] %s5322_s4  ;;  %v5371_v15 = vadd.f32 %v1092_v63, %v1022_v29 }
 0x37c   : > { %7547 = sst [smem:[#allocation142_spill]] %s5327_s18 }
 0x37d   : > { %s7549_s22 = sld [smem:[#allocation37_spill]] }
 0x37e   : > { %7548 = sst [smem:[#allocation143_spill]] %s5333_s13 }
 0x37f   : > { %s7550_s20 = sld [smem:[#allocation38_spill]] }
 0x380   : > { %s5335_s19 = sld [smem:[#allocation10 + $0x109]] }
 0x381   : > { %s5343_s16 = sld [smem:[#allocation10 + $0x10a]] }
 0x382   : > { %s7553_s11 = sld [smem:[#allocation39_spill]] }
 0x383   : > { %s7554_s28 = sld [smem:[#allocation40_spill]]  ;;  %v1102_v11 = vstv %s7549_s22 }
 0x384   : > { %s7555_s13 = sld [smem:[#allocation41_spill]]  ;;  %v1103_v29 = vmul.f32 %v3726_v7, %v1102_v11 }
 0x385   : > { %s7557_s18 = sld [smem:[#allocation42_spill]]  ;;  %v1106_v12 = vstv %s7550_s20 }
 0x386   : > { %7551 = sst [smem:[#allocation144_spill]] %s5335_s19  ;;  %v1107_v37 = vmul.f32 %v3726_v7, %v1106_v12  ;;  %v1104_v44 = vadd.f32 %v1103_v29, %v5324_v47  ;;  %v1311_v29 = vstv %s4994_s6 }
 0x387   : > { %7552 = sst [smem:[#allocation145_spill]] %s5343_s16 }
 0x388   : > { %s5353_s19 = sld [smem:[#allocation10 + $0x10b]]  ;;  %v1110_v39 = vstv %s7553_s11  ;;  %v1108_v63 = vadd.f32 %v1107_v37, %v5329_v53 }
 0x389   : > { %s7558_s4 = sld [smem:[#allocation43_spill]]  ;;  %v1114_v26 = vstv %s7554_s28  ;;  %v1111_v5 = vmul.f32 %v3726_v7, %v1110_v39  ;;  %v3728_v39 = vpop.eup %3727 }
 0x38a   : > { %s7559_s16 = sld [smem:[#allocation44_spill]]  ;;  %v1118_v42 = vstv %s7555_s13  ;;  %v1115_v16 = vmul.f32 %v3726_v7, %v1114_v26 }
 0x38b   : > { %s7560_s25 = sld [smem:[#allocation69_spill]]  ;;  %v1122_v43 = vstv %s7557_s18  ;;  %v1119_v51 = vmul.f32 %v3726_v7, %v1118_v42  ;;  %v1112_v47 = vadd.f32 %v1111_v5, %v5331_v54 }
 0x38c   : > { %s5361_s29 = sld [smem:[#allocation10 + $0x10c]]  ;;  %v1123_v35 = vmul.f32 %v3726_v7, %v1122_v43  ;;  %v1116_v11 = vadd.f32 %v1115_v16, %v5337_v14 }
 0x38d   : > { %s7562_s10 = sld [smem:[#allocation45_spill]]  ;;  %v1120_v26 = vadd.f32 %v1119_v51, %v5339_v20 }
 0x38e   : > { %7556 = sst [smem:[#allocation146_spill]] %s5353_s19  ;;  %v1124_v42 = vadd.f32 %v1123_v35, %v5341_v59 }
 0x38f   : > { %s7563_s8 = sld [smem:[#allocation46_spill]]  ;;  %v1126_v46 = vstv %s7558_s4 }
 0x390   : > { %s7564_s19 = sld [smem:[#allocation47_spill]]  ;;  %v1130_v0 = vstv %s7559_s16  ;;  %v1127_v18 = vmul.f32 %v3726_v7, %v1126_v46 }
 0x391   : > { %s7565_s21 = sld [smem:[#allocation48_spill]]  ;;  %v1134_v31 = vstv %s7560_s25  ;;  %v1131_v45 = vmul.f32 %v3726_v7, %v1130_v0 }
 0x392   : > { %7561 = sst [smem:[#allocation147_spill]] %s5361_s29  ;;  %v1135_v50 = vmul.f32 %v3726_v7, %v1134_v31  ;;  %v1128_v43 = vadd.f32 %v1127_v18, %v5345_v21 }
 0x393   : > { %s5369_s24 = sld [smem:[#allocation10 + $0x10d]]  ;;  %v1138_v3 = vstv %s7562_s10 }
 0x394   : > { %s7567_s22 = sld [smem:[#allocation49_spill]]  ;;  %v1139_v52 = vmul.f32 %v3726_v7, %v1138_v3  ;;  %v1136_v53 = vadd.f32 %v1135_v50, %v5349_v8  ;;  %v1174_v8 = vmul.f32 %v3728_v39, %v1173_v40 }
 0x395   : > { %s7568_s20 = sld [smem:[#allocation50_spill]]  ;;  %v1142_v22 = vstv %s7563_s8 }
 0x396   : > { %s7569_s29 = sld [smem:[#allocation51_spill]]  ;;  %v1146_v48 = vstv %s7564_s19  ;;  %v1143_v55 = vmul.f32 %v3726_v7, %v1142_v22  ;;  %v1140_v54 = vadd.f32 %v1139_v52, %v5351_v9 }
 0x397   : > { %s5376_s12 = sld [smem:[#allocation10 + $0x10e]]  ;;  %v1150_v17 = vstv %s7565_s21  ;;  %v1147_v58 = vmul.f32 %v3726_v7, %v1146_v48 }
 0x398   : > { %s7570_s27 = sld [smem:[#allocation54_spill]]  ;;  %v1151_v60 = vmul.f32 %v3726_v7, %v1150_v17  ;;  %v1144_v14 = vadd.f32 %v1143_v55, %v5355_v10  ;;  %v1308_v10 = vstv %s4990_s30 }
 0x399   : > { %7566 = sst [smem:[#allocation148_spill]] %s5369_s24  ;;  %v1148_v46 = vadd.f32 %v1147_v58, %v5357_v24 }
 0x39a   : > { %s7571_s15 = sld [smem:[#allocation55_spill]]  ;;  %v1154_v23 = vstv %s7567_s22  ;;  %v1152_v20 = vadd.f32 %v1151_v60, %v5363_v25 }
 0x39b   : > { %s7572_s9 = sld [smem:[#allocation68_spill]]  ;;  %v1158_v27 = vstv %s7568_s20  ;;  %v1155_v61 = vmul.f32 %v3726_v7, %v1154_v23  ;;  %v1309_v23 = vmul.f32 %v5172_v1, %v1308_v10 }
 0x39c   : > { %s5382_s24 = sld [smem:[#allocation10 + $0x10f]]  ;;  %v1162_v28 = vstv %s7569_s29  ;;  %v1159_v62 = vmul.f32 %v3726_v7, %v1158_v27  ;;  %v5461_v27 = vadd.f32 %v1174_v8, %v1104_v44 }
 0x39d   : > { %s7574_s7 = sld [smem:[#allocation70_spill]]  ;;  %v1163_v19 = vmul.f32 %v3726_v7, %v1162_v28  ;;  %v1132_v7 = vadd.f32 %v1131_v45, %v5347_v6  ;;  %v1156_v59 = vadd.f32 %v1155_v61, %v5365_v4  ;;  %v1312_v51 = vadd.f32 %v1311_v29, %v1309_v23 }
 0x39e   : > { %s7575_s11 = sld [smem:[#allocation56_spill]]  ;;  %v1177_v56 = vstv %s7570_s27  ;;  %v1160_v21 = vadd.f32 %v1159_v62, %v5367_v13 }
 0x39f   : > { %s7576_s28 = sld [smem:[#allocation57_spill]]  ;;  %v1164_v6 = vadd.f32 %v1163_v19, %v5371_v15  ;;  %v1178_v9 = vmul.f32 %v3728_v39, %v1177_v56 }
 0x3a0   : > { %s7577_s13 = sld [smem:[#allocation58_spill]]  ;;  %v1181_v30 = vstv %s7571_s15 }
 0x3a1   : > { %s5388_s17 = sld [smem:[#allocation7 + $0x11]]  ;;  %v1237_v32 = vstv %s7572_s9  ;;  %v1182_v24 = vmul.f32 %v3728_v39, %v1181_v30 }
 0x3a2   : > { %7573 = sst [smem:[#allocation149_spill]] %s5382_s24  ;;  %v1238_v36 = vmul.f32 %v5172_v1, %v1237_v32 }
 0x3a3   : > { %s7578_s18 = sld [smem:[#allocation59_spill]]  ;;  %v1185_v57 = vstv %s7574_s7  ;;  %v5477_v5 = vadd.f32 %v1182_v24, %v1112_v47 }
 0x3a4   : > { %s7579_s4 = sld [smem:[#allocation60_spill]]  ;;  %v1189_v33 = vstv %s7575_s11  ;;  %v1186_v25 = vmul.f32 %v3728_v39, %v1185_v57 }
 0x3a5   : > { %s5394_s16 = sld [smem:[#allocation9 + $0x11]]  ;;  %v1193_v34 = vstv %s7576_s28  ;;  %v1190_v4 = vmul.f32 %v3728_v39, %v1189_v33  ;;  %v5473_v33 = vadd.f32 %v1178_v9, %v1108_v63 }
 0x3a6   : > { %s5399_s10 = sld [smem:[#allocation10 + $0x110]]  ;;  %v1197_v41 = vstv %s7577_s13  ;;  %v1194_v13 = vmul.f32 %v3728_v39, %v1193_v34 }
 0x3a7   : > { %s7581_s21 = sld [smem:[#allocation71_spill]]  ;;  %v1198_v15 = vmul.f32 %v3728_v39, %v1197_v41 }
 0x3a8   : > { %s5405_s8 = sld [smem:[#allocation10 + $0x111]]  ;;  %v5485_v35 = vadd.f32 %v1194_v13, %v1124_v42 }
 0x3a9   : > { %v1201_v38 = vstv %s7578_s18  ;;  %s5409_s26 = sld [smem:[#allocation10 + $0x112]] }
 0x3aa   : > { %v1205_v2 = vstv %s7579_s4  ;;  %s5412_s9 = sld [smem:[#allocation10 + $0x113]]  ;;  %v1202_v28 = vmul.f32 %v3728_v39, %v1201_v38  ;;  %v5479_v38 = vadd.f32 %v1186_v25, %v1116_v11 }
 0x3ab   : > { %s5416_s7 = sld [smem:[#allocation10 + $0x114]]  ;;  %v1206_v56 = vmul.f32 %v3728_v39, %v1205_v2  ;;  %v5483_v2 = vadd.f32 %v1190_v4, %v1120_v26 }
 0x3ac   : > { %7580 = sst [smem:[#allocation150_spill]] %s5399_s10  ;;  %v5489_v44 = vadd.f32 %v1202_v28, %v1132_v7  ;;  %v1382_v28 = vstv %s5101_s2 }
 0x3ad   : > { %v1240_v49 = vstv %s7581_s21  ;;  %s5418_s27 = sld [smem:[#allocation10 + $0x115]]  ;;  %v5493_v18 = vadd.f32 %v1206_v56, %v1136_v53 }
 0x3ae   : > { %7582 = sst [smem:[#allocation158_spill]] %s5405_s8  ;;  %v1241_v12 = vadd.f32 %v1240_v49, %v1238_v36  ;;  %v5487_v36 = vadd.f32 %v1198_v15, %v1128_v43 }
 0x3af   : > { %7583 = sst [smem:[#allocation151_spill]] %s5409_s26 }
 0x3b0   : > { %7584 = sst [smem:[#allocation152_spill]] %s5412_s9  ;;  %3729 = vtanh.f32 %v1241_v12 }
 0x3b1   : > { %7585 = sst [smem:[#allocation153_spill]] %s5416_s7  ;;  %3731 = vtanh.f32 %v1312_v51 }
 0x3b2   : > { %s5420_s15 = sld [smem:[#allocation10 + $0x116]] }
 0x3b3   : > { %7586 = sst [smem:[#allocation154_spill]] %s5418_s27 }
 0x3b4   : > { %s5425_s29 = sld [smem:[#allocation10 + $0x117]] }
 0x3b5   : > { %s5431_s25 = sld [smem:[#allocation10 + $0x118]] }
 0x3b6   : > { %s5437_s19 = sld [smem:[#allocation10 + $0x119]] }
 0x3b7   : > { %s7591_s22 = sld [smem:[#allocation61_spill]] }
 0x3b8   : > { %7587 = sst [smem:[#allocation155_spill]] %s5420_s15 }
 0x3b9   : > { %s7592_s20 = sld [smem:[#allocation62_spill]] }
 0x3ba   : > { %7588 = sst [smem:[#allocation156_spill]] %s5425_s29 }
 0x3bb   : > { %7589 = sst [smem:[#allocation157_spill]] %s5431_s25 }
 0x3bc   : > { %7590 = sst [smem:[#allocation159_spill]] %s5437_s19 }
 0x3bd   : > { %s7593_s11 = sld [smem:[#allocation63_spill]]  ;;  %v1209_v0 = vstv %s7591_s22 }
 0x3be   : > { %s5443_s28 = sld [smem:[#allocation10 + $0x11a]]  ;;  %v1210_v30 = vmul.f32 %v3728_v39, %v1209_v0 }
 0x3bf   : > { %s7595_s13 = sld [smem:[#allocation64_spill]]  ;;  %v1213_v31 = vstv %s7592_s20 }
 0x3c0   : > { %s7596_s21 = sld [smem:[#allocation65_spill]]  ;;  %v1214_v32 = vmul.f32 %v3728_v39, %v1213_v31  ;;  %v5495_v45 = vadd.f32 %v1210_v30, %v1140_v54 }
 0x3c1   : > { %s7597_s25 = sld [smem:[#allocation66_spill]] }
 0x3c2   : > { %s5446_s19 = sld [smem:[#allocation10 + $0x11b]]  ;;  %v5497_v49 = vadd.f32 %v1214_v32, %v1144_v14 }
 0x3c3   : > { %s7599_s29 = sld [smem:[#allocation67_spill]]  ;;  %v1217_v3 = vstv %s7593_s11 }
 0x3c4   : > { %7594 = sst [smem:[#allocation160_spill]] %s5443_s28  ;;  %v1218_v57 = vmul.f32 %v3728_v39, %v1217_v3 }
 0x3c5   : > { %s5448_s15 = sld [smem:[#allocation10 + $0x11c]]  ;;  %v1221_v22 = vstv %s7595_s13 }
 0x3c6   : > { %s5453_s28 = sld [smem:[#allocation10 + $0x11d]]  ;;  %v1225_v48 = vstv %s7596_s21  ;;  %v1222_v34 = vmul.f32 %v3728_v39, %v1221_v22  ;;  %v5499_v50 = vadd.f32 %v1218_v57, %v1148_v46 }
 0x3c7   : > { %v1229_v17 = vstv %s7597_s25  ;;  %s5459_s30 = sld [smem:[#allocation10 + $0x11e]]  ;;  %v1226_v41 = vmul.f32 %v3728_v39, %v1225_v48 }
 0x3c8   : > { %7598 = sst [smem:[#allocation161_spill]] %s5446_s19  ;;  %v1230_v37 = vmul.f32 %v3728_v39, %v1229_v17  ;;  %v5503_v52 = vadd.f32 %v1222_v34, %v1152_v20 }
 0x3c9   : > { %v1233_v40 = vstv %s7599_s29  ;;  %s5471_s22 = sld [smem:[#allocation7 + $0x12]]  ;;  %v5505_v55 = vadd.f32 %v1226_v41, %v1156_v59 }
 0x3ca   : > { %s5475_s25 = sld [smem:[#allocation9 + $0x12]]  ;;  %v1234_v16 = vmul.f32 %v3728_v39, %v1233_v40  ;;  %v5507_v58 = vadd.f32 %v1230_v37, %v1160_v21  ;;  %v3730_v39 = vpop.eup %3729 }
 0x3cb   : > { %7600 = sst [smem:[#allocation162_spill]] %s5448_s15 }
 0x3cc   : > { %7601 = sst [smem:[#allocation163_spill]] %s5453_s28  ;;  %v5512_v61 = vadd.f32 %v1234_v16, %v1164_v6  ;;  %v1379_v6 = vstv %s5095_s3 }
 0x3cd   : > { %7602 = sst [smem:[#allocation164_spill]] %s5459_s30  ;;  %v1380_v22 = vmul.f32 %v5172_v1, %v1379_v6 }
 0x3ce   : > { %s5467_s15 = sld [smem:[#allocation10 + $0x11f]] }
 0x3cf   : > { %7604 = sst [smem:[#allocation166_spill]] %s5471_s22 }
 0x3d0   : > { %7605 = sst [smem:[#allocation167_spill]] %s5475_s25 }
 0x3d1   : > { %s7606_s6 = sld [smem:[#allocation72_spill]] }
 0x3d2   : > { %s5481_s18 = sld [smem:[#allocation10 + $0x120]] }
 0x3d3   : > { %s7608_s4 = sld [smem:[#allocation73_spill]] }
 0x3d4   : > { %7603 = sst [smem:[#allocation165_spill]] %s5467_s15 }
 0x3d5   : > { %s7609_s29 = sld [smem:[#allocation87_spill]] }
 0x3d6   : > { %s5491_s20 = sld [smem:[#allocation10 + $0x121]] }
 0x3d7   : > { %s7611_s11 = sld [smem:[#allocation74_spill]]  ;;  %v1244_v60 = vstv %s7606_s6 }
 0x3d8   : > { %7607 = sst [smem:[#allocation168_spill]] %s5481_s18  ;;  %v1245_v8 = vmul.f32 %v3730_v39, %v1244_v60  ;;  %v1383_v60 = vadd.f32 %v1382_v28, %v1380_v22 }
 0x3d9   : > { %s7612_s13 = sld [smem:[#allocation75_spill]]  ;;  %v1248_v62 = vstv %s7608_s4 }
 0x3da   : > { %s7613_s21 = sld [smem:[#allocation76_spill]]  ;;  %v1249_v25 = vmul.f32 %v3730_v39, %v1248_v62  ;;  %v1246_v40 = vadd.f32 %v1245_v8, %v5461_v27  ;;  %3733 = vtanh.f32 %v1383_v60  ;;  %v1375_v8 = vstv %s5089_s1 }
 0x3db   : > { %s7614_s18 = sld [smem:[#allocation77_spill]]  ;;  %v1252_v19 = vstv %s7609_s29 }
 0x3dc   : > { %7610 = sst [smem:[#allocation169_spill]] %s5491_s20  ;;  %v1253_v0 = vmul.f32 %v3730_v39, %v1252_v19  ;;  %v1250_v37 = vadd.f32 %v1249_v25, %v5473_v33 }
 0x3dd   : > { %s5501_s15 = sld [smem:[#allocation10 + $0x122]]  ;;  %v1256_v63 = vstv %s7611_s11 }
 0x3de   : > { %s7616_s30 = sld [smem:[#allocation88_spill]]  ;;  %v1257_v31 = vmul.f32 %v3730_v39, %v1256_v63  ;;  %v1254_v16 = vadd.f32 %v1253_v0, %v5477_v5 }
 0x3df   : > { %s7617_s20 = sld [smem:[#allocation78_spill]]  ;;  %v1260_v47 = vstv %s7612_s13 }
 0x3e0   : > { %s7618_s28 = sld [smem:[#allocation79_spill]]  ;;  %v1264_v11 = vstv %s7613_s21  ;;  %v1261_v3 = vmul.f32 %v3730_v39, %v1260_v47  ;;  %v1258_v27 = vadd.f32 %v1257_v31, %v5479_v38  ;;  %v3732_v47 = vpop.eup %3731 }
 0x3e1   : > { %s7619_s19 = sld [smem:[#allocation80_spill]]  ;;  %v1268_v12 = vstv %s7614_s18  ;;  %v1265_v48 = vmul.f32 %v3730_v39, %v1264_v11 }
 0x3e2   : > { %s5510_s25 = sld [smem:[#allocation10 + $0x123]]  ;;  %v1269_v17 = vmul.f32 %v3730_v39, %v1268_v12  ;;  %v1262_v62 = vadd.f32 %v1261_v3, %v5483_v2 }
 0x3e3   : > { %7615 = sst [smem:[#allocation170_spill]] %s5501_s15  ;;  %v1266_v19 = vadd.f32 %v1265_v48, %v5485_v35  ;;  %v1376_v48 = vmul.f32 %v3732_v47, %v1375_v8 }
 0x3e4   : > { %s7621_s27 = sld [smem:[#allocation105_spill]]  ;;  %v1272_v26 = vstv %s7616_s30  ;;  %v1270_v63 = vadd.f32 %v1269_v17, %v5487_v36 }
 0x3e5   : > { %s7622_s7 = sld [smem:[#allocation81_spill]]  ;;  %v1276_v42 = vstv %s7617_s20  ;;  %v1273_v23 = vmul.f32 %v3730_v39, %v1272_v26 }
 0x3e6   : > { %s7623_s15 = sld [smem:[#allocation82_spill]]  ;;  %v1280_v43 = vstv %s7618_s28  ;;  %v1277_v29 = vmul.f32 %v3730_v39, %v1276_v42 }
 0x3e7   : > { %s7624_s9 = sld [smem:[#allocation83_spill]]  ;;  %v1284_v7 = vstv %s7619_s19  ;;  %v1281_v56 = vmul.f32 %v3730_v39, %v1280_v43  ;;  %v1274_v33 = vadd.f32 %v1273_v23, %v5489_v44 }
 0x3e8   : > { %7620 = sst [smem:[#allocation171_spill]] %s5510_s25  ;;  %v1285_v30 = vmul.f32 %v3730_v39, %v1284_v7  ;;  %v1278_v5 = vadd.f32 %v1277_v29, %v5493_v18 }
 0x3e9   : > { %s5516_s26 = sld [smem:[#allocation10 + $0x124]]  ;;  %v1282_v11 = vadd.f32 %v1281_v56, %v5495_v45  ;;  %v1450_v45 = vstv %s5183_s0 }
 0x3ea   : > { %s7625_s22 = sld [smem:[#allocation84_spill]]  ;;  %v1288_v53 = vstv %s7621_s27  ;;  %v1286_v38 = vadd.f32 %v1285_v30, %v5497_v49 }
 0x3eb   : > { %s7626_s8 = sld [smem:[#allocation85_spill]]  ;;  %v1292_v54 = vstv %s7622_s7  ;;  %v1289_v32 = vmul.f32 %v3730_v39, %v1288_v53  ;;  %v1451_v53 = vmul.f32 %v5172_v1, %v1450_v45 }
 0x3ec   : > { %s7627_s6 = sld [smem:[#allocation86_spill]]  ;;  %v1296_v14 = vstv %s7623_s15  ;;  %v1293_v57 = vmul.f32 %v3730_v39, %v1292_v54 }
 0x3ed   : > { %s5522_s25 = sld [smem:[#allocation10 + $0x125]]  ;;  %v1300_v46 = vstv %s7624_s9  ;;  %v1297_v34 = vmul.f32 %v3730_v39, %v1296_v14  ;;  %v1290_v2 = vadd.f32 %v1289_v32, %v5499_v50 }
 0x3ee   : > { %s7628_s4 = sld [smem:[#allocation106_spill]]  ;;  %v1301_v41 = vmul.f32 %v3730_v39, %v1300_v46  ;;  %v1294_v35 = vadd.f32 %v1293_v57, %v5503_v52 }
 0x3ef   : > { %s7629_s29 = sld [smem:[#allocation89_spill]]  ;;  %v1298_v36 = vadd.f32 %v1297_v34, %v5505_v55 }
 0x3f0   : > { %s7630_s10 = sld [smem:[#allocation90_spill]]  ;;  %v1304_v20 = vstv %s7625_s22  ;;  %v1302_v44 = vadd.f32 %v1301_v41, %v5507_v58 }
 0x3f1   : > { %s5528_s24 = sld [smem:[#allocation10 + $0x126]]  ;;  %v1315_v59 = vstv %s7626_s8  ;;  %v1305_v51 = vmul.f32 %v3730_v39, %v1304_v20  ;;  %v1453_v20 = vstv %s5187_s23 }
 0x3f2   : > { %s7631_s11 = sld [smem:[#allocation91_spill]]  ;;  %v1319_v21 = vstv %s7627_s6  ;;  %v1316_v49 = vmul.f32 %v3732_v47, %v1315_v59  ;;  %v1454_v0 = vadd.f32 %v1453_v20, %v1451_v53 }
 0x3f3   : > { %s7632_s13 = sld [smem:[#allocation92_spill]]  ;;  %v1306_v18 = vadd.f32 %v1305_v51, %v5512_v61  ;;  %v1320_v55 = vmul.f32 %v3732_v47, %v1319_v21 }
 0x3f4   : > { %s7633_s21 = sld [smem:[#allocation93_spill]]  ;;  %v1323_v9 = vstv %s7628_s4  ;;  %v5608_v59 = vadd.f32 %v1316_v49, %v1246_v40  ;;  %3735 = vtanh.f32 %v1454_v0  ;;  %v1521_v49 = vstv %s5281_s5 }
 0x3f5   : > { %s5534_s18 = sld [smem:[#allocation10 + $0x127]]  ;;  %v1327_v10 = vstv %s7629_s29  ;;  %v1324_v58 = vmul.f32 %v3732_v47, %v1323_v9  ;;  %v5613_v9 = vadd.f32 %v1320_v55, %v1250_v37  ;;  %v5655_v37 = vadd.f32 %v1376_v48, %v1306_v18 }
 0x3f6   : > { %s5540_s30 = sld [smem:[#allocation10 + $0x128]]  ;;  %v1331_v24 = vstv %s7630_s10  ;;  %v1328_v26 = vmul.f32 %v3732_v47, %v1327_v10 }
 0x3f7   : > { %s5545_s27 = sld [smem:[#allocation10 + $0x129]]  ;;  %v1332_v61 = vmul.f32 %v3732_v47, %v1331_v24  ;;  %v5615_v10 = vadd.f32 %v1324_v58, %v1254_v16 }
 0x3f8   : > { %v1335_v4 = vstv %s7631_s11  ;;  %s5550_s9 = sld [smem:[#allocation10 + $0x12a]]  ;;  %v5621_v31 = vadd.f32 %v1328_v26, %v1258_v27  ;;  %v3734_v27 = vpop.eup %3733 }
 0x3f9   : > { %v1339_v13 = vstv %s7632_s13  ;;  %s5553_s3 = sld [smem:[#allocation10 + $0x12b]]  ;;  %v1336_v42 = vmul.f32 %v3732_v47, %v1335_v4  ;;  %v5623_v3 = vadd.f32 %v1332_v61, %v1262_v62 }
 0x3fa   : > { %v1343_v15 = vstv %s7633_s21  ;;  %s5556_s10 = sld [smem:[#allocation10 + $0x12c]]  ;;  %v1340_v43 = vmul.f32 %v3732_v47, %v1339_v13 }
 0x3fb   : > { %s5559_s8 = sld [smem:[#allocation10 + $0x12d]]  ;;  %v1344_v7 = vmul.f32 %v3732_v47, %v1343_v15  ;;  %v5625_v22 = vadd.f32 %v1336_v42, %v1266_v19 }
 0x3fc   : > { %7634 = sst [smem:[#allocation172_spill]] %s5540_s30  ;;  %v5629_v17 = vadd.f32 %v1340_v43, %v1270_v63 }
 0x3fd   : > { %7635 = sst [smem:[#allocation173_spill]] %s5545_s27  ;;  %v5631_v23 = vadd.f32 %v1344_v7, %v1274_v33 }
 0x3fe   : > { %7636 = sst [smem:[#allocation174_spill]] %s5550_s9 }
 0x3ff   : > { %7637 = sst [smem:[#allocation186_spill]] %s5553_s3 }
 0x400   : > { %7638 = sst [smem:[#allocation175_spill]] %s5556_s10 }
 0x401   : > { %7639 = sst [smem:[#allocation176_spill]] %s5559_s8 }
 0x402   : > { %s5561_s7 = sld [smem:[#allocation10 + $0x12e]] }
 0x403   : > { %s5565_s2 = sld [smem:[#allocation10 + $0x12f]] }
 0x404   : > { %s7642_s15 = sld [smem:[#allocation94_spill]] }
 0x405   : > { %s5571_s19 = sld [smem:[#allocation7 + $0x13]] }
 0x406   : > { %s7643_s28 = sld [smem:[#allocation95_spill]] }
 0x407   : > { %s7644_s22 = sld [smem:[#allocation96_spill]] }
 0x408   : > { %7640 = sst [smem:[#allocation177_spill]] %s5561_s7 }
 0x409   : > { %7641 = sst [smem:[#allocation178_spill]] %s5565_s2 }
 0x40a   : > { %s7645_s20 = sld [smem:[#allocation97_spill]]  ;;  %v1347_v12 = vstv %s7642_s15 }
 0x40b   : > { %s5577_s4 = sld [smem:[#allocation9 + $0x13]]  ;;  %v1348_v21 = vmul.f32 %v3732_v47, %v1347_v12 }
 0x40c   : > { %s5583_s29 = sld [smem:[#allocation10 + $0x130]]  ;;  %v1351_v39 = vstv %s7643_s28 }
 0x40d   : > { %s5588_s11 = sld [smem:[#allocation10 + $0x131]]  ;;  %v1355_v50 = vstv %s7644_s22  ;;  %v1352_v6 = vmul.f32 %v3732_v47, %v1351_v39  ;;  %v5633_v28 = vadd.f32 %v1348_v21, %v1278_v5 }
 0x40e   : > { %s7648_s13 = sld [smem:[#allocation98_spill]]  ;;  %v1356_v24 = vmul.f32 %v3732_v47, %v1355_v50 }
 0x40f   : > { %s7649_s21 = sld [smem:[#allocation99_spill]]  ;;  %v5635_v40 = vadd.f32 %v1352_v6, %v1282_v11 }
 0x410   : > { %s7650_s2 = sld [smem:[#allocation100_spill]]  ;;  %v1359_v52 = vstv %s7645_s20  ;;  %v5639_v29 = vadd.f32 %v1356_v24, %v1286_v38 }
 0x411   : > { %s5593_s7 = sld [smem:[#allocation10 + $0x132]]  ;;  %v1360_v25 = vmul.f32 %v3732_v47, %v1359_v52  ;;  %v1477_v52 = vstv %s5232_s14 }
 0x412   : > { %7646 = sst [smem:[#allocation179_spill]] %s5583_s29 }
 0x413   : > { %7647 = sst [smem:[#allocation180_spill]] %s5588_s11  ;;  %v5641_v56 = vadd.f32 %v1360_v25, %v1290_v2 }
 0x414   : > { %s5597_s15 = sld [smem:[#allocation10 + $0x133]]  ;;  %v1363_v54 = vstv %s7648_s13 }
 0x415   : > { %s5600_s0 = sld [smem:[#allocation10 + $0x134]]  ;;  %v1367_v14 = vstv %s7649_s21  ;;  %v1364_v4 = vmul.f32 %v3732_v47, %v1363_v54  ;;  %v1522_v54 = vmul.f32 %v5172_v1, %v1521_v49 }
 0x416   : > { %v1371_v46 = vstv %s7650_s2  ;;  %s5606_s28 = sld [smem:[#allocation10 + $0x135]]  ;;  %v1368_v13 = vmul.f32 %v3732_v47, %v1367_v14 }
 0x417   : > { %7651 = sst [smem:[#allocation36_spill]] %s5593_s7  ;;  %v1372_v15 = vmul.f32 %v3732_v47, %v1371_v46  ;;  %v5647_v57 = vadd.f32 %v1364_v4, %v1294_v35 }
 0x418   : > { %s5611_s6 = sld [smem:[#allocation10 + $0x136]]  ;;  %v5649_v34 = vadd.f32 %v1368_v13, %v1298_v36 }
 0x419   : > { %s5617_s22 = sld [smem:[#allocation10 + $0x137]]  ;;  %v5651_v41 = vadd.f32 %v1372_v15, %v1302_v44 }
 0x41a   : > { %7652 = sst [smem:[#allocation181_spill]] %s5597_s15 }
 0x41b   : > { %7653 = sst [smem:[#allocation53_spill]] %s5600_s0 }
 0x41c   : > { %7654 = sst [smem:[#allocation182_spill]] %s5606_s28 }
 0x41d   : > { %s7657_s23 = sld [smem:[#allocation101_spill]] }
 0x41e   : > { %7655 = sst [smem:[#allocation183_spill]] %s5611_s6 }
 0x41f   : > { %7656 = sst [smem:[#allocation184_spill]] %s5617_s22 }
 0x420   : > { %s7658_s2 = sld [smem:[#allocation102_spill]] }
 0x421   : > { %s5619_s20 = sld [smem:[#allocation10 + $0x138]] }
 0x422   : > { %s5627_s1 = sld [smem:[#allocation10 + $0x139]] }
 0x423   : > { %s7661_s13 = sld [smem:[#allocation103_spill]]  ;;  %v1386_v30 = vstv %s7657_s23 }
 0x424   : > { %s7662_s21 = sld [smem:[#allocation104_spill]]  ;;  %v1387_v18 = vmul.f32 %v3734_v27, %v1386_v30 }
 0x425   : > { %s7663_s22 = sld [smem:[#allocation107_spill]] }
 0x426   : > { %s7665_s6 = sld [smem:[#allocation108_spill]]  ;;  %v1390_v32 = vstv %s7658_s2  ;;  %v1388_v14 = vadd.f32 %v1387_v18, %v5608_v59  ;;  %v1595_v18 = vstv %s5394_s16 }
 0x427   : > { %7659 = sst [smem:[#allocation34_spill]] %s5619_s20  ;;  %v1391_v58 = vmul.f32 %v3734_v27, %v1390_v32  ;;  %v3736_v32 = vpop.eup %3735 }
 0x428   : > { %7660 = sst [smem:[#allocation35_spill]] %s5627_s1 }
 0x429   : > { %s5637_s20 = sld [smem:[#allocation10 + $0x13a]]  ;;  %v1394_v16 = vstv %s7661_s13  ;;  %v1392_v1 = vadd.f32 %v1391_v58, %v5613_v9 }
 0x42a   : > { %s7666_s28 = sld [smem:[#allocation123_spill]]  ;;  %v1398_v51 = vstv %s7662_s21  ;;  %v1395_v26 = vmul.f32 %v3734_v27, %v1394_v16 }
 0x42b   : > { %s7667_s1 = sld [smem:[#allocation109_spill]]  ;;  %v1402_v60 = vstv %s7663_s22  ;;  %v1399_v43 = vmul.f32 %v3734_v27, %v1398_v51 }
 0x42c   : > { %s7668_s0 = sld [smem:[#allocation110_spill]]  ;;  %v1406_v62 = vstv %s7665_s6  ;;  %v1403_v7 = vmul.f32 %v3734_v27, %v1402_v60  ;;  %v1396_v59 = vadd.f32 %v1395_v26, %v5615_v10 }
 0x42d   : > { %s5645_s15 = sld [smem:[#allocation10 + $0x13b]]  ;;  %v1407_v53 = vmul.f32 %v3734_v27, %v1406_v62  ;;  %v1400_v48 = vadd.f32 %v1399_v43, %v5621_v31 }
 0x42e   : > { %s7670_s7 = sld [smem:[#allocation111_spill]]  ;;  %v1404_v16 = vadd.f32 %v1403_v7, %v5623_v3 }
 0x42f   : > { %7664 = sst [smem:[#allocation52_spill]] %s5637_s20  ;;  %v1408_v51 = vadd.f32 %v1407_v53, %v5625_v22 }
 0x430   : > { %s7671_s11 = sld [smem:[#allocation112_spill]]  ;;  %v1410_v19 = vstv %s7666_s28 }
 0x431   : > { %s7672_s20 = sld [smem:[#allocation113_spill]]  ;;  %v1414_v63 = vstv %s7667_s1  ;;  %v1411_v46 = vmul.f32 %v3734_v27, %v1410_v19 }
 0x432   : > { %s7673_s29 = sld [smem:[#allocation114_spill]]  ;;  %v1418_v47 = vstv %s7668_s0  ;;  %v1415_v20 = vmul.f32 %v3734_v27, %v1414_v63 }
 0x433   : > { %7669 = sst [smem:[#allocation185_spill]] %s5645_s15  ;;  %v1419_v6 = vmul.f32 %v3734_v27, %v1418_v47  ;;  %v1412_v60 = vadd.f32 %v1411_v46, %v5629_v17 }
 0x434   : > { %s5653_s8 = sld [smem:[#allocation10 + $0x13c]]  ;;  %v1422_v33 = vstv %s7670_s7 }
 0x435   : > { %s7675_s23 = sld [smem:[#allocation124_spill]]  ;;  %v1423_v8 = vmul.f32 %v3734_v27, %v1422_v33  ;;  %v1420_v9 = vadd.f32 %v1419_v6, %v5633_v28 }
 0x436   : > { %s7676_s2 = sld [smem:[#allocation115_spill]]  ;;  %v1426_v5 = vstv %s7671_s11 }
 0x437   : > { %s7677_s15 = sld [smem:[#allocation141_spill]]  ;;  %v1430_v11 = vstv %s7672_s20  ;;  %v1427_v24 = vmul.f32 %v3734_v27, %v1426_v5  ;;  %v1424_v10 = vadd.f32 %v1423_v8, %v5635_v40 }
 0x438   : > { %s7678_s10 = sld [smem:[#allocation116_spill]]  ;;  %v1434_v38 = vstv %s7673_s29  ;;  %v1431_v25 = vmul.f32 %v3734_v27, %v1430_v11 }
 0x439   : > { %s5660_s3 = sld [smem:[#allocation10 + $0x13d]]  ;;  %v1435_v4 = vmul.f32 %v3734_v27, %v1434_v38  ;;  %v1428_v31 = vadd.f32 %v1427_v24, %v5639_v29  ;;  %v1592_v29 = vstv %s5388_s17 }
 0x43a   : > { %7674 = sst [smem:[#allocation37_spill]] %s5653_s8  ;;  %v1432_v62 = vadd.f32 %v1431_v25, %v5641_v56 }
 0x43b   : > { %s7680_s9 = sld [smem:[#allocation117_spill]]  ;;  %v1438_v2 = vstv %s7675_s23  ;;  %v1436_v3 = vadd.f32 %v1435_v4, %v5647_v57 }
 0x43c   : > { %s7681_s27 = sld [smem:[#allocation118_spill]]  ;;  %v1442_v35 = vstv %s7676_s2  ;;  %v1439_v13 = vmul.f32 %v3734_v27, %v1438_v2 }
 0x43d   : > { %s5666_s8 = sld [smem:[#allocation10 + $0x13e]]  ;;  %v1446_v36 = vstv %s7677_s15  ;;  %v1443_v15 = vmul.f32 %v3734_v27, %v1442_v35 }
 0x43e   : > { %s7683_s30 = sld [smem:[#allocation119_spill]]  ;;  %v1457_v44 = vstv %s7678_s10  ;;  %v1447_v0 = vmul.f32 %v3734_v27, %v1446_v36  ;;  %v1416_v27 = vadd.f32 %v1415_v20, %v5631_v23  ;;  %v1440_v22 = vadd.f32 %v1439_v13, %v5649_v34 }
 0x43f   : > { %7679 = sst [smem:[#allocation38_spill]] %s5660_s3  ;;  %v1444_v17 = vadd.f32 %v1443_v15, %v5651_v41  ;;  %v1458_v28 = vmul.f32 %v3736_v32, %v1457_v44  ;;  %v1478_v41 = vmul.f32 %v3736_v32, %v1477_v52 }
 0x440   : > { %s7684_s13 = sld [smem:[#allocation120_spill]]  ;;  %v1448_v23 = vadd.f32 %v1447_v0, %v5655_v37 }
 0x441   : > { %s7685_s22 = sld [smem:[#allocation121_spill]]  ;;  %v1461_v12 = vstv %s7680_s9  ;;  %v5748_v35 = vadd.f32 %v1458_v28, %v1388_v14  ;;  %v5772_v53 = vadd.f32 %v1478_v41, %v1408_v51 }
 0x442   : > { %s5672_s21 = sld [smem:[#allocation10 + $0x13f]]  ;;  %v1465_v45 = vstv %s7681_s27  ;;  %v1462_v40 = vmul.f32 %v3736_v32, %v1461_v12 }
 0x443   : > { %7682 = sst [smem:[#allocation39_spill]] %s5666_s8  ;;  %v1466_v56 = vmul.f32 %v3736_v32, %v1465_v45 }
 0x444   : > { %s7687_s6 = sld [smem:[#allocation122_spill]]  ;;  %v1469_v39 = vstv %s7683_s30 }
 0x445   : > { %s7688_s28 = sld [smem:[#allocation125_spill]]  ;;  %v1470_v57 = vmul.f32 %v3736_v32, %v1469_v39  ;;  %v5764_v26 = vadd.f32 %v1466_v56, %v1396_v59 }
 0x446   : > { %s5678_s1 = sld [smem:[#allocation7 + $0x14]]  ;;  %v1473_v50 = vstv %s7684_s13 }
 0x447   : > { %s5683_s7 = sld [smem:[#allocation9 + $0x14]]  ;;  %v1481_v55 = vstv %s7685_s22  ;;  %v1474_v34 = vmul.f32 %v3736_v32, %v1473_v50  ;;  %v5760_v50 = vadd.f32 %v1462_v40, %v1392_v1 }
 0x448   : > { %7686 = sst [smem:[#allocation40_spill]] %s5672_s21  ;;  %v1482_v37 = vmul.f32 %v3736_v32, %v1481_v55 }
 0x449   : > { %s7689_s29 = sld [smem:[#allocation133_spill]] }
 0x44a   : > { %s5689_s11 = sld [smem:[#allocation10 + $0x140]]  ;;  %v1485_v61 = vstv %s7687_s6 }
 0x44b   : > { %v1489_v42 = vstv %s7688_s28  ;;  %s5693_s10 = sld [smem:[#allocation10 + $0x141]]  ;;  %v1486_v36 = vmul.f32 %v3736_v32, %v1485_v61  ;;  %v5766_v61 = vadd.f32 %v1470_v57, %v1400_v48 }
 0x44c   : > { %s5696_s5 = sld [smem:[#allocation10 + $0x142]]  ;;  %v1490_v12 = vmul.f32 %v3736_v32, %v1489_v42  ;;  %v5770_v42 = vadd.f32 %v1474_v34, %v1404_v16 }
 0x44d   : > { %s5700_s14 = sld [smem:[#allocation10 + $0x143]]  ;;  %v5776_v14 = vadd.f32 %v1486_v36, %v1416_v27 }
 0x44e   : > { %s5702_s30 = sld [smem:[#allocation10 + $0x144]]  ;;  %v5780_v46 = vadd.f32 %v1490_v12, %v1420_v9 }
 0x44f   : > { %v1524_v21 = vstv %s7689_s29  ;;  %s5704_s27 = sld [smem:[#allocation10 + $0x145]] }
 0x450   : > { %7690 = sst [smem:[#allocation41_spill]] %s5689_s11  ;;  %v1525_v30 = vadd.f32 %v1524_v21, %v1522_v54  ;;  %v5774_v54 = vadd.f32 %v1482_v37, %v1412_v60 }
 0x451   : > { %7691 = sst [smem:[#allocation42_spill]] %s5693_s10 }
 0x452   : > { %7692 = sst [smem:[#allocation43_spill]] %s5696_s5  ;;  %3737 = vtanh.f32 %v1525_v30 }
 0x453   : > { %7693 = sst [smem:[#allocation44_spill]] %s5700_s14 }
 0x454   : > { %7694 = sst [smem:[#allocation69_spill]] %s5702_s30 }
 0x455   : > { %7695 = sst [smem:[#allocation45_spill]] %s5704_s27 }
 0x456   : > { %s5709_s9 = sld [smem:[#allocation10 + $0x146]] }
 0x457   : > { %s5715_s15 = sld [smem:[#allocation10 + $0x147]] }
 0x458   : > { %s5721_s0 = sld [smem:[#allocation10 + $0x148]] }
 0x459   : > { %s7699_s20 = sld [smem:[#allocation126_spill]] }
 0x45a   : > { %s7700_s23 = sld [smem:[#allocation127_spill]] }
 0x45b   : > { %s7701_s2 = sld [smem:[#allocation128_spill]] }
 0x45c   : > { %7696 = sst [smem:[#allocation46_spill]] %s5709_s9 }
 0x45d   : > { %7697 = sst [smem:[#allocation47_spill]] %s5715_s15 }
 0x45e   : > { %7698 = sst [smem:[#allocation48_spill]] %s5721_s0 }
 0x45f   : > { %s5727_s13 = sld [smem:[#allocation10 + $0x149]]  ;;  %v1493_v19 = vstv %s7699_s20 }
 0x460   : > { %s7703_s22 = sld [smem:[#allocation129_spill]]  ;;  %v1497_v63 = vstv %s7700_s23  ;;  %v1494_v45 = vmul.f32 %v3736_v32, %v1493_v19 }
 0x461   : > { %s7704_s29 = sld [smem:[#allocation130_spill]]  ;;  %v1501_v47 = vstv %s7701_s2  ;;  %v1498_v49 = vmul.f32 %v3736_v32, %v1497_v63 }
 0x462   : > { %s7705_s15 = sld [smem:[#allocation131_spill]]  ;;  %v1502_v39 = vmul.f32 %v3736_v32, %v1501_v47  ;;  %v5782_v20 = vadd.f32 %v1494_v45, %v1424_v10 }
 0x463   : > { %s7706_s0 = sld [smem:[#allocation33_spill]]  ;;  %v5784_v21 = vadd.f32 %v1498_v49, %v1428_v31 }
 0x464   : > { %s5730_s9 = sld [smem:[#allocation10 + $0x14a]]  ;;  %v5786_v6 = vadd.f32 %v1502_v39, %v1432_v62  ;;  %v1584_v62 = vstv %s5376_s12 }
 0x465   : > { %7702 = sst [smem:[#allocation49_spill]] %s5727_s13 }
 0x466   : > { %s7708_s27 = sld [smem:[#allocation132_spill]]  ;;  %v1505_v33 = vstv %s7703_s22 }
 0x467   : > { %s5732_s30 = sld [smem:[#allocation10 + $0x14b]]  ;;  %v1509_v5 = vstv %s7704_s29  ;;  %v1506_v52 = vmul.f32 %v3736_v32, %v1505_v33 }
 0x468   : > { %s5737_s13 = sld [smem:[#allocation10 + $0x14c]]  ;;  %v1513_v11 = vstv %s7705_s15  ;;  %v1510_v55 = vmul.f32 %v3736_v32, %v1509_v5 }
 0x469   : > { %v5743_v38 = vld [vmem:[%s7706_s0] sm:$0xff]  ;;  %s5746_s17 = sld [smem:[#allocation10 + $0x14d]]  ;;  %v1514_v58 = vmul.f32 %v3736_v32, %v1513_v11  ;;  %v5790_v8 = vadd.f32 %v1506_v52, %v1436_v3 }
 0x46a   : > { %7707 = sst [smem:[#allocation50_spill]] %s5730_s9  ;;  %v1593_v2 = vmul.f32 %v5743_v38, %v1592_v29  ;;  %v5792_v24 = vadd.f32 %v1510_v55, %v1440_v22 }
 0x46b   : > { %s5754_s20 = sld [smem:[#allocation10 + $0x14e]]  ;;  %v5794_v25 = vadd.f32 %v1514_v58, %v1444_v17 }
 0x46c   : > { %v1517_v44 = vstv %s7708_s27  ;;  %s5758_s15 = sld [smem:[#allocation10 + $0x14f]]  ;;  %v1596_v7 = vadd.f32 %v1595_v18, %v1593_v2 }
 0x46d   : > { %7709 = sst [smem:[#allocation51_spill]] %s5732_s30  ;;  %v1518_v43 = vmul.f32 %v3736_v32, %v1517_v44  ;;  %v3738_v32 = vpop.eup %3737 }
 0x46e   : > { %7710 = sst [smem:[#allocation54_spill]] %s5737_s13  ;;  %3739 = vtanh.f32 %v1596_v7  ;;  %v1585_v55 = vmul.f32 %v3738_v32, %v1584_v62 }
 0x46f   : > { %7711 = sst [smem:[#allocation55_spill]] %s5746_s17  ;;  %v5799_v13 = vadd.f32 %v1518_v43, %v1448_v23 }
 0x470   : > { %s5762_s23 = sld [smem:[#allocation7 + $0x15]] }
 0x471   : > { %7712 = sst [smem:[#allocation68_spill]] %s5754_s20 }
 0x472   : > { %7713 = sst [smem:[#allocation70_spill]] %s5758_s15 }
 0x473   : > { %s7714_s16 = sld [smem:[#allocation134_spill]] }
 0x474   : > { %s5768_s6 = sld [smem:[#allocation9 + $0x15]] }
 0x475   : > { %s7716_s28 = sld [smem:[#allocation135_spill]] }
 0x476   : > { %s7717_s27 = sld [smem:[#allocation136_spill]] }
 0x477   : > { %s5778_s2 = sld [smem:[#allocation10 + $0x150]] }
 0x478   : > { %s7719_s22 = sld [smem:[#allocation137_spill]] }
 0x479   : > { %s7720_s29 = sld [smem:[#allocation138_spill]]  ;;  %v1528_v4 = vstv %s7714_s16 }
 0x47a   : > { %7715 = sst [smem:[#allocation56_spill]] %s5768_s6  ;;  %v1529_v28 = vmul.f32 %v3738_v32, %v1528_v4 }
 0x47b   : > { %s7721_s0 = sld [smem:[#allocation139_spill]]  ;;  %v1532_v15 = vstv %s7716_s28 }
 0x47c   : > { %s7722_s15 = sld [smem:[#allocation140_spill]]  ;;  %v1536_v0 = vstv %s7717_s27  ;;  %v1533_v57 = vmul.f32 %v3738_v32, %v1532_v15  ;;  %v1530_v44 = vadd.f32 %v1529_v28, %v5748_v35 }
 0x47d   : > { %7718 = sst [smem:[#allocation57_spill]] %s5778_s2  ;;  %v1537_v19 = vmul.f32 %v3738_v32, %v1536_v0 }
 0x47e   : > { %s5788_s20 = sld [smem:[#allocation10 + $0x151]]  ;;  %v1540_v1 = vstv %s7719_s22  ;;  %v1534_v58 = vadd.f32 %v1533_v57, %v5760_v50 }
 0x47f   : > { %s7724_s17 = sld [smem:[#allocation142_spill]]  ;;  %v1544_v59 = vstv %s7720_s29  ;;  %v1541_v63 = vmul.f32 %v3738_v32, %v1540_v1  ;;  %v1538_v43 = vadd.f32 %v1537_v19, %v5764_v26 }
 0x480   : > { %s7725_s2 = sld [smem:[#allocation143_spill]]  ;;  %v1545_v47 = vmul.f32 %v3738_v32, %v1544_v59  ;;  %v3740_v59 = vpop.eup %3739 }
 0x481   : > { %s7726_s13 = sld [smem:[#allocation144_spill]]  ;;  %v1548_v48 = vstv %s7721_s0  ;;  %v1542_v35 = vadd.f32 %v1541_v63, %v5766_v61 }
 0x482   : > { %s7727_s30 = sld [smem:[#allocation145_spill]]  ;;  %v1552_v30 = vstv %s7722_s15  ;;  %v1549_v5 = vmul.f32 %v3738_v32, %v1548_v48  ;;  %v1546_v15 = vadd.f32 %v1545_v47, %v5770_v42 }
 0x483   : > { %s5797_s9 = sld [smem:[#allocation10 + $0x152]]  ;;  %v1553_v11 = vmul.f32 %v3738_v32, %v1552_v30 }
 0x484   : > { %7723 = sst [smem:[#allocation58_spill]] %s5788_s20  ;;  %v1550_v0 = vadd.f32 %v1549_v5, %v5772_v53 }
 0x485   : > { %s7729_s14 = sld [smem:[#allocation146_spill]]  ;;  %v1556_v16 = vstv %s7724_s17  ;;  %v1554_v1 = vadd.f32 %v1553_v11, %v5774_v54 }
 0x486   : > { %s7730_s5 = sld [smem:[#allocation147_spill]]  ;;  %v1560_v51 = vstv %s7725_s2  ;;  %v1557_v2 = vmul.f32 %v3738_v32, %v1556_v16 }
 0x487   : > { %s7731_s20 = sld [smem:[#allocation148_spill]]  ;;  %v1564_v60 = vstv %s7726_s13  ;;  %v1561_v18 = vmul.f32 %v3738_v32, %v1560_v51 }
 0x488   : > { %s5803_s10 = sld [smem:[#allocation10 + $0x153]]  ;;  %v1568_v27 = vstv %s7727_s30  ;;  %v1565_v12 = vmul.f32 %v3738_v32, %v1564_v60  ;;  %v1558_v50 = vadd.f32 %v1557_v2, %v5776_v14  ;;  %v1586_v14 = vadd.f32 %v1585_v55, %v5794_v25 }
 0x489   : > { %7728 = sst [smem:[#allocation59_spill]] %s5797_s9  ;;  %v1569_v45 = vmul.f32 %v3738_v32, %v1568_v27  ;;  %v1562_v26 = vadd.f32 %v1561_v18, %v5780_v46 }
 0x48a   : > { %s7732_s11 = sld [smem:[#allocation149_spill]]  ;;  %v1566_v48 = vadd.f32 %v1565_v12, %v5782_v20  ;;  %v1734_v20 = vstv %s5571_s19 }
 0x48b   : > { %s7733_s6 = sld [smem:[#allocation150_spill]]  ;;  %v1572_v9 = vstv %s7729_s14  ;;  %v1570_v61 = vadd.f32 %v1569_v45, %v5784_v21 }
 0x48c   : > { %s7734_s16 = sld [smem:[#allocation158_spill]]  ;;  %v1576_v10 = vstv %s7730_s5  ;;  %v1573_v49 = vmul.f32 %v3738_v32, %v1572_v9  ;;  %v1735_v9 = vmul.f32 %v5743_v38, %v1734_v20 }
 0x48d   : > { %s7735_s21 = sld [smem:[#allocation166_spill]]  ;;  %v1580_v31 = vstv %s7731_s20  ;;  %v1577_v39 = vmul.f32 %v3738_v32, %v1576_v10 }
 0x48e   : > { %s5809_s9 = sld [smem:[#allocation10 + $0x154]]  ;;  %v1581_v52 = vmul.f32 %v3738_v32, %v1580_v31  ;;  %v1574_v42 = vadd.f32 %v1573_v49, %v5786_v6 }
 0x48f   : > { %s7736_s28 = sld [smem:[#allocation151_spill]]  ;;  %v1578_v53 = vadd.f32 %v1577_v39, %v5790_v8 }
 0x490   : > { %s7737_s27 = sld [smem:[#allocation152_spill]]  ;;  %v1588_v3 = vstv %s7732_s11  ;;  %v1582_v54 = vadd.f32 %v1581_v52, %v5792_v24 }
 0x491   : > { %s7738_s8 = sld [smem:[#allocation153_spill]]  ;;  %v1599_v22 = vstv %s7733_s6  ;;  %v1589_v7 = vmul.f32 %v3738_v32, %v1588_v3  ;;  %v1737_v3 = vstv %s5577_s4 }
 0x492   : > { %s5815_s3 = sld [smem:[#allocation10 + $0x155]]  ;;  %v1603_v17 = vstv %s7734_s16  ;;  %v1600_v21 = vmul.f32 %v3740_v59, %v1599_v22  ;;  %v1738_v19 = vadd.f32 %v1737_v3, %v1735_v9 }
 0x493   : > { %s7739_s22 = sld [smem:[#allocation154_spill]]  ;;  %v1663_v23 = vstv %s7735_s21  ;;  %v1590_v46 = vadd.f32 %v1589_v7, %v5799_v13  ;;  %v1604_v24 = vmul.f32 %v3740_v59, %v1603_v17 }
 0x494   : > { %s7740_s29 = sld [smem:[#allocation155_spill]]  ;;  %v1664_v33 = vmul.f32 %v5743_v38, %v1663_v23  ;;  %v5895_v22 = vadd.f32 %v1600_v21, %v1530_v44  ;;  %v1805_v21 = vstv %s5678_s1 }
 0x495   : > { %s7741_s0 = sld [smem:[#allocation156_spill]]  ;;  %v1607_v40 = vstv %s7736_s28 }
 0x496   : > { %s5821_s15 = sld [smem:[#allocation10 + $0x156]]  ;;  %v1611_v29 = vstv %s7737_s27  ;;  %v1608_v25 = vmul.f32 %v3740_v59, %v1607_v40  ;;  %v5900_v40 = vadd.f32 %v1604_v24, %v1534_v58 }
 0x497   : > { %s5827_s17 = sld [smem:[#allocation10 + $0x157]]  ;;  %v1615_v56 = vstv %s7738_s8  ;;  %v1612_v16 = vmul.f32 %v3740_v59, %v1611_v29 }
 0x498   : > { %s7742_s30 = sld [smem:[#allocation167_spill]]  ;;  %v1616_v13 = vmul.f32 %v3740_v59, %v1615_v56  ;;  %v5902_v29 = vadd.f32 %v1608_v25, %v1538_v43 }
 0x499   : > { %s5832_s14 = sld [smem:[#allocation10 + $0x158]]  ;;  %v1619_v34 = vstv %s7739_s22  ;;  %v5908_v63 = vadd.f32 %v1612_v16, %v1542_v35 }
 0x49a   : > { %v1623_v41 = vstv %s7740_s29  ;;  %s5837_s12 = sld [smem:[#allocation10 + $0x159]]  ;;  %v1620_v51 = vmul.f32 %v3740_v59, %v1619_v34  ;;  %v5910_v47 = vadd.f32 %v1616_v13, %v1546_v15  ;;  %v1690_v15 = vstv %s5522_s25 }
 0x49b   : > { %v1627_v37 = vstv %s7741_s0  ;;  %s5840_s21 = sld [smem:[#allocation10 + $0x15a]]  ;;  %v1624_v60 = vmul.f32 %v3740_v59, %v1623_v41 }
 0x49c   : > { %s5843_s8 = sld [smem:[#allocation10 + $0x15b]]  ;;  %v1628_v27 = vmul.f32 %v3740_v59, %v1627_v37 }
 0x49d   : > { %s5846_s11 = sld [smem:[#allocation10 + $0x15c]]  ;;  %v5916_v11 = vadd.f32 %v1624_v60, %v1554_v1  ;;  %v1698_v1 = vstv %s5534_s18 }
 0x49e   : > { %v1666_v36 = vstv %s7742_s30  ;;  %s5848_s5 = sld [smem:[#allocation10 + $0x15d]]  ;;  %v5918_v2 = vadd.f32 %v1628_v27, %v1558_v50 }
 0x49f   : > { %7743 = sst [smem:[#allocation60_spill]] %s5832_s14  ;;  %v1667_v4 = vadd.f32 %v1666_v36, %v1664_v33  ;;  %v5912_v33 = vadd.f32 %v1620_v51, %v1550_v0  ;;  %v1694_v0 = vstv %s5528_s24 }
 0x4a0   : > { %7744 = sst [smem:[#allocation71_spill]] %s5837_s12 }
 0x4a1   : > { %7745 = sst [smem:[#allocation61_spill]] %s5840_s21  ;;  %3741 = vtanh.f32 %v1667_v4  ;;  %v1686_v4 = vstv %s5516_s26 }
 0x4a2   : > { %7746 = sst [smem:[#allocation62_spill]] %s5843_s8  ;;  %3743 = vtanh.f32 %v1738_v19 }
 0x4a3   : > { %7747 = sst [smem:[#allocation63_spill]] %s5846_s11 }
 0x4a4   : > { %7748 = sst [smem:[#allocation64_spill]] %s5848_s5 }
 0x4a5   : > { %s5852_s13 = sld [smem:[#allocation10 + $0x15e]] }
 0x4a6   : > { %s7750_s20 = sld [smem:[#allocation157_spill]] }
 0x4a7   : > { %s5858_s6 = sld [smem:[#allocation10 + $0x15f]] }
 0x4a8   : > { %s7752_s2 = sld [smem:[#allocation159_spill]] }
 0x4a9   : > { %s7753_s28 = sld [smem:[#allocation160_spill]] }
 0x4aa   : > { %s7754_s27 = sld [smem:[#allocation161_spill]] }
 0x4ab   : > { %7749 = sst [smem:[#allocation65_spill]] %s5852_s13 }
 0x4ac   : > { %s5864_s22 = sld [smem:[#allocation7 + $0x16]]  ;;  %v1631_v30 = vstv %s7750_s20 }
 0x4ad   : > { %7751 = sst [smem:[#allocation66_spill]] %s5858_s6  ;;  %v1632_v17 = vmul.f32 %v3740_v59, %v1631_v30 }
 0x4ae   : > { %s5870_s29 = sld [smem:[#allocation9 + $0x16]]  ;;  %v1635_v32 = vstv %s7752_s2  ;;  %v3742_v35 = vpop.eup %3741 }
 0x4af   : > { %s5875_s0 = sld [smem:[#allocation10 + $0x160]]  ;;  %v1639_v6 = vstv %s7753_s28  ;;  %v1636_v23 = vmul.f32 %v3740_v59, %v1635_v32  ;;  %v5920_v36 = vadd.f32 %v1632_v17, %v1562_v26  ;;  %v1687_v27 = vmul.f32 %v3742_v35, %v1686_v4 }
 0x4b0   : > { %s7756_s30 = sld [smem:[#allocation162_spill]]  ;;  %v1643_v8 = vstv %s7754_s27  ;;  %v1640_v56 = vmul.f32 %v3740_v59, %v1639_v6  ;;  %v1691_v9 = vmul.f32 %v3742_v35, %v1690_v15  ;;  %v1699_v3 = vmul.f32 %v3742_v35, %v1698_v1 }
 0x4b1   : > { %s7757_s6 = sld [smem:[#allocation163_spill]]  ;;  %v1644_v57 = vmul.f32 %v3740_v59, %v1643_v8  ;;  %v5922_v44 = vadd.f32 %v1636_v23, %v1566_v48  ;;  %v1808_v17 = vstv %s5683_s7 }
 0x4b2   : > { %s7758_s13 = sld [smem:[#allocation164_spill]]  ;;  %v5926_v18 = vadd.f32 %v1640_v56, %v1570_v61  ;;  %v1692_v4 = vadd.f32 %v1691_v9, %v5912_v33 }
 0x4b3   : > { %s5880_s5 = sld [smem:[#allocation10 + $0x161]]  ;;  %v5928_v12 = vadd.f32 %v1644_v57, %v1574_v42 }
 0x4b4   : > { %s7760_s11 = sld [smem:[#allocation165_spill]] }
 0x4b5   : > { %7755 = sst [smem:[#allocation67_spill]] %s5875_s0 }
 0x4b6   : > { %s5884_s20 = sld [smem:[#allocation10 + $0x162]]  ;;  %v1647_v10 = vstv %s7756_s30 }
 0x4b7   : > { %s5887_s19 = sld [smem:[#allocation10 + $0x163]]  ;;  %v1651_v31 = vstv %s7757_s6  ;;  %v1648_v34 = vmul.f32 %v3740_v59, %v1647_v10  ;;  %v1806_v10 = vmul.f32 %v5743_v38, %v1805_v21 }
 0x4b8   : > { %v1655_v62 = vstv %s7758_s13  ;;  %s5893_s2 = sld [smem:[#allocation10 + $0x164]]  ;;  %v1652_v41 = vmul.f32 %v3740_v59, %v1651_v31 }
 0x4b9   : > { %7759 = sst [smem:[#allocation72_spill]] %s5880_s5  ;;  %v1656_v37 = vmul.f32 %v3740_v59, %v1655_v62  ;;  %v5934_v39 = vadd.f32 %v1648_v34, %v1578_v53  ;;  %v1695_v62 = vmul.f32 %v3742_v35, %v1694_v0 }
 0x4ba   : > { %v1659_v28 = vstv %s7760_s11  ;;  %s5898_s16 = sld [smem:[#allocation10 + $0x165]]  ;;  %v5936_v52 = vadd.f32 %v1652_v41, %v1582_v54 }
 0x4bb   : > { %s5904_s28 = sld [smem:[#allocation10 + $0x166]]  ;;  %v1660_v5 = vmul.f32 %v3740_v59, %v1659_v28  ;;  %v5938_v55 = vadd.f32 %v1656_v37, %v1586_v14  ;;  %v1696_v15 = vadd.f32 %v1695_v62, %v5916_v11 }
 0x4bc   : > { %7761 = sst [smem:[#allocation73_spill]] %s5884_s20 }
 0x4bd   : > { %7762 = sst [smem:[#allocation87_spill]] %s5887_s19  ;;  %v5942_v58 = vadd.f32 %v1660_v5, %v1590_v46 }
 0x4be   : > { %7763 = sst [smem:[#allocation74_spill]] %s5893_s2 }
 0x4bf   : > { %s7766_s4 = sld [smem:[#allocation168_spill]] }
 0x4c0   : > { %7764 = sst [smem:[#allocation75_spill]] %s5898_s16 }
 0x4c1   : > { %7765 = sst [smem:[#allocation76_spill]] %s5904_s28 }
 0x4c2   : > { %s7767_s13 = sld [smem:[#allocation169_spill]] }
 0x4c3   : > { %s5906_s6 = sld [smem:[#allocation10 + $0x167]] }
 0x4c4   : > { %s5914_s11 = sld [smem:[#allocation10 + $0x168]] }
 0x4c5   : > { %s7770_s27 = sld [smem:[#allocation170_spill]]  ;;  %v1670_v45 = vstv %s7766_s4 }
 0x4c6   : > { %s7771_s30 = sld [smem:[#allocation171_spill]]  ;;  %v1671_v46 = vmul.f32 %v3742_v35, %v1670_v45 }
 0x4c7   : > { %s5932_s28 = sld [smem:[#allocation10 + $0x16a]] }
 0x4c8   : > { %v1674_v49 = vstv %s7767_s13  ;;  %s7775_s16 = sld [smem:[#allocation173_spill]]  ;;  %v1672_v31 = vadd.f32 %v1671_v46, %v5895_v22 }
 0x4c9   : > { %7768 = sst [smem:[#allocation77_spill]] %s5906_s6  ;;  %v1675_v25 = vmul.f32 %v3742_v35, %v1674_v49  ;;  %v1809_v49 = vadd.f32 %v1808_v17, %v1806_v10 }
 0x4ca   : > { %7769 = sst [smem:[#allocation88_spill]] %s5914_s11 }
 0x4cb   : > { %s5924_s6 = sld [smem:[#allocation10 + $0x169]]  ;;  %v1678_v43 = vstv %s7770_s27  ;;  %v1676_v5 = vadd.f32 %v1675_v25, %v5900_v40  ;;  %3745 = vtanh.f32 %v1809_v49 }
 0x4cc   : > { %s7773_s11 = sld [smem:[#allocation172_spill]]  ;;  %v1682_v7 = vstv %s7771_s30  ;;  %v1679_v16 = vmul.f32 %v3742_v35, %v1678_v43  ;;  %v3744_v43 = vpop.eup %3743 }
 0x4cd   : > { %7774 = sst [smem:[#allocation79_spill]] %s5932_s28  ;;  %v1683_v60 = vmul.f32 %v3742_v35, %v1682_v7  ;;  %v1688_v7 = vadd.f32 %v1687_v27, %v5910_v47 }
 0x4ce   : > { %s7776_s2 = sld [smem:[#allocation174_spill]]  ;;  %v1706_v50 = vstv %s7775_s16  ;;  %v1680_v22 = vadd.f32 %v1679_v16, %v5902_v29 }
 0x4cf   : > { %s7778_s19 = sld [smem:[#allocation175_spill]]  ;;  %v1707_v28 = vmul.f32 %v3742_v35, %v1706_v50  ;;  %v1684_v45 = vadd.f32 %v1683_v60, %v5908_v63 }
 0x4d0   : > { %s5940_s20 = sld [smem:[#allocation10 + $0x16b]] }
 0x4d1   : > { %7772 = sst [smem:[#allocation78_spill]] %s5924_s6  ;;  %v1708_v29 = vadd.f32 %v1707_v28, %v5922_v44 }
 0x4d2   : > { %s7777_s6 = sld [smem:[#allocation186_spill]]  ;;  %v1702_v59 = vstv %s7773_s11 }
 0x4d3   : > { %s7780_s4 = sld [smem:[#allocation176_spill]]  ;;  %v1703_v23 = vmul.f32 %v3742_v35, %v1702_v59 }
 0x4d4   : > { %s7781_s13 = sld [smem:[#allocation177_spill]]  ;;  %v1710_v26 = vstv %s7776_s2 }
 0x4d5   : > { %s7782_s28 = sld [smem:[#allocation178_spill]]  ;;  %v1718_v61 = vstv %s7778_s19  ;;  %v1711_v56 = vmul.f32 %v3742_v35, %v1710_v26  ;;  %v1704_v40 = vadd.f32 %v1703_v23, %v5920_v36 }
 0x4d6   : > { %7779 = sst [smem:[#allocation80_spill]] %s5940_s20  ;;  %v1719_v34 = vmul.f32 %v3742_v35, %v1718_v61 }
 0x4d7   : > { %s7783_s5 = sld [smem:[#allocation179_spill]]  ;;  %v1712_v63 = vadd.f32 %v1711_v56, %v5926_v18  ;;  %v1876_v18 = vstv %s5762_s23 }
 0x4d8   : > { %s5947_s0 = sld [smem:[#allocation10 + $0x16c]]  ;;  %v1714_v48 = vstv %s7777_s6  ;;  %v1720_v47 = vadd.f32 %v1719_v34, %v5934_v39 }
 0x4d9   : > { %s7784_s8 = sld [smem:[#allocation180_spill]]  ;;  %v1722_v42 = vstv %s7780_s4  ;;  %v1715_v57 = vmul.f32 %v3742_v35, %v1714_v48 }
 0x4da   : > { %s7785_s21 = sld [smem:[#allocation36_spill]]  ;;  %v1726_v53 = vstv %s7781_s13  ;;  %v1723_v41 = vmul.f32 %v3742_v35, %v1722_v42  ;;  %v1877_v42 = vmul.f32 %v5743_v38, %v1876_v18  ;;  %v1895_v18 = vstv %s5803_s10 }
 0x4db   : > { %s5953_s20 = sld [smem:[#allocation10 + $0x16d]]  ;;  %v1730_v54 = vstv %s7782_s28  ;;  %v1727_v37 = vmul.f32 %v3742_v35, %v1726_v53  ;;  %v1716_v0 = vadd.f32 %v1715_v57, %v5928_v12 }
 0x4dc   : > { %s7786_s12 = sld [smem:[#allocation181_spill]]  ;;  %v1731_v19 = vmul.f32 %v3742_v35, %v1730_v54  ;;  %v1700_v35 = vadd.f32 %v1699_v3, %v5918_v2  ;;  %v1724_v33 = vadd.f32 %v1723_v41, %v5936_v52 }
 0x4dd   : > { %s7787_s27 = sld [smem:[#allocation53_spill]]  ;;  %v1741_v14 = vstv %s7783_s5  ;;  %v1728_v11 = vadd.f32 %v1727_v37, %v5938_v55 }
 0x4de   : > { %s7788_s30 = sld [smem:[#allocation182_spill]]  ;;  %v1732_v2 = vadd.f32 %v1731_v19, %v5942_v58  ;;  %v1742_v36 = vmul.f32 %v3744_v43, %v1741_v14 }
 0x4df   : > { %s7789_s26 = sld [smem:[#allocation183_spill]]  ;;  %v1745_v30 = vstv %s7784_s8 }
 0x4e0   : > { %s5959_s14 = sld [smem:[#allocation10 + $0x16e]]  ;;  %v1749_v20 = vstv %s7785_s21  ;;  %v1746_v44 = vmul.f32 %v3744_v43, %v1745_v30  ;;  %v6032_v53 = vadd.f32 %v1742_v36, %v1672_v31 }
 0x4e1   : > { %s7790_s25 = sld [smem:[#allocation184_spill]]  ;;  %v1750_v12 = vmul.f32 %v3744_v43, %v1749_v20 }
 0x4e2   : > { %s7791_s24 = sld [smem:[#allocation34_spill]]  ;;  %v1753_v32 = vstv %s7786_s12 }
 0x4e3   : > { %s5965_s18 = sld [smem:[#allocation10 + $0x16f]]  ;;  %v1757_v6 = vstv %s7787_s27  ;;  %v1754_v39 = vmul.f32 %v3744_v43, %v1753_v32  ;;  %v6048_v16 = vadd.f32 %v1750_v12, %v1680_v22  ;;  %v1899_v12 = vstv %s5809_s9 }
 0x4e4   : > { %s5970_s16 = sld [smem:[#allocation7 + $0x17]]  ;;  %v1761_v8 = vstv %s7788_s30  ;;  %v1758_v52 = vmul.f32 %v3744_v43, %v1757_v6  ;;  %v6044_v6 = vadd.f32 %v1746_v44, %v1676_v5 }
 0x4e5   : > { %v1765_v24 = vstv %s7789_s26  ;;  %s5976_s19 = sld [smem:[#allocation9 + $0x17]]  ;;  %v1762_v55 = vmul.f32 %v3744_v43, %v1761_v8 }
 0x4e6   : > { %s5980_s5 = sld [smem:[#allocation10 + $0x170]]  ;;  %v1766_v58 = vmul.f32 %v3744_v43, %v1765_v24 }
 0x4e7   : > { %v1769_v13 = vstv %s7790_s25  ;;  %s5983_s1 = sld [smem:[#allocation10 + $0x171]]  ;;  %v6056_v9 = vadd.f32 %v1762_v55, %v1692_v4  ;;  %v1907_v55 = vstv %s5821_s15 }
 0x4e8   : > { %v1773_v51 = vstv %s7791_s24  ;;  %s5987_s12 = sld [smem:[#allocation10 + $0x172]]  ;;  %v1770_v54 = vmul.f32 %v3744_v43, %v1769_v13  ;;  %v6050_v13 = vadd.f32 %v1754_v39, %v1684_v45  ;;  %v6058_v10 = vadd.f32 %v1766_v58, %v1696_v15 }
 0x4e9   : > { %7792 = sst [smem:[#allocation105_spill]] %s5965_s18  ;;  %v1774_v30 = vmul.f32 %v3744_v43, %v1773_v51  ;;  %v6054_v51 = vadd.f32 %v1758_v52, %v1688_v7  ;;  %v1903_v52 = vstv %s5815_s3  ;;  %v1911_v58 = vstv %s5827_s17 }
 0x4ea   : > { %s5989_s21 = sld [smem:[#allocation10 + $0x173]]  ;;  %v6060_v31 = vadd.f32 %v1770_v54, %v1700_v35  ;;  %v1950_v54 = vstv %s5870_s29 }
 0x4eb   : > { %s5991_s8 = sld [smem:[#allocation10 + $0x174]]  ;;  %v6064_v62 = vadd.f32 %v1774_v30, %v1704_v40 }
 0x4ec   : > { %7793 = sst [smem:[#allocation81_spill]] %s5980_s5 }
 0x4ed   : > { %7794 = sst [smem:[#allocation82_spill]] %s5983_s1 }
 0x4ee   : > { %7795 = sst [smem:[#allocation83_spill]] %s5987_s12 }
 0x4ef   : > { %s5996_s7 = sld [smem:[#allocation10 + $0x175]] }
 0x4f0   : > { %7796 = sst [smem:[#allocation84_spill]] %s5989_s21 }
 0x4f1   : > { %7797 = sst [smem:[#allocation85_spill]] %s5991_s8 }
 0x4f2   : > { %s6002_s2 = sld [smem:[#allocation10 + $0x176]] }
 0x4f3   : > { %s6008_s28 = sld [smem:[#allocation10 + $0x177]] }
 0x4f4   : > { %s7801_s6 = sld [smem:[#allocation35_spill]] }
 0x4f5   : > { %7798 = sst [smem:[#allocation86_spill]] %s5996_s7 }
 0x4f6   : > { %s7802_s11 = sld [smem:[#allocation52_spill]] }
 0x4f7   : > { %s7803_s4 = sld [smem:[#allocation185_spill]] }
 0x4f8   : > { %7799 = sst [smem:[#allocation106_spill]] %s6002_s2 }
 0x4f9   : > { %7800 = sst [smem:[#allocation89_spill]] %s6008_s28 }
 0x4fa   : > { %s6014_s13 = sld [smem:[#allocation10 + $0x178]]  ;;  %v1777_v1 = vstv %s7801_s6 }
 0x4fb   : > { %s7805_s27 = sld [smem:[#allocation37_spill]]  ;;  %v1778_v20 = vmul.f32 %v3744_v43, %v1777_v1 }
 0x4fc   : > { %s7806_s30 = sld [smem:[#allocation38_spill]]  ;;  %v1781_v59 = vstv %s7802_s11 }
 0x4fd   : > { %s7807_s26 = sld [smem:[#allocation39_spill]]  ;;  %v1785_v50 = vstv %s7803_s4  ;;  %v1782_v21 = vmul.f32 %v3744_v43, %v1781_v59  ;;  %v6066_v3 = vadd.f32 %v1778_v20, %v1708_v29 }
 0x4fe   : > { %s6017_s28 = sld [smem:[#allocation10 + $0x179]]  ;;  %v1786_v32 = vmul.f32 %v3744_v43, %v1785_v50 }
 0x4ff   : > { %s7809_s2 = sld [smem:[#allocation40_spill]]  ;;  %v6068_v17 = vadd.f32 %v1782_v21, %v1712_v63 }
 0x500   : > { %7804 = sst [smem:[#allocation90_spill]] %s6014_s13  ;;  %v6070_v23 = vadd.f32 %v1786_v32, %v1716_v0 }
 0x501   : > { %s7810_s7 = sld [smem:[#allocation56_spill]]  ;;  %v1789_v26 = vstv %s7805_s27 }
 0x502   : > { %s6019_s8 = sld [smem:[#allocation10 + $0x17a]]  ;;  %v1793_v48 = vstv %s7806_s30  ;;  %v1790_v8 = vmul.f32 %v3744_v43, %v1789_v26 }
 0x503   : > { %s6024_s13 = sld [smem:[#allocation10 + $0x17b]]  ;;  %v1797_v61 = vstv %s7807_s26  ;;  %v1794_v24 = vmul.f32 %v3744_v43, %v1793_v48 }
 0x504   : > { %7808 = sst [smem:[#allocation91_spill]] %s6017_s28  ;;  %v1798_v25 = vmul.f32 %v3744_v43, %v1797_v61  ;;  %v6074_v28 = vadd.f32 %v1790_v8, %v1720_v47 }
 0x505   : > { %s6030_s23 = sld [smem:[#allocation10 + $0x17c]]  ;;  %v1801_v14 = vstv %s7809_s2  ;;  %v6076_v56 = vadd.f32 %v1794_v24, %v1724_v33 }
 0x506   : > { %s6042_s6 = sld [smem:[#allocation10 + $0x17e]]  ;;  %v1802_v60 = vmul.f32 %v3744_v43, %v1801_v14  ;;  %v6078_v57 = vadd.f32 %v1798_v25, %v1728_v11  ;;  %v3746_v43 = vpop.eup %3745 }
 0x507   : > { %v1879_v46 = vstv %s7810_s7  ;;  %s6046_s11 = sld [smem:[#allocation10 + $0x17f]] }
 0x508   : > { %7811 = sst [smem:[#allocation92_spill]] %s6019_s8  ;;  %v1880_v27 = vadd.f32 %v1879_v46, %v1877_v42  ;;  %v6083_v41 = vadd.f32 %v1802_v60, %v1732_v2  ;;  %v1947_v2 = vstv %s5864_s22 }
 0x509   : > { %7812 = sst [smem:[#allocation93_spill]] %s6024_s13  ;;  %v1948_v26 = vmul.f32 %v5743_v38, %v1947_v2 }
 0x50a   : > { %s6038_s8 = sld [smem:[#allocation10 + $0x17d]]  ;;  %3747 = vtanh.f32 %v1880_v27 }
 0x50b   : > { %7813 = sst [smem:[#allocation94_spill]] %s6030_s23 }
 0x50c   : > { %7815 = sst [smem:[#allocation96_spill]] %s6042_s6 }
 0x50d   : > { %7816 = sst [smem:[#allocation97_spill]] %s6046_s11 }
 0x50e   : > { %s7817_s25 = sld [smem:[#allocation41_spill]] }
 0x50f   : > { %s6052_s24 = sld [smem:[#allocation7 + $0x18]] }
 0x510   : > { %7814 = sst [smem:[#allocation95_spill]] %s6038_s8 }
 0x511   : > { %s7819_s7 = sld [smem:[#allocation42_spill]] }
 0x512   : > { %s7820_s2 = sld [smem:[#allocation43_spill]] }
 0x513   : > { %s6062_s4 = sld [smem:[#allocation9 + $0x18]] }
 0x514   : > { %s7822_s27 = sld [smem:[#allocation44_spill]]  ;;  %v1812_v34 = vstv %s7817_s25 }
 0x515   : > { %7818 = sst [smem:[#allocation98_spill]] %s6052_s24  ;;  %v1813_v36 = vmul.f32 %v3746_v43, %v1812_v34  ;;  %v1951_v34 = vadd.f32 %v1950_v54, %v1948_v26 }
 0x516   : > { %s7823_s30 = sld [smem:[#allocation69_spill]] }
 0x517   : > { %s7824_s26 = sld [smem:[#allocation45_spill]]  ;;  %v1816_v37 = vstv %s7819_s7  ;;  %v1814_v14 = vadd.f32 %v1813_v36, %v6032_v53  ;;  %3749 = vtanh.f32 %v1951_v34 }
 0x518   : > { %s7825_s11 = sld [smem:[#allocation46_spill]]  ;;  %v1820_v19 = vstv %s7820_s2  ;;  %v1817_v39 = vmul.f32 %v3746_v43, %v1816_v37 }
 0x519   : > { %7821 = sst [smem:[#allocation99_spill]] %s6062_s4  ;;  %v1821_v1 = vmul.f32 %v3746_v43, %v1820_v19 }
 0x51a   : > { %s6072_s6 = sld [smem:[#allocation10 + $0x180]]  ;;  %v1824_v5 = vstv %s7822_s27  ;;  %v1818_v25 = vadd.f32 %v1817_v39, %v6044_v6 }
 0x51b   : > { %s7827_s8 = sld [smem:[#allocation47_spill]]  ;;  %v1825_v59 = vmul.f32 %v3746_v43, %v1824_v5  ;;  %v1822_v60 = vadd.f32 %v1821_v1, %v6048_v16 }
 0x51c   : > { %s7828_s23 = sld [smem:[#allocation48_spill]]  ;;  %v1828_v22 = vstv %s7823_s30 }
 0x51d   : > { %s7829_s13 = sld [smem:[#allocation49_spill]]  ;;  %v1832_v45 = vstv %s7824_s26  ;;  %v1829_v50 = vmul.f32 %v3746_v43, %v1828_v22  ;;  %v1826_v53 = vadd.f32 %v1825_v59, %v6050_v13  ;;  %v3748_v22 = vpop.eup %3747 }
 0x51e   : > { %s7830_s28 = sld [smem:[#allocation50_spill]]  ;;  %v1836_v49 = vstv %s7825_s11  ;;  %v1833_v48 = vmul.f32 %v3746_v43, %v1832_v45 }
 0x51f   : > { %s6081_s4 = sld [smem:[#allocation10 + $0x181]]  ;;  %v1837_v61 = vmul.f32 %v3746_v43, %v1836_v49  ;;  %v1830_v37 = vadd.f32 %v1829_v50, %v6054_v51 }
 0x520   : > { %7826 = sst [smem:[#allocation100_spill]] %s6072_s6  ;;  %v1834_v19 = vadd.f32 %v1833_v48, %v6056_v9 }
 0x521   : > { %s7832_s21 = sld [smem:[#allocation51_spill]]  ;;  %v1840_v7 = vstv %s7827_s8  ;;  %v1838_v5 = vadd.f32 %v1837_v61, %v6058_v10 }
 0x522   : > { %s7833_s24 = sld [smem:[#allocation54_spill]]  ;;  %v1844_v4 = vstv %s7828_s23  ;;  %v1841_v42 = vmul.f32 %v3746_v43, %v1840_v7  ;;  %v1896_v7 = vmul.f32 %v3748_v22, %v1895_v18 }
 0x523   : > { %s7834_s6 = sld [smem:[#allocation55_spill]]  ;;  %v1848_v15 = vstv %s7829_s13  ;;  %v1845_v46 = vmul.f32 %v3746_v43, %v1844_v4  ;;  %v1904_v4 = vmul.f32 %v3748_v22, %v1903_v52 }
 0x524   : > { %s7835_s12 = sld [smem:[#allocation68_spill]]  ;;  %v1852_v35 = vstv %s7830_s28  ;;  %v1849_v30 = vmul.f32 %v3746_v43, %v1848_v15  ;;  %v1842_v6 = vadd.f32 %v1841_v42, %v6060_v31  ;;  %v1908_v15 = vmul.f32 %v3748_v22, %v1907_v55 }
 0x525   : > { %7831 = sst [smem:[#allocation101_spill]] %s6081_s4  ;;  %v1853_v20 = vmul.f32 %v3746_v43, %v1852_v35  ;;  %v1846_v16 = vadd.f32 %v1845_v46, %v6064_v62  ;;  %v1912_v35 = vmul.f32 %v3748_v22, %v1911_v58  ;;  %v6192_v59 = vadd.f32 %v1896_v7, %v1826_v53  ;;  %v3750_v53 = vpop.eup %3749 }
 0x526   : > { %s6087_s1 = sld [smem:[#allocation10 + $0x182]]  ;;  %v1850_v45 = vadd.f32 %v1849_v30, %v6066_v3  ;;  %v2018_v3 = vstv %s5970_s16  ;;  %v6196_v26 = vadd.f32 %v1904_v4, %v1834_v19  ;;  %v6200_v61 = vadd.f32 %v1908_v15, %v1838_v5 }
 0x527   : > { %s7836_s5 = sld [smem:[#allocation70_spill]]  ;;  %v1856_v40 = vstv %s7832_s21  ;;  %v1854_v13 = vadd.f32 %v1853_v20, %v6068_v17  ;;  %v6202_v42 = vadd.f32 %v1912_v35, %v1842_v6 }
 0x528   : > { %s7837_s18 = sld [smem:[#allocation57_spill]]  ;;  %v1860_v29 = vstv %s7833_s24  ;;  %v1857_v21 = vmul.f32 %v3746_v43, %v1856_v40  ;;  %v2019_v40 = vmul.f32 %v5743_v38, %v2018_v3 }
 0x529   : > { %s7838_s25 = sld [smem:[#allocation58_spill]]  ;;  %v1864_v63 = vstv %s7834_s6  ;;  %v1861_v32 = vmul.f32 %v3746_v43, %v1860_v29 }
 0x52a   : > { %s6093_s4 = sld [smem:[#allocation10 + $0x183]]  ;;  %v1868_v0 = vstv %s7835_s12  ;;  %v1865_v8 = vmul.f32 %v3746_v43, %v1864_v63  ;;  %v1858_v51 = vadd.f32 %v1857_v21, %v6070_v23 }
 0x52b   : > { %s7839_s7 = sld [smem:[#allocation59_spill]]  ;;  %v1869_v24 = vmul.f32 %v3746_v43, %v1868_v0  ;;  %v1862_v9 = vadd.f32 %v1861_v32, %v6074_v28 }
 0x52c   : > { %s6099_s2 = sld [smem:[#allocation10 + $0x184]]  ;;  %v1866_v10 = vadd.f32 %v1865_v8, %v6076_v56 }
 0x52d   : > { %s6105_s11 = sld [smem:[#allocation10 + $0x185]]  ;;  %v1872_v47 = vstv %s7836_s5  ;;  %v1870_v31 = vadd.f32 %v1869_v24, %v6078_v57 }
 0x52e   : > { %v1883_v33 = vstv %s7837_s18  ;;  %s6111_s8 = sld [smem:[#allocation10 + $0x186]]  ;;  %v1873_v27 = vmul.f32 %v3746_v43, %v1872_v47  ;;  %v2021_v47 = vstv %s5976_s19 }
 0x52f   : > { %v1887_v11 = vstv %s7838_s25  ;;  %s6116_s21 = sld [smem:[#allocation10 + $0x187]]  ;;  %v1884_v17 = vmul.f32 %v3748_v22, %v1883_v33  ;;  %v2022_v1 = vadd.f32 %v2021_v47, %v2019_v40 }
 0x530   : > { %s6121_s12 = sld [smem:[#allocation10 + $0x188]]  ;;  %v1874_v62 = vadd.f32 %v1873_v27, %v6083_v41  ;;  %v1888_v56 = vmul.f32 %v3748_v22, %v1887_v11  ;;  %v1900_v41 = vmul.f32 %v3748_v22, %v1899_v12 }
 0x531   : > { %v1891_v44 = vstv %s7839_s7  ;;  %s6124_s22 = sld [smem:[#allocation10 + $0x189]]  ;;  %v6179_v33 = vadd.f32 %v1884_v17, %v1814_v14  ;;  %3751 = vtanh.f32 %v2022_v1 }
 0x532   : > { %s6127_s10 = sld [smem:[#allocation10 + $0x18a]]  ;;  %v1892_v57 = vmul.f32 %v3748_v22, %v1891_v44  ;;  %v6184_v44 = vadd.f32 %v1888_v56, %v1818_v25  ;;  %v6194_v50 = vadd.f32 %v1900_v41, %v1830_v37 }
 0x533   : > { %s6130_s3 = sld [smem:[#allocation10 + $0x18b]] }
 0x534   : > { %s6132_s9 = sld [smem:[#allocation10 + $0x18c]]  ;;  %v6186_v18 = vadd.f32 %v1892_v57, %v1822_v60 }
 0x535   : > { %s6136_s15 = sld [smem:[#allocation10 + $0x18d]] }
 0x536   : > { %s7845_s17 = sld [smem:[#allocation60_spill]] }
 0x537   : > { %7840 = sst [smem:[#allocation102_spill]] %s6124_s22 }
 0x538   : > { %7841 = sst [smem:[#allocation103_spill]] %s6127_s10 }
 0x539   : > { %7842 = sst [smem:[#allocation104_spill]] %s6130_s3 }
 0x53a   : > { %7843 = sst [smem:[#allocation107_spill]] %s6132_s9 }
 0x53b   : > { %7844 = sst [smem:[#allocation108_spill]] %s6136_s15 }
 0x53c   : > { %s6142_s29 = sld [smem:[#allocation10 + $0x18e]]  ;;  %v1915_v49 = vstv %s7845_s17 }
 0x53d   : > { %s7847_s18 = sld [smem:[#allocation71_spill]]  ;;  %v1916_v11 = vmul.f32 %v3748_v22, %v1915_v49 }
 0x53e   : > { %s7848_s5 = sld [smem:[#allocation61_spill]] }
 0x53f   : > { %s7849_s28 = sld [smem:[#allocation62_spill]]  ;;  %v6204_v54 = vadd.f32 %v1916_v11, %v1846_v16 }
 0x540   : > { %s6148_s13 = sld [smem:[#allocation10 + $0x18f]] }
 0x541   : > { %s6154_s23 = sld [smem:[#allocation7 + $0x19]] }
 0x542   : > { %7846 = sst [smem:[#allocation123_spill]] %s6142_s29 }
 0x543   : > { %s6159_s6 = sld [smem:[#allocation9 + $0x19]]  ;;  %v1919_v43 = vstv %s7847_s18 }
 0x544   : > { %s7851_s24 = sld [smem:[#allocation63_spill]]  ;;  %v1923_v23 = vstv %s7848_s5  ;;  %v1920_v2 = vmul.f32 %v3748_v22, %v1919_v43 }
 0x545   : > { %s7852_s27 = sld [smem:[#allocation64_spill]]  ;;  %v1927_v28 = vstv %s7849_s28  ;;  %v1924_v12 = vmul.f32 %v3748_v22, %v1923_v23 }
 0x546   : > { %7850 = sst [smem:[#allocation109_spill]] %s6148_s13  ;;  %v1928_v39 = vmul.f32 %v3748_v22, %v1927_v28  ;;  %v6206_v14 = vadd.f32 %v1920_v2, %v1850_v45 }
 0x547   : > { %s7853_s30 = sld [smem:[#allocation65_spill]]  ;;  %v6210_v46 = vadd.f32 %v1924_v12, %v1854_v13  ;;  %v2002_v13 = vstv %s5947_s0 }
 0x548   : > { %s6164_s26 = sld [smem:[#allocation10 + $0x190]]  ;;  %v6212_v30 = vadd.f32 %v1928_v39, %v1858_v51  ;;  %v2006_v51 = vstv %s5953_s20 }
 0x549   : > { %s7855_s7 = sld [smem:[#allocation66_spill]] }
 0x54a   : > { %s6168_s17 = sld [smem:[#allocation10 + $0x191]]  ;;  %v1931_v29 = vstv %s7851_s24 }
 0x54b   : > { %s6171_s16 = sld [smem:[#allocation10 + $0x192]]  ;;  %v1935_v63 = vstv %s7852_s27  ;;  %v1932_v52 = vmul.f32 %v3748_v22, %v1931_v29 }
 0x54c   : > { %s6177_s18 = sld [smem:[#allocation10 + $0x193]]  ;;  %v1936_v55 = vmul.f32 %v3748_v22, %v1935_v63 }
 0x54d   : > { %v1939_v0 = vstv %s7853_s30  ;;  %s6182_s25 = sld [smem:[#allocation10 + $0x194]]  ;;  %v6218_v32 = vadd.f32 %v1932_v52, %v1862_v9  ;;  %v2010_v9 = vstv %s5959_s14  ;;  %v2003_v52 = vmul.f32 %v3750_v53, %v2002_v13 }
 0x54e   : > { %7854 = sst [smem:[#allocation110_spill]] %s6164_s26  ;;  %v1940_v58 = vmul.f32 %v3748_v22, %v1939_v0  ;;  %v6220_v8 = vadd.f32 %v1936_v55, %v1866_v10  ;;  %v2007_v55 = vmul.f32 %v3750_v53, %v2006_v51 }
 0x54f   : > { %v1943_v36 = vstv %s7855_s7  ;;  %s6188_s5 = sld [smem:[#allocation10 + $0x195]] }
 0x550   : > { %7856 = sst [smem:[#allocation111_spill]] %s6168_s17  ;;  %v1944_v48 = vmul.f32 %v3748_v22, %v1943_v36  ;;  %v6222_v24 = vadd.f32 %v1940_v58, %v1870_v31  ;;  %v2011_v58 = vmul.f32 %v3750_v53, %v2010_v9 }
 0x551   : > { %7857 = sst [smem:[#allocation112_spill]] %s6171_s16 }
 0x552   : > { %7858 = sst [smem:[#allocation113_spill]] %s6177_s18  ;;  %v6226_v25 = vadd.f32 %v1944_v48, %v1874_v62 }
 0x553   : > { %7859 = sst [smem:[#allocation114_spill]] %s6182_s25 }
 0x554   : > { %s7861_s19 = sld [smem:[#allocation67_spill]] }
 0x555   : > { %7860 = sst [smem:[#allocation124_spill]] %s6188_s5 }
 0x556   : > { %s7862_s28 = sld [smem:[#allocation72_spill]] }
 0x557   : > { %s6190_s24 = sld [smem:[#allocation10 + $0x196]] }
 0x558   : > { %s6198_s27 = sld [smem:[#allocation10 + $0x197]] }
 0x559   : > { %s7865_s30 = sld [smem:[#allocation73_spill]] }
 0x55a   : > { %s7866_s7 = sld [smem:[#allocation87_spill]]  ;;  %v1954_v20 = vstv %s7861_s19 }
 0x55b   : > { %s7867_s5 = sld [smem:[#allocation74_spill]]  ;;  %v1955_v62 = vmul.f32 %v3750_v53, %v1954_v20 }
 0x55c   : > { %s7869_s25 = sld [smem:[#allocation75_spill]]  ;;  %v1958_v21 = vstv %s7862_s28 }
 0x55d   : > { %7863 = sst [smem:[#allocation115_spill]] %s6190_s24  ;;  %v1959_v57 = vmul.f32 %v3750_v53, %v1958_v21  ;;  %v1956_v63 = vadd.f32 %v1955_v62, %v6179_v33  ;;  %v3752_v21 = vpop.eup %3751  ;;  %v2163_v62 = vstv %s6159_s6 }
 0x55e   : > { %7864 = sst [smem:[#allocation141_spill]] %s6198_s27 }
 0x55f   : > { %s6208_s24 = sld [smem:[#allocation10 + $0x198]]  ;;  %v1962_v60 = vstv %s7865_s30 }
 0x560   : > { %s7870_s18 = sld [smem:[#allocation76_spill]]  ;;  %v1966_v27 = vstv %s7866_s7  ;;  %v1963_v7 = vmul.f32 %v3750_v53, %v1962_v60 }
 0x561   : > { %s7871_s27 = sld [smem:[#allocation77_spill]]  ;;  %v1970_v34 = vstv %s7867_s5  ;;  %v1967_v15 = vmul.f32 %v3750_v53, %v1966_v27 }
 0x562   : > { %s7872_s16 = sld [smem:[#allocation88_spill]]  ;;  %v1974_v37 = vstv %s7869_s25  ;;  %v1971_v35 = vmul.f32 %v3750_v53, %v1970_v34  ;;  %v1964_v33 = vadd.f32 %v1963_v7, %v6186_v18 }
 0x563   : > { %s6216_s17 = sld [smem:[#allocation10 + $0x199]]  ;;  %v1975_v40 = vmul.f32 %v3750_v53, %v1974_v37  ;;  %v1968_v48 = vadd.f32 %v1967_v15, %v6192_v59 }
 0x564   : > { %s7874_s26 = sld [smem:[#allocation78_spill]]  ;;  %v1972_v60 = vadd.f32 %v1971_v35, %v6194_v50  ;;  %v2004_v50 = vadd.f32 %v2003_v52, %v6218_v32 }
 0x565   : > { %7868 = sst [smem:[#allocation116_spill]] %s6208_s24  ;;  %v1976_v27 = vadd.f32 %v1975_v40, %v6196_v26  ;;  %v2008_v26 = vadd.f32 %v2007_v55, %v6220_v8 }
 0x566   : > { %s7875_s13 = sld [smem:[#allocation79_spill]]  ;;  %v1978_v19 = vstv %s7870_s18 }
 0x567   : > { %s7876_s24 = sld [smem:[#allocation80_spill]]  ;;  %v1982_v5 = vstv %s7871_s27  ;;  %v1979_v0 = vmul.f32 %v3750_v53, %v1978_v19 }
 0x568   : > { %s6224_s29 = sld [smem:[#allocation10 + $0x19a]]  ;;  %v1986_v22 = vstv %s7872_s16  ;;  %v1983_v47 = vmul.f32 %v3750_v53, %v1982_v5 }
 0x569   : > { %7873 = sst [smem:[#allocation117_spill]] %s6216_s17  ;;  %v1987_v2 = vmul.f32 %v3750_v53, %v1986_v22  ;;  %v1980_v34 = vadd.f32 %v1979_v0, %v6200_v61  ;;  %v2012_v61 = vadd.f32 %v2011_v58, %v6222_v24 }
 0x56a   : > { %s7878_s19 = sld [smem:[#allocation105_spill]]  ;;  %v1990_v6 = vstv %s7874_s26 }
 0x56b   : > { %s7879_s28 = sld [smem:[#allocation81_spill]]  ;;  %v1991_v36 = vmul.f32 %v3750_v53, %v1990_v6 }
 0x56c   : > { %s6231_s17 = sld [smem:[#allocation10 + $0x19b]]  ;;  %v1994_v16 = vstv %s7875_s13 }
 0x56d   : > { %s7880_s15 = sld [smem:[#allocation82_spill]]  ;;  %v1998_v45 = vstv %s7876_s24  ;;  %v1995_v12 = vmul.f32 %v3750_v53, %v1994_v16  ;;  %v1992_v18 = vadd.f32 %v1991_v36, %v6206_v14 }
 0x56e   : > { %7877 = sst [smem:[#allocation118_spill]] %s6224_s29  ;;  %v1999_v39 = vmul.f32 %v3750_v53, %v1998_v45 }
 0x56f   : > { %s7881_s9 = sld [smem:[#allocation83_spill]]  ;;  %v1996_v59 = vadd.f32 %v1995_v12, %v6210_v46  ;;  %v2160_v46 = vstv %s6154_s23 }
 0x570   : > { %s7882_s3 = sld [smem:[#allocation98_spill]]  ;;  %v2014_v10 = vstv %s7878_s19  ;;  %v2000_v37 = vadd.f32 %v1999_v39, %v6212_v30 }
 0x571   : > { %s6237_s29 = sld [smem:[#allocation10 + $0x19c]]  ;;  %v2025_v31 = vstv %s7879_s28  ;;  %v2015_v1 = vmul.f32 %v3750_v53, %v2014_v10  ;;  %v1984_v53 = vadd.f32 %v1983_v47, %v6202_v42 }
 0x572   : > { %s7883_s10 = sld [smem:[#allocation84_spill]] }
 0x573   : > { %s7884_s30 = sld [smem:[#allocation85_spill]]  ;;  %v2029_v49 = vstv %s7880_s15  ;;  %v2016_v42 = vadd.f32 %v2015_v1, %v6226_v25  ;;  %v2104_v1 = vstv %s6087_s1 }
 0x574   : > { %s7885_s7 = sld [smem:[#allocation86_spill]]  ;;  %v2030_v14 = vmul.f32 %v3752_v21, %v2029_v49 }
 0x575   : > { %s7886_s5 = sld [smem:[#allocation106_spill]]  ;;  %v2033_v3 = vstv %s7881_s9 }
 0x576   : > { %s6243_s22 = sld [smem:[#allocation10 + $0x19d]]  ;;  %v2089_v17 = vstv %s7882_s3  ;;  %v2034_v30 = vmul.f32 %v3752_v21, %v2033_v3 }
 0x577   : > { %s7887_s25 = sld [smem:[#allocation89_spill]]  ;;  %v2090_v29 = vmul.f32 %v5743_v38, %v2089_v17  ;;  %v1960_v38 = vadd.f32 %v1959_v57, %v6184_v44  ;;  %v1988_v44 = vadd.f32 %v1987_v2, %v6204_v54  ;;  %v2026_v54 = vmul.f32 %v3752_v21, %v2025_v31 }
 0x578   : > { %s7888_s18 = sld [smem:[#allocation90_spill]]  ;;  %v2037_v43 = vstv %s7883_s10  ;;  %v6335_v7 = vadd.f32 %v2034_v30, %v1964_v33  ;;  %v2112_v33 = vstv %s6099_s2 }
 0x579   : > { %s6249_s27 = sld [smem:[#allocation10 + $0x19e]]  ;;  %v2041_v23 = vstv %s7884_s30  ;;  %v2038_v32 = vmul.f32 %v3752_v21, %v2037_v43  ;;  %v6319_v9 = vadd.f32 %v2026_v54, %v1956_v63 }
 0x57a   : > { %s6254_s26 = sld [smem:[#allocation10 + $0x19f]]  ;;  %v2045_v28 = vstv %s7885_s7  ;;  %v2042_v8 = vmul.f32 %v3752_v21, %v2041_v23  ;;  %v6331_v23 = vadd.f32 %v2030_v14, %v1960_v38  ;;  %v2108_v38 = vstv %s6093_s4 }
 0x57b   : > { %s7889_s0 = sld [smem:[#allocation99_spill]]  ;;  %v2049_v56 = vstv %s7886_s5  ;;  %v2046_v24 = vmul.f32 %v3752_v21, %v2045_v28 }
 0x57c   : > { %s6260_s13 = sld [smem:[#allocation7 + $0x1a]]  ;;  %v2050_v25 = vmul.f32 %v3752_v21, %v2049_v56 }
 0x57d   : > { %v2053_v41 = vstv %s7887_s25  ;;  %s6264_s14 = sld [smem:[#allocation9 + $0x1a]]  ;;  %v6343_v40 = vadd.f32 %v2046_v24, %v1976_v27  ;;  %v2128_v27 = vstv %s6121_s12 }
 0x57e   : > { %v2057_v4 = vstv %s7888_s18  ;;  %s6267_s20 = sld [smem:[#allocation10 + $0x1a0]]  ;;  %v2054_v10 = vmul.f32 %v3752_v21, %v2053_v41  ;;  %v6337_v41 = vadd.f32 %v2038_v32, %v1968_v48  ;;  %v2116_v48 = vstv %s6105_s11 }
 0x57f   : > { %s6271_s10 = sld [smem:[#allocation10 + $0x1a1]]  ;;  %v2058_v49 = vmul.f32 %v3752_v21, %v2057_v4  ;;  %v6341_v4 = vadd.f32 %v2042_v8, %v1972_v60  ;;  %v2124_v60 = vstv %s6116_s21 }
 0x580   : > { %s6273_s3 = sld [smem:[#allocation10 + $0x1a2]]  ;;  %v6347_v63 = vadd.f32 %v2054_v10, %v1984_v53 }
 0x581   : > { %v2092_v11 = vstv %s7889_s0  ;;  %s6275_s9 = sld [smem:[#allocation10 + $0x1a3]]  ;;  %v6351_v0 = vadd.f32 %v2058_v49, %v1988_v44 }
 0x582   : > { %v2093_v20 = vadd.f32 %v2092_v11, %v2090_v29  ;;  %s6280_s15 = sld [smem:[#allocation10 + $0x1a4]]  ;;  %v6345_v29 = vadd.f32 %v2050_v25, %v1980_v34 }
 0x583   : > { %s6286_s16 = sld [smem:[#allocation10 + $0x1a5]]  ;;  %v2234_v10 = vstv %s6264_s14 }
 0x584   : > { %s6292_s24 = sld [smem:[#allocation10 + $0x1a6]]  ;;  %3753 = vtanh.f32 %v2093_v20  ;;  %v2120_v20 = vstv %s6111_s8 }
 0x585   : > { %7890 = sst [smem:[#allocation119_spill]] %s6271_s10 }
 0x586   : > { %7891 = sst [smem:[#allocation120_spill]] %s6273_s3 }
 0x587   : > { %7892 = sst [smem:[#allocation121_spill]] %s6275_s9 }
 0x588   : > { %7893 = sst [smem:[#allocation122_spill]] %s6280_s15 }
 0x589   : > { %7894 = sst [smem:[#allocation125_spill]] %s6286_s16 }
 0x58a   : > { %7895 = sst [smem:[#allocation133_spill]] %s6292_s24 }
 0x58b   : > { %s7896_s19 = sld [smem:[#allocation91_spill]] }
 0x58c   : > { %s7897_s28 = sld [smem:[#allocation92_spill]] }
 0x58d   : > { %s7898_s30 = sld [smem:[#allocation93_spill]] }
 0x58e   : > { %s6298_s7 = sld [smem:[#allocation10 + $0x1a7]] }
 0x58f   : > { %s7900_s5 = sld [smem:[#allocation94_spill]] }
 0x590   : > { %s7901_s0 = sld [smem:[#allocation95_spill]] }
 0x591   : > { %s7902_s16 = sld [smem:[#allocation96_spill]]  ;;  %v2061_v19 = vstv %s7896_s19 }
 0x592   : > { %s7903_s24 = sld [smem:[#allocation33_spill]]  ;;  %v2065_v5 = vstv %s7897_s28  ;;  %v2062_v3 = vmul.f32 %v3752_v21, %v2061_v19 }
 0x593   : > { %s6301_s15 = sld [smem:[#allocation10 + $0x1a8]]  ;;  %v2069_v22 = vstv %s7898_s30  ;;  %v2066_v17 = vmul.f32 %v3752_v21, %v2065_v5 }
 0x594   : > { %7899 = sst [smem:[#allocation126_spill]] %s6298_s7  ;;  %v2070_v43 = vmul.f32 %v3752_v21, %v2069_v22  ;;  %v6353_v47 = vadd.f32 %v2062_v3, %v1992_v18 }
 0x595   : > { %s7905_s9 = sld [smem:[#allocation97_spill]]  ;;  %v2073_v6 = vstv %s7900_s5  ;;  %v6355_v11 = vadd.f32 %v2066_v17, %v1996_v59 }
 0x596   : > { %s6303_s3 = sld [smem:[#allocation10 + $0x1a9]]  ;;  %v2077_v16 = vstv %s7901_s0  ;;  %v2074_v28 = vmul.f32 %v3752_v21, %v2073_v6  ;;  %v6357_v2 = vadd.f32 %v2070_v43, %v2000_v37 }
 0x597   : > { %s6308_s7 = sld [smem:[#allocation10 + $0x1aa]]  ;;  %v2081_v45 = vstv %s7902_s16  ;;  %v2078_v56 = vmul.f32 %v3752_v21, %v2077_v16 }
 0x598   : > { %v6314_v13 = vld [vmem:[%s7903_s24] sm:$0xff]  ;;  %s6317_s23 = sld [smem:[#allocation10 + $0x1ab]]  ;;  %v2082_v57 = vmul.f32 %v3752_v21, %v2081_v45  ;;  %v6361_v36 = vadd.f32 %v2074_v28, %v2004_v50 }
 0x599   : > { %7904 = sst [smem:[#allocation127_spill]] %s6301_s15  ;;  %v2161_v51 = vmul.f32 %v6314_v13, %v2160_v46  ;;  %v6363_v12 = vadd.f32 %v2078_v56, %v2008_v26 }
 0x59a   : > { %s6325_s19 = sld [smem:[#allocation10 + $0x1ac]]  ;;  %v6365_v39 = vadd.f32 %v2082_v57, %v2012_v61 }
 0x59b   : > { %v2085_v31 = vstv %s7905_s9  ;;  %s6329_s16 = sld [smem:[#allocation10 + $0x1ad]]  ;;  %v2164_v35 = vadd.f32 %v2163_v62, %v2161_v51 }
 0x59c   : > { %7906 = sst [smem:[#allocation128_spill]] %s6303_s3  ;;  %v2086_v15 = vmul.f32 %v3752_v21, %v2085_v31  ;;  %v3754_v21 = vpop.eup %3753 }
 0x59d   : > { %7907 = sst [smem:[#allocation129_spill]] %s6308_s7  ;;  %3755 = vtanh.f32 %v2164_v35  ;;  %v2105_v19 = vmul.f32 %v3754_v21, %v2104_v1  ;;  %v2109_v5 = vmul.f32 %v3754_v21, %v2108_v38  ;;  %v2113_v22 = vmul.f32 %v3754_v21, %v2112_v33 }
 0x59e   : > { %7908 = sst [smem:[#allocation130_spill]] %s6317_s23  ;;  %v6370_v55 = vadd.f32 %v2086_v15, %v2016_v42  ;;  %v2231_v42 = vstv %s6260_s13  ;;  %v2117_v16 = vmul.f32 %v3754_v21, %v2116_v48  ;;  %v2121_v45 = vmul.f32 %v3754_v21, %v2120_v20 }
 0x59f   : > { %s6333_s28 = sld [smem:[#allocation10 + $0x1ae]]  ;;  %v2232_v6 = vmul.f32 %v6314_v13, %v2231_v42  ;;  %v2125_v51 = vmul.f32 %v3754_v21, %v2124_v60  ;;  %v2129_v62 = vmul.f32 %v3754_v21, %v2128_v27  ;;  %v2106_v15 = vadd.f32 %v2105_v19, %v6335_v7 }
 0x5a0   : > { %7909 = sst [smem:[#allocation131_spill]] %s6325_s19  ;;  %v2118_v1 = vadd.f32 %v2117_v16, %v6343_v40  ;;  %v2122_v38 = vadd.f32 %v2121_v45, %v6345_v29 }
 0x5a1   : > { %7910 = sst [smem:[#allocation132_spill]] %s6329_s16  ;;  %v2130_v7 = vadd.f32 %v2129_v62, %v6351_v0 }
 0x5a2   : > { %s7912_s6 = sld [smem:[#allocation100_spill]] }
 0x5a3   : > { %s6339_s25 = sld [smem:[#allocation10 + $0x1af]] }
 0x5a4   : > { %s7914_s18 = sld [smem:[#allocation101_spill]] }
 0x5a5   : > { %7911 = sst [smem:[#allocation134_spill]] %s6333_s28 }
 0x5a6   : > { %s6349_s9 = sld [smem:[#allocation7 + $0x1b]] }
 0x5a7   : > { %s6359_s30 = sld [smem:[#allocation9 + $0x1b]] }
 0x5a8   : > { %s7915_s5 = sld [smem:[#allocation102_spill]]  ;;  %v2096_v52 = vstv %s7912_s6 }
 0x5a9   : > { %7913 = sst [smem:[#allocation135_spill]] %s6339_s25  ;;  %v2097_v54 = vmul.f32 %v3754_v21, %v2096_v52  ;;  %v2235_v52 = vadd.f32 %v2234_v10, %v2232_v6 }
 0x5aa   : > { %s7916_s0 = sld [smem:[#allocation103_spill]]  ;;  %v2100_v58 = vstv %s7914_s18  ;;  %v3756_v33 = vpop.eup %3755 }
 0x5ab   : > { %s6368_s24 = sld [smem:[#allocation10 + $0x1b0]]  ;;  %v2101_v32 = vmul.f32 %v3754_v21, %v2100_v58  ;;  %v2098_v31 = vadd.f32 %v2097_v54, %v6319_v9  ;;  %v2110_v9 = vadd.f32 %v2109_v5, %v6337_v41  ;;  %v2114_v58 = vadd.f32 %v2113_v22, %v6341_v4 }
 0x5ac   : > { %s7918_s25 = sld [smem:[#allocation104_spill]]  ;;  %3757 = vtanh.f32 %v2235_v52  ;;  %v2227_v54 = vstv %s6254_s26 }
 0x5ad   : > { %s7919_s28 = sld [smem:[#allocation107_spill]]  ;;  %v2102_v57 = vadd.f32 %v2101_v32, %v6331_v23  ;;  %v2126_v23 = vadd.f32 %v2125_v51, %v6347_v63  ;;  %v2228_v16 = vmul.f32 %v3756_v33, %v2227_v54 }
 0x5ae   : > { %s7920_s16 = sld [smem:[#allocation108_spill]]  ;;  %v2132_v34 = vstv %s7915_s5 }
 0x5af   : > { %s7921_s19 = sld [smem:[#allocation123_spill]]  ;;  %v2133_v49 = vmul.f32 %v3754_v21, %v2132_v34 }
 0x5b0   : > { %s6374_s23 = sld [smem:[#allocation10 + $0x1b1]]  ;;  %v2136_v53 = vstv %s7916_s0 }
 0x5b1   : > { %7917 = sst [smem:[#allocation136_spill]] %s6368_s24  ;;  %v2137_v3 = vmul.f32 %v3754_v21, %v2136_v53  ;;  %v2134_v48 = vadd.f32 %v2133_v49, %v6353_v47  ;;  %v2302_v47 = vstv %s6349_s9 }
 0x5b2   : > { %s7922_s7 = sld [smem:[#allocation109_spill]]  ;;  %v2140_v44 = vstv %s7918_s25 }
 0x5b3   : > { %s7923_s3 = sld [smem:[#allocation110_spill]]  ;;  %v2144_v18 = vstv %s7919_s28  ;;  %v2141_v17 = vmul.f32 %v3754_v21, %v2140_v44  ;;  %v2138_v41 = vadd.f32 %v2137_v3, %v6355_v11  ;;  %v2303_v44 = vmul.f32 %v6314_v13, %v2302_v47 }
 0x5b4   : > { %s7924_s6 = sld [smem:[#allocation111_spill]]  ;;  %v2148_v59 = vstv %s7920_s16  ;;  %v2145_v43 = vmul.f32 %v3754_v21, %v2144_v18  ;;  %v2215_v18 = vstv %s6237_s29  ;;  %v2238_v3 = vstv %s6267_s20 }
 0x5b5   : > { %s6380_s24 = sld [smem:[#allocation10 + $0x1b2]]  ;;  %v2152_v37 = vstv %s7921_s19  ;;  %v2149_v28 = vmul.f32 %v3754_v21, %v2148_v59  ;;  %v2142_v4 = vadd.f32 %v2141_v17, %v6357_v2  ;;  %v2219_v59 = vstv %s6243_s22 }
 0x5b6   : > { %s7925_s18 = sld [smem:[#allocation112_spill]]  ;;  %v2153_v56 = vmul.f32 %v3754_v21, %v2152_v37  ;;  %v2146_v40 = vadd.f32 %v2145_v43, %v6361_v36  ;;  %v2211_v36 = vstv %s6231_s17  ;;  %v2223_v37 = vstv %s6249_s27 }
 0x5b7   : > { %s7926_s1 = sld [smem:[#allocation113_spill]]  ;;  %v2150_v29 = vadd.f32 %v2149_v28, %v6363_v12  ;;  %v2212_v32 = vmul.f32 %v3756_v33, %v2211_v36  ;;  %v2313_v47 = vstv %s6374_s23 }
 0x5b8   : > { %s7927_s15 = sld [smem:[#allocation114_spill]]  ;;  %v2156_v50 = vstv %s7922_s7  ;;  %v2154_v63 = vadd.f32 %v2153_v56, %v6365_v39 }
 0x5b9   : > { %s6386_s10 = sld [smem:[#allocation10 + $0x1b3]]  ;;  %v2167_v26 = vstv %s7923_s3  ;;  %v2157_v35 = vmul.f32 %v3754_v21, %v2156_v50  ;;  %v2305_v50 = vstv %s6359_s30  ;;  %v6499_v49 = vadd.f32 %v2212_v32, %v2142_v4 }
 0x5ba   : > { %s7928_s4 = sld [smem:[#allocation124_spill]]  ;;  %v2171_v61 = vstv %s7924_s6  ;;  %v2168_v11 = vmul.f32 %v3756_v33, %v2167_v26  ;;  %v2306_v19 = vadd.f32 %v2305_v50, %v2303_v44 }
 0x5bb   : > { %s7929_s2 = sld [smem:[#allocation115_spill]]  ;;  %v2158_v0 = vadd.f32 %v2157_v35, %v6370_v55  ;;  %v2172_v12 = vmul.f32 %v3756_v33, %v2171_v61 }
 0x5bc   : > { %s7930_s11 = sld [smem:[#allocation141_spill]]  ;;  %v2175_v14 = vstv %s7925_s18  ;;  %v6466_v26 = vadd.f32 %v2168_v11, %v2098_v31  ;;  %3759 = vtanh.f32 %v2306_v19  ;;  %v2317_v11 = vstv %s6380_s24 }
 0x5bd   : > { %s6392_s8 = sld [smem:[#allocation10 + $0x1b4]]  ;;  %v2179_v46 = vstv %s7926_s1  ;;  %v2176_v39 = vmul.f32 %v3756_v33, %v2175_v14  ;;  %v6471_v14 = vadd.f32 %v2172_v12, %v2102_v57  ;;  %v6513_v57 = vadd.f32 %v2228_v16, %v2158_v0 }
 0x5be   : > { %s6398_s21 = sld [smem:[#allocation10 + $0x1b5]]  ;;  %v2183_v30 = vstv %s7927_s15  ;;  %v2180_v60 = vmul.f32 %v3756_v33, %v2179_v46 }
 0x5bf   : > { %s6403_s12 = sld [smem:[#allocation10 + $0x1b6]]  ;;  %v2184_v55 = vmul.f32 %v3756_v33, %v2183_v30  ;;  %v6473_v46 = vadd.f32 %v2176_v39, %v2106_v15 }
 0x5c0   : > { %v2187_v8 = vstv %s7928_s4  ;;  %s6408_s19 = sld [smem:[#allocation10 + $0x1b7]]  ;;  %v6479_v5 = vadd.f32 %v2180_v60, %v2110_v9  ;;  %v3758_v9 = vpop.eup %3757 }
 0x5c1   : > { %v2191_v24 = vstv %s7929_s2  ;;  %s6411_s13 = sld [smem:[#allocation10 + $0x1b8]]  ;;  %v2188_v27 = vmul.f32 %v3756_v33, %v2187_v8  ;;  %v2216_v8 = vmul.f32 %v3756_v33, %v2215_v18  ;;  %v6481_v22 = vadd.f32 %v2184_v55, %v2114_v58 }
 0x5c2   : > { %v2195_v25 = vstv %s7930_s11  ;;  %s6414_s3 = sld [smem:[#allocation10 + $0x1b9]]  ;;  %v2192_v34 = vmul.f32 %v3756_v33, %v2191_v24  ;;  %v2220_v24 = vmul.f32 %v3756_v33, %v2219_v59  ;;  %v2239_v0 = vmul.f32 %v3758_v9, %v2238_v3 }
 0x5c3   : > { %s6417_s15 = sld [smem:[#allocation10 + $0x1ba]]  ;;  %v2196_v53 = vmul.f32 %v3756_v33, %v2195_v25  ;;  %v2224_v25 = vmul.f32 %v3756_v33, %v2223_v37  ;;  %v6483_v6 = vadd.f32 %v2188_v27, %v2118_v1  ;;  %v6505_v43 = vadd.f32 %v2216_v8, %v2146_v40 }
 0x5c4   : > { %s6419_s7 = sld [smem:[#allocation10 + $0x1bb]]  ;;  %v6487_v45 = vadd.f32 %v2192_v34, %v2122_v38  ;;  %v6507_v28 = vadd.f32 %v2220_v24, %v2150_v29  ;;  %v2329_v36 = vstv %s6398_s21  ;;  %v2240_v59 = vadd.f32 %v2239_v0, %v6466_v26 }
 0x5c5   : > { %s6423_s14 = sld [smem:[#allocation10 + $0x1bc]]  ;;  %v6489_v51 = vadd.f32 %v2196_v53, %v2126_v23  ;;  %v6509_v56 = vadd.f32 %v2224_v25, %v2154_v63  ;;  %v2333_v12 = vstv %s6403_s12 }
 0x5c6   : > { %s7931_s16 = sld [smem:[#allocation116_spill]]  ;;  %v2337_v60 = vstv %s6408_s19 }
 0x5c7   : > { %s6429_s28 = sld [smem:[#allocation10 + $0x1bd]]  ;;  %v2341_v55 = vstv %s6411_s13 }
 0x5c8   : > { %s7933_s25 = sld [smem:[#allocation117_spill]] }
 0x5c9   : > { %s7934_s5 = sld [smem:[#allocation118_spill]] }
 0x5ca   : > { %s6435_s0 = sld [smem:[#allocation10 + $0x1be]] }
 0x5cb   : > { %s6441_s18 = sld [smem:[#allocation10 + $0x1bf]] }
 0x5cc   : > { %v2199_v20 = vstv %s7931_s16  ;;  %s6446_s1 = sld [smem:[#allocation7 + $0x1c]] }
 0x5cd   : > { %7932 = sst [smem:[#allocation137_spill]] %s6429_s28  ;;  %v2200_v61 = vmul.f32 %v3756_v33, %v2199_v20 }
 0x5ce   : > { %v2203_v21 = vstv %s7933_s25  ;;  %s6451_s4 = sld [smem:[#allocation9 + $0x1c]] }
 0x5cf   : > { %v2207_v2 = vstv %s7934_s5  ;;  %s6455_s2 = sld [smem:[#allocation10 + $0x1c0]]  ;;  %v2204_v42 = vmul.f32 %v3756_v33, %v2203_v21  ;;  %v6491_v10 = vadd.f32 %v2200_v61, %v2130_v7  ;;  %v2321_v21 = vstv %s6386_s10 }
 0x5d0   : > { %7935 = sst [smem:[#allocation138_spill]] %s6435_s0  ;;  %v2208_v30 = vmul.f32 %v3756_v33, %v2207_v2  ;;  %v2325_v2 = vstv %s6392_s8 }
 0x5d1   : > { %7936 = sst [smem:[#allocation139_spill]] %s6441_s18  ;;  %v6493_v31 = vadd.f32 %v2204_v42, %v2134_v48 }
 0x5d2   : > { %s6458_s9 = sld [smem:[#allocation10 + $0x1c1]]  ;;  %v6497_v62 = vadd.f32 %v2208_v30, %v2138_v41  ;;  %v2373_v63 = vstv %s6446_s1 }
 0x5d3   : > { %s6464_s17 = sld [smem:[#allocation10 + $0x1c2]]  ;;  %v2374_v27 = vmul.f32 %v6314_v13, %v2373_v63 }
 0x5d4   : > { %s6469_s6 = sld [smem:[#allocation10 + $0x1c3]]  ;;  %v2376_v18 = vstv %s6451_s4 }
 0x5d5   : > { %7937 = sst [smem:[#allocation140_spill]] %s6455_s2  ;;  %v2377_v19 = vadd.f32 %v2376_v18, %v2374_v27 }
 0x5d6   : > { %s6475_s11 = sld [smem:[#allocation10 + $0x1c4]] }
 0x5d7   : > { %s7942_s22 = sld [smem:[#allocation119_spill]]  ;;  %3761 = vtanh.f32 %v2377_v19 }
 0x5d8   : > { %7938 = sst [smem:[#allocation142_spill]] %s6458_s9 }
 0x5d9   : > { %7939 = sst [smem:[#allocation143_spill]] %s6464_s17 }
 0x5da   : > { %7940 = sst [smem:[#allocation144_spill]] %s6469_s6 }
 0x5db   : > { %s6477_s29 = sld [smem:[#allocation10 + $0x1c5]] }
 0x5dc   : > { %7941 = sst [smem:[#allocation145_spill]] %s6475_s11 }
 0x5dd   : > { %s6485_s27 = sld [smem:[#allocation10 + $0x1c6]]  ;;  %v2242_v17 = vstv %s7942_s22 }
 0x5de   : > { %s7945_s26 = sld [smem:[#allocation120_spill]]  ;;  %v2243_v39 = vmul.f32 %v3758_v9, %v2242_v17 }
 0x5df   : > { %s7946_s30 = sld [smem:[#allocation121_spill]] }
 0x5e0   : > { %s7947_s16 = sld [smem:[#allocation122_spill]]  ;;  %v2244_v16 = vadd.f32 %v2243_v39, %v6471_v14 }
 0x5e1   : > { %7943 = sst [smem:[#allocation146_spill]] %s6477_s29 }
 0x5e2   : > { %s6495_s25 = sld [smem:[#allocation10 + $0x1c7]] }
 0x5e3   : > { %7944 = sst [smem:[#allocation147_spill]] %s6485_s27 }
 0x5e4   : > { %s7949_s5 = sld [smem:[#allocation125_spill]]  ;;  %v2246_v15 = vstv %s7945_s26 }
 0x5e5   : > { %s7950_s29 = sld [smem:[#allocation133_spill]]  ;;  %v2250_v35 = vstv %s7946_s30  ;;  %v2247_v34 = vmul.f32 %v3758_v9, %v2246_v15  ;;  %v3760_v15 = vpop.eup %3759 }
 0x5e6   : > { %s7951_s27 = sld [smem:[#allocation126_spill]]  ;;  %v2254_v52 = vstv %s7947_s16  ;;  %v2251_v53 = vmul.f32 %v3758_v9, %v2250_v35 }
 0x5e7   : > { %s7952_s11 = sld [smem:[#allocation127_spill]]  ;;  %v2255_v44 = vmul.f32 %v3758_v9, %v2254_v52  ;;  %v2248_v26 = vadd.f32 %v2247_v34, %v6473_v46 }
 0x5e8   : > { %7948 = sst [smem:[#allocation148_spill]] %s6495_s25  ;;  %v2252_v3 = vadd.f32 %v2251_v53, %v6479_v5 }
 0x5e9   : > { %s6503_s6 = sld [smem:[#allocation10 + $0x1c8]]  ;;  %v2256_v35 = vadd.f32 %v2255_v44, %v6481_v22 }
 0x5ea   : > { %s7954_s17 = sld [smem:[#allocation128_spill]]  ;;  %v2258_v58 = vstv %s7949_s5 }
 0x5eb   : > { %s7955_s9 = sld [smem:[#allocation129_spill]]  ;;  %v2262_v1 = vstv %s7950_s29  ;;  %v2259_v37 = vmul.f32 %v3758_v9, %v2258_v58 }
 0x5ec   : > { %s7956_s25 = sld [smem:[#allocation130_spill]]  ;;  %v2266_v38 = vstv %s7951_s27  ;;  %v2263_v50 = vmul.f32 %v3758_v9, %v2262_v1 }
 0x5ed   : > { %s7957_s2 = sld [smem:[#allocation131_spill]]  ;;  %v2270_v33 = vstv %s7952_s11  ;;  %v2267_v61 = vmul.f32 %v3758_v9, %v2266_v38  ;;  %v2260_v52 = vadd.f32 %v2259_v37, %v6483_v6  ;;  %v2334_v38 = vmul.f32 %v3760_v15, %v2333_v12 }
 0x5ee   : > { %s6511_s18 = sld [smem:[#allocation10 + $0x1c9]]  ;;  %v2271_v42 = vmul.f32 %v3758_v9, %v2270_v33  ;;  %v2264_v58 = vadd.f32 %v2263_v50, %v6487_v45  ;;  %v2345_v33 = vstv %s6414_s3 }
 0x5ef   : > { %7953 = sst [smem:[#allocation149_spill]] %s6503_s6  ;;  %v2268_v1 = vadd.f32 %v2267_v61, %v6489_v51 }
 0x5f0   : > { %s7959_s20 = sld [smem:[#allocation132_spill]]  ;;  %v2274_v23 = vstv %s7954_s17  ;;  %v2272_v14 = vadd.f32 %v2271_v42, %v6491_v10  ;;  %v6629_v18 = vadd.f32 %v2334_v38, %v2264_v58 }
 0x5f1   : > { %s7960_s22 = sld [smem:[#allocation134_spill]]  ;;  %v2278_v7 = vstv %s7955_s9  ;;  %v2275_v54 = vmul.f32 %v3758_v9, %v2274_v23  ;;  %v2353_v23 = vstv %s6419_s7 }
 0x5f2   : > { %s7961_s6 = sld [smem:[#allocation135_spill]]  ;;  %v2282_v48 = vstv %s7956_s25  ;;  %v2279_v30 = vmul.f32 %v3758_v9, %v2278_v7  ;;  %v2357_v7 = vstv %s6423_s14 }
 0x5f3   : > { %s6518_s0 = sld [smem:[#allocation10 + $0x1ca]]  ;;  %v2286_v41 = vstv %s7957_s2  ;;  %v2283_v32 = vmul.f32 %v3758_v9, %v2282_v48  ;;  %v2276_v46 = vadd.f32 %v2275_v54, %v6493_v31  ;;  %v2314_v31 = vmul.f32 %v3760_v15, %v2313_v47 }
 0x5f4   : > { %7958 = sst [smem:[#allocation150_spill]] %s6511_s18  ;;  %v2287_v8 = vmul.f32 %v3758_v9, %v2286_v41  ;;  %v2280_v5 = vadd.f32 %v2279_v30, %v6497_v62  ;;  %v2346_v47 = vmul.f32 %v3760_v15, %v2345_v33 }
 0x5f5   : > { %s7962_s28 = sld [smem:[#allocation136_spill]] }
 0x5f6   : > { %s6524_s18 = sld [smem:[#allocation10 + $0x1cb]]  ;;  %v2290_v4 = vstv %s7959_s20  ;;  %v2288_v22 = vadd.f32 %v2287_v8, %v6505_v43  ;;  %v2322_v43 = vmul.f32 %v3760_v15, %v2321_v21  ;;  %v2354_v21 = vmul.f32 %v3760_v15, %v2353_v23 }
 0x5f7   : > { %s6530_s26 = sld [smem:[#allocation10 + $0x1cc]]  ;;  %v2294_v40 = vstv %s7960_s22  ;;  %v2291_v24 = vmul.f32 %v3758_v9, %v2290_v4  ;;  %v6637_v50 = vadd.f32 %v2346_v47, %v2276_v46 }
 0x5f8   : > { %v2298_v29 = vstv %s7961_s6  ;;  %s6536_s29 = sld [smem:[#allocation10 + $0x1cd]]  ;;  %v2295_v25 = vmul.f32 %v3758_v9, %v2294_v40 }
 0x5f9   : > { %s6541_s9 = sld [smem:[#allocation10 + $0x1ce]]  ;;  %v2299_v17 = vmul.f32 %v3758_v9, %v2298_v29  ;;  %v2284_v9 = vadd.f32 %v2283_v32, %v6499_v49  ;;  %v2292_v6 = vadd.f32 %v2291_v24, %v6507_v28  ;;  %v2318_v49 = vmul.f32 %v3760_v15, %v2317_v11 }
 0x5fa   : > { %s6547_s2 = sld [smem:[#allocation10 + $0x1cf]]  ;;  %v2296_v45 = vadd.f32 %v2295_v25, %v6509_v56  ;;  %v2326_v28 = vmul.f32 %v3760_v15, %v2325_v2  ;;  %v2330_v56 = vmul.f32 %v3760_v15, %v2329_v36  ;;  %v2338_v29 = vmul.f32 %v3760_v15, %v2337_v60 }
 0x5fb   : > { %v2309_v20 = vstv %s7962_s28  ;;  %s6552_s1 = sld [smem:[#allocation7 + $0x1d]]  ;;  %v2300_v51 = vadd.f32 %v2299_v17, %v6513_v57  ;;  %v2349_v57 = vstv %s6417_s15  ;;  %v6615_v2 = vadd.f32 %v2314_v31, %v2244_v16  ;;  %v3762_v16 = vpop.eup %3761 }
 0x5fc   : > { %s6555_s24 = sld [smem:[#allocation9 + $0x1d]]  ;;  %v2310_v10 = vmul.f32 %v3760_v15, %v2309_v20  ;;  %v2342_v20 = vmul.f32 %v3760_v15, %v2341_v55  ;;  %v2350_v11 = vmul.f32 %v3760_v15, %v2349_v57  ;;  %v2358_v36 = vmul.f32 %v3760_v15, %v2357_v7 }
 0x5fd   : > { %s6558_s10 = sld [smem:[#allocation10 + $0x1d0]]  ;;  %v6619_v27 = vadd.f32 %v2318_v49, %v2248_v26  ;;  %v6621_v60 = vadd.f32 %v2322_v43, %v2252_v3  ;;  %v6625_v55 = vadd.f32 %v2326_v28, %v2256_v35  ;;  %v6627_v44 = vadd.f32 %v2330_v56, %v2260_v52 }
 0x5fe   : > { %s6560_s23 = sld [smem:[#allocation10 + $0x1d1]]  ;;  %v6603_v40 = vadd.f32 %v2310_v10, %v2240_v59  ;;  %v6631_v59 = vadd.f32 %v2338_v29, %v2268_v1  ;;  %v6635_v37 = vadd.f32 %v2342_v20, %v2272_v14  ;;  %v6639_v61 = vadd.f32 %v2350_v11, %v2280_v5 }
 0x5ff   : > { %s6562_s8 = sld [smem:[#allocation10 + $0x1d2]]  ;;  %v6641_v42 = vadd.f32 %v2354_v21, %v2284_v9  ;;  %v6645_v54 = vadd.f32 %v2358_v36, %v2288_v22  ;;  %v2420_v1 = vstv %s6518_s0  ;;  %v2424_v14 = vstv %s6524_s18 }
 0x600   : > { %s6567_s21 = sld [smem:[#allocation10 + $0x1d3]]  ;;  %v2428_v46 = vstv %s6530_s26  ;;  %v2432_v5 = vstv %s6536_s29  ;;  %v2436_v9 = vstv %s6541_s9  ;;  %v2421_v20 = vmul.f32 %v3762_v16, %v2420_v1 }
 0x601   : > { %s6573_s12 = sld [smem:[#allocation10 + $0x1d4]]  ;;  %v2444_v62 = vstv %s6552_s1  ;;  %v2425_v11 = vmul.f32 %v3762_v16, %v2424_v14  ;;  %v2429_v21 = vmul.f32 %v3762_v16, %v2428_v46  ;;  %v2433_v36 = vmul.f32 %v3762_v16, %v2432_v5 }
 0x602   : > { %s6579_s28 = sld [smem:[#allocation10 + $0x1d5]]  ;;  %v2445_v4 = vmul.f32 %v6314_v13, %v2444_v62  ;;  %v2447_v0 = vstv %s6555_s24 }
 0x603   : > { %s6584_s4 = sld [smem:[#allocation10 + $0x1d6]] }
 0x604   : > { %s7963_s17 = sld [smem:[#allocation137_spill]]  ;;  %v2448_v53 = vadd.f32 %v2447_v0, %v2445_v4 }
 0x605   : > { %s7964_s6 = sld [smem:[#allocation138_spill]]  ;;  %v2459_v10 = vstv %s6562_s8 }
 0x606   : > { %s6588_s11 = sld [smem:[#allocation10 + $0x1d7]]  ;;  %3763 = vtanh.f32 %v2448_v53  ;;  %v2463_v31 = vstv %s6567_s21 }
 0x607   : > { %s7965_s27 = sld [smem:[#allocation139_spill]]  ;;  %v2467_v62 = vstv %s6573_s12 }
 0x608   : > { %s6590_s30 = sld [smem:[#allocation10 + $0x1d8]]  ;;  %v2471_v49 = vstv %s6579_s28 }
 0x609   : > { %s6595_s16 = sld [smem:[#allocation10 + $0x1d9]]  ;;  %v2475_v56 = vstv %s6584_s4 }
 0x60a   : > { %v2361_v48 = vstv %s7963_s17  ;;  %s6601_s25 = sld [smem:[#allocation10 + $0x1da]] }
 0x60b   : > { %v2365_v41 = vstv %s7964_s6  ;;  %s6609_s5 = sld [smem:[#allocation10 + $0x1db]]  ;;  %v2362_v12 = vmul.f32 %v3760_v15, %v2361_v48 }
 0x60c   : > { %s6613_s3 = sld [smem:[#allocation10 + $0x1dc]]  ;;  %v2366_v39 = vmul.f32 %v3760_v15, %v2365_v41  ;;  %v2479_v38 = vstv %s6588_s11 }
 0x60d   : > { %v2369_v63 = vstv %s7965_s27  ;;  %s6617_s15 = sld [smem:[#allocation10 + $0x1dd]]  ;;  %v6647_v30 = vadd.f32 %v2362_v12, %v2292_v6  ;;  %v2440_v6 = vstv %s6547_s2  ;;  %v2437_v12 = vmul.f32 %v3762_v16, %v2436_v9 }
 0x60e   : > { %v2370_v34 = vmul.f32 %v3760_v15, %v2369_v63  ;;  %s7968_s19 = sld [smem:[#allocation140_spill]]  ;;  %v6649_v32 = vadd.f32 %v2366_v39, %v2296_v45  ;;  %v2451_v45 = vstv %s6558_s10 }
 0x60f   : > { %s6623_s13 = sld [smem:[#allocation10 + $0x1de]] }
 0x610   : > { %s7970_s7 = sld [smem:[#allocation142_spill]]  ;;  %v6654_v24 = vadd.f32 %v2370_v34, %v2300_v51  ;;  %v2455_v51 = vstv %s6560_s23  ;;  %v2441_v34 = vmul.f32 %v3762_v16, %v2440_v6 }
 0x611   : > { %s7971_s14 = sld [smem:[#allocation143_spill]] }
 0x612   : > { %7966 = sst [smem:[#allocation158_spill]] %s6613_s3 }
 0x613   : > { %7967 = sst [smem:[#allocation166_spill]] %s6617_s15 }
 0x614   : > { %s6633_s20 = sld [smem:[#allocation10 + $0x1df]]  ;;  %v2380_v8 = vstv %s7968_s19 }
 0x615   : > { %7969 = sst [smem:[#allocation151_spill]] %s6623_s13  ;;  %v2381_v22 = vmul.f32 %v3762_v16, %v2380_v8 }
 0x616   : > { %s7973_s22 = sld [smem:[#allocation144_spill]]  ;;  %v2384_v25 = vstv %s7970_s7 }
 0x617   : > { %s7974_s1 = sld [smem:[#allocation145_spill]]  ;;  %v2388_v19 = vstv %s7971_s14  ;;  %v2385_v43 = vmul.f32 %v3762_v16, %v2384_v25  ;;  %v2382_v48 = vadd.f32 %v2381_v22, %v6603_v40 }
 0x618   : > { %s7975_s24 = sld [smem:[#allocation146_spill]]  ;;  %v2389_v28 = vmul.f32 %v3762_v16, %v2388_v19 }
 0x619   : > { %s7976_s17 = sld [smem:[#allocation147_spill]]  ;;  %v2386_v40 = vadd.f32 %v2385_v43, %v6615_v2 }
 0x61a   : > { %7972 = sst [smem:[#allocation152_spill]] %s6633_s20  ;;  %v2390_v39 = vadd.f32 %v2389_v28, %v6619_v27 }
 0x61b   : > { %s6643_s6 = sld [smem:[#allocation7 + $0x1e]] }
 0x61c   : > { %s7977_s27 = sld [smem:[#allocation148_spill]]  ;;  %v2392_v26 = vstv %s7973_s22 }
 0x61d   : > { %s7978_s20 = sld [smem:[#allocation149_spill]]  ;;  %v2396_v3 = vstv %s7974_s1  ;;  %v2393_v33 = vmul.f32 %v3762_v16, %v2392_v26 }
 0x61e   : > { %s7979_s13 = sld [smem:[#allocation150_spill]]  ;;  %v2400_v17 = vstv %s7975_s24  ;;  %v2397_v57 = vmul.f32 %v3762_v16, %v2396_v3  ;;  %v3764_v3 = vpop.eup %3763 }
 0x61f   : > { %s6652_s15 = sld [smem:[#allocation9 + $0x1e]]  ;;  %v2404_v15 = vstv %s7976_s17  ;;  %v2401_v23 = vmul.f32 %v3762_v16, %v2400_v17  ;;  %v2394_v8 = vadd.f32 %v2393_v33, %v6621_v60  ;;  %v2422_v60 = vadd.f32 %v2421_v20, %v6639_v61 }
 0x620   : > { %s6658_s3 = sld [smem:[#allocation10 + $0x1e0]]  ;;  %v2405_v41 = vmul.f32 %v3762_v16, %v2404_v15  ;;  %v2398_v25 = vadd.f32 %v2397_v57, %v6625_v55  ;;  %v2426_v55 = vadd.f32 %v2425_v11, %v6641_v42  ;;  %v2487_v61 = vstv %s6595_s16 }
 0x621   : > { %s6664_s19 = sld [smem:[#allocation10 + $0x1e1]]  ;;  %v2515_v7 = vstv %s6643_s6  ;;  %v2402_v19 = vadd.f32 %v2401_v23, %v6627_v44  ;;  %v2430_v44 = vadd.f32 %v2429_v21, %v6645_v54  ;;  %v2452_v42 = vmul.f32 %v3764_v3, %v2451_v45 }
 0x622   : > { %v2408_v35 = vstv %s7977_s27  ;;  %s6670_s7 = sld [smem:[#allocation10 + $0x1e2]]  ;;  %v2516_v47 = vmul.f32 %v6314_v13, %v2515_v7  ;;  %v2406_v26 = vadd.f32 %v2405_v41, %v6629_v18  ;;  %v2434_v18 = vadd.f32 %v2433_v36, %v6647_v30 }
 0x623   : > { %v2412_v52 = vstv %s7978_s20  ;;  %s6676_s14 = sld [smem:[#allocation10 + $0x1e3]]  ;;  %v2409_v4 = vmul.f32 %v3762_v16, %v2408_v35  ;;  %v2491_v54 = vstv %s6601_s25  ;;  %v2495_v30 = vstv %s6609_s5 }
 0x624   : > { %v2416_v58 = vstv %s7979_s13  ;;  %s6681_s20 = sld [smem:[#allocation10 + $0x1e4]]  ;;  %v2413_v63 = vmul.f32 %v3762_v16, %v2412_v52  ;;  %v2456_v17 = vmul.f32 %v3764_v3, %v2455_v51  ;;  %v2464_v52 = vmul.f32 %v3764_v3, %v2463_v31 }
 0x625   : > { %s6687_s0 = sld [smem:[#allocation10 + $0x1e5]]  ;;  %v2518_v29 = vstv %s6652_s15  ;;  %v2417_v0 = vmul.f32 %v3762_v16, %v2416_v58  ;;  %v2410_v2 = vadd.f32 %v2409_v4, %v6631_v59  ;;  %v2438_v59 = vadd.f32 %v2437_v12, %v6649_v32 }
 0x626   : > { %s6691_s18 = sld [smem:[#allocation10 + $0x1e6]]  ;;  %v2519_v53 = vadd.f32 %v2518_v29, %v2516_v47  ;;  %v2414_v27 = vadd.f32 %v2413_v63, %v6635_v37  ;;  %v2442_v37 = vadd.f32 %v2441_v34, %v6654_v24  ;;  %v2460_v24 = vmul.f32 %v3764_v3, %v2459_v10 }
 0x627   : > { %s6694_s26 = sld [smem:[#allocation10 + $0x1e7]]  ;;  %v2418_v16 = vadd.f32 %v2417_v0, %v6637_v50  ;;  %v2483_v50 = vstv %s6590_s30  ;;  %v2468_v58 = vmul.f32 %v3764_v3, %v2467_v62  ;;  %v2472_v1 = vmul.f32 %v3764_v3, %v2471_v49 }
 0x628   : > { %s6698_s29 = sld [smem:[#allocation10 + $0x1e8]]  ;;  %3765 = vtanh.f32 %v2519_v53  ;;  %v2476_v14 = vmul.f32 %v3764_v3, %v2475_v56  ;;  %v6756_v6 = vadd.f32 %v2452_v42, %v2382_v48  ;;  %v2484_v45 = vmul.f32 %v3764_v3, %v2483_v50 }
 0x629   : > { %s6701_s9 = sld [smem:[#allocation10 + $0x1e9]]  ;;  %v2488_v10 = vmul.f32 %v3764_v3, %v2487_v61  ;;  %v2492_v31 = vmul.f32 %v3764_v3, %v2491_v54  ;;  %v2496_v62 = vmul.f32 %v3764_v3, %v2495_v30  ;;  %v6765_v49 = vadd.f32 %v2456_v17, %v2386_v40 }
 0x62a   : > { %s6703_s2 = sld [smem:[#allocation7 + $0x1f]]  ;;  %v6769_v33 = vadd.f32 %v2460_v24, %v2390_v39  ;;  %v6773_v57 = vadd.f32 %v2468_v58, %v2398_v25  ;;  %v2473_v7 = vadd.f32 %v2472_v1, %v2402_v19  ;;  %v6777_v48 = vadd.f32 %v2476_v14, %v2406_v26 }
 0x62b   : > { %s6707_s10 = sld [smem:[#allocation9 + $0x1f]]  ;;  %v6781_v4 = vadd.f32 %v2484_v45, %v2414_v27  ;;  %v6785_v29 = vadd.f32 %v2488_v10, %v2418_v16  ;;  %v6787_v63 = vadd.f32 %v2492_v31, %v2422_v60  ;;  %v6789_v0 = vadd.f32 %v2496_v62, %v2426_v55 }
 0x62c   : > { %s6713_s8 = sld [smem:[#allocation10 + $0x1ea]]  ;;  %v2522_v20 = vstv %s6658_s3  ;;  %v2526_v36 = vstv %s6664_s19  ;;  %v2530_v40 = vstv %s6670_s7  ;;  %v2534_v39 = vstv %s6676_s14 }
 0x62d   : > { %s6719_s4 = sld [smem:[#allocation10 + $0x1eb]]  ;;  %v2538_v34 = vstv %s6681_s20  ;;  %v2546_v25 = vstv %s6691_s18  ;;  %v2550_v19 = vstv %s6694_s26 }
 0x62e   : > { %s6725_s15 = sld [smem:[#allocation10 + $0x1ec]]  ;;  %v2554_v26 = vstv %s6698_s29 }
 0x62f   : > { %s6730_s13 = sld [smem:[#allocation10 + $0x1ed]] }
 0x630   : > { %s7980_s22 = sld [smem:[#allocation158_spill]]  ;;  %v2586_v32 = vstv %s6703_s2 }
 0x631   : > { %s7981_s1 = sld [smem:[#allocation166_spill]]  ;;  %v2587_v15 = vmul.f32 %v6314_v13, %v2586_v32  ;;  %v2589_v35 = vstv %s6707_s10  ;;  %v2480_v13 = vmul.f32 %v3764_v3, %v2479_v38  ;;  %v6771_v38 = vadd.f32 %v2464_v52, %v2394_v8 }
 0x632   : > { %s7982_s24 = sld [smem:[#allocation151_spill]]  ;;  %v2542_v8 = vstv %s6687_s0 }
 0x633   : > { %s6734_s17 = sld [smem:[#allocation10 + $0x1ee]]  ;;  %v2590_v22 = vadd.f32 %v2589_v35, %v2587_v15  ;;  %v6779_v41 = vadd.f32 %v2480_v13, %v2410_v2  ;;  %v2562_v2 = vstv %s6713_s8  ;;  %v2566_v27 = vstv %s6719_s4 }
 0x634   : > { %s6739_s6 = sld [smem:[#allocation10 + $0x1ef]]  ;;  %v2570_v16 = vstv %s6725_s15 }
 0x635   : > { %s7983_s30 = sld [smem:[#allocation152_spill]]  ;;  %3767 = vtanh.f32 %v2590_v22  ;;  %v6808_v53 = vpop.eup %3765  ;;  %v2574_v60 = vstv %s6730_s13 }
 0x636   : > { %s6749_s16 = sld [smem:[#allocation10 + $0x1f0]]  ;;  %v2499_v46 = vstv %s7980_s22  ;;  %v2531_v50 = vmul.f32 %v6808_v53, %v2530_v40  ;;  %v2535_v61 = vmul.f32 %v6808_v53, %v2534_v39  ;;  %v2539_v42 = vmul.f32 %v6808_v53, %v2538_v34 }
 0x637   : > { %v2503_v5 = vstv %s7981_s1  ;;  %s6754_s23 = sld [smem:[#allocation10 + $0x1f1]]  ;;  %v2500_v43 = vmul.f32 %v3764_v3, %v2499_v46  ;;  %v2543_v54 = vmul.f32 %v6808_v53, %v2542_v8  ;;  %v2547_v58 = vmul.f32 %v6808_v53, %v2546_v25 }
 0x638   : > { %v2507_v9 = vstv %s7982_s24  ;;  %s6761_s21 = sld [smem:[#allocation10 + $0x1f2]]  ;;  %v2504_v28 = vmul.f32 %v3764_v3, %v2503_v5  ;;  %v2551_v1 = vmul.f32 %v6808_v53, %v2550_v19  ;;  %v2532_v22 = vadd.f32 %v2531_v50, %v6769_v33 }
 0x639   : > { %s6763_s12 = sld [smem:[#allocation10 + $0x1f3]]  ;;  %v2508_v56 = vmul.f32 %v3764_v3, %v2507_v9  ;;  %v6794_v47 = vadd.f32 %v2500_v43, %v2430_v44  ;;  %v2578_v55 = vstv %s6734_s17  ;;  %v2536_v13 = vadd.f32 %v2535_v61, %v6771_v38 }
 0x63a   : > { %s6767_s28 = sld [smem:[#allocation10 + $0x1f4]]  ;;  %v6796_v11 = vadd.f32 %v2504_v28, %v2434_v18  ;;  %v2582_v44 = vstv %s6739_s6  ;;  %v2540_v45 = vadd.f32 %v2539_v42, %v6773_v57  ;;  %v2555_v10 = vmul.f32 %v6808_v53, %v2554_v26 }
 0x63b   : > { %v2511_v51 = vstv %s7983_s30  ;;  %s6775_s11 = sld [smem:[#allocation10 + $0x1f5]]  ;;  %v6798_v21 = vadd.f32 %v2508_v56, %v2438_v59  ;;  %v2523_v59 = vmul.f32 %v6808_v53, %v2522_v20  ;;  %v2548_v28 = vadd.f32 %v2547_v58, %v6777_v48 }
 0x63c   : > { %v2512_v23 = vmul.f32 %v3764_v3, %v2511_v51  ;;  %s6783_s25 = sld [smem:[#allocation10 + $0x1f6]]  ;;  %v2558_v3 = vstv %s6701_s9  ;;  %v2593_v18 = vstv %s6749_s16  ;;  %v2544_v51 = vadd.f32 %v2543_v54, %v2473_v7 }
 0x63d   : > { %s6792_s5 = sld [smem:[#allocation10 + $0x1f7]]  ;;  %v2597_v30 = vstv %s6754_s23  ;;  %v2524_v5 = vadd.f32 %v2523_v59, %v6756_v6  ;;  %v2559_v62 = vmul.f32 %v6808_v53, %v2558_v3  ;;  %v2563_v6 = vmul.f32 %v6808_v53, %v2562_v2 }
 0x63e   : > { %s6801_s27 = sld [smem:[#allocation10 + $0x1f8]]  ;;  %v6803_v12 = vadd.f32 %v2512_v23, %v2442_v37  ;;  %v2527_v37 = vmul.f32 %v6808_v53, %v2526_v36  ;;  %v2601_v32 = vstv %s6761_s21  ;;  %v2552_v57 = vadd.f32 %v2551_v1, %v6779_v41 }
 0x63f   : > { %s6814_s3 = sld [smem:[#allocation10 + $0x1f9]]  ;;  %v2605_v17 = vstv %s6763_s12  ;;  %v2567_v23 = vmul.f32 %v6808_v53, %v2566_v27  ;;  %v2556_v48 = vadd.f32 %v2555_v10, %v6781_v4  ;;  %v2571_v36 = vmul.f32 %v6808_v53, %v2570_v16 }
 0x640   : > { %s6820_s19 = sld [smem:[#allocation10 + $0x1fa]]  ;;  %v2609_v24 = vstv %s6767_s28  ;;  %v2528_v9 = vadd.f32 %v2527_v37, %v6765_v49  ;;  %v6886_v40 = vmul.f32 %v6808_v53, %v2574_v60  ;;  %v2560_v41 = vadd.f32 %v2559_v62, %v6785_v29 }
 0x641   : > { %s6826_s7 = sld [smem:[#allocation10 + $0x1fb]]  ;;  %v2613_v15 = vstv %s6775_s11  ;;  %v2564_v34 = vadd.f32 %v2563_v6, %v6787_v63 }
 0x642   : > { %s6832_s14 = sld [smem:[#allocation10 + $0x1fc]]  ;;  %v2617_v35 = vstv %s6783_s25  ;;  %v6846_v52 = vpop.eup %3767 }
 0x643   : > { %s6838_s20 = sld [smem:[#allocation10 + $0x1fd]]  ;;  %v2621_v14 = vstv %s6792_s5  ;;  %v2594_v31 = vmul.f32 %v6846_v52, %v2593_v18  ;;  %v2598_v49 = vmul.f32 %v6846_v52, %v2597_v30  ;;  %v2602_v43 = vmul.f32 %v6846_v52, %v2601_v32 }
 0x644   : > { %s6844_s0 = sld [smem:[#allocation12]]  ;;  %v2625_v46 = vstv %s6801_s27  ;;  %v2606_v56 = vmul.f32 %v6846_v52, %v2605_v17  ;;  %v2610_v33 = vmul.f32 %v6846_v52, %v2609_v24  ;;  %v2614_v38 = vmul.f32 %v6846_v52, %v2613_v15 }
 0x645   : > { %s6852_s18 = sld [smem:[#allocation12 + $0x1]]  ;;  %v2618_v7 = vmul.f32 %v6846_v52, %v2617_v35  ;;  %v2622_v20 = vmul.f32 %v6846_v52, %v2621_v14  ;;  %v2595_v39 = vadd.f32 %v2594_v31, %v2524_v5  ;;  %v2599_v8 = vadd.f32 %v2598_v49, %v2528_v9 }
 0x646   : > { %s6858_s26 = sld [smem:[#allocation12 + $0x2]]  ;;  %v2603_v25 = vadd.f32 %v2602_v43, %v2532_v22  ;;  %v2607_v4 = vadd.f32 %v2606_v56, %v2536_v13  ;;  %v2611_v19 = vadd.f32 %v2610_v33, %v2540_v45  ;;  %v2615_v26 = vadd.f32 %v2614_v38, %v2544_v51 }
 0x647   : > { %s6863_s29 = sld [smem:[#allocation12 + $0x3]]  ;;  %v2629_v3 = vstv %s6814_s3  ;;  %v2619_v2 = vadd.f32 %v2618_v7, %v2548_v28  ;;  %v2623_v27 = vadd.f32 %v2622_v20, %v2552_v57  ;;  %v2633_v16 = vstv %s6820_s19 }
 0x648   : > { %s6869_s9 = sld [smem:[#allocation12 + $0x4]]  ;;  %v2626_v63 = vmul.f32 %v6846_v52, %v2625_v46  ;;  %v2637_v60 = vstv %s6826_s7  ;;  %v2630_v37 = vmul.f32 %v6846_v52, %v2629_v3  ;;  %v2634_v54 = vmul.f32 %v6846_v52, %v2633_v16 }
 0x649   : > { %s6875_s2 = sld [smem:[#allocation12 + $0x5]]  ;;  %v2641_v35 = vstv %s6832_s14  ;;  %v2568_v9 = vadd.f32 %v2567_v23, %v6789_v0  ;;  %v2638_v22 = vmul.f32 %v6846_v52, %v2637_v60  ;;  %v2579_v45 = vmul.f32 %v6808_v53, %v2578_v55 }
 0x64a   : > { %s6881_s10 = sld [smem:[#allocation12 + $0x6]]  ;;  %v2657_v29 = vstv %s6844_s0  ;;  %v2627_v14 = vadd.f32 %v2626_v63, %v2556_v48  ;;  %v2631_v51 = vadd.f32 %v2630_v37, %v2560_v41  ;;  %v2572_v31 = vadd.f32 %v2571_v36, %v6794_v47 }
 0x64b   : > { %s6888_s8 = sld [smem:[#allocation10 + $0x1fe]]  ;;  %v2658_v18 = vadd.f32 %v2657_v29, %v2595_v39  ;;  %v2661_v59 = vstv %s6852_s18  ;;  %v2642_v0 = vmul.f32 %v6846_v52, %v2641_v35  ;;  %v2645_v62 = vstv %s6838_s20 }
 0x64c   : > { %s6892_s4 = sld [smem:[#allocation12 + $0x7]]  ;;  %v2662_v50 = vadd.f32 %v2661_v59, %v2599_v8  ;;  %v2665_v61 = vstv %s6858_s26  ;;  %v2583_v49 = vmul.f32 %v6808_v53, %v2582_v44  ;;  %v2635_v55 = vadd.f32 %v2634_v54, %v2564_v34 }
 0x64d   : > { %s6895_s15 = sld [smem:[#allocation12 + $0x8]]  ;;  %v2669_v42 = vstv %s6863_s29  ;;  %3769 = vtanh.f32 %v2658_v18  ;;  %v2666_v30 = vadd.f32 %v2665_v61, %v2603_v25  ;;  %v2576_v28 = vadd.f32 %v6886_v40, %v6796_v11 }
 0x64e   : > { %s6898_s13 = sld [smem:[#allocation10 + $0x1ff]]  ;;  %v2670_v32 = vadd.f32 %v2669_v42, %v2607_v4  ;;  %3771 = vtanh.f32 %v2662_v50  ;;  %v2673_v17 = vstv %s6869_s9  ;;  %v2639_v47 = vadd.f32 %v2638_v22, %v2568_v9 }
 0x64f   : > { %s6904_s22 = sld [smem:[#allocation12 + $0x9]]  ;;  %v2677_v24 = vstv %s6875_s2  ;;  %3773 = vtanh.f32 %v2666_v30  ;;  %v2674_v58 = vadd.f32 %v2673_v17, %v2611_v19  ;;  %v2646_v38 = vmul.f32 %v6846_v52, %v2645_v62 }
 0x650   : > { %s6909_s1 = sld [smem:[#allocation12 + $0xa]]  ;;  %v2681_v15 = vstv %s6881_s10  ;;  %v2678_v1 = vadd.f32 %v2677_v24, %v2615_v26  ;;  %3775 = vtanh.f32 %v2670_v32  ;;  %v2580_v57 = vadd.f32 %v2579_v45, %v6798_v21 }
 0x651   : > { %s6912_s24 = sld [smem:[#allocation12 + $0xb]]  ;;  %v2682_v46 = vadd.f32 %v2681_v15, %v2619_v2  ;;  %3777 = vtanh.f32 %v2674_v58  ;;  %v2649_v56 = vstv %s6888_s8  ;;  %v2643_v23 = vadd.f32 %v2642_v0, %v2572_v31 }
 0x652   : > { %s6917_s30 = sld [smem:[#allocation12 + $0xc]]  ;;  %v2685_v5 = vstv %s6892_s4  ;;  %3779 = vtanh.f32 %v2678_v1  ;;  %v2650_v7 = vmul.f32 %v6846_v52, %v2649_v56  ;;  %v2584_v36 = vadd.f32 %v2583_v49, %v6803_v12  ;;  %s4022_s4 = smov 0.0  }
 0x653   : > { %s6920_s16 = sld [smem:[#allocation12 + $0xd]]  ;;  %v2689_v13 = vstv %s6895_s15  ;;  %v2686_v10 = vadd.f32 %v2685_v5, %v2623_v27  ;;  %3781 = vtanh.f32 %v2682_v46  ;;  %v2647_v34 = vadd.f32 %v2646_v38, %v2576_v28 }
 0x654   : > { %s6923_s23 = sld [smem:[#allocation13]]  ;;  %v2690_v43 = vadd.f32 %v2689_v13, %v2627_v14  ;;  %v2653_v53 = vstv %s6898_s13  ;;  %v2651_v2 = vadd.f32 %v2650_v7, %v2580_v57 }
 0x655   : > { %s6928_s21 = sld [smem:[#allocation13 + $0x1]]  ;;  %v2693_v6 = vstv %s6904_s22  ;;  %3783 = vtanh.f32 %v2686_v10  ;;  %v2654_v40 = vmul.f32 %v6846_v52, %v2653_v53 }
 0x656   : > { %s6933_s12 = sld [smem:[#allocation13 + $0x2]]  ;;  %v2697_v33 = vstv %s6909_s1  ;;  %v2694_v44 = vadd.f32 %v2693_v6, %v2631_v51  ;;  %3785 = vtanh.f32 %v2690_v43 }
 0x657   : > { %s6939_s28 = sld [smem:[#allocation13 + $0x3]]  ;;  %v2701_v11 = vstv %s6912_s24  ;;  %v2698_v20 = vadd.f32 %v2697_v33, %v2635_v55  ;;  %v2655_v29 = vadd.f32 %v2654_v40, %v2584_v36 }
 0x658   : > { %s6944_s17 = sld [smem:[#allocation12 + $0xe]]  ;;  %v2705_v39 = vstv %s6917_s30  ;;  %3787 = vtanh.f32 %v2694_v44  ;;  %v2702_v8 = vadd.f32 %v2701_v11, %v2639_v47 }
 0x659   : > { %s6950_s11 = sld [smem:[#allocation13 + $0x4]]  ;;  %v2709_v19 = vstv %s6920_s16  ;;  %3789 = vtanh.f32 %v2698_v20  ;;  %v2706_v52 = vadd.f32 %v2705_v39, %v2643_v23 }
 0x65a   : > { %s6954_s6 = sld [smem:[#allocation12 + $0xf]]  ;;  %v2721_v48 = vstv %s6923_s23  ;;  %v3770_v21 = vpop.eup %3769  ;;  %3791 = vtanh.f32 %v2702_v8  ;;  %v2710_v37 = vadd.f32 %v2709_v19, %v2647_v34 }
 0x65b   : > { %s6958_s25 = sld [smem:[#allocation13 + $0x5]]  ;;  %v2724_v41 = vstv %s6928_s21  ;;  %v3772_v4 = vpop.eup %3771  ;;  %v2722_v26 = vmul.f32 %v3770_v21, %v2721_v48  ;;  %3793 = vtanh.f32 %v2706_v52 }
 0x65c   : > { %s6966_s5 = sld [smem:[#allocation13 + $0x6]]  ;;  %v2728_v25 = vstv %s6933_s12  ;;  %v3774_v12 = vpop.eup %3773  ;;  %v2725_v27 = vmul.f32 %v3772_v4, %v2724_v41  ;;  %3795 = vtanh.f32 %v2710_v37 }
 0x65d   : > { %v2732_v3 = vstv %s6939_s28  ;;  %s6971_s27 = sld [smem:[#allocation13 + $0x7]]  ;;  %v3776_v16 = vpop.eup %3775  ;;  %v2729_v60 = vmul.f32 %v3774_v12, %v2728_v25 }
 0x65e   : > { %v2713_v63 = vstv %s6944_s17  ;;  %s6975_s3 = sld [smem:[#allocation13 + $0x8]]  ;;  %v3778_v59 = vpop.eup %3777  ;;  %v2726_v50 = vadd.f32 %v2725_v27, %v2722_v26  ;;  %v2733_v61 = vmul.f32 %v3776_v16, %v2732_v3 }
 0x65f   : > { %v2736_v18 = vstv %s6950_s11  ;;  %v3780_v42 = vpop.eup %3779  ;;  %s6979_s19 = sld [smem:[#allocation13 + $0x9]]  ;;  %v2714_v32 = vadd.f32 %v2713_v63, %v2651_v2 }
 0x660   : > { %v2717_v54 = vstv %s6954_s6  ;;  %v2730_v17 = vadd.f32 %v2729_v60, %v2726_v50  ;;  %v2737_v24 = vmul.f32 %v3778_v59, %v2736_v18  ;;  %v3782_v15 = vpop.eup %3781  ;;  %s6982_s7 = sld [smem:[#allocation13 + $0xa]] }
 0x661   : > { %v2740_v30 = vstv %s6958_s25  ;;  %v2718_v58 = vadd.f32 %v2717_v54, %v2655_v29  ;;  %s7984_s14 = sld [smem:[#allocation33_spill]]  ;;  %3797 = vtanh.f32 %v2714_v32 }
 0x662   : > { %v2744_v35 = vstv %s6966_s5  ;;  %v2734_v1 = vadd.f32 %v2733_v61, %v2730_v17  ;;  %v2741_v14 = vmul.f32 %v3780_v42, %v2740_v30  ;;  %v3784_v46 = vpop.eup %3783  ;;  %s6985_s20 = sld [smem:[#allocation13 + $0xb]]  ;;  %s4023_s5 = smov [#allocation16]  }
 0x663   : > { %v2748_v5 = vstv %s6971_s27  ;;  %v2745_v22 = vmul.f32 %v3782_v15, %v2744_v35  ;;  %v3786_v13 = vpop.eup %3785  ;;  %s3587_s0 = sld [smem:[#allocation13 + $0xc]]  ;;  %3799 = vtanh.f32 %v2718_v58  ;;  %s3937_s27 = sshll.u32 %s4023_s5, 4  ;;  %s3938_s27 = int_to_ptr.vmem [resolvable:$false] %s3937_s27 }
 0x664   : > { %v2738_v9 = vadd.f32 %v2737_v24, %v2734_v1  ;;  %v2752_v45 = vstv %s6975_s3  ;;  %v2749_v10 = vmul.f32 %v3784_v46, %v2748_v5  ;;  %s3588_s18 = sld [smem:[#allocation13 + $0xd]]  ;;  %s3939_s3 = scalar_lea.vmem %s3938_s27, 256 }
 0x665   : > { %v3788_v31 = vpop.eup %3787  ;;  %v2756_v0 = vstv %s6979_s19  ;;  %v2753_v55 = vmul.f32 %v3786_v13, %v2752_v45  ;;  %s3589_s26 = sld [smem:[#allocation13 + $0xe]] }
 0x666   : > { %v2742_v51 = vadd.f32 %v2741_v14, %v2738_v9  ;;  %v3790_v43 = vpop.eup %3789  ;;  %v2760_v28 = vstv %s6982_s7  ;;  %v2757_v56 = vmul.f32 %v3788_v31, %v2756_v0  ;;  %s3590_s29 = sld [smem:[#allocation13 + $0xf]] }
 0x667   : > { %v3814_v62 = vld [vmem:[%s7984_s14] sm:$0xff]  ;;  %v3792_v33 = vpop.eup %3791  ;;  %v2761_v57 = vmul.f32 %v3790_v43, %v2760_v28  ;;  %s2783_s9 = sld [smem:[#allocation2]] }
 0x668   : > { %v2806_v6 = vmax.f32 %v3814_v62, 1e-06  ;;  %v2746_v49 = vadd.f32 %v2745_v22, %v2742_v51  ;;  %v2764_v38 = vstv %s6985_s20  ;;  %v3794_v23 = vpop.eup %3793  ;;  %s2801_s2 = sld [smem:[#allocation3]] }
 0x669   : > { %v2768_v11 = vstv %s3587_s0  ;;  %v2765_v20 = vmul.f32 %v3792_v33, %v2764_v38  ;;  %v3796_v48 = vpop.eup %3795  ;;  %s3591_s10 = sld [smem:[#allocation3 + $0x1]] }
 0x66a   : > { %v2750_v47 = vadd.f32 %v2749_v10, %v2746_v49  ;;  %v2807_v53 = vmin.f32 %v2806_v6, 0.999999  ;;  %v2772_v36 = vstv %s3588_s18  ;;  %v2769_v41 = vmul.f32 %v3794_v23, %v2768_v11  ;;  %s7985_s13 = sld [smem:[#allocation27_spill]] }
 0x66b   : > { %v2776_v34 = vstv %s3589_s26  ;;  %v2773_v25 = vmul.f32 %v3796_v48, %v2772_v36  ;;  %s7986_s22 = sld [smem:[#allocation32_spill]] }
 0x66c   : > { %v2754_v44 = vadd.f32 %v2753_v55, %v2750_v47  ;;  %v2808_v40 = vsub.f32 1.0, %v2807_v53  ;;  %3801 = vlog2.f32 %v2807_v53  ;;  %v2780_v19 = vstv %s3590_s29  ;;  %s3592_s1 = sld [smem:[#allocation3 + $0x2]] }
 0x66d   : > { %v2784_v27 = vstv %s2783_s9  ;;  %s7987_s24 = sld [smem:[#allocation30_spill]] }
 0x66e   : > { %v2758_v7 = vadd.f32 %v2757_v56, %v2754_v44  ;;  %v3798_v21 = vpop.eup %3797  ;;  %3803 = vlog2.f32 %v2808_v40  ;;  %s2805_s8 = ssub.f32 1.0, %s2801_s2 }
 0x66f   : > { %v2777_v3 = vmul.f32 %v3798_v21, %v2776_v34  ;;  %s2804_s15 = smax.f32 %s4022_s4, %s3591_s10  ;;  %s7989_s17 = sld [smem:[#allocation194_spill]] }
 0x670   : > { %v2762_v39 = vadd.f32 %v2761_v57, %v2758_v7  ;;  %v3800_v4 = vpop.eup %3799  ;;  %v2811_v42 = vstv %s2804_s15  ;;  %v2815_v54 = vstv %s2805_s8  ;;  %s3594_s30 = sshll.u32 %s7985_s13, 7 }
 0x671   : > { %v2781_v2 = vmul.f32 %v3800_v4, %v2780_v19  ;;  %s7988_s16 = sshll.u32 %s7986_s22, 3  ;;  %s2825_s6 = scalar_lea.sflag [#allocation5], %s7986_s22 }
 0x672   : > { %v2766_v8 = vadd.f32 %v2765_v20, %v2762_v39  ;;  %v2820_v9 = vstv %s3592_s1  ;;  %s398_s23 = scalar_lea.vmem [#allocation16], %s7988_s16 }
 0x673   : > { %s2838_s21 = sshll.u32 %s398_s23, 4  ;;  %p7990_p9 = scmp.ne.s32.totalorder %s7987_s24, 0  ;;  %s2839_s21 = int_to_ptr.vmem [resolvable:$true] %s2838_s21 }
 0x674   : > { %v2770_v26 = vadd.f32 %v2769_v41, %v2766_v8  ;;  %s3933_s25 = scalar_lea.vmem %s2839_s21, 128  ;;  %p3940_p2 = scmp.lt.s32.totalorder %s2839_s21, %s3938_s27 }
 0x675   : > { %s2836_s11 = scalar_lea.hbm %s7989_s17, %s3594_s30  ;;  %p3934_p7 = scmp.ne.s32.totalorder %s2839_s21, %s3933_s25 }
 0x676   : > { %v2774_v12 = vadd.f32 %v2773_v25, %v2770_v26  ;;  %p3941_p1 = scmp.lt.s32.totalorder %s3939_s3, %s3933_s25 }
 0x677   : > { %p3935_p13 = pnand %p3934_p7, %p7990_p9 }
 0x678   : > { %v2778_v52 = vadd.f32 %v2777_v3, %v2774_v12  ;;  %p3942_p8 = por %p3941_p1, %p3940_p2 }
 0x679   : > { %v3802_v60 = vpop.eup %3801  ;;  %p3936_p0 = pneg %p3935_p13 }
 0x67a   : > { %v2782_v16 = vadd.f32 %v2781_v2, %v2778_v52  ;;  %v2814_v61 = vmul.f32 0.6931472, %v3802_v60 }
 0x67b   : > { %v3804_v18 = vpop.eup %3803  ;;  %p3943_p3 = pnand %p3942_p8, %p3936_p0 }
 0x67c   : > { %v2785_v29 = vadd.f32 %v2784_v27, %v2782_v16  ;;  %v2810_v50 = vmul.f32 0.6931472, %v3804_v18  ;;  %v2816_v32 = vmul.f32 %v2815_v54, %v2814_v61 }
 0x67e   : > { %v2787_v63 = vand.u32 2147483647, %v2785_v29  ;;  %v2812_v30 = vmul.f32 %v2811_v42, %v2810_v50  ;;  %v2786_v13 = vmax.f32 %v2785_v29, 0.0 }
 0x680   : > { %v2788_v59 = vsub.f32 0.0, %v2787_v63  ;;  %v2817_v17 = vadd.f32 %v2816_v32, %v2812_v30 }
 0x682   : > { %v2789_v37 = vmul.f32 1.442695, %v2788_v59  ;;  %v2818_v24 = vmul.f32 1.442695, %v2817_v17 }
 0x684   : > { %3805 = vpow2.f32 %v2789_v37 }
 0x685   : > { %3807 = vpow2.f32 %v2818_v24 }
 0x691   : > { %v3806_v15 = vpop.eup %3805 }
 0x692   : > { %v2791_v35 = vadd.f32 1.0, %v3806_v15  ;;  %v2794_v58 = vmul.f32 -0.5, %v3806_v15  ;;  %v2797_v14 = vand.u32 2147483647, %v3806_v15  ;;  %v3808_v46 = vpop.eup %3807 }
 0x693   : > { %v2821_v51 = vmul.f32 %v3808_v46, %v2820_v9 }
 0x694   : > { %3809 = vlog2.f32 %v2791_v35  ;;  %v2795_v1 = vadd.f32 1.0, %v2794_v58  ;;  %vm2798_vm0 = vcmp.lt.f32.partialorder %v2797_v14, 0.0004427343 }
 0x696   : > { %v2796_v5 = vmul.f32 %v3806_v15, %v2795_v1 }
 0x6a1   : > { %v3810_v22 = vpop.eup %3809 }
 0x6a2   : > { %v2793_v45 = vmul.f32 0.6931472, %v3810_v22 }
 0x6a4   : > { %v2799_v10 = vsel %vm2798_vm0, %v2796_v5, %v2793_v45 }
 0x6a5   : > { %v2800_v31 = vadd.f32 %v2799_v10, %v2786_v13 }
 0x6a7   : > { %v2822_v0 = vmul.f32 %v2821_v51, %v2800_v31 }
 0x6a9   : > { %2823 = vst [vmem:[%s398_s23] sm:$0xff] %v2822_v0 }
 0x6aa   : > { %3946 = shalt.err (!%p3943_p3)
}
 0x6ab   : > { %s3947_s19 = scalar_lea.hbm %s2836_s11, 128  ;;  %s3951_s20 = scalar_lea.hbm %s7989_s17, 256 }
 0x6ac   : > { %p3948_p4 = scmp.ne.s32.totalorder %s2836_s11, %s3947_s19  ;;  %p3952_p11 = scmp.lt.s32.totalorder %s2836_s11, %s7989_s17 }
 0x6ad   : > { %p3953_p12 = scmp.lt.s32.totalorder %s3951_s20, %s3947_s19 }
 0x6ae   : > { %p3949_p6 = pnand %p3948_p4, %p7990_p9 }
 0x6af   : > { %p3954_p5 = por %p3953_p12, %p3952_p11 }
 0x6b0   : > { %p3950_p10 = pneg %p3949_p6 }
 0x6b2   : > { %p3955_p7 = pnand %p3954_p5, %p3950_p10 }
 0x6b4   : > { %3958 = shalt.err (!%p3955_p7)
}
 0x6b5   : > { %3623 = dma.vmem_to_hbm [thread:$0]  (%p7990_p9), %s2839_s21, 128, %s2836_s11, %s2825_s6  }
 0x6b6 PF: > { %s7991_s26 = sld [smem:[#allocation23_spill]] }
 0x6b7   : > { %s7992_s29 = sld [smem:[#allocation31_spill]] }
 0x6b8   : > { %s7993_s9 = sld [smem:[#allocation26_spill]] }
 0x6bc   : > { %s2850_s2 = sand.u32 1, %s7991_s26  }
 0x6bd   : > { %p7994_p13 = scmp.ne.s32.totalorder %s7992_s29, 0  ;;  %s2851_s10 = scalar_lea.sflag [#allocation5], %s2850_s2 }
 0x6be   : > { %p7995_p0 = scmp.ge.s32.totalorder %s7993_s9, 2 }
 0x6c0   : > { %p3649_p2 = pnand %p7995_p0, %p7994_p13 }
 0x6c2   : > { %p3650_p1 = pneg %p3649_p2 }
 0x6c4   : > { %3996 = dma.done.wait (%p3650_p1), %s2851_s10, 128  }
 0x6c5   : > { %3998 = vsyncadd (%p3650_p1), %s2851_s10, 4294967168  ;;  %s7996_s10 = sld [smem:[#allocation28_spill]] }
 0x6c6   : > { %s7997_s29 = sld [smem:[#allocation24_spill]] }
 0x6c7   : > { %s7998_s30 = sld [smem:[#allocation25_spill]] }
 0x6c8   : > { %s7999_s9 = sld [smem:[#allocation29_spill]] }
 0x6cb   : > { %p26_p8 = scmp.ge.s32.totalorder %s7996_s10, 4  }
 0x6cd   :  { %28 = sbr.rel (!%p26_p8) target bundleno = 19 (0x13), region = 122 }
 0x6d2   :  { %2856 = vsyncpa [#allocation4], 1 }
 0x6d3   :  { %2858 = vsyncpa [#allocation4 + $0x1], 1 }
 0x6d4   :  { %2859 = vsyncpa [#allocation5], 1 }
 0x6d5   :  { %2861 = vsyncpa [#allocation5 + $0x1], 1 }
 0x6d6   :  { %2862 = vsyncpa [#allocation6], 1 }
 0x6d7   :  { %2864 = vsyncpa [#allocation6 + $0x1], 1 }
 0x6d8   :  { %2865 = vsyncpa [#allocation8], 1 }
 0x6d9   :  { %2866 = vsyncpa [#allocation11], 1 }
 0x6da   :  { %2867 = vsyncpa [#allocation14], 1 }

</bundles_post_ra>
